<compile_context>
chip_gen: v7x
topology: tpu7x:2x2x1
jax: 0.10.0
libtpu: 0.0.40
codegen_flags: <defaults>
</compile_context>

<pallas_src>
import math

import jax
import jax.numpy as jnp
from jax.experimental import pallas as pl
from jax.experimental.pallas import tpu as pltpu

# ----------------------------- small config ---------------------------------
N_FEATS = 50          # feat vocabulary size
N_RELS = 8            # number of dependency labels
N_FEAT_EMBED = 32     # feat embedding size
N_LSTM_HIDDEN = 64    # LSTM hidden size (per direction)
N_LSTM_LAYERS = 3
N_MLP_ARC = 128
N_MLP_REL = 32
PAD_INDEX = 0
B, S = 2, 8           # batch, seq_len

H = N_LSTM_HIDDEN     # 64
H2 = 2 * H            # 128 (fwd|bwd state width; LSTM output width)
G6 = 6 * H            # 384 (sigmoid gate lanes: i_f,i_b,f_f,f_b,o_f,o_b)
G8 = 8 * H            # 512 (all gate lanes incl. tanh slots g_f,g_b)
MLP_W = 512           # fused-MLP width; every block 128-lane aligned
COL_ARC_D = 0         # [0, 128)
COL_ARC_H = 128       # [128, 256)
COL_REL_D = 256       # rel_d (32) + ones col + zero pad -> [256, 384)
COL_REL_H = 384       # rel_h (32) + ones col + zero pad -> [384, 512)
RELW_W = N_RELS * 128 # rel biaffine weight width: one 128-lane block per label

VMEM = pl.BlockSpec(memory_space=pltpu.MemorySpace.VMEM)


# ----------------------------- fused kernel ---------------------------------
def _fused_kernel(x0_ref, mask_ref, cmask_ref,
                  wih0_ref, whh0_ref, b0_ref,
                  wih1_ref, whh1_ref, b1_ref,
                  wih2_ref, whh2_ref, b2_ref,
                  perm_ref, mlpw_ref, mlpb_ref,
                  arcw_ref, arcb_ref, relw_ref,
                  s_arc_ref, s_rel_ref,
                  xproj_scr, y_scr):
    f32 = jnp.float32
    # Column mask selecting the forward-direction gate slots (even 64-lane
    # blocks). Compared ONCE here so every per-step use is a plain vselect.
    cmask = cmask_ref[...] > 0.5                                  # [B, 8H] bool

    # ---- bidirectional LSTM layer (fwd & bwd fused, input proj hoisted) ----
    def lstm_layer(x_in, wih_ref, whh_ref, b_ref):
        # Hoisted input projection for all timesteps and both directions:
        # [S*B, D] @ [D, 8H] (+ bias), columns already in fused gate-slot order.
        xproj_scr[...] = (jnp.dot(x_in, wih_ref[...], preferred_element_type=f32)
                          + b_ref[...])
        h = jnp.zeros((B, H2), f32)     # cols [0:H)=fwd state, [H:2H)=bwd state
        c = jnp.zeros((B, H2), f32)
        # Fully unrolled recurrence (S static) -> static slice offsets everywhere.
        # TODO(synk): switch to lax.fori_loop (+pl.multiple_of) once S grows ~>16.
        # TODO(synk): hold whh resident in the MXU via pltpu.matmul_push_rhs /
        #             matmul_acc_lhs / matmul_pop instead of one jnp.dot per step.
        for t in range(S):
            tb = S - 1 - t
            # block-diagonal [2H, 8H] recurrent weight: one matmul covers both dirs
            rec = jnp.dot(h, whh_ref[...], preferred_element_type=f32)   # [B, 8H]
            xf = xproj_scr[t * B:(t + 1) * B, :]                         # fwd: x(t)
            xb = xproj_scr[tb * B:(tb + 1) * B, :]                       # bwd: x(tb)
            gates = jnp.where(cmask, xf, xb) + rec                       # [B, 8H]
            sig = jax.nn.sigmoid(gates[:, 0:G6])      # one EUP op, 384 lanes
            g_g = jnp.tanh(gates[:, G6:G8])           # one EUP op, 128 lanes
            i_g = sig[:, 0:H2]                        # 128-lane aligned slices,
            f_g = sig[:, H2:2 * H2]                   # (fwd|bwd) layout matches c/h
            o_g = sig[:, 2 * H2:3 * H2]
            c_new = f_g * c + i_g * g_g
            h_new = o_g * jnp.tanh(c_new)
            # pre-broadcast mask: [B, 2H], cols 0:H = valid(t), H:2H = valid(tb)
            mb = mask_ref[t * B:(t + 1) * B, :] > 0.5
            c = jnp.where(mb, c_new, c)       # packed-seq: freeze state at pads
            h = jnp.where(mb, h_new, h)
            y_m = jnp.where(mb, h_new, 0.0)   # packed-seq: zero output at pads
            y_scr[t * B:(t + 1) * B, 0:H] = y_m[:, 0:H]
            y_scr[tb * B:(tb + 1) * B, H:H2] = y_m[:, H:H2]
        return y_scr[...]                                                # [S*B, 2H]

    x = lstm_layer(x0_ref[...], wih0_ref, whh0_ref, b0_ref)
    x = lstm_layer(x, wih1_ref, whh1_ref, b1_ref)
    x = lstm_layer(x, wih2_ref, whh2_ref, b2_ref)

    # ---- time-major -> batch-major via ONE tiny MXU permutation matmul ----
    y_bm = jnp.dot(perm_ref[...], x, preferred_element_type=f32)         # [B*S, 2H]

    # ---- fused 4-way MLP + ones columns + zero pad (all blocks 128-aligned) ----
    act = (jnp.dot(y_bm, mlpw_ref[...], preferred_element_type=f32)
           + mlpb_ref[...])
    act = jnp.where(act > 0, act, 0.1 * act)      # LeakyReLU(0.1)   [B*S, 512]

    # ---- biaffines (static batch loop; all rel channels in one matmul) ----
    arcb = arcb_ref[...]                                                 # [1, 128]
    for b in range(B):
        xb_all = act[b * S:(b + 1) * S, :]        # [S, 512] aligned sublane slice
        arc_d = xb_all[:, COL_ARC_D:COL_ARC_D + N_MLP_ARC]               # [S, 128]
        arc_h = xb_all[:, COL_ARC_H:COL_ARC_H + N_MLP_ARC]               # [S, 128]
        # bias_x folded: [arc_d, 1] @ W == arc_d @ W[:128] + W[128]
        xw = jnp.dot(arc_d, arcw_ref[...], preferred_element_type=f32) + arcb
        s_arc_ref[b] = jax.lax.dot_general(
            xw, arc_h, (((1,), (1,)), ((), ())), preferred_element_type=f32)

        rel_d_ext = xb_all[:, COL_REL_D:COL_REL_D + 128]                 # [S, 128]
        rel_h_ext = xb_all[:, COL_REL_H:COL_REL_H + 128]                 # [S, 128]
        # all n_rels channels at once; each channel block is 128-lane aligned
        xw_rel = jnp.dot(rel_d_ext, relw_ref[...], preferred_element_type=f32)
        for o in range(N_RELS):
            s_rel_ref[b, o] = jax.lax.dot_general(
                xw_rel[:, o * 128:(o + 1) * 128], rel_h_ext,
                (((1,), (1,)), ((), ())), preferred_element_type=f32)


# ------------------------------- parameters ---------------------------------
def init_params(key):
    keys = list(jax.random.split(key, 64))
    it = iter(keys)

    def rnd(shape, scale):
        return jax.random.normal(next(it), shape, jnp.float32) * scale

    params = {"feat_embed": rnd((N_FEATS, N_FEAT_EMBED), 0.1)}

    lstm_layers = []
    for layer in range(N_LSTM_LAYERS):
        d_in = N_FEAT_EMBED if layer == 0 else 2 * N_LSTM_HIDDEN
        lp = {}
        for d in ("f", "b"):
            lp[f"wih_{d}"] = rnd((d_in, 4 * N_LSTM_HIDDEN), 1.0 / math.sqrt(d_in))
            lp[f"whh_{d}"] = rnd((N_LSTM_HIDDEN, 4 * N_LSTM_HIDDEN),
                                 1.0 / math.sqrt(N_LSTM_HIDDEN))
            lp[f"b_{d}"] = rnd((1, 4 * N_LSTM_HIDDEN), 0.1)
        lstm_layers.append(lp)
    params["lstm"] = lstm_layers

    for name, n_out in (("mlp_arc_d", N_MLP_ARC), ("mlp_arc_h", N_MLP_ARC),
                        ("mlp_rel_d", N_MLP_REL), ("mlp_rel_h", N_MLP_REL)):
        params[name] = {
            "w": rnd((2 * N_LSTM_HIDDEN, n_out), 1.0 / math.sqrt(2 * N_LSTM_HIDDEN)),
            "b": rnd((1, n_out), 0.1),
        }

    params["arc_w"] = rnd((1, N_MLP_ARC + 1, N_MLP_ARC), 1.0 / math.sqrt(N_MLP_ARC))
    params["rel_w"] = rnd((N_RELS, N_MLP_REL + 1, N_MLP_REL + 1),
                          1.0 / math.sqrt(N_MLP_REL))
    return params


# ------------------------ wrapper-side weight packing ------------------------
def _pack_gate_cols(f_mat, b_mat):
    """Per-direction [*, 4H] in (i,f,g,o) order -> [*, 8H] fused slot order
    (i_f, i_b, f_f, f_b, o_f, o_b, g_f, g_b)."""
    i_f, f_f, g_f, o_f = (f_mat[:, k * H:(k + 1) * H] for k in range(4))
    i_b, f_b, g_b, o_b = (b_mat[:, k * H:(k + 1) * H] for k in range(4))
    return jnp.concatenate([i_f, i_b, f_f, f_b, o_f, o_b, g_f, g_b], axis=1)


def _pack_whh(whh_f, whh_b):
    """Block-diagonal recurrent weight [2H, 8H]: rows 0:H read the fwd h half,
    rows H:2H the bwd h half, each routed to its direction's gate slots."""
    z = jnp.zeros((H, H), jnp.float32)
    i_f, f_f, g_f, o_f = (whh_f[:, k * H:(k + 1) * H] for k in range(4))
    i_b, f_b, g_b, o_b = (whh_b[:, k * H:(k + 1) * H] for k in range(4))
    top = jnp.concatenate([i_f, z, f_f, z, o_f, z, g_f, z], axis=1)
    bot = jnp.concatenate([z, i_b, z, f_b, z, o_b, z, g_b], axis=1)
    return jnp.concatenate([top, bot], axis=0)


# -------------------------------- forward -----------------------------------
@jax.jit
def forward(params, words):
    bsz, seq = words.shape
    assert (bsz, seq) == (B, S)
    f32 = jnp.float32

    # ---- glue: embedding lookup (gather), time-major flattened row order ----
    # TODO(synk): at larger vocab/seq the gather could move in-kernel via jnp.take.
    words_tm = jnp.transpose(words, (1, 0)).reshape(-1)                  # [S*B]
    x0 = params["feat_embed"][words_tm].astype(f32)                      # [S*B, E]

    # pre-broadcast per-step pad mask: row block t = [valid(t) | valid(S-1-t)] x H
    valid_tm = (jnp.transpose(words, (1, 0)) != PAD_INDEX).astype(f32)   # [S, B]
    m_f = jnp.broadcast_to(valid_tm[:, :, None], (S, B, H))
    m_b = jnp.broadcast_to(valid_tm[::-1][:, :, None], (S, B, H))
    mask_full = jnp.concatenate([m_f, m_b], axis=-1).reshape(S * B, H2)  # [S*B, 2H]

    # forward-direction gate-slot column mask (even 64-lane blocks)
    colmask = jnp.broadcast_to(
        (((jnp.arange(G8) // H) % 2) == 0).astype(f32)[None, :], (B, G8))

    # ---- pack LSTM weights into the fused fwd/bwd gate-slot layout ----
    # TODO(synk): at production sizes store these (and mlp/biaffine weights) in
    # bf16 and matmul with preferred_element_type=f32.
    lstm_w = []
    for layer in range(N_LSTM_LAYERS):
        p = params["lstm"][layer]
        lstm_w.append(_pack_gate_cols(p["wih_f"], p["wih_b"]))           # [D, 8H]
        lstm_w.append(_pack_whh(p["whh_f"], p["whh_b"]))                 # [2H, 8H]
        lstm_w.append(_pack_gate_cols(p["b_f"], p["b_b"]))               # [1, 8H]

    # time-major -> batch-major row permutation, applied on the MXU in-kernel
    r = jnp.arange(B * S)
    perm = jax.nn.one_hot((r % S) * B + (r // S), S * B, dtype=f32)      # [B*S, S*B]

    # ---- fused MLP weight: [arc_d | arc_h | rel_d,1,pad | rel_h,1,pad] ----
    d_in = H2
    zero_col = jnp.zeros((d_in, 1), f32)
    pad_w = jnp.zeros((d_in, 128 - (N_MLP_REL + 1)), f32)
    mlp_w = jnp.concatenate([
        params["mlp_arc_d"]["w"], params["mlp_arc_h"]["w"],
        params["mlp_rel_d"]["w"], zero_col, pad_w,
        params["mlp_rel_h"]["w"], zero_col, pad_w], axis=1)              # [128, 512]
    one_b = jnp.ones((1, 1), f32)
    pad_b = jnp.zeros((1, 128 - (N_MLP_REL + 1)), f32)
    mlp_b = jnp.concatenate([
        params["mlp_arc_d"]["b"], params["mlp_arc_h"]["b"],
        params["mlp_rel_d"]["b"], one_b, pad_b,
        params["mlp_rel_h"]["b"], one_b, pad_b], axis=1)                 # [1, 512]

    # ---- biaffine weights: fold arc bias row; pad rel channels to 128 lanes ----
    arc_w = params["arc_w"][0]                                           # [129, 128]
    arc_w_main = arc_w[:N_MLP_ARC, :]                                    # [128, 128]
    arc_w_bias = arc_w[N_MLP_ARC:, :]                                    # [1, 128]
    rel_blk = jnp.pad(params["rel_w"],
                      ((0, 0), (0, 128 - (N_MLP_REL + 1)),
                       (0, 128 - (N_MLP_REL + 1))))                      # [R,128,128]
    rel_w_pad = jnp.transpose(rel_blk, (1, 0, 2)).reshape(128, RELW_W)   # [128, 1024]

    # TODO(synk): on v7x, shard over batch with grid=(B,)/core_map at production
    # batch sizes; at B=2/S=8 the latency-bound LSTM is better batched on one TC
    # (a batch grid would serialize two full recurrence chains on v5e/v6e).
    s_arc, s_rel_raw = pl.pallas_call(
        _fused_kernel,
        out_shape=(jax.ShapeDtypeStruct((B, S, S), jnp.float32),
                   jax.ShapeDtypeStruct((B, N_RELS, S, S), jnp.float32)),
        in_specs=[VMEM] * 18,
        out_specs=(VMEM, VMEM),
        scratch_shapes=[pltpu.VMEM((S * B, G8), jnp.float32),    # xproj (per layer)
                        pltpu.VMEM((S * B, H2), jnp.float32)],   # LSTM layer output
    )(x0, mask_full, colmask, *lstm_w, perm, mlp_w, mlp_b,
      arc_w_main, arc_w_bias, rel_w_pad)

    # TODO(synk): at production S, keep the kernel's [B, R, S, S] layout (lane-dense
    # once S is a multiple of 128) instead of this (tiny at S=8) XLA transpose.
    s_rel = jnp.transpose(s_rel_raw, (0, 2, 3, 1))                       # [B,S,S,R]
    return s_arc, s_rel


# --------------------------- pure-JAX reference ------------------------------
def forward_reference(params, words):
    """Same math in plain JAX, used only to validate the fused kernel."""
    p_hi = jax.lax.Precision.HIGHEST
    mask = (words != PAD_INDEX)
    embed = params["feat_embed"][words].astype(jnp.float32)              # [B, S, E]
    x = jnp.transpose(embed, (1, 0, 2))                                  # [S, B, E]
    m = jnp.transpose(mask, (1, 0)).astype(jnp.float32)[:, :, None]      # [S, B, 1]

    def run_dir(x, wih, whh, bias, reverse):
        h = jnp.zeros((B, H), jnp.float32)
        c = jnp.zeros((B, H), jnp.float32)
        ys = [None] * S
        order = range(S - 1, -1, -1) if reverse else range(S)
        for t in order:
            gates = (jnp.dot(x[t], wih, precision=p_hi)
                     + jnp.dot(h, whh, precision=p_hi) + bias)
            i = jax.nn.sigmoid(gates[:, 0 * H:1 * H])
            f = jax.nn.sigmoid(gates[:, 1 * H:2 * H])
            g = jnp.tanh(gates[:, 2 * H:3 * H])
            o = jax.nn.sigmoid(gates[:, 3 * H:4 * H])
            c_new = f * c + i * g
            h_new = o * jnp.tanh(c_new)
            h = jnp.where(m[t] > 0.5, h_new, h)
            c = jnp.where(m[t] > 0.5, c_new, c)
            ys[t] = jnp.where(m[t] > 0.5, h_new, 0.0)
        return jnp.stack(ys, axis=0)

    for layer in range(N_LSTM_LAYERS):
        lp = params["lstm"][layer]
        fwd = run_dir(x, lp["wih_f"], lp["whh_f"], lp["b_f"], False)
        bwd = run_dir(x, lp["wih_b"], lp["whh_b"], lp["b_b"], True)
        x = jnp.concatenate([fwd, bwd], axis=-1)

    x = jnp.transpose(x, (1, 0, 2))                                      # [B, S, 2H]

    def mlp(v, w, b):
        y = jnp.dot(v, w, precision=p_hi) + b
        return jnp.where(y > 0, y, 0.1 * y)

    arc_d = mlp(x, params["mlp_arc_d"]["w"], params["mlp_arc_d"]["b"])
    arc_h = mlp(x, params["mlp_arc_h"]["w"], params["mlp_arc_h"]["b"])
    rel_d = mlp(x, params["mlp_rel_d"]["w"], params["mlp_rel_d"]["b"])
    rel_h = mlp(x, params["mlp_rel_h"]["w"], params["mlp_rel_h"]["b"])

    ones = jnp.ones((B, S, 1), jnp.float32)
    arc_d_e = jnp.concatenate([arc_d, ones], -1)
    s_arc = jnp.einsum('bxi,oij,byj->boxy', arc_d_e, params["arc_w"], arc_h,
                       precision=p_hi)[:, 0]
    rel_d_e = jnp.concatenate([rel_d, ones], -1)
    rel_h_e = jnp.concatenate([rel_h, ones], -1)
    s_rel = jnp.einsum('bxi,oij,byj->boxy', rel_d_e, params["rel_w"], rel_h_e,
                       precision=p_hi)
    return s_arc, jnp.transpose(s_rel, (0, 2, 3, 1))


# --------------------------------- main --------------------------------------
if __name__ == "__main__":
    key = jax.random.PRNGKey(0)
    pkey, wkey = jax.random.split(key)
    params = init_params(pkey)

    # deterministic example input: [B, S] word indices with trailing padding
    words = jax.random.randint(wkey, (B, S), 2, N_FEATS, dtype=jnp.int32)
    lens = jnp.array([S, S - 3], dtype=jnp.int32)
    keep = jnp.arange(S)[None, :] < lens[:, None]
    words = jnp.where(keep, words, PAD_INDEX)

    s_arc, s_rel = forward(params, words)
    jax.block_until_ready((s_arc, s_rel))

    assert s_arc.shape == (B, S, S) and s_arc.dtype == jnp.float32
    assert s_rel.shape == (B, S, S, N_RELS) and s_rel.dtype == jnp.float32
    assert bool(jnp.all(jnp.isfinite(s_arc))) and bool(jnp.all(jnp.isfinite(s_rel)))

    # sanity check against a pure-JAX reference (loose tol: only catches real bugs)
    s_arc_r, s_rel_r = jax.jit(forward_reference)(params, words)
    scale = float(jnp.maximum(jnp.max(jnp.abs(s_arc_r)), jnp.max(jnp.abs(s_rel_r))))
    tol = 0.05 * (1.0 + scale)
    err_arc = float(jnp.max(jnp.abs(s_arc - s_arc_r)))
    err_rel = float(jnp.max(jnp.abs(s_rel - s_rel_r)))
    assert err_arc < tol and err_rel < tol, (err_arc, err_rel, tol)

    print("KERNEL_OK")
</pallas_src>

<mosaic_0001>
module attributes {stable_mosaic.version = 11 : i64} {
  func.func @_fused_kernel(%arg0: memref<16x32xf32, #tpu.memory_space<vmem>>, %arg1: memref<16x128xf32, #tpu.memory_space<vmem>>, %arg2: memref<2x512xf32, #tpu.memory_space<vmem>>, %arg3: memref<32x512xf32, #tpu.memory_space<vmem>>, %arg4: memref<128x512xf32, #tpu.memory_space<vmem>>, %arg5: memref<1x512xf32, #tpu.memory_space<vmem>>, %arg6: memref<128x512xf32, #tpu.memory_space<vmem>>, %arg7: memref<128x512xf32, #tpu.memory_space<vmem>>, %arg8: memref<1x512xf32, #tpu.memory_space<vmem>>, %arg9: memref<128x512xf32, #tpu.memory_space<vmem>>, %arg10: memref<128x512xf32, #tpu.memory_space<vmem>>, %arg11: memref<1x512xf32, #tpu.memory_space<vmem>>, %arg12: memref<16x16xf32, #tpu.memory_space<vmem>>, %arg13: memref<128x512xf32, #tpu.memory_space<vmem>>, %arg14: memref<1x512xf32, #tpu.memory_space<vmem>>, %arg15: memref<128x128xf32, #tpu.memory_space<vmem>>, %arg16: memref<1x128xf32, #tpu.memory_space<vmem>>, %arg17: memref<128x1024xf32, #tpu.memory_space<vmem>>, %arg18: memref<2x8x8xf32, #tpu.memory_space<vmem>>, %arg19: memref<2x8x8x8xf32, #tpu.memory_space<vmem>>, %arg20: memref<16x512xf32, #tpu.memory_space<vmem>>, %arg21: memref<16x128xf32, #tpu.memory_space<vmem>>) attributes {dimension_semantics = [], scalar_prefetch = 0 : i64, scratch_operands = 2 : i64, tpu.core_type = #tpu.core_type<tc>} {
    %c0 = arith.constant 0 : index
    %c0_0 = arith.constant 0 : index
    %0 = vector.load %arg2[%c0, %c0_0] : memref<2x512xf32, #tpu.memory_space<vmem>>, vector<2x512xf32>
    %cst = arith.constant 5.000000e-01 : f32
    %1 = vector.broadcast %cst : f32 to vector<2x512xf32>
    %2 = arith.cmpf ogt, %0, %1 : vector<2x512xf32>
    %c0_1 = arith.constant 0 : index
    %c0_2 = arith.constant 0 : index
    %3 = vector.load %arg0[%c0_1, %c0_2] : memref<16x32xf32, #tpu.memory_space<vmem>>, vector<16x32xf32>
    %c0_3 = arith.constant 0 : index
    %c0_4 = arith.constant 0 : index
    %4 = vector.load %arg3[%c0_3, %c0_4] : memref<32x512xf32, #tpu.memory_space<vmem>>, vector<32x512xf32>
    %cst_5 = arith.constant dense<0.000000e+00> : vector<16x512xf32>
    %5 = tpu.matmul %3, %4, %cst_5 {dimension_numbers = #tpu.dot_dimension_numbers<[1], [0], [0], [1], [0, 0, 1, 1], [], []>} : vector<16x32xf32>, vector<32x512xf32>, vector<16x512xf32> -> vector<16x512xf32>
    %c0_6 = arith.constant 0 : index
    %c0_7 = arith.constant 0 : index
    %6 = vector.load %arg5[%c0_6, %c0_7] : memref<1x512xf32, #tpu.memory_space<vmem>>, vector<1x512xf32>
    %7 = vector.broadcast %6 : vector<1x512xf32> to vector<16x512xf32>
    %8 = arith.addf %5, %7 : vector<16x512xf32>
    %c0_8 = arith.constant 0 : index
    %c0_9 = arith.constant 0 : index
    %9 = vector.load %arg20[%c0_8, %c0_9] : memref<16x512xf32, #tpu.memory_space<vmem>>, vector<16x512xf32>
    tpu.vector_store %arg20[%c0_8, %c0_9], %8 {strides = array<i32>} : memref<16x512xf32, #tpu.memory_space<vmem>>, vector<16x512xf32>,
    %cst_10 = arith.constant 0.000000e+00 : f32
    %10 = vector.broadcast %cst_10 : f32 to vector<2x128xf32>
    %cst_11 = arith.constant 0.000000e+00 : f32
    %11 = vector.broadcast %cst_11 : f32 to vector<2x128xf32>
    %c0_12 = arith.constant 0 : index
    %c0_13 = arith.constant 0 : index
    %12 = vector.load %arg4[%c0_12, %c0_13] : memref<128x512xf32, #tpu.memory_space<vmem>>, vector<128x512xf32>
    %cst_14 = arith.constant dense<0.000000e+00> : vector<2x512xf32>
    %13 = tpu.matmul %10, %12, %cst_14 {dimension_numbers = #tpu.dot_dimension_numbers<[1], [0], [0], [1], [0, 0, 1, 1], [], []>} : vector<2x128xf32>, vector<128x512xf32>, vector<2x512xf32> -> vector<2x512xf32>
    %c0_15 = arith.constant 0 : index
    %c0_16 = arith.constant 0 : index
    %14 = vector.load %arg20[%c0_15, %c0_16] : memref<16x512xf32, #tpu.memory_space<vmem>>, vector<2x512xf32>
    %c14 = arith.constant 14 : index
    %c0_17 = arith.constant 0 : index
    %15 = vector.load %arg20[%c14, %c0_17] : memref<16x512xf32, #tpu.memory_space<vmem>>, vector<2x512xf32>
    %16 = arith.select %2, %14, %15 : vector<2x512xi1>, vector<2x512xf32>
    %17 = arith.addf %16, %13 : vector<2x512xf32>
    %18 = vector.extract_strided_slice %17 {offsets = [0, 0], sizes = [2, 384], strides = [1, 1]} : vector<2x512xf32> to vector<2x384xf32>
    %19 = arith.negf %18 : vector<2x384xf32>
    %20 = math.exp %19 : vector<2x384xf32>
    %cst_18 = arith.constant 1.000000e+00 : f32
    %21 = vector.broadcast %cst_18 : f32 to vector<2x384xf32>
    %22 = arith.addf %21, %20 : vector<2x384xf32>
    %23 = arith.divf %21, %22 : vector<2x384xf32>
    %24 = vector.extract_strided_slice %17 {offsets = [0, 384], sizes = [2, 128], strides = [1, 1]} : vector<2x512xf32> to vector<2x128xf32>
    %25 = math.tanh %24 : vector<2x128xf32>
    %26 = vector.extract_strided_slice %23 {offsets = [0, 0], sizes = [2, 128], strides = [1, 1]} : vector<2x384xf32> to vector<2x128xf32>
    %27 = vector.extract_strided_slice %23 {offsets = [0, 128], sizes = [2, 128], strides = [1, 1]} : vector<2x384xf32> to vector<2x128xf32>
    %28 = vector.extract_strided_slice %23 {offsets = [0, 256], sizes = [2, 128], strides = [1, 1]} : vector<2x384xf32> to vector<2x128xf32>
    %29 = arith.mulf %27, %11 : vector<2x128xf32>
    %30 = arith.mulf %26, %25 : vector<2x128xf32>
    %31 = arith.addf %29, %30 : vector<2x128xf32>
    %32 = math.tanh %31 : vector<2x128xf32>
    %33 = arith.mulf %28, %32 : vector<2x128xf32>
    %c0_19 = arith.constant 0 : index
    %c0_20 = arith.constant 0 : index
    %34 = vector.load %arg1[%c0_19, %c0_20] : memref<16x128xf32, #tpu.memory_space<vmem>>, vector<2x128xf32>
    %cst_21 = arith.constant 5.000000e-01 : f32
    %35 = vector.broadcast %cst_21 : f32 to vector<2x128xf32>
    %36 = arith.cmpf ogt, %34, %35 : vector<2x128xf32>
    %37 = arith.select %36, %31, %11 : vector<2x128xi1>, vector<2x128xf32>
    %38 = arith.select %36, %33, %10 : vector<2x128xi1>, vector<2x128xf32>
    %cst_22 = arith.constant 0.000000e+00 : f32
    %39 = vector.broadcast %cst_22 : f32 to vector<2x128xf32>
    %40 = arith.select %36, %33, %39 : vector<2x128xi1>, vector<2x128xf32>
    %41 = vector.extract_strided_slice %40 {offsets = [0, 0], sizes = [2, 64], strides = [1, 1]} : vector<2x128xf32> to vector<2x64xf32>
    %c0_23 = arith.constant 0 : index
    %c0_24 = arith.constant 0 : index
    %42 = vector.load %arg21[%c0_23, %c0_24] : memref<16x128xf32, #tpu.memory_space<vmem>>, vector<2x64xf32>
    tpu.vector_store %arg21[%c0_23, %c0_24], %41 {strides = array<i32>} : memref<16x128xf32, #tpu.memory_space<vmem>>, vector<2x64xf32>,
    %43 = vector.extract_strided_slice %40 {offsets = [0, 64], sizes = [2, 64], strides = [1, 1]} : vector<2x128xf32> to vector<2x64xf32>
    %c14_25 = arith.constant 14 : index
    %c64 = arith.constant 64 : index
    %44 = vector.load %arg21[%c14_25, %c64] : memref<16x128xf32, #tpu.memory_space<vmem>>, vector<2x64xf32>
    tpu.vector_store %arg21[%c14_25, %c64], %43 {strides = array<i32>} : memref<16x128xf32, #tpu.memory_space<vmem>>, vector<2x64xf32>,
    %c0_26 = arith.constant 0 : index
    %c0_27 = arith.constant 0 : index
    %45 = vector.load %arg4[%c0_26, %c0_27] : memref<128x512xf32, #tpu.memory_space<vmem>>, vector<128x512xf32>
    %cst_28 = arith.constant dense<0.000000e+00> : vector<2x512xf32>
    %46 = tpu.matmul %38, %45, %cst_28 {dimension_numbers = #tpu.dot_dimension_numbers<[1], [0], [0], [1], [0, 0, 1, 1], [], []>} : vector<2x128xf32>, vector<128x512xf32>, vector<2x512xf32> -> vector<2x512xf32>
    %c2 = arith.constant 2 : index
    %c0_29 = arith.constant 0 : index
    %47 = vector.load %arg20[%c2, %c0_29] : memref<16x512xf32, #tpu.memory_space<vmem>>, vector<2x512xf32>
    %c12 = arith.constant 12 : index
    %c0_30 = arith.constant 0 : index
    %48 = vector.load %arg20[%c12, %c0_30] : memref<16x512xf32, #tpu.memory_space<vmem>>, vector<2x512xf32>
    %49 = arith.select %2, %47, %48 : vector<2x512xi1>, vector<2x512xf32>
    %50 = arith.addf %49, %46 : vector<2x512xf32>
    %51 = vector.extract_strided_slice %50 {offsets = [0, 0], sizes = [2, 384], strides = [1, 1]} : vector<2x512xf32> to vector<2x384xf32>
    %52 = arith.negf %51 : vector<2x384xf32>
    %53 = math.exp %52 : vector<2x384xf32>
    %cst_31 = arith.constant 1.000000e+00 : f32
    %54 = vector.broadcast %cst_31 : f32 to vector<2x384xf32>
    %55 = arith.addf %54, %53 : vector<2x384xf32>
    %56 = arith.divf %54, %55 : vector<2x384xf32>
    %57 = vector.extract_strided_slice %50 {offsets = [0, 384], sizes = [2, 128], strides = [1, 1]} : vector<2x512xf32> to vector<2x128xf32>
    %58 = math.tanh %57 : vector<2x128xf32>
    %59 = vector.extract_strided_slice %56 {offsets = [0, 0], sizes = [2, 128], strides = [1, 1]} : vector<2x384xf32> to vector<2x128xf32>
    %60 = vector.extract_strided_slice %56 {offsets = [0, 128], sizes = [2, 128], strides = [1, 1]} : vector<2x384xf32> to vector<2x128xf32>
    %61 = vector.extract_strided_slice %56 {offsets = [0, 256], sizes = [2, 128], strides = [1, 1]} : vector<2x384xf32> to vector<2x128xf32>
    %62 = arith.mulf %60, %37 : vector<2x128xf32>
    %63 = arith.mulf %59, %58 : vector<2x128xf32>
    %64 = arith.addf %62, %63 : vector<2x128xf32>
    %65 = math.tanh %64 : vector<2x128xf32>
    %66 = arith.mulf %61, %65 : vector<2x128xf32>
    %c2_32 = arith.constant 2 : index
    %c0_33 = arith.constant 0 : index
    %67 = vector.load %arg1[%c2_32, %c0_33] : memref<16x128xf32, #tpu.memory_space<vmem>>, vector<2x128xf32>
    %cst_34 = arith.constant 5.000000e-01 : f32
    %68 = vector.broadcast %cst_34 : f32 to vector<2x128xf32>
    %69 = arith.cmpf ogt, %67, %68 : vector<2x128xf32>
    %70 = arith.select %69, %64, %37 : vector<2x128xi1>, vector<2x128xf32>
    %71 = arith.select %69, %66, %38 : vector<2x128xi1>, vector<2x128xf32>
    %cst_35 = arith.constant 0.000000e+00 : f32
    %72 = vector.broadcast %cst_35 : f32 to vector<2x128xf32>
    %73 = arith.select %69, %66, %72 : vector<2x128xi1>, vector<2x128xf32>
    %74 = vector.extract_strided_slice %73 {offsets = [0, 0], sizes = [2, 64], strides = [1, 1]} : vector<2x128xf32> to vector<2x64xf32>
    %c2_36 = arith.constant 2 : index
    %c0_37 = arith.constant 0 : index
    %75 = vector.load %arg21[%c2_36, %c0_37] : memref<16x128xf32, #tpu.memory_space<vmem>>, vector<2x64xf32>
    tpu.vector_store %arg21[%c2_36, %c0_37], %74 {strides = array<i32>} : memref<16x128xf32, #tpu.memory_space<vmem>>, vector<2x64xf32>,
    %76 = vector.extract_strided_slice %73 {offsets = [0, 64], sizes = [2, 64], strides = [1, 1]} : vector<2x128xf32> to vector<2x64xf32>
    %c12_38 = arith.constant 12 : index
    %c64_39 = arith.constant 64 : index
    %77 = vector.load %arg21[%c12_38, %c64_39] : memref<16x128xf32, #tpu.memory_space<vmem>>, vector<2x64xf32>
    tpu.vector_store %arg21[%c12_38, %c64_39], %76 {strides = array<i32>} : memref<16x128xf32, #tpu.memory_space<vmem>>, vector<2x64xf32>,
    %c0_40 = arith.constant 0 : index
    %c0_41 = arith.constant 0 : index
    %78 = vector.load %arg4[%c0_40, %c0_41] : memref<128x512xf32, #tpu.memory_space<vmem>>, vector<128x512xf32>
    %cst_42 = arith.constant dense<0.000000e+00> : vector<2x512xf32>
    %79 = tpu.matmul %71, %78, %cst_42 {dimension_numbers = #tpu.dot_dimension_numbers<[1], [0], [0], [1], [0, 0, 1, 1], [], []>} : vector<2x128xf32>, vector<128x512xf32>, vector<2x512xf32> -> vector<2x512xf32>
    %c4 = arith.constant 4 : index
    %c0_43 = arith.constant 0 : index
    %80 = vector.load %arg20[%c4, %c0_43] : memref<16x512xf32, #tpu.memory_space<vmem>>, vector<2x512xf32>
    %c10 = arith.constant 10 : index
    %c0_44 = arith.constant 0 : index
    %81 = vector.load %arg20[%c10, %c0_44] : memref<16x512xf32, #tpu.memory_space<vmem>>, vector<2x512xf32>
    %82 = arith.select %2, %80, %81 : vector<2x512xi1>, vector<2x512xf32>
    %83 = arith.addf %82, %79 : vector<2x512xf32>
    %84 = vector.extract_strided_slice %83 {offsets = [0, 0], sizes = [2, 384], strides = [1, 1]} : vector<2x512xf32> to vector<2x384xf32>
    %85 = arith.negf %84 : vector<2x384xf32>
    %86 = math.exp %85 : vector<2x384xf32>
    %cst_45 = arith.constant 1.000000e+00 : f32
    %87 = vector.broadcast %cst_45 : f32 to vector<2x384xf32>
    %88 = arith.addf %87, %86 : vector<2x384xf32>
    %89 = arith.divf %87, %88 : vector<2x384xf32>
    %90 = vector.extract_strided_slice %83 {offsets = [0, 384], sizes = [2, 128], strides = [1, 1]} : vector<2x512xf32> to vector<2x128xf32>
    %91 = math.tanh %90 : vector<2x128xf32>
    %92 = vector.extract_strided_slice %89 {offsets = [0, 0], sizes = [2, 128], strides = [1, 1]} : vector<2x384xf32> to vector<2x128xf32>
    %93 = vector.extract_strided_slice %89 {offsets = [0, 128], sizes = [2, 128], strides = [1, 1]} : vector<2x384xf32> to vector<2x128xf32>
    %94 = vector.extract_strided_slice %89 {offsets = [0, 256], sizes = [2, 128], strides = [1, 1]} : vector<2x384xf32> to vector<2x128xf32>
    %95 = arith.mulf %93, %70 : vector<2x128xf32>
    %96 = arith.mulf %92, %91 : vector<2x128xf32>
    %97 = arith.addf %95, %96 : vector<2x128xf32>
    %98 = math.tanh %97 : vector<2x128xf32>
    %99 = arith.mulf %94, %98 : vector<2x128xf32>
    %c4_46 = arith.constant 4 : index
    %c0_47 = arith.constant 0 : index
    %100 = vector.load %arg1[%c4_46, %c0_47] : memref<16x128xf32, #tpu.memory_space<vmem>>, vector<2x128xf32>
    %cst_48 = arith.constant 5.000000e-01 : f32
    %101 = vector.broadcast %cst_48 : f32 to vector<2x128xf32>
    %102 = arith.cmpf ogt, %100, %101 : vector<2x128xf32>
    %103 = arith.select %102, %97, %70 : vector<2x128xi1>, vector<2x128xf32>
    %104 = arith.select %102, %99, %71 : vector<2x128xi1>, vector<2x128xf32>
    %cst_49 = arith.constant 0.000000e+00 : f32
    %105 = vector.broadcast %cst_49 : f32 to vector<2x128xf32>
    %106 = arith.select %102, %99, %105 : vector<2x128xi1>, vector<2x128xf32>
    %107 = vector.extract_strided_slice %106 {offsets = [0, 0], sizes = [2, 64], strides = [1, 1]} : vector<2x128xf32> to vector<2x64xf32>
    %c4_50 = arith.constant 4 : index
    %c0_51 = arith.constant 0 : index
    %108 = vector.load %arg21[%c4_50, %c0_51] : memref<16x128xf32, #tpu.memory_space<vmem>>, vector<2x64xf32>
    tpu.vector_store %arg21[%c4_50, %c0_51], %107 {strides = array<i32>} : memref<16x128xf32, #tpu.memory_space<vmem>>, vector<2x64xf32>,
    %109 = vector.extract_strided_slice %106 {offsets = [0, 64], sizes = [2, 64], strides = [1, 1]} : vector<2x128xf32> to vector<2x64xf32>
    %c10_52 = arith.constant 10 : index
    %c64_53 = arith.constant 64 : index
    %110 = vector.load %arg21[%c10_52, %c64_53] : memref<16x128xf32, #tpu.memory_space<vmem>>, vector<2x64xf32>
    tpu.vector_store %arg21[%c10_52, %c64_53], %109 {strides = array<i32>} : memref<16x128xf32, #tpu.memory_space<vmem>>, vector<2x64xf32>,
    %c0_54 = arith.constant 0 : index
    %c0_55 = arith.constant 0 : index
    %111 = vector.load %arg4[%c0_54, %c0_55] : memref<128x512xf32, #tpu.memory_space<vmem>>, vector<128x512xf32>
    %cst_56 = arith.constant dense<0.000000e+00> : vector<2x512xf32>
    %112 = tpu.matmul %104, %111, %cst_56 {dimension_numbers = #tpu.dot_dimension_numbers<[1], [0], [0], [1], [0, 0, 1, 1], [], []>} : vector<2x128xf32>, vector<128x512xf32>, vector<2x512xf32> -> vector<2x512xf32>
    %c6 = arith.constant 6 : index
    %c0_57 = arith.constant 0 : index
    %113 = vector.load %arg20[%c6, %c0_57] : memref<16x512xf32, #tpu.memory_space<vmem>>, vector<2x512xf32>
    %c8 = arith.constant 8 : index
    %c0_58 = arith.constant 0 : index
    %114 = vector.load %arg20[%c8, %c0_58] : memref<16x512xf32, #tpu.memory_space<vmem>>, vector<2x512xf32>
    %115 = arith.select %2, %113, %114 : vector<2x512xi1>, vector<2x512xf32>
    %116 = arith.addf %115, %112 : vector<2x512xf32>
    %117 = vector.extract_strided_slice %116 {offsets = [0, 0], sizes = [2, 384], strides = [1, 1]} : vector<2x512xf32> to vector<2x384xf32>
    %118 = arith.negf %117 : vector<2x384xf32>
    %119 = math.exp %118 : vector<2x384xf32>
    %cst_59 = arith.constant 1.000000e+00 : f32
    %120 = vector.broadcast %cst_59 : f32 to vector<2x384xf32>
    %121 = arith.addf %120, %119 : vector<2x384xf32>
    %122 = arith.divf %120, %121 : vector<2x384xf32>
    %123 = vector.extract_strided_slice %116 {offsets = [0, 384], sizes = [2, 128], strides = [1, 1]} : vector<2x512xf32> to vector<2x128xf32>
    %124 = math.tanh %123 : vector<2x128xf32>
    %125 = vector.extract_strided_slice %122 {offsets = [0, 0], sizes = [2, 128], strides = [1, 1]} : vector<2x384xf32> to vector<2x128xf32>
    %126 = vector.extract_strided_slice %122 {offsets = [0, 128], sizes = [2, 128], strides = [1, 1]} : vector<2x384xf32> to vector<2x128xf32>
    %127 = vector.extract_strided_slice %122 {offsets = [0, 256], sizes = [2, 128], strides = [1, 1]} : vector<2x384xf32> to vector<2x128xf32>
    %128 = arith.mulf %126, %103 : vector<2x128xf32>
    %129 = arith.mulf %125, %124 : vector<2x128xf32>
    %130 = arith.addf %128, %129 : vector<2x128xf32>
    %131 = math.tanh %130 : vector<2x128xf32>
    %132 = arith.mulf %127, %131 : vector<2x128xf32>
    %c6_60 = arith.constant 6 : index
    %c0_61 = arith.constant 0 : index
    %133 = vector.load %arg1[%c6_60, %c0_61] : memref<16x128xf32, #tpu.memory_space<vmem>>, vector<2x128xf32>
    %cst_62 = arith.constant 5.000000e-01 : f32
    %134 = vector.broadcast %cst_62 : f32 to vector<2x128xf32>
    %135 = arith.cmpf ogt, %133, %134 : vector<2x128xf32>
    %136 = arith.select %135, %130, %103 : vector<2x128xi1>, vector<2x128xf32>
    %137 = arith.select %135, %132, %104 : vector<2x128xi1>, vector<2x128xf32>
    %cst_63 = arith.constant 0.000000e+00 : f32
    %138 = vector.broadcast %cst_63 : f32 to vector<2x128xf32>
    %139 = arith.select %135, %132, %138 : vector<2x128xi1>, vector<2x128xf32>
    %140 = vector.extract_strided_slice %139 {offsets = [0, 0], sizes = [2, 64], strides = [1, 1]} : vector<2x128xf32> to vector<2x64xf32>
    %c6_64 = arith.constant 6 : index
    %c0_65 = arith.constant 0 : index
    %141 = vector.load %arg21[%c6_64, %c0_65] : memref<16x128xf32, #tpu.memory_space<vmem>>, vector<2x64xf32>
    tpu.vector_store %arg21[%c6_64, %c0_65], %140 {strides = array<i32>} : memref<16x128xf32, #tpu.memory_space<vmem>>, vector<2x64xf32>,
    %142 = vector.extract_strided_slice %139 {offsets = [0, 64], sizes = [2, 64], strides = [1, 1]} : vector<2x128xf32> to vector<2x64xf32>
    %c8_66 = arith.constant 8 : index
    %c64_67 = arith.constant 64 : index
    %143 = vector.load %arg21[%c8_66, %c64_67] : memref<16x128xf32, #tpu.memory_space<vmem>>, vector<2x64xf32>
    tpu.vector_store %arg21[%c8_66, %c64_67], %142 {strides = array<i32>} : memref<16x128xf32, #tpu.memory_space<vmem>>, vector<2x64xf32>,
    %c0_68 = arith.constant 0 : index
    %c0_69 = arith.constant 0 : index
    %144 = vector.load %arg4[%c0_68, %c0_69] : memref<128x512xf32, #tpu.memory_space<vmem>>, vector<128x512xf32>
    %cst_70 = arith.constant dense<0.000000e+00> : vector<2x512xf32>
    %145 = tpu.matmul %137, %144, %cst_70 {dimension_numbers = #tpu.dot_dimension_numbers<[1], [0], [0], [1], [0, 0, 1, 1], [], []>} : vector<2x128xf32>, vector<128x512xf32>, vector<2x512xf32> -> vector<2x512xf32>
    %c8_71 = arith.constant 8 : index
    %c0_72 = arith.constant 0 : index
    %146 = vector.load %arg20[%c8_71, %c0_72] : memref<16x512xf32, #tpu.memory_space<vmem>>, vector<2x512xf32>
    %c6_73 = arith.constant 6 : index
    %c0_74 = arith.constant 0 : index
    %147 = vector.load %arg20[%c6_73, %c0_74] : memref<16x512xf32, #tpu.memory_space<vmem>>, vector<2x512xf32>
    %148 = arith.select %2, %146, %147 : vector<2x512xi1>, vector<2x512xf32>
    %149 = arith.addf %148, %145 : vector<2x512xf32>
    %150 = vector.extract_strided_slice %149 {offsets = [0, 0], sizes = [2, 384], strides = [1, 1]} : vector<2x512xf32> to vector<2x384xf32>
    %151 = arith.negf %150 : vector<2x384xf32>
    %152 = math.exp %151 : vector<2x384xf32>
    %cst_75 = arith.constant 1.000000e+00 : f32
    %153 = vector.broadcast %cst_75 : f32 to vector<2x384xf32>
    %154 = arith.addf %153, %152 : vector<2x384xf32>
    %155 = arith.divf %153, %154 : vector<2x384xf32>
    %156 = vector.extract_strided_slice %149 {offsets = [0, 384], sizes = [2, 128], strides = [1, 1]} : vector<2x512xf32> to vector<2x128xf32>
    %157 = math.tanh %156 : vector<2x128xf32>
    %158 = vector.extract_strided_slice %155 {offsets = [0, 0], sizes = [2, 128], strides = [1, 1]} : vector<2x384xf32> to vector<2x128xf32>
    %159 = vector.extract_strided_slice %155 {offsets = [0, 128], sizes = [2, 128], strides = [1, 1]} : vector<2x384xf32> to vector<2x128xf32>
    %160 = vector.extract_strided_slice %155 {offsets = [0, 256], sizes = [2, 128], strides = [1, 1]} : vector<2x384xf32> to vector<2x128xf32>
    %161 = arith.mulf %159, %136 : vector<2x128xf32>
    %162 = arith.mulf %158, %157 : vector<2x128xf32>
    %163 = arith.addf %161, %162 : vector<2x128xf32>
    %164 = math.tanh %163 : vector<2x128xf32>
    %165 = arith.mulf %160, %164 : vector<2x128xf32>
    %c8_76 = arith.constant 8 : index
    %c0_77 = arith.constant 0 : index
    %166 = vector.load %arg1[%c8_76, %c0_77] : memref<16x128xf32, #tpu.memory_space<vmem>>, vector<2x128xf32>
    %cst_78 = arith.constant 5.000000e-01 : f32
    %167 = vector.broadcast %cst_78 : f32 to vector<2x128xf32>
    %168 = arith.cmpf ogt, %166, %167 : vector<2x128xf32>
    %169 = arith.select %168, %163, %136 : vector<2x128xi1>, vector<2x128xf32>
    %170 = arith.select %168, %165, %137 : vector<2x128xi1>, vector<2x128xf32>
    %cst_79 = arith.constant 0.000000e+00 : f32
    %171 = vector.broadcast %cst_79 : f32 to vector<2x128xf32>
    %172 = arith.select %168, %165, %171 : vector<2x128xi1>, vector<2x128xf32>
    %173 = vector.extract_strided_slice %172 {offsets = [0, 0], sizes = [2, 64], strides = [1, 1]} : vector<2x128xf32> to vector<2x64xf32>
    %c8_80 = arith.constant 8 : index
    %c0_81 = arith.constant 0 : index
    %174 = vector.load %arg21[%c8_80, %c0_81] : memref<16x128xf32, #tpu.memory_space<vmem>>, vector<2x64xf32>
    tpu.vector_store %arg21[%c8_80, %c0_81], %173 {strides = array<i32>} : memref<16x128xf32, #tpu.memory_space<vmem>>, vector<2x64xf32>,
    %175 = vector.extract_strided_slice %172 {offsets = [0, 64], sizes = [2, 64], strides = [1, 1]} : vector<2x128xf32> to vector<2x64xf32>
    %c6_82 = arith.constant 6 : index
    %c64_83 = arith.constant 64 : index
    %176 = vector.load %arg21[%c6_82, %c64_83] : memref<16x128xf32, #tpu.memory_space<vmem>>, vector<2x64xf32>
    tpu.vector_store %arg21[%c6_82, %c64_83], %175 {strides = array<i32>} : memref<16x128xf32, #tpu.memory_space<vmem>>, vector<2x64xf32>,
    %c0_84 = arith.constant 0 : index
    %c0_85 = arith.constant 0 : index
    %177 = vector.load %arg4[%c0_84, %c0_85] : memref<128x512xf32, #tpu.memory_space<vmem>>, vector<128x512xf32>
    %cst_86 = arith.constant dense<0.000000e+00> : vector<2x512xf32>
    %178 = tpu.matmul %170, %177, %cst_86 {dimension_numbers = #tpu.dot_dimension_numbers<[1], [0], [0], [1], [0, 0, 1, 1], [], []>} : vector<2x128xf32>, vector<128x512xf32>, vector<2x512xf32> -> vector<2x512xf32>
    %c10_87 = arith.constant 10 : index
    %c0_88 = arith.constant 0 : index
    %179 = vector.load %arg20[%c10_87, %c0_88] : memref<16x512xf32, #tpu.memory_space<vmem>>, vector<2x512xf32>
    %c4_89 = arith.constant 4 : index
    %c0_90 = arith.constant 0 : index
    %180 = vector.load %arg20[%c4_89, %c0_90] : memref<16x512xf32, #tpu.memory_space<vmem>>, vector<2x512xf32>
    %181 = arith.select %2, %179, %180 : vector<2x512xi1>, vector<2x512xf32>
    %182 = arith.addf %181, %178 : vector<2x512xf32>
    %183 = vector.extract_strided_slice %182 {offsets = [0, 0], sizes = [2, 384], strides = [1, 1]} : vector<2x512xf32> to vector<2x384xf32>
    %184 = arith.negf %183 : vector<2x384xf32>
    %185 = math.exp %184 : vector<2x384xf32>
    %cst_91 = arith.constant 1.000000e+00 : f32
    %186 = vector.broadcast %cst_91 : f32 to vector<2x384xf32>
    %187 = arith.addf %186, %185 : vector<2x384xf32>
    %188 = arith.divf %186, %187 : vector<2x384xf32>
    %189 = vector.extract_strided_slice %182 {offsets = [0, 384], sizes = [2, 128], strides = [1, 1]} : vector<2x512xf32> to vector<2x128xf32>
    %190 = math.tanh %189 : vector<2x128xf32>
    %191 = vector.extract_strided_slice %188 {offsets = [0, 0], sizes = [2, 128], strides = [1, 1]} : vector<2x384xf32> to vector<2x128xf32>
    %192 = vector.extract_strided_slice %188 {offsets = [0, 128], sizes = [2, 128], strides = [1, 1]} : vector<2x384xf32> to vector<2x128xf32>
    %193 = vector.extract_strided_slice %188 {offsets = [0, 256], sizes = [2, 128], strides = [1, 1]} : vector<2x384xf32> to vector<2x128xf32>
    %194 = arith.mulf %192, %169 : vector<2x128xf32>
    %195 = arith.mulf %191, %190 : vector<2x128xf32>
    %196 = arith.addf %194, %195 : vector<2x128xf32>
    %197 = math.tanh %196 : vector<2x128xf32>
    %198 = arith.mulf %193, %197 : vector<2x128xf32>
    %c10_92 = arith.constant 10 : index
    %c0_93 = arith.constant 0 : index
    %199 = vector.load %arg1[%c10_92, %c0_93] : memref<16x128xf32, #tpu.memory_space<vmem>>, vector<2x128xf32>
    %cst_94 = arith.constant 5.000000e-01 : f32
    %200 = vector.broadcast %cst_94 : f32 to vector<2x128xf32>
    %201 = arith.cmpf ogt, %199, %200 : vector<2x128xf32>
    %202 = arith.select %201, %196, %169 : vector<2x128xi1>, vector<2x128xf32>
    %203 = arith.select %201, %198, %170 : vector<2x128xi1>, vector<2x128xf32>
    %cst_95 = arith.constant 0.000000e+00 : f32
    %204 = vector.broadcast %cst_95 : f32 to vector<2x128xf32>
    %205 = arith.select %201, %198, %204 : vector<2x128xi1>, vector<2x128xf32>
    %206 = vector.extract_strided_slice %205 {offsets = [0, 0], sizes = [2, 64], strides = [1, 1]} : vector<2x128xf32> to vector<2x64xf32>
    %c10_96 = arith.constant 10 : index
    %c0_97 = arith.constant 0 : index
    %207 = vector.load %arg21[%c10_96, %c0_97] : memref<16x128xf32, #tpu.memory_space<vmem>>, vector<2x64xf32>
    tpu.vector_store %arg21[%c10_96, %c0_97], %206 {strides = array<i32>} : memref<16x128xf32, #tpu.memory_space<vmem>>, vector<2x64xf32>,
    %208 = vector.extract_strided_slice %205 {offsets = [0, 64], sizes = [2, 64], strides = [1, 1]} : vector<2x128xf32> to vector<2x64xf32>
    %c4_98 = arith.constant 4 : index
    %c64_99 = arith.constant 64 : index
    %209 = vector.load %arg21[%c4_98, %c64_99] : memref<16x128xf32, #tpu.memory_space<vmem>>, vector<2x64xf32>
    tpu.vector_store %arg21[%c4_98, %c64_99], %208 {strides = array<i32>} : memref<16x128xf32, #tpu.memory_space<vmem>>, vector<2x64xf32>,
    %c0_100 = arith.constant 0 : index
    %c0_101 = arith.constant 0 : index
    %210 = vector.load %arg4[%c0_100, %c0_101] : memref<128x512xf32, #tpu.memory_space<vmem>>, vector<128x512xf32>
    %cst_102 = arith.constant dense<0.000000e+00> : vector<2x512xf32>
    %211 = tpu.matmul %203, %210, %cst_102 {dimension_numbers = #tpu.dot_dimension_numbers<[1], [0], [0], [1], [0, 0, 1, 1], [], []>} : vector<2x128xf32>, vector<128x512xf32>, vector<2x512xf32> -> vector<2x512xf32>
    %c12_103 = arith.constant 12 : index
    %c0_104 = arith.constant 0 : index
    %212 = vector.load %arg20[%c12_103, %c0_104] : memref<16x512xf32, #tpu.memory_space<vmem>>, vector<2x512xf32>
    %c2_105 = arith.constant 2 : index
    %c0_106 = arith.constant 0 : index
    %213 = vector.load %arg20[%c2_105, %c0_106] : memref<16x512xf32, #tpu.memory_space<vmem>>, vector<2x512xf32>
    %214 = arith.select %2, %212, %213 : vector<2x512xi1>, vector<2x512xf32>
    %215 = arith.addf %214, %211 : vector<2x512xf32>
    %216 = vector.extract_strided_slice %215 {offsets = [0, 0], sizes = [2, 384], strides = [1, 1]} : vector<2x512xf32> to vector<2x384xf32>
    %217 = arith.negf %216 : vector<2x384xf32>
    %218 = math.exp %217 : vector<2x384xf32>
    %cst_107 = arith.constant 1.000000e+00 : f32
    %219 = vector.broadcast %cst_107 : f32 to vector<2x384xf32>
    %220 = arith.addf %219, %218 : vector<2x384xf32>
    %221 = arith.divf %219, %220 : vector<2x384xf32>
    %222 = vector.extract_strided_slice %215 {offsets = [0, 384], sizes = [2, 128], strides = [1, 1]} : vector<2x512xf32> to vector<2x128xf32>
    %223 = math.tanh %222 : vector<2x128xf32>
    %224 = vector.extract_strided_slice %221 {offsets = [0, 0], sizes = [2, 128], strides = [1, 1]} : vector<2x384xf32> to vector<2x128xf32>
    %225 = vector.extract_strided_slice %221 {offsets = [0, 128], sizes = [2, 128], strides = [1, 1]} : vector<2x384xf32> to vector<2x128xf32>
    %226 = vector.extract_strided_slice %221 {offsets = [0, 256], sizes = [2, 128], strides = [1, 1]} : vector<2x384xf32> to vector<2x128xf32>
    %227 = arith.mulf %225, %202 : vector<2x128xf32>
    %228 = arith.mulf %224, %223 : vector<2x128xf32>
    %229 = arith.addf %227, %228 : vector<2x128xf32>
    %230 = math.tanh %229 : vector<2x128xf32>
    %231 = arith.mulf %226, %230 : vector<2x128xf32>
    %c12_108 = arith.constant 12 : index
    %c0_109 = arith.constant 0 : index
    %232 = vector.load %arg1[%c12_108, %c0_109] : memref<16x128xf32, #tpu.memory_space<vmem>>, vector<2x128xf32>
    %cst_110 = arith.constant 5.000000e-01 : f32
    %233 = vector.broadcast %cst_110 : f32 to vector<2x128xf32>
    %234 = arith.cmpf ogt, %232, %233 : vector<2x128xf32>
    %235 = arith.select %234, %229, %202 : vector<2x128xi1>, vector<2x128xf32>
    %236 = arith.select %234, %231, %203 : vector<2x128xi1>, vector<2x128xf32>
    %cst_111 = arith.constant 0.000000e+00 : f32
    %237 = vector.broadcast %cst_111 : f32 to vector<2x128xf32>
    %238 = arith.select %234, %231, %237 : vector<2x128xi1>, vector<2x128xf32>
    %239 = vector.extract_strided_slice %238 {offsets = [0, 0], sizes = [2, 64], strides = [1, 1]} : vector<2x128xf32> to vector<2x64xf32>
    %c12_112 = arith.constant 12 : index
    %c0_113 = arith.constant 0 : index
    %240 = vector.load %arg21[%c12_112, %c0_113] : memref<16x128xf32, #tpu.memory_space<vmem>>, vector<2x64xf32>
    tpu.vector_store %arg21[%c12_112, %c0_113], %239 {strides = array<i32>} : memref<16x128xf32, #tpu.memory_space<vmem>>, vector<2x64xf32>,
    %241 = vector.extract_strided_slice %238 {offsets = [0, 64], sizes = [2, 64], strides = [1, 1]} : vector<2x128xf32> to vector<2x64xf32>
    %c2_114 = arith.constant 2 : index
    %c64_115 = arith.constant 64 : index
    %242 = vector.load %arg21[%c2_114, %c64_115] : memref<16x128xf32, #tpu.memory_space<vmem>>, vector<2x64xf32>
    tpu.vector_store %arg21[%c2_114, %c64_115], %241 {strides = array<i32>} : memref<16x128xf32, #tpu.memory_space<vmem>>, vector<2x64xf32>,
    %c0_116 = arith.constant 0 : index
    %c0_117 = arith.constant 0 : index
    %243 = vector.load %arg4[%c0_116, %c0_117] : memref<128x512xf32, #tpu.memory_space<vmem>>, vector<128x512xf32>
    %cst_118 = arith.constant dense<0.000000e+00> : vector<2x512xf32>
    %244 = tpu.matmul %236, %243, %cst_118 {dimension_numbers = #tpu.dot_dimension_numbers<[1], [0], [0], [1], [0, 0, 1, 1], [], []>} : vector<2x128xf32>, vector<128x512xf32>, vector<2x512xf32> -> vector<2x512xf32>
    %c14_119 = arith.constant 14 : index
    %c0_120 = arith.constant 0 : index
    %245 = vector.load %arg20[%c14_119, %c0_120] : memref<16x512xf32, #tpu.memory_space<vmem>>, vector<2x512xf32>
    %c0_121 = arith.constant 0 : index
    %c0_122 = arith.constant 0 : index
    %246 = vector.load %arg20[%c0_121, %c0_122] : memref<16x512xf32, #tpu.memory_space<vmem>>, vector<2x512xf32>
    %247 = arith.select %2, %245, %246 : vector<2x512xi1>, vector<2x512xf32>
    %248 = arith.addf %247, %244 : vector<2x512xf32>
    %249 = vector.extract_strided_slice %248 {offsets = [0, 0], sizes = [2, 384], strides = [1, 1]} : vector<2x512xf32> to vector<2x384xf32>
    %250 = arith.negf %249 : vector<2x384xf32>
    %251 = math.exp %250 : vector<2x384xf32>
    %cst_123 = arith.constant 1.000000e+00 : f32
    %252 = vector.broadcast %cst_123 : f32 to vector<2x384xf32>
    %253 = arith.addf %252, %251 : vector<2x384xf32>
    %254 = arith.divf %252, %253 : vector<2x384xf32>
    %255 = vector.extract_strided_slice %248 {offsets = [0, 384], sizes = [2, 128], strides = [1, 1]} : vector<2x512xf32> to vector<2x128xf32>
    %256 = math.tanh %255 : vector<2x128xf32>
    %257 = vector.extract_strided_slice %254 {offsets = [0, 0], sizes = [2, 128], strides = [1, 1]} : vector<2x384xf32> to vector<2x128xf32>
    %258 = vector.extract_strided_slice %254 {offsets = [0, 128], sizes = [2, 128], strides = [1, 1]} : vector<2x384xf32> to vector<2x128xf32>
    %259 = vector.extract_strided_slice %254 {offsets = [0, 256], sizes = [2, 128], strides = [1, 1]} : vector<2x384xf32> to vector<2x128xf32>
    %260 = arith.mulf %258, %235 : vector<2x128xf32>
    %261 = arith.mulf %257, %256 : vector<2x128xf32>
    %262 = arith.addf %260, %261 : vector<2x128xf32>
    %263 = math.tanh %262 : vector<2x128xf32>
    %264 = arith.mulf %259, %263 : vector<2x128xf32>
    %c14_124 = arith.constant 14 : index
    %c0_125 = arith.constant 0 : index
    %265 = vector.load %arg1[%c14_124, %c0_125] : memref<16x128xf32, #tpu.memory_space<vmem>>, vector<2x128xf32>
    %cst_126 = arith.constant 5.000000e-01 : f32
    %266 = vector.broadcast %cst_126 : f32 to vector<2x128xf32>
    %267 = arith.cmpf ogt, %265, %266 : vector<2x128xf32>
    %cst_127 = arith.constant 0.000000e+00 : f32
    %268 = vector.broadcast %cst_127 : f32 to vector<2x128xf32>
    %269 = arith.select %267, %264, %268 : vector<2x128xi1>, vector<2x128xf32>
    %270 = vector.extract_strided_slice %269 {offsets = [0, 0], sizes = [2, 64], strides = [1, 1]} : vector<2x128xf32> to vector<2x64xf32>
    %c14_128 = arith.constant 14 : index
    %c0_129 = arith.constant 0 : index
    %271 = vector.load %arg21[%c14_128, %c0_129] : memref<16x128xf32, #tpu.memory_space<vmem>>, vector<2x64xf32>
    tpu.vector_store %arg21[%c14_128, %c0_129], %270 {strides = array<i32>} : memref<16x128xf32, #tpu.memory_space<vmem>>, vector<2x64xf32>,
    %272 = vector.extract_strided_slice %269 {offsets = [0, 64], sizes = [2, 64], strides = [1, 1]} : vector<2x128xf32> to vector<2x64xf32>
    %c0_130 = arith.constant 0 : index
    %c64_131 = arith.constant 64 : index
    %273 = vector.load %arg21[%c0_130, %c64_131] : memref<16x128xf32, #tpu.memory_space<vmem>>, vector<2x64xf32>
    tpu.vector_store %arg21[%c0_130, %c64_131], %272 {strides = array<i32>} : memref<16x128xf32, #tpu.memory_space<vmem>>, vector<2x64xf32>,
    %c0_132 = arith.constant 0 : index
    %c0_133 = arith.constant 0 : index
    %274 = vector.load %arg21[%c0_132, %c0_133] : memref<16x128xf32, #tpu.memory_space<vmem>>, vector<16x128xf32>
    %c0_134 = arith.constant 0 : index
    %c0_135 = arith.constant 0 : index
    %275 = vector.load %arg6[%c0_134, %c0_135] : memref<128x512xf32, #tpu.memory_space<vmem>>, vector<128x512xf32>
    %cst_136 = arith.constant dense<0.000000e+00> : vector<16x512xf32>
    %276 = tpu.matmul %274, %275, %cst_136 {dimension_numbers = #tpu.dot_dimension_numbers<[1], [0], [0], [1], [0, 0, 1, 1], [], []>} : vector<16x128xf32>, vector<128x512xf32>, vector<16x512xf32> -> vector<16x512xf32>
    %c0_137 = arith.constant 0 : index
    %c0_138 = arith.constant 0 : index
    %277 = vector.load %arg8[%c0_137, %c0_138] : memref<1x512xf32, #tpu.memory_space<vmem>>, vector<1x512xf32>
    %278 = vector.broadcast %277 : vector<1x512xf32> to vector<16x512xf32>
    %279 = arith.addf %276, %278 : vector<16x512xf32>
    %c0_139 = arith.constant 0 : index
    %c0_140 = arith.constant 0 : index
    %280 = vector.load %arg20[%c0_139, %c0_140] : memref<16x512xf32, #tpu.memory_space<vmem>>, vector<16x512xf32>
    tpu.vector_store %arg20[%c0_139, %c0_140], %279 {strides = array<i32>} : memref<16x512xf32, #tpu.memory_space<vmem>>, vector<16x512xf32>,
    %cst_141 = arith.constant 0.000000e+00 : f32
    %281 = vector.broadcast %cst_141 : f32 to vector<2x128xf32>
    %cst_142 = arith.constant 0.000000e+00 : f32
    %282 = vector.broadcast %cst_142 : f32 to vector<2x128xf32>
    %c0_143 = arith.constant 0 : index
    %c0_144 = arith.constant 0 : index
    %283 = vector.load %arg7[%c0_143, %c0_144] : memref<128x512xf32, #tpu.memory_space<vmem>>, vector<128x512xf32>
    %cst_145 = arith.constant dense<0.000000e+00> : vector<2x512xf32>
    %284 = tpu.matmul %281, %283, %cst_145 {dimension_numbers = #tpu.dot_dimension_numbers<[1], [0], [0], [1], [0, 0, 1, 1], [], []>} : vector<2x128xf32>, vector<128x512xf32>, vector<2x512xf32> -> vector<2x512xf32>
    %c0_146 = arith.constant 0 : index
    %c0_147 = arith.constant 0 : index
    %285 = vector.load %arg20[%c0_146, %c0_147] : memref<16x512xf32, #tpu.memory_space<vmem>>, vector<2x512xf32>
    %c14_148 = arith.constant 14 : index
    %c0_149 = arith.constant 0 : index
    %286 = vector.load %arg20[%c14_148, %c0_149] : memref<16x512xf32, #tpu.memory_space<vmem>>, vector<2x512xf32>
    %287 = arith.select %2, %285, %286 : vector<2x512xi1>, vector<2x512xf32>
    %288 = arith.addf %287, %284 : vector<2x512xf32>
    %289 = vector.extract_strided_slice %288 {offsets = [0, 0], sizes = [2, 384], strides = [1, 1]} : vector<2x512xf32> to vector<2x384xf32>
    %290 = arith.negf %289 : vector<2x384xf32>
    %291 = math.exp %290 : vector<2x384xf32>
    %cst_150 = arith.constant 1.000000e+00 : f32
    %292 = vector.broadcast %cst_150 : f32 to vector<2x384xf32>
    %293 = arith.addf %292, %291 : vector<2x384xf32>
    %294 = arith.divf %292, %293 : vector<2x384xf32>
    %295 = vector.extract_strided_slice %288 {offsets = [0, 384], sizes = [2, 128], strides = [1, 1]} : vector<2x512xf32> to vector<2x128xf32>
    %296 = math.tanh %295 : vector<2x128xf32>
    %297 = vector.extract_strided_slice %294 {offsets = [0, 0], sizes = [2, 128], strides = [1, 1]} : vector<2x384xf32> to vector<2x128xf32>
    %298 = vector.extract_strided_slice %294 {offsets = [0, 128], sizes = [2, 128], strides = [1, 1]} : vector<2x384xf32> to vector<2x128xf32>
    %299 = vector.extract_strided_slice %294 {offsets = [0, 256], sizes = [2, 128], strides = [1, 1]} : vector<2x384xf32> to vector<2x128xf32>
    %300 = arith.mulf %298, %282 : vector<2x128xf32>
    %301 = arith.mulf %297, %296 : vector<2x128xf32>
    %302 = arith.addf %300, %301 : vector<2x128xf32>
    %303 = math.tanh %302 : vector<2x128xf32>
    %304 = arith.mulf %299, %303 : vector<2x128xf32>
    %c0_151 = arith.constant 0 : index
    %c0_152 = arith.constant 0 : index
    %305 = vector.load %arg1[%c0_151, %c0_152] : memref<16x128xf32, #tpu.memory_space<vmem>>, vector<2x128xf32>
    %cst_153 = arith.constant 5.000000e-01 : f32
    %306 = vector.broadcast %cst_153 : f32 to vector<2x128xf32>
    %307 = arith.cmpf ogt, %305, %306 : vector<2x128xf32>
    %308 = arith.select %307, %302, %282 : vector<2x128xi1>, vector<2x128xf32>
    %309 = arith.select %307, %304, %281 : vector<2x128xi1>, vector<2x128xf32>
    %cst_154 = arith.constant 0.000000e+00 : f32
    %310 = vector.broadcast %cst_154 : f32 to vector<2x128xf32>
    %311 = arith.select %307, %304, %310 : vector<2x128xi1>, vector<2x128xf32>
    %312 = vector.extract_strided_slice %311 {offsets = [0, 0], sizes = [2, 64], strides = [1, 1]} : vector<2x128xf32> to vector<2x64xf32>
    %c0_155 = arith.constant 0 : index
    %c0_156 = arith.constant 0 : index
    %313 = vector.load %arg21[%c0_155, %c0_156] : memref<16x128xf32, #tpu.memory_space<vmem>>, vector<2x64xf32>
    tpu.vector_store %arg21[%c0_155, %c0_156], %312 {strides = array<i32>} : memref<16x128xf32, #tpu.memory_space<vmem>>, vector<2x64xf32>,
    %314 = vector.extract_strided_slice %311 {offsets = [0, 64], sizes = [2, 64], strides = [1, 1]} : vector<2x128xf32> to vector<2x64xf32>
    %c14_157 = arith.constant 14 : index
    %c64_158 = arith.constant 64 : index
    %315 = vector.load %arg21[%c14_157, %c64_158] : memref<16x128xf32, #tpu.memory_space<vmem>>, vector<2x64xf32>
    tpu.vector_store %arg21[%c14_157, %c64_158], %314 {strides = array<i32>} : memref<16x128xf32, #tpu.memory_space<vmem>>, vector<2x64xf32>,
    %c0_159 = arith.constant 0 : index
    %c0_160 = arith.constant 0 : index
    %316 = vector.load %arg7[%c0_159, %c0_160] : memref<128x512xf32, #tpu.memory_space<vmem>>, vector<128x512xf32>
    %cst_161 = arith.constant dense<0.000000e+00> : vector<2x512xf32>
    %317 = tpu.matmul %309, %316, %cst_161 {dimension_numbers = #tpu.dot_dimension_numbers<[1], [0], [0], [1], [0, 0, 1, 1], [], []>} : vector<2x128xf32>, vector<128x512xf32>, vector<2x512xf32> -> vector<2x512xf32>
    %c2_162 = arith.constant 2 : index
    %c0_163 = arith.constant 0 : index
    %318 = vector.load %arg20[%c2_162, %c0_163] : memref<16x512xf32, #tpu.memory_space<vmem>>, vector<2x512xf32>
    %c12_164 = arith.constant 12 : index
    %c0_165 = arith.constant 0 : index
    %319 = vector.load %arg20[%c12_164, %c0_165] : memref<16x512xf32, #tpu.memory_space<vmem>>, vector<2x512xf32>
    %320 = arith.select %2, %318, %319 : vector<2x512xi1>, vector<2x512xf32>
    %321 = arith.addf %320, %317 : vector<2x512xf32>
    %322 = vector.extract_strided_slice %321 {offsets = [0, 0], sizes = [2, 384], strides = [1, 1]} : vector<2x512xf32> to vector<2x384xf32>
    %323 = arith.negf %322 : vector<2x384xf32>
    %324 = math.exp %323 : vector<2x384xf32>
    %cst_166 = arith.constant 1.000000e+00 : f32
    %325 = vector.broadcast %cst_166 : f32 to vector<2x384xf32>
    %326 = arith.addf %325, %324 : vector<2x384xf32>
    %327 = arith.divf %325, %326 : vector<2x384xf32>
    %328 = vector.extract_strided_slice %321 {offsets = [0, 384], sizes = [2, 128], strides = [1, 1]} : vector<2x512xf32> to vector<2x128xf32>
    %329 = math.tanh %328 : vector<2x128xf32>
    %330 = vector.extract_strided_slice %327 {offsets = [0, 0], sizes = [2, 128], strides = [1, 1]} : vector<2x384xf32> to vector<2x128xf32>
    %331 = vector.extract_strided_slice %327 {offsets = [0, 128], sizes = [2, 128], strides = [1, 1]} : vector<2x384xf32> to vector<2x128xf32>
    %332 = vector.extract_strided_slice %327 {offsets = [0, 256], sizes = [2, 128], strides = [1, 1]} : vector<2x384xf32> to vector<2x128xf32>
    %333 = arith.mulf %331, %308 : vector<2x128xf32>
    %334 = arith.mulf %330, %329 : vector<2x128xf32>
    %335 = arith.addf %333, %334 : vector<2x128xf32>
    %336 = math.tanh %335 : vector<2x128xf32>
    %337 = arith.mulf %332, %336 : vector<2x128xf32>
    %c2_167 = arith.constant 2 : index
    %c0_168 = arith.constant 0 : index
    %338 = vector.load %arg1[%c2_167, %c0_168] : memref<16x128xf32, #tpu.memory_space<vmem>>, vector<2x128xf32>
    %cst_169 = arith.constant 5.000000e-01 : f32
    %339 = vector.broadcast %cst_169 : f32 to vector<2x128xf32>
    %340 = arith.cmpf ogt, %338, %339 : vector<2x128xf32>
    %341 = arith.select %340, %335, %308 : vector<2x128xi1>, vector<2x128xf32>
    %342 = arith.select %340, %337, %309 : vector<2x128xi1>, vector<2x128xf32>
    %cst_170 = arith.constant 0.000000e+00 : f32
    %343 = vector.broadcast %cst_170 : f32 to vector<2x128xf32>
    %344 = arith.select %340, %337, %343 : vector<2x128xi1>, vector<2x128xf32>
    %345 = vector.extract_strided_slice %344 {offsets = [0, 0], sizes = [2, 64], strides = [1, 1]} : vector<2x128xf32> to vector<2x64xf32>
    %c2_171 = arith.constant 2 : index
    %c0_172 = arith.constant 0 : index
    %346 = vector.load %arg21[%c2_171, %c0_172] : memref<16x128xf32, #tpu.memory_space<vmem>>, vector<2x64xf32>
    tpu.vector_store %arg21[%c2_171, %c0_172], %345 {strides = array<i32>} : memref<16x128xf32, #tpu.memory_space<vmem>>, vector<2x64xf32>,
    %347 = vector.extract_strided_slice %344 {offsets = [0, 64], sizes = [2, 64], strides = [1, 1]} : vector<2x128xf32> to vector<2x64xf32>
    %c12_173 = arith.constant 12 : index
    %c64_174 = arith.constant 64 : index
    %348 = vector.load %arg21[%c12_173, %c64_174] : memref<16x128xf32, #tpu.memory_space<vmem>>, vector<2x64xf32>
    tpu.vector_store %arg21[%c12_173, %c64_174], %347 {strides = array<i32>} : memref<16x128xf32, #tpu.memory_space<vmem>>, vector<2x64xf32>,
    %c0_175 = arith.constant 0 : index
    %c0_176 = arith.constant 0 : index
    %349 = vector.load %arg7[%c0_175, %c0_176] : memref<128x512xf32, #tpu.memory_space<vmem>>, vector<128x512xf32>
    %cst_177 = arith.constant dense<0.000000e+00> : vector<2x512xf32>
    %350 = tpu.matmul %342, %349, %cst_177 {dimension_numbers = #tpu.dot_dimension_numbers<[1], [0], [0], [1], [0, 0, 1, 1], [], []>} : vector<2x128xf32>, vector<128x512xf32>, vector<2x512xf32> -> vector<2x512xf32>
    %c4_178 = arith.constant 4 : index
    %c0_179 = arith.constant 0 : index
    %351 = vector.load %arg20[%c4_178, %c0_179] : memref<16x512xf32, #tpu.memory_space<vmem>>, vector<2x512xf32>
    %c10_180 = arith.constant 10 : index
    %c0_181 = arith.constant 0 : index
    %352 = vector.load %arg20[%c10_180, %c0_181] : memref<16x512xf32, #tpu.memory_space<vmem>>, vector<2x512xf32>
    %353 = arith.select %2, %351, %352 : vector<2x512xi1>, vector<2x512xf32>
    %354 = arith.addf %353, %350 : vector<2x512xf32>
    %355 = vector.extract_strided_slice %354 {offsets = [0, 0], sizes = [2, 384], strides = [1, 1]} : vector<2x512xf32> to vector<2x384xf32>
    %356 = arith.negf %355 : vector<2x384xf32>
    %357 = math.exp %356 : vector<2x384xf32>
    %cst_182 = arith.constant 1.000000e+00 : f32
    %358 = vector.broadcast %cst_182 : f32 to vector<2x384xf32>
    %359 = arith.addf %358, %357 : vector<2x384xf32>
    %360 = arith.divf %358, %359 : vector<2x384xf32>
    %361 = vector.extract_strided_slice %354 {offsets = [0, 384], sizes = [2, 128], strides = [1, 1]} : vector<2x512xf32> to vector<2x128xf32>
    %362 = math.tanh %361 : vector<2x128xf32>
    %363 = vector.extract_strided_slice %360 {offsets = [0, 0], sizes = [2, 128], strides = [1, 1]} : vector<2x384xf32> to vector<2x128xf32>
    %364 = vector.extract_strided_slice %360 {offsets = [0, 128], sizes = [2, 128], strides = [1, 1]} : vector<2x384xf32> to vector<2x128xf32>
    %365 = vector.extract_strided_slice %360 {offsets = [0, 256], sizes = [2, 128], strides = [1, 1]} : vector<2x384xf32> to vector<2x128xf32>
    %366 = arith.mulf %364, %341 : vector<2x128xf32>
    %367 = arith.mulf %363, %362 : vector<2x128xf32>
    %368 = arith.addf %366, %367 : vector<2x128xf32>
    %369 = math.tanh %368 : vector<2x128xf32>
    %370 = arith.mulf %365, %369 : vector<2x128xf32>
    %c4_183 = arith.constant 4 : index
    %c0_184 = arith.constant 0 : index
    %371 = vector.load %arg1[%c4_183, %c0_184] : memref<16x128xf32, #tpu.memory_space<vmem>>, vector<2x128xf32>
    %cst_185 = arith.constant 5.000000e-01 : f32
    %372 = vector.broadcast %cst_185 : f32 to vector<2x128xf32>
    %373 = arith.cmpf ogt, %371, %372 : vector<2x128xf32>
    %374 = arith.select %373, %368, %341 : vector<2x128xi1>, vector<2x128xf32>
    %375 = arith.select %373, %370, %342 : vector<2x128xi1>, vector<2x128xf32>
    %cst_186 = arith.constant 0.000000e+00 : f32
    %376 = vector.broadcast %cst_186 : f32 to vector<2x128xf32>
    %377 = arith.select %373, %370, %376 : vector<2x128xi1>, vector<2x128xf32>
    %378 = vector.extract_strided_slice %377 {offsets = [0, 0], sizes = [2, 64], strides = [1, 1]} : vector<2x128xf32> to vector<2x64xf32>
    %c4_187 = arith.constant 4 : index
    %c0_188 = arith.constant 0 : index
    %379 = vector.load %arg21[%c4_187, %c0_188] : memref<16x128xf32, #tpu.memory_space<vmem>>, vector<2x64xf32>
    tpu.vector_store %arg21[%c4_187, %c0_188], %378 {strides = array<i32>} : memref<16x128xf32, #tpu.memory_space<vmem>>, vector<2x64xf32>,
    %380 = vector.extract_strided_slice %377 {offsets = [0, 64], sizes = [2, 64], strides = [1, 1]} : vector<2x128xf32> to vector<2x64xf32>
    %c10_189 = arith.constant 10 : index
    %c64_190 = arith.constant 64 : index
    %381 = vector.load %arg21[%c10_189, %c64_190] : memref<16x128xf32, #tpu.memory_space<vmem>>, vector<2x64xf32>
    tpu.vector_store %arg21[%c10_189, %c64_190], %380 {strides = array<i32>} : memref<16x128xf32, #tpu.memory_space<vmem>>, vector<2x64xf32>,
    %c0_191 = arith.constant 0 : index
    %c0_192 = arith.constant 0 : index
    %382 = vector.load %arg7[%c0_191, %c0_192] : memref<128x512xf32, #tpu.memory_space<vmem>>, vector<128x512xf32>
    %cst_193 = arith.constant dense<0.000000e+00> : vector<2x512xf32>
    %383 = tpu.matmul %375, %382, %cst_193 {dimension_numbers = #tpu.dot_dimension_numbers<[1], [0], [0], [1], [0, 0, 1, 1], [], []>} : vector<2x128xf32>, vector<128x512xf32>, vector<2x512xf32> -> vector<2x512xf32>
    %c6_194 = arith.constant 6 : index
    %c0_195 = arith.constant 0 : index
    %384 = vector.load %arg20[%c6_194, %c0_195] : memref<16x512xf32, #tpu.memory_space<vmem>>, vector<2x512xf32>
    %c8_196 = arith.constant 8 : index
    %c0_197 = arith.constant 0 : index
    %385 = vector.load %arg20[%c8_196, %c0_197] : memref<16x512xf32, #tpu.memory_space<vmem>>, vector<2x512xf32>
    %386 = arith.select %2, %384, %385 : vector<2x512xi1>, vector<2x512xf32>
    %387 = arith.addf %386, %383 : vector<2x512xf32>
    %388 = vector.extract_strided_slice %387 {offsets = [0, 0], sizes = [2, 384], strides = [1, 1]} : vector<2x512xf32> to vector<2x384xf32>
    %389 = arith.negf %388 : vector<2x384xf32>
    %390 = math.exp %389 : vector<2x384xf32>
    %cst_198 = arith.constant 1.000000e+00 : f32
    %391 = vector.broadcast %cst_198 : f32 to vector<2x384xf32>
    %392 = arith.addf %391, %390 : vector<2x384xf32>
    %393 = arith.divf %391, %392 : vector<2x384xf32>
    %394 = vector.extract_strided_slice %387 {offsets = [0, 384], sizes = [2, 128], strides = [1, 1]} : vector<2x512xf32> to vector<2x128xf32>
    %395 = math.tanh %394 : vector<2x128xf32>
    %396 = vector.extract_strided_slice %393 {offsets = [0, 0], sizes = [2, 128], strides = [1, 1]} : vector<2x384xf32> to vector<2x128xf32>
    %397 = vector.extract_strided_slice %393 {offsets = [0, 128], sizes = [2, 128], strides = [1, 1]} : vector<2x384xf32> to vector<2x128xf32>
    %398 = vector.extract_strided_slice %393 {offsets = [0, 256], sizes = [2, 128], strides = [1, 1]} : vector<2x384xf32> to vector<2x128xf32>
    %399 = arith.mulf %397, %374 : vector<2x128xf32>
    %400 = arith.mulf %396, %395 : vector<2x128xf32>
    %401 = arith.addf %399, %400 : vector<2x128xf32>
    %402 = math.tanh %401 : vector<2x128xf32>
    %403 = arith.mulf %398, %402 : vector<2x128xf32>
    %c6_199 = arith.constant 6 : index
    %c0_200 = arith.constant 0 : index
    %404 = vector.load %arg1[%c6_199, %c0_200] : memref<16x128xf32, #tpu.memory_space<vmem>>, vector<2x128xf32>
    %cst_201 = arith.constant 5.000000e-01 : f32
    %405 = vector.broadcast %cst_201 : f32 to vector<2x128xf32>
    %406 = arith.cmpf ogt, %404, %405 : vector<2x128xf32>
    %407 = arith.select %406, %401, %374 : vector<2x128xi1>, vector<2x128xf32>
    %408 = arith.select %406, %403, %375 : vector<2x128xi1>, vector<2x128xf32>
    %cst_202 = arith.constant 0.000000e+00 : f32
    %409 = vector.broadcast %cst_202 : f32 to vector<2x128xf32>
    %410 = arith.select %406, %403, %409 : vector<2x128xi1>, vector<2x128xf32>
    %411 = vector.extract_strided_slice %410 {offsets = [0, 0], sizes = [2, 64], strides = [1, 1]} : vector<2x128xf32> to vector<2x64xf32>
    %c6_203 = arith.constant 6 : index
    %c0_204 = arith.constant 0 : index
    %412 = vector.load %arg21[%c6_203, %c0_204] : memref<16x128xf32, #tpu.memory_space<vmem>>, vector<2x64xf32>
    tpu.vector_store %arg21[%c6_203, %c0_204], %411 {strides = array<i32>} : memref<16x128xf32, #tpu.memory_space<vmem>>, vector<2x64xf32>,
    %413 = vector.extract_strided_slice %410 {offsets = [0, 64], sizes = [2, 64], strides = [1, 1]} : vector<2x128xf32> to vector<2x64xf32>
    %c8_205 = arith.constant 8 : index
    %c64_206 = arith.constant 64 : index
    %414 = vector.load %arg21[%c8_205, %c64_206] : memref<16x128xf32, #tpu.memory_space<vmem>>, vector<2x64xf32>
    tpu.vector_store %arg21[%c8_205, %c64_206], %413 {strides = array<i32>} : memref<16x128xf32, #tpu.memory_space<vmem>>, vector<2x64xf32>,
    %c0_207 = arith.constant 0 : index
    %c0_208 = arith.constant 0 : index
    %415 = vector.load %arg7[%c0_207, %c0_208] : memref<128x512xf32, #tpu.memory_space<vmem>>, vector<128x512xf32>
    %cst_209 = arith.constant dense<0.000000e+00> : vector<2x512xf32>
    %416 = tpu.matmul %408, %415, %cst_209 {dimension_numbers = #tpu.dot_dimension_numbers<[1], [0], [0], [1], [0, 0, 1, 1], [], []>} : vector<2x128xf32>, vector<128x512xf32>, vector<2x512xf32> -> vector<2x512xf32>
    %c8_210 = arith.constant 8 : index
    %c0_211 = arith.constant 0 : index
    %417 = vector.load %arg20[%c8_210, %c0_211] : memref<16x512xf32, #tpu.memory_space<vmem>>, vector<2x512xf32>
    %c6_212 = arith.constant 6 : index
    %c0_213 = arith.constant 0 : index
    %418 = vector.load %arg20[%c6_212, %c0_213] : memref<16x512xf32, #tpu.memory_space<vmem>>, vector<2x512xf32>
    %419 = arith.select %2, %417, %418 : vector<2x512xi1>, vector<2x512xf32>
    %420 = arith.addf %419, %416 : vector<2x512xf32>
    %421 = vector.extract_strided_slice %420 {offsets = [0, 0], sizes = [2, 384], strides = [1, 1]} : vector<2x512xf32> to vector<2x384xf32>
    %422 = arith.negf %421 : vector<2x384xf32>
    %423 = math.exp %422 : vector<2x384xf32>
    %cst_214 = arith.constant 1.000000e+00 : f32
    %424 = vector.broadcast %cst_214 : f32 to vector<2x384xf32>
    %425 = arith.addf %424, %423 : vector<2x384xf32>
    %426 = arith.divf %424, %425 : vector<2x384xf32>
    %427 = vector.extract_strided_slice %420 {offsets = [0, 384], sizes = [2, 128], strides = [1, 1]} : vector<2x512xf32> to vector<2x128xf32>
    %428 = math.tanh %427 : vector<2x128xf32>
    %429 = vector.extract_strided_slice %426 {offsets = [0, 0], sizes = [2, 128], strides = [1, 1]} : vector<2x384xf32> to vector<2x128xf32>
    %430 = vector.extract_strided_slice %426 {offsets = [0, 128], sizes = [2, 128], strides = [1, 1]} : vector<2x384xf32> to vector<2x128xf32>
    %431 = vector.extract_strided_slice %426 {offsets = [0, 256], sizes = [2, 128], strides = [1, 1]} : vector<2x384xf32> to vector<2x128xf32>
    %432 = arith.mulf %430, %407 : vector<2x128xf32>
    %433 = arith.mulf %429, %428 : vector<2x128xf32>
    %434 = arith.addf %432, %433 : vector<2x128xf32>
    %435 = math.tanh %434 : vector<2x128xf32>
    %436 = arith.mulf %431, %435 : vector<2x128xf32>
    %c8_215 = arith.constant 8 : index
    %c0_216 = arith.constant 0 : index
    %437 = vector.load %arg1[%c8_215, %c0_216] : memref<16x128xf32, #tpu.memory_space<vmem>>, vector<2x128xf32>
    %cst_217 = arith.constant 5.000000e-01 : f32
    %438 = vector.broadcast %cst_217 : f32 to vector<2x128xf32>
    %439 = arith.cmpf ogt, %437, %438 : vector<2x128xf32>
    %440 = arith.select %439, %434, %407 : vector<2x128xi1>, vector<2x128xf32>
    %441 = arith.select %439, %436, %408 : vector<2x128xi1>, vector<2x128xf32>
    %cst_218 = arith.constant 0.000000e+00 : f32
    %442 = vector.broadcast %cst_218 : f32 to vector<2x128xf32>
    %443 = arith.select %439, %436, %442 : vector<2x128xi1>, vector<2x128xf32>
    %444 = vector.extract_strided_slice %443 {offsets = [0, 0], sizes = [2, 64], strides = [1, 1]} : vector<2x128xf32> to vector<2x64xf32>
    %c8_219 = arith.constant 8 : index
    %c0_220 = arith.constant 0 : index
    %445 = vector.load %arg21[%c8_219, %c0_220] : memref<16x128xf32, #tpu.memory_space<vmem>>, vector<2x64xf32>
    tpu.vector_store %arg21[%c8_219, %c0_220], %444 {strides = array<i32>} : memref<16x128xf32, #tpu.memory_space<vmem>>, vector<2x64xf32>,
    %446 = vector.extract_strided_slice %443 {offsets = [0, 64], sizes = [2, 64], strides = [1, 1]} : vector<2x128xf32> to vector<2x64xf32>
    %c6_221 = arith.constant 6 : index
    %c64_222 = arith.constant 64 : index
    %447 = vector.load %arg21[%c6_221, %c64_222] : memref<16x128xf32, #tpu.memory_space<vmem>>, vector<2x64xf32>
    tpu.vector_store %arg21[%c6_221, %c64_222], %446 {strides = array<i32>} : memref<16x128xf32, #tpu.memory_space<vmem>>, vector<2x64xf32>,
    %c0_223 = arith.constant 0 : index
    %c0_224 = arith.constant 0 : index
    %448 = vector.load %arg7[%c0_223, %c0_224] : memref<128x512xf32, #tpu.memory_space<vmem>>, vector<128x512xf32>
    %cst_225 = arith.constant dense<0.000000e+00> : vector<2x512xf32>
    %449 = tpu.matmul %441, %448, %cst_225 {dimension_numbers = #tpu.dot_dimension_numbers<[1], [0], [0], [1], [0, 0, 1, 1], [], []>} : vector<2x128xf32>, vector<128x512xf32>, vector<2x512xf32> -> vector<2x512xf32>
    %c10_226 = arith.constant 10 : index
    %c0_227 = arith.constant 0 : index
    %450 = vector.load %arg20[%c10_226, %c0_227] : memref<16x512xf32, #tpu.memory_space<vmem>>, vector<2x512xf32>
    %c4_228 = arith.constant 4 : index
    %c0_229 = arith.constant 0 : index
    %451 = vector.load %arg20[%c4_228, %c0_229] : memref<16x512xf32, #tpu.memory_space<vmem>>, vector<2x512xf32>
    %452 = arith.select %2, %450, %451 : vector<2x512xi1>, vector<2x512xf32>
    %453 = arith.addf %452, %449 : vector<2x512xf32>
    %454 = vector.extract_strided_slice %453 {offsets = [0, 0], sizes = [2, 384], strides = [1, 1]} : vector<2x512xf32> to vector<2x384xf32>
    %455 = arith.negf %454 : vector<2x384xf32>
    %456 = math.exp %455 : vector<2x384xf32>
    %cst_230 = arith.constant 1.000000e+00 : f32
    %457 = vector.broadcast %cst_230 : f32 to vector<2x384xf32>
    %458 = arith.addf %457, %456 : vector<2x384xf32>
    %459 = arith.divf %457, %458 : vector<2x384xf32>
    %460 = vector.extract_strided_slice %453 {offsets = [0, 384], sizes = [2, 128], strides = [1, 1]} : vector<2x512xf32> to vector<2x128xf32>
    %461 = math.tanh %460 : vector<2x128xf32>
    %462 = vector.extract_strided_slice %459 {offsets = [0, 0], sizes = [2, 128], strides = [1, 1]} : vector<2x384xf32> to vector<2x128xf32>
    %463 = vector.extract_strided_slice %459 {offsets = [0, 128], sizes = [2, 128], strides = [1, 1]} : vector<2x384xf32> to vector<2x128xf32>
    %464 = vector.extract_strided_slice %459 {offsets = [0, 256], sizes = [2, 128], strides = [1, 1]} : vector<2x384xf32> to vector<2x128xf32>
    %465 = arith.mulf %463, %440 : vector<2x128xf32>
    %466 = arith.mulf %462, %461 : vector<2x128xf32>
    %467 = arith.addf %465, %466 : vector<2x128xf32>
    %468 = math.tanh %467 : vector<2x128xf32>
    %469 = arith.mulf %464, %468 : vector<2x128xf32>
    %c10_231 = arith.constant 10 : index
    %c0_232 = arith.constant 0 : index
    %470 = vector.load %arg1[%c10_231, %c0_232] : memref<16x128xf32, #tpu.memory_space<vmem>>, vector<2x128xf32>
    %cst_233 = arith.constant 5.000000e-01 : f32
    %471 = vector.broadcast %cst_233 : f32 to vector<2x128xf32>
    %472 = arith.cmpf ogt, %470, %471 : vector<2x128xf32>
    %473 = arith.select %472, %467, %440 : vector<2x128xi1>, vector<2x128xf32>
    %474 = arith.select %472, %469, %441 : vector<2x128xi1>, vector<2x128xf32>
    %cst_234 = arith.constant 0.000000e+00 : f32
    %475 = vector.broadcast %cst_234 : f32 to vector<2x128xf32>
    %476 = arith.select %472, %469, %475 : vector<2x128xi1>, vector<2x128xf32>
    %477 = vector.extract_strided_slice %476 {offsets = [0, 0], sizes = [2, 64], strides = [1, 1]} : vector<2x128xf32> to vector<2x64xf32>
    %c10_235 = arith.constant 10 : index
    %c0_236 = arith.constant 0 : index
    %478 = vector.load %arg21[%c10_235, %c0_236] : memref<16x128xf32, #tpu.memory_space<vmem>>, vector<2x64xf32>
    tpu.vector_store %arg21[%c10_235, %c0_236], %477 {strides = array<i32>} : memref<16x128xf32, #tpu.memory_space<vmem>>, vector<2x64xf32>,
    %479 = vector.extract_strided_slice %476 {offsets = [0, 64], sizes = [2, 64], strides = [1, 1]} : vector<2x128xf32> to vector<2x64xf32>
    %c4_237 = arith.constant 4 : index
    %c64_238 = arith.constant 64 : index
    %480 = vector.load %arg21[%c4_237, %c64_238] : memref<16x128xf32, #tpu.memory_space<vmem>>, vector<2x64xf32>
    tpu.vector_store %arg21[%c4_237, %c64_238], %479 {strides = array<i32>} : memref<16x128xf32, #tpu.memory_space<vmem>>, vector<2x64xf32>,
    %c0_239 = arith.constant 0 : index
    %c0_240 = arith.constant 0 : index
    %481 = vector.load %arg7[%c0_239, %c0_240] : memref<128x512xf32, #tpu.memory_space<vmem>>, vector<128x512xf32>
    %cst_241 = arith.constant dense<0.000000e+00> : vector<2x512xf32>
    %482 = tpu.matmul %474, %481, %cst_241 {dimension_numbers = #tpu.dot_dimension_numbers<[1], [0], [0], [1], [0, 0, 1, 1], [], []>} : vector<2x128xf32>, vector<128x512xf32>, vector<2x512xf32> -> vector<2x512xf32>
    %c12_242 = arith.constant 12 : index
    %c0_243 = arith.constant 0 : index
    %483 = vector.load %arg20[%c12_242, %c0_243] : memref<16x512xf32, #tpu.memory_space<vmem>>, vector<2x512xf32>
    %c2_244 = arith.constant 2 : index
    %c0_245 = arith.constant 0 : index
    %484 = vector.load %arg20[%c2_244, %c0_245] : memref<16x512xf32, #tpu.memory_space<vmem>>, vector<2x512xf32>
    %485 = arith.select %2, %483, %484 : vector<2x512xi1>, vector<2x512xf32>
    %486 = arith.addf %485, %482 : vector<2x512xf32>
    %487 = vector.extract_strided_slice %486 {offsets = [0, 0], sizes = [2, 384], strides = [1, 1]} : vector<2x512xf32> to vector<2x384xf32>
    %488 = arith.negf %487 : vector<2x384xf32>
    %489 = math.exp %488 : vector<2x384xf32>
    %cst_246 = arith.constant 1.000000e+00 : f32
    %490 = vector.broadcast %cst_246 : f32 to vector<2x384xf32>
    %491 = arith.addf %490, %489 : vector<2x384xf32>
    %492 = arith.divf %490, %491 : vector<2x384xf32>
    %493 = vector.extract_strided_slice %486 {offsets = [0, 384], sizes = [2, 128], strides = [1, 1]} : vector<2x512xf32> to vector<2x128xf32>
    %494 = math.tanh %493 : vector<2x128xf32>
    %495 = vector.extract_strided_slice %492 {offsets = [0, 0], sizes = [2, 128], strides = [1, 1]} : vector<2x384xf32> to vector<2x128xf32>
    %496 = vector.extract_strided_slice %492 {offsets = [0, 128], sizes = [2, 128], strides = [1, 1]} : vector<2x384xf32> to vector<2x128xf32>
    %497 = vector.extract_strided_slice %492 {offsets = [0, 256], sizes = [2, 128], strides = [1, 1]} : vector<2x384xf32> to vector<2x128xf32>
    %498 = arith.mulf %496, %473 : vector<2x128xf32>
    %499 = arith.mulf %495, %494 : vector<2x128xf32>
    %500 = arith.addf %498, %499 : vector<2x128xf32>
    %501 = math.tanh %500 : vector<2x128xf32>
    %502 = arith.mulf %497, %501 : vector<2x128xf32>
    %c12_247 = arith.constant 12 : index
    %c0_248 = arith.constant 0 : index
    %503 = vector.load %arg1[%c12_247, %c0_248] : memref<16x128xf32, #tpu.memory_space<vmem>>, vector<2x128xf32>
    %cst_249 = arith.constant 5.000000e-01 : f32
    %504 = vector.broadcast %cst_249 : f32 to vector<2x128xf32>
    %505 = arith.cmpf ogt, %503, %504 : vector<2x128xf32>
    %506 = arith.select %505, %500, %473 : vector<2x128xi1>, vector<2x128xf32>
    %507 = arith.select %505, %502, %474 : vector<2x128xi1>, vector<2x128xf32>
    %cst_250 = arith.constant 0.000000e+00 : f32
    %508 = vector.broadcast %cst_250 : f32 to vector<2x128xf32>
    %509 = arith.select %505, %502, %508 : vector<2x128xi1>, vector<2x128xf32>
    %510 = vector.extract_strided_slice %509 {offsets = [0, 0], sizes = [2, 64], strides = [1, 1]} : vector<2x128xf32> to vector<2x64xf32>
    %c12_251 = arith.constant 12 : index
    %c0_252 = arith.constant 0 : index
    %511 = vector.load %arg21[%c12_251, %c0_252] : memref<16x128xf32, #tpu.memory_space<vmem>>, vector<2x64xf32>
    tpu.vector_store %arg21[%c12_251, %c0_252], %510 {strides = array<i32>} : memref<16x128xf32, #tpu.memory_space<vmem>>, vector<2x64xf32>,
    %512 = vector.extract_strided_slice %509 {offsets = [0, 64], sizes = [2, 64], strides = [1, 1]} : vector<2x128xf32> to vector<2x64xf32>
    %c2_253 = arith.constant 2 : index
    %c64_254 = arith.constant 64 : index
    %513 = vector.load %arg21[%c2_253, %c64_254] : memref<16x128xf32, #tpu.memory_space<vmem>>, vector<2x64xf32>
    tpu.vector_store %arg21[%c2_253, %c64_254], %512 {strides = array<i32>} : memref<16x128xf32, #tpu.memory_space<vmem>>, vector<2x64xf32>,
    %c0_255 = arith.constant 0 : index
    %c0_256 = arith.constant 0 : index
    %514 = vector.load %arg7[%c0_255, %c0_256] : memref<128x512xf32, #tpu.memory_space<vmem>>, vector<128x512xf32>
    %cst_257 = arith.constant dense<0.000000e+00> : vector<2x512xf32>
    %515 = tpu.matmul %507, %514, %cst_257 {dimension_numbers = #tpu.dot_dimension_numbers<[1], [0], [0], [1], [0, 0, 1, 1], [], []>} : vector<2x128xf32>, vector<128x512xf32>, vector<2x512xf32> -> vector<2x512xf32>
    %c14_258 = arith.constant 14 : index
    %c0_259 = arith.constant 0 : index
    %516 = vector.load %arg20[%c14_258, %c0_259] : memref<16x512xf32, #tpu.memory_space<vmem>>, vector<2x512xf32>
    %c0_260 = arith.constant 0 : index
    %c0_261 = arith.constant 0 : index
    %517 = vector.load %arg20[%c0_260, %c0_261] : memref<16x512xf32, #tpu.memory_space<vmem>>, vector<2x512xf32>
    %518 = arith.select %2, %516, %517 : vector<2x512xi1>, vector<2x512xf32>
    %519 = arith.addf %518, %515 : vector<2x512xf32>
    %520 = vector.extract_strided_slice %519 {offsets = [0, 0], sizes = [2, 384], strides = [1, 1]} : vector<2x512xf32> to vector<2x384xf32>
    %521 = arith.negf %520 : vector<2x384xf32>
    %522 = math.exp %521 : vector<2x384xf32>
    %cst_262 = arith.constant 1.000000e+00 : f32
    %523 = vector.broadcast %cst_262 : f32 to vector<2x384xf32>
    %524 = arith.addf %523, %522 : vector<2x384xf32>
    %525 = arith.divf %523, %524 : vector<2x384xf32>
    %526 = vector.extract_strided_slice %519 {offsets = [0, 384], sizes = [2, 128], strides = [1, 1]} : vector<2x512xf32> to vector<2x128xf32>
    %527 = math.tanh %526 : vector<2x128xf32>
    %528 = vector.extract_strided_slice %525 {offsets = [0, 0], sizes = [2, 128], strides = [1, 1]} : vector<2x384xf32> to vector<2x128xf32>
    %529 = vector.extract_strided_slice %525 {offsets = [0, 128], sizes = [2, 128], strides = [1, 1]} : vector<2x384xf32> to vector<2x128xf32>
    %530 = vector.extract_strided_slice %525 {offsets = [0, 256], sizes = [2, 128], strides = [1, 1]} : vector<2x384xf32> to vector<2x128xf32>
    %531 = arith.mulf %529, %506 : vector<2x128xf32>
    %532 = arith.mulf %528, %527 : vector<2x128xf32>
    %533 = arith.addf %531, %532 : vector<2x128xf32>
    %534 = math.tanh %533 : vector<2x128xf32>
    %535 = arith.mulf %530, %534 : vector<2x128xf32>
    %c14_263 = arith.constant 14 : index
    %c0_264 = arith.constant 0 : index
    %536 = vector.load %arg1[%c14_263, %c0_264] : memref<16x128xf32, #tpu.memory_space<vmem>>, vector<2x128xf32>
    %cst_265 = arith.constant 5.000000e-01 : f32
    %537 = vector.broadcast %cst_265 : f32 to vector<2x128xf32>
    %538 = arith.cmpf ogt, %536, %537 : vector<2x128xf32>
    %cst_266 = arith.constant 0.000000e+00 : f32
    %539 = vector.broadcast %cst_266 : f32 to vector<2x128xf32>
    %540 = arith.select %538, %535, %539 : vector<2x128xi1>, vector<2x128xf32>
    %541 = vector.extract_strided_slice %540 {offsets = [0, 0], sizes = [2, 64], strides = [1, 1]} : vector<2x128xf32> to vector<2x64xf32>
    %c14_267 = arith.constant 14 : index
    %c0_268 = arith.constant 0 : index
    %542 = vector.load %arg21[%c14_267, %c0_268] : memref<16x128xf32, #tpu.memory_space<vmem>>, vector<2x64xf32>
    tpu.vector_store %arg21[%c14_267, %c0_268], %541 {strides = array<i32>} : memref<16x128xf32, #tpu.memory_space<vmem>>, vector<2x64xf32>,
    %543 = vector.extract_strided_slice %540 {offsets = [0, 64], sizes = [2, 64], strides = [1, 1]} : vector<2x128xf32> to vector<2x64xf32>
    %c0_269 = arith.constant 0 : index
    %c64_270 = arith.constant 64 : index
    %544 = vector.load %arg21[%c0_269, %c64_270] : memref<16x128xf32, #tpu.memory_space<vmem>>, vector<2x64xf32>
    tpu.vector_store %arg21[%c0_269, %c64_270], %543 {strides = array<i32>} : memref<16x128xf32, #tpu.memory_space<vmem>>, vector<2x64xf32>,
    %c0_271 = arith.constant 0 : index
    %c0_272 = arith.constant 0 : index
    %545 = vector.load %arg21[%c0_271, %c0_272] : memref<16x128xf32, #tpu.memory_space<vmem>>, vector<16x128xf32>
    %c0_273 = arith.constant 0 : index
    %c0_274 = arith.constant 0 : index
    %546 = vector.load %arg9[%c0_273, %c0_274] : memref<128x512xf32, #tpu.memory_space<vmem>>, vector<128x512xf32>
    %cst_275 = arith.constant dense<0.000000e+00> : vector<16x512xf32>
    %547 = tpu.matmul %545, %546, %cst_275 {dimension_numbers = #tpu.dot_dimension_numbers<[1], [0], [0], [1], [0, 0, 1, 1], [], []>} : vector<16x128xf32>, vector<128x512xf32>, vector<16x512xf32> -> vector<16x512xf32>
    %c0_276 = arith.constant 0 : index
    %c0_277 = arith.constant 0 : index
    %548 = vector.load %arg11[%c0_276, %c0_277] : memref<1x512xf32, #tpu.memory_space<vmem>>, vector<1x512xf32>
    %549 = vector.broadcast %548 : vector<1x512xf32> to vector<16x512xf32>
    %550 = arith.addf %547, %549 : vector<16x512xf32>
    %c0_278 = arith.constant 0 : index
    %c0_279 = arith.constant 0 : index
    %551 = vector.load %arg20[%c0_278, %c0_279] : memref<16x512xf32, #tpu.memory_space<vmem>>, vector<16x512xf32>
    tpu.vector_store %arg20[%c0_278, %c0_279], %550 {strides = array<i32>} : memref<16x512xf32, #tpu.memory_space<vmem>>, vector<16x512xf32>,
    %cst_280 = arith.constant 0.000000e+00 : f32
    %552 = vector.broadcast %cst_280 : f32 to vector<2x128xf32>
    %cst_281 = arith.constant 0.000000e+00 : f32
    %553 = vector.broadcast %cst_281 : f32 to vector<2x128xf32>
    %c0_282 = arith.constant 0 : index
    %c0_283 = arith.constant 0 : index
    %554 = vector.load %arg10[%c0_282, %c0_283] : memref<128x512xf32, #tpu.memory_space<vmem>>, vector<128x512xf32>
    %cst_284 = arith.constant dense<0.000000e+00> : vector<2x512xf32>
    %555 = tpu.matmul %552, %554, %cst_284 {dimension_numbers = #tpu.dot_dimension_numbers<[1], [0], [0], [1], [0, 0, 1, 1], [], []>} : vector<2x128xf32>, vector<128x512xf32>, vector<2x512xf32> -> vector<2x512xf32>
    %c0_285 = arith.constant 0 : index
    %c0_286 = arith.constant 0 : index
    %556 = vector.load %arg20[%c0_285, %c0_286] : memref<16x512xf32, #tpu.memory_space<vmem>>, vector<2x512xf32>
    %c14_287 = arith.constant 14 : index
    %c0_288 = arith.constant 0 : index
    %557 = vector.load %arg20[%c14_287, %c0_288] : memref<16x512xf32, #tpu.memory_space<vmem>>, vector<2x512xf32>
    %558 = arith.select %2, %556, %557 : vector<2x512xi1>, vector<2x512xf32>
    %559 = arith.addf %558, %555 : vector<2x512xf32>
    %560 = vector.extract_strided_slice %559 {offsets = [0, 0], sizes = [2, 384], strides = [1, 1]} : vector<2x512xf32> to vector<2x384xf32>
    %561 = arith.negf %560 : vector<2x384xf32>
    %562 = math.exp %561 : vector<2x384xf32>
    %cst_289 = arith.constant 1.000000e+00 : f32
    %563 = vector.broadcast %cst_289 : f32 to vector<2x384xf32>
    %564 = arith.addf %563, %562 : vector<2x384xf32>
    %565 = arith.divf %563, %564 : vector<2x384xf32>
    %566 = vector.extract_strided_slice %559 {offsets = [0, 384], sizes = [2, 128], strides = [1, 1]} : vector<2x512xf32> to vector<2x128xf32>
    %567 = math.tanh %566 : vector<2x128xf32>
    %568 = vector.extract_strided_slice %565 {offsets = [0, 0], sizes = [2, 128], strides = [1, 1]} : vector<2x384xf32> to vector<2x128xf32>
    %569 = vector.extract_strided_slice %565 {offsets = [0, 128], sizes = [2, 128], strides = [1, 1]} : vector<2x384xf32> to vector<2x128xf32>
    %570 = vector.extract_strided_slice %565 {offsets = [0, 256], sizes = [2, 128], strides = [1, 1]} : vector<2x384xf32> to vector<2x128xf32>
    %571 = arith.mulf %569, %553 : vector<2x128xf32>
    %572 = arith.mulf %568, %567 : vector<2x128xf32>
    %573 = arith.addf %571, %572 : vector<2x128xf32>
    %574 = math.tanh %573 : vector<2x128xf32>
    %575 = arith.mulf %570, %574 : vector<2x128xf32>
    %c0_290 = arith.constant 0 : index
    %c0_291 = arith.constant 0 : index
    %576 = vector.load %arg1[%c0_290, %c0_291] : memref<16x128xf32, #tpu.memory_space<vmem>>, vector<2x128xf32>
    %cst_292 = arith.constant 5.000000e-01 : f32
    %577 = vector.broadcast %cst_292 : f32 to vector<2x128xf32>
    %578 = arith.cmpf ogt, %576, %577 : vector<2x128xf32>
    %579 = arith.select %578, %573, %553 : vector<2x128xi1>, vector<2x128xf32>
    %580 = arith.select %578, %575, %552 : vector<2x128xi1>, vector<2x128xf32>
    %cst_293 = arith.constant 0.000000e+00 : f32
    %581 = vector.broadcast %cst_293 : f32 to vector<2x128xf32>
    %582 = arith.select %578, %575, %581 : vector<2x128xi1>, vector<2x128xf32>
    %583 = vector.extract_strided_slice %582 {offsets = [0, 0], sizes = [2, 64], strides = [1, 1]} : vector<2x128xf32> to vector<2x64xf32>
    %c0_294 = arith.constant 0 : index
    %c0_295 = arith.constant 0 : index
    %584 = vector.load %arg21[%c0_294, %c0_295] : memref<16x128xf32, #tpu.memory_space<vmem>>, vector<2x64xf32>
    tpu.vector_store %arg21[%c0_294, %c0_295], %583 {strides = array<i32>} : memref<16x128xf32, #tpu.memory_space<vmem>>, vector<2x64xf32>,
    %585 = vector.extract_strided_slice %582 {offsets = [0, 64], sizes = [2, 64], strides = [1, 1]} : vector<2x128xf32> to vector<2x64xf32>
    %c14_296 = arith.constant 14 : index
    %c64_297 = arith.constant 64 : index
    %586 = vector.load %arg21[%c14_296, %c64_297] : memref<16x128xf32, #tpu.memory_space<vmem>>, vector<2x64xf32>
    tpu.vector_store %arg21[%c14_296, %c64_297], %585 {strides = array<i32>} : memref<16x128xf32, #tpu.memory_space<vmem>>, vector<2x64xf32>,
    %c0_298 = arith.constant 0 : index
    %c0_299 = arith.constant 0 : index
    %587 = vector.load %arg10[%c0_298, %c0_299] : memref<128x512xf32, #tpu.memory_space<vmem>>, vector<128x512xf32>
    %cst_300 = arith.constant dense<0.000000e+00> : vector<2x512xf32>
    %588 = tpu.matmul %580, %587, %cst_300 {dimension_numbers = #tpu.dot_dimension_numbers<[1], [0], [0], [1], [0, 0, 1, 1], [], []>} : vector<2x128xf32>, vector<128x512xf32>, vector<2x512xf32> -> vector<2x512xf32>
    %c2_301 = arith.constant 2 : index
    %c0_302 = arith.constant 0 : index
    %589 = vector.load %arg20[%c2_301, %c0_302] : memref<16x512xf32, #tpu.memory_space<vmem>>, vector<2x512xf32>
    %c12_303 = arith.constant 12 : index
    %c0_304 = arith.constant 0 : index
    %590 = vector.load %arg20[%c12_303, %c0_304] : memref<16x512xf32, #tpu.memory_space<vmem>>, vector<2x512xf32>
    %591 = arith.select %2, %589, %590 : vector<2x512xi1>, vector<2x512xf32>
    %592 = arith.addf %591, %588 : vector<2x512xf32>
    %593 = vector.extract_strided_slice %592 {offsets = [0, 0], sizes = [2, 384], strides = [1, 1]} : vector<2x512xf32> to vector<2x384xf32>
    %594 = arith.negf %593 : vector<2x384xf32>
    %595 = math.exp %594 : vector<2x384xf32>
    %cst_305 = arith.constant 1.000000e+00 : f32
    %596 = vector.broadcast %cst_305 : f32 to vector<2x384xf32>
    %597 = arith.addf %596, %595 : vector<2x384xf32>
    %598 = arith.divf %596, %597 : vector<2x384xf32>
    %599 = vector.extract_strided_slice %592 {offsets = [0, 384], sizes = [2, 128], strides = [1, 1]} : vector<2x512xf32> to vector<2x128xf32>
    %600 = math.tanh %599 : vector<2x128xf32>
    %601 = vector.extract_strided_slice %598 {offsets = [0, 0], sizes = [2, 128], strides = [1, 1]} : vector<2x384xf32> to vector<2x128xf32>
    %602 = vector.extract_strided_slice %598 {offsets = [0, 128], sizes = [2, 128], strides = [1, 1]} : vector<2x384xf32> to vector<2x128xf32>
    %603 = vector.extract_strided_slice %598 {offsets = [0, 256], sizes = [2, 128], strides = [1, 1]} : vector<2x384xf32> to vector<2x128xf32>
    %604 = arith.mulf %602, %579 : vector<2x128xf32>
    %605 = arith.mulf %601, %600 : vector<2x128xf32>
    %606 = arith.addf %604, %605 : vector<2x128xf32>
    %607 = math.tanh %606 : vector<2x128xf32>
    %608 = arith.mulf %603, %607 : vector<2x128xf32>
    %c2_306 = arith.constant 2 : index
    %c0_307 = arith.constant 0 : index
    %609 = vector.load %arg1[%c2_306, %c0_307] : memref<16x128xf32, #tpu.memory_space<vmem>>, vector<2x128xf32>
    %cst_308 = arith.constant 5.000000e-01 : f32
    %610 = vector.broadcast %cst_308 : f32 to vector<2x128xf32>
    %611 = arith.cmpf ogt, %609, %610 : vector<2x128xf32>
    %612 = arith.select %611, %606, %579 : vector<2x128xi1>, vector<2x128xf32>
    %613 = arith.select %611, %608, %580 : vector<2x128xi1>, vector<2x128xf32>
    %cst_309 = arith.constant 0.000000e+00 : f32
    %614 = vector.broadcast %cst_309 : f32 to vector<2x128xf32>
    %615 = arith.select %611, %608, %614 : vector<2x128xi1>, vector<2x128xf32>
    %616 = vector.extract_strided_slice %615 {offsets = [0, 0], sizes = [2, 64], strides = [1, 1]} : vector<2x128xf32> to vector<2x64xf32>
    %c2_310 = arith.constant 2 : index
    %c0_311 = arith.constant 0 : index
    %617 = vector.load %arg21[%c2_310, %c0_311] : memref<16x128xf32, #tpu.memory_space<vmem>>, vector<2x64xf32>
    tpu.vector_store %arg21[%c2_310, %c0_311], %616 {strides = array<i32>} : memref<16x128xf32, #tpu.memory_space<vmem>>, vector<2x64xf32>,
    %618 = vector.extract_strided_slice %615 {offsets = [0, 64], sizes = [2, 64], strides = [1, 1]} : vector<2x128xf32> to vector<2x64xf32>
    %c12_312 = arith.constant 12 : index
    %c64_313 = arith.constant 64 : index
    %619 = vector.load %arg21[%c12_312, %c64_313] : memref<16x128xf32, #tpu.memory_space<vmem>>, vector<2x64xf32>
    tpu.vector_store %arg21[%c12_312, %c64_313], %618 {strides = array<i32>} : memref<16x128xf32, #tpu.memory_space<vmem>>, vector<2x64xf32>,
    %c0_314 = arith.constant 0 : index
    %c0_315 = arith.constant 0 : index
    %620 = vector.load %arg10[%c0_314, %c0_315] : memref<128x512xf32, #tpu.memory_space<vmem>>, vector<128x512xf32>
    %cst_316 = arith.constant dense<0.000000e+00> : vector<2x512xf32>
    %621 = tpu.matmul %613, %620, %cst_316 {dimension_numbers = #tpu.dot_dimension_numbers<[1], [0], [0], [1], [0, 0, 1, 1], [], []>} : vector<2x128xf32>, vector<128x512xf32>, vector<2x512xf32> -> vector<2x512xf32>
    %c4_317 = arith.constant 4 : index
    %c0_318 = arith.constant 0 : index
    %622 = vector.load %arg20[%c4_317, %c0_318] : memref<16x512xf32, #tpu.memory_space<vmem>>, vector<2x512xf32>
    %c10_319 = arith.constant 10 : index
    %c0_320 = arith.constant 0 : index
    %623 = vector.load %arg20[%c10_319, %c0_320] : memref<16x512xf32, #tpu.memory_space<vmem>>, vector<2x512xf32>
    %624 = arith.select %2, %622, %623 : vector<2x512xi1>, vector<2x512xf32>
    %625 = arith.addf %624, %621 : vector<2x512xf32>
    %626 = vector.extract_strided_slice %625 {offsets = [0, 0], sizes = [2, 384], strides = [1, 1]} : vector<2x512xf32> to vector<2x384xf32>
    %627 = arith.negf %626 : vector<2x384xf32>
    %628 = math.exp %627 : vector<2x384xf32>
    %cst_321 = arith.constant 1.000000e+00 : f32
    %629 = vector.broadcast %cst_321 : f32 to vector<2x384xf32>
    %630 = arith.addf %629, %628 : vector<2x384xf32>
    %631 = arith.divf %629, %630 : vector<2x384xf32>
    %632 = vector.extract_strided_slice %625 {offsets = [0, 384], sizes = [2, 128], strides = [1, 1]} : vector<2x512xf32> to vector<2x128xf32>
    %633 = math.tanh %632 : vector<2x128xf32>
    %634 = vector.extract_strided_slice %631 {offsets = [0, 0], sizes = [2, 128], strides = [1, 1]} : vector<2x384xf32> to vector<2x128xf32>
    %635 = vector.extract_strided_slice %631 {offsets = [0, 128], sizes = [2, 128], strides = [1, 1]} : vector<2x384xf32> to vector<2x128xf32>
    %636 = vector.extract_strided_slice %631 {offsets = [0, 256], sizes = [2, 128], strides = [1, 1]} : vector<2x384xf32> to vector<2x128xf32>
    %637 = arith.mulf %635, %612 : vector<2x128xf32>
    %638 = arith.mulf %634, %633 : vector<2x128xf32>
    %639 = arith.addf %637, %638 : vector<2x128xf32>
    %640 = math.tanh %639 : vector<2x128xf32>
    %641 = arith.mulf %636, %640 : vector<2x128xf32>
    %c4_322 = arith.constant 4 : index
    %c0_323 = arith.constant 0 : index
    %642 = vector.load %arg1[%c4_322, %c0_323] : memref<16x128xf32, #tpu.memory_space<vmem>>, vector<2x128xf32>
    %cst_324 = arith.constant 5.000000e-01 : f32
    %643 = vector.broadcast %cst_324 : f32 to vector<2x128xf32>
    %644 = arith.cmpf ogt, %642, %643 : vector<2x128xf32>
    %645 = arith.select %644, %639, %612 : vector<2x128xi1>, vector<2x128xf32>
    %646 = arith.select %644, %641, %613 : vector<2x128xi1>, vector<2x128xf32>
    %cst_325 = arith.constant 0.000000e+00 : f32
    %647 = vector.broadcast %cst_325 : f32 to vector<2x128xf32>
    %648 = arith.select %644, %641, %647 : vector<2x128xi1>, vector<2x128xf32>
    %649 = vector.extract_strided_slice %648 {offsets = [0, 0], sizes = [2, 64], strides = [1, 1]} : vector<2x128xf32> to vector<2x64xf32>
    %c4_326 = arith.constant 4 : index
    %c0_327 = arith.constant 0 : index
    %650 = vector.load %arg21[%c4_326, %c0_327] : memref<16x128xf32, #tpu.memory_space<vmem>>, vector<2x64xf32>
    tpu.vector_store %arg21[%c4_326, %c0_327], %649 {strides = array<i32>} : memref<16x128xf32, #tpu.memory_space<vmem>>, vector<2x64xf32>,
    %651 = vector.extract_strided_slice %648 {offsets = [0, 64], sizes = [2, 64], strides = [1, 1]} : vector<2x128xf32> to vector<2x64xf32>
    %c10_328 = arith.constant 10 : index
    %c64_329 = arith.constant 64 : index
    %652 = vector.load %arg21[%c10_328, %c64_329] : memref<16x128xf32, #tpu.memory_space<vmem>>, vector<2x64xf32>
    tpu.vector_store %arg21[%c10_328, %c64_329], %651 {strides = array<i32>} : memref<16x128xf32, #tpu.memory_space<vmem>>, vector<2x64xf32>,
    %c0_330 = arith.constant 0 : index
    %c0_331 = arith.constant 0 : index
    %653 = vector.load %arg10[%c0_330, %c0_331] : memref<128x512xf32, #tpu.memory_space<vmem>>, vector<128x512xf32>
    %cst_332 = arith.constant dense<0.000000e+00> : vector<2x512xf32>
    %654 = tpu.matmul %646, %653, %cst_332 {dimension_numbers = #tpu.dot_dimension_numbers<[1], [0], [0], [1], [0, 0, 1, 1], [], []>} : vector<2x128xf32>, vector<128x512xf32>, vector<2x512xf32> -> vector<2x512xf32>
    %c6_333 = arith.constant 6 : index
    %c0_334 = arith.constant 0 : index
    %655 = vector.load %arg20[%c6_333, %c0_334] : memref<16x512xf32, #tpu.memory_space<vmem>>, vector<2x512xf32>
    %c8_335 = arith.constant 8 : index
    %c0_336 = arith.constant 0 : index
    %656 = vector.load %arg20[%c8_335, %c0_336] : memref<16x512xf32, #tpu.memory_space<vmem>>, vector<2x512xf32>
    %657 = arith.select %2, %655, %656 : vector<2x512xi1>, vector<2x512xf32>
    %658 = arith.addf %657, %654 : vector<2x512xf32>
    %659 = vector.extract_strided_slice %658 {offsets = [0, 0], sizes = [2, 384], strides = [1, 1]} : vector<2x512xf32> to vector<2x384xf32>
    %660 = arith.negf %659 : vector<2x384xf32>
    %661 = math.exp %660 : vector<2x384xf32>
    %cst_337 = arith.constant 1.000000e+00 : f32
    %662 = vector.broadcast %cst_337 : f32 to vector<2x384xf32>
    %663 = arith.addf %662, %661 : vector<2x384xf32>
    %664 = arith.divf %662, %663 : vector<2x384xf32>
    %665 = vector.extract_strided_slice %658 {offsets = [0, 384], sizes = [2, 128], strides = [1, 1]} : vector<2x512xf32> to vector<2x128xf32>
    %666 = math.tanh %665 : vector<2x128xf32>
    %667 = vector.extract_strided_slice %664 {offsets = [0, 0], sizes = [2, 128], strides = [1, 1]} : vector<2x384xf32> to vector<2x128xf32>
    %668 = vector.extract_strided_slice %664 {offsets = [0, 128], sizes = [2, 128], strides = [1, 1]} : vector<2x384xf32> to vector<2x128xf32>
    %669 = vector.extract_strided_slice %664 {offsets = [0, 256], sizes = [2, 128], strides = [1, 1]} : vector<2x384xf32> to vector<2x128xf32>
    %670 = arith.mulf %668, %645 : vector<2x128xf32>
    %671 = arith.mulf %667, %666 : vector<2x128xf32>
    %672 = arith.addf %670, %671 : vector<2x128xf32>
    %673 = math.tanh %672 : vector<2x128xf32>
    %674 = arith.mulf %669, %673 : vector<2x128xf32>
    %c6_338 = arith.constant 6 : index
    %c0_339 = arith.constant 0 : index
    %675 = vector.load %arg1[%c6_338, %c0_339] : memref<16x128xf32, #tpu.memory_space<vmem>>, vector<2x128xf32>
    %cst_340 = arith.constant 5.000000e-01 : f32
    %676 = vector.broadcast %cst_340 : f32 to vector<2x128xf32>
    %677 = arith.cmpf ogt, %675, %676 : vector<2x128xf32>
    %678 = arith.select %677, %672, %645 : vector<2x128xi1>, vector<2x128xf32>
    %679 = arith.select %677, %674, %646 : vector<2x128xi1>, vector<2x128xf32>
    %cst_341 = arith.constant 0.000000e+00 : f32
    %680 = vector.broadcast %cst_341 : f32 to vector<2x128xf32>
    %681 = arith.select %677, %674, %680 : vector<2x128xi1>, vector<2x128xf32>
    %682 = vector.extract_strided_slice %681 {offsets = [0, 0], sizes = [2, 64], strides = [1, 1]} : vector<2x128xf32> to vector<2x64xf32>
    %c6_342 = arith.constant 6 : index
    %c0_343 = arith.constant 0 : index
    %683 = vector.load %arg21[%c6_342, %c0_343] : memref<16x128xf32, #tpu.memory_space<vmem>>, vector<2x64xf32>
    tpu.vector_store %arg21[%c6_342, %c0_343], %682 {strides = array<i32>} : memref<16x128xf32, #tpu.memory_space<vmem>>, vector<2x64xf32>,
    %684 = vector.extract_strided_slice %681 {offsets = [0, 64], sizes = [2, 64], strides = [1, 1]} : vector<2x128xf32> to vector<2x64xf32>
    %c8_344 = arith.constant 8 : index
    %c64_345 = arith.constant 64 : index
    %685 = vector.load %arg21[%c8_344, %c64_345] : memref<16x128xf32, #tpu.memory_space<vmem>>, vector<2x64xf32>
    tpu.vector_store %arg21[%c8_344, %c64_345], %684 {strides = array<i32>} : memref<16x128xf32, #tpu.memory_space<vmem>>, vector<2x64xf32>,
    %c0_346 = arith.constant 0 : index
    %c0_347 = arith.constant 0 : index
    %686 = vector.load %arg10[%c0_346, %c0_347] : memref<128x512xf32, #tpu.memory_space<vmem>>, vector<128x512xf32>
    %cst_348 = arith.constant dense<0.000000e+00> : vector<2x512xf32>
    %687 = tpu.matmul %679, %686, %cst_348 {dimension_numbers = #tpu.dot_dimension_numbers<[1], [0], [0], [1], [0, 0, 1, 1], [], []>} : vector<2x128xf32>, vector<128x512xf32>, vector<2x512xf32> -> vector<2x512xf32>
    %c8_349 = arith.constant 8 : index
    %c0_350 = arith.constant 0 : index
    %688 = vector.load %arg20[%c8_349, %c0_350] : memref<16x512xf32, #tpu.memory_space<vmem>>, vector<2x512xf32>
    %c6_351 = arith.constant 6 : index
    %c0_352 = arith.constant 0 : index
    %689 = vector.load %arg20[%c6_351, %c0_352] : memref<16x512xf32, #tpu.memory_space<vmem>>, vector<2x512xf32>
    %690 = arith.select %2, %688, %689 : vector<2x512xi1>, vector<2x512xf32>
    %691 = arith.addf %690, %687 : vector<2x512xf32>
    %692 = vector.extract_strided_slice %691 {offsets = [0, 0], sizes = [2, 384], strides = [1, 1]} : vector<2x512xf32> to vector<2x384xf32>
    %693 = arith.negf %692 : vector<2x384xf32>
    %694 = math.exp %693 : vector<2x384xf32>
    %cst_353 = arith.constant 1.000000e+00 : f32
    %695 = vector.broadcast %cst_353 : f32 to vector<2x384xf32>
    %696 = arith.addf %695, %694 : vector<2x384xf32>
    %697 = arith.divf %695, %696 : vector<2x384xf32>
    %698 = vector.extract_strided_slice %691 {offsets = [0, 384], sizes = [2, 128], strides = [1, 1]} : vector<2x512xf32> to vector<2x128xf32>
    %699 = math.tanh %698 : vector<2x128xf32>
    %700 = vector.extract_strided_slice %697 {offsets = [0, 0], sizes = [2, 128], strides = [1, 1]} : vector<2x384xf32> to vector<2x128xf32>
    %701 = vector.extract_strided_slice %697 {offsets = [0, 128], sizes = [2, 128], strides = [1, 1]} : vector<2x384xf32> to vector<2x128xf32>
    %702 = vector.extract_strided_slice %697 {offsets = [0, 256], sizes = [2, 128], strides = [1, 1]} : vector<2x384xf32> to vector<2x128xf32>
    %703 = arith.mulf %701, %678 : vector<2x128xf32>
    %704 = arith.mulf %700, %699 : vector<2x128xf32>
    %705 = arith.addf %703, %704 : vector<2x128xf32>
    %706 = math.tanh %705 : vector<2x128xf32>
    %707 = arith.mulf %702, %706 : vector<2x128xf32>
    %c8_354 = arith.constant 8 : index
    %c0_355 = arith.constant 0 : index
    %708 = vector.load %arg1[%c8_354, %c0_355] : memref<16x128xf32, #tpu.memory_space<vmem>>, vector<2x128xf32>
    %cst_356 = arith.constant 5.000000e-01 : f32
    %709 = vector.broadcast %cst_356 : f32 to vector<2x128xf32>
    %710 = arith.cmpf ogt, %708, %709 : vector<2x128xf32>
    %711 = arith.select %710, %705, %678 : vector<2x128xi1>, vector<2x128xf32>
    %712 = arith.select %710, %707, %679 : vector<2x128xi1>, vector<2x128xf32>
    %cst_357 = arith.constant 0.000000e+00 : f32
    %713 = vector.broadcast %cst_357 : f32 to vector<2x128xf32>
    %714 = arith.select %710, %707, %713 : vector<2x128xi1>, vector<2x128xf32>
    %715 = vector.extract_strided_slice %714 {offsets = [0, 0], sizes = [2, 64], strides = [1, 1]} : vector<2x128xf32> to vector<2x64xf32>
    %c8_358 = arith.constant 8 : index
    %c0_359 = arith.constant 0 : index
    %716 = vector.load %arg21[%c8_358, %c0_359] : memref<16x128xf32, #tpu.memory_space<vmem>>, vector<2x64xf32>
    tpu.vector_store %arg21[%c8_358, %c0_359], %715 {strides = array<i32>} : memref<16x128xf32, #tpu.memory_space<vmem>>, vector<2x64xf32>,
    %717 = vector.extract_strided_slice %714 {offsets = [0, 64], sizes = [2, 64], strides = [1, 1]} : vector<2x128xf32> to vector<2x64xf32>
    %c6_360 = arith.constant 6 : index
    %c64_361 = arith.constant 64 : index
    %718 = vector.load %arg21[%c6_360, %c64_361] : memref<16x128xf32, #tpu.memory_space<vmem>>, vector<2x64xf32>
    tpu.vector_store %arg21[%c6_360, %c64_361], %717 {strides = array<i32>} : memref<16x128xf32, #tpu.memory_space<vmem>>, vector<2x64xf32>,
    %c0_362 = arith.constant 0 : index
    %c0_363 = arith.constant 0 : index
    %719 = vector.load %arg10[%c0_362, %c0_363] : memref<128x512xf32, #tpu.memory_space<vmem>>, vector<128x512xf32>
    %cst_364 = arith.constant dense<0.000000e+00> : vector<2x512xf32>
    %720 = tpu.matmul %712, %719, %cst_364 {dimension_numbers = #tpu.dot_dimension_numbers<[1], [0], [0], [1], [0, 0, 1, 1], [], []>} : vector<2x128xf32>, vector<128x512xf32>, vector<2x512xf32> -> vector<2x512xf32>
    %c10_365 = arith.constant 10 : index
    %c0_366 = arith.constant 0 : index
    %721 = vector.load %arg20[%c10_365, %c0_366] : memref<16x512xf32, #tpu.memory_space<vmem>>, vector<2x512xf32>
    %c4_367 = arith.constant 4 : index
    %c0_368 = arith.constant 0 : index
    %722 = vector.load %arg20[%c4_367, %c0_368] : memref<16x512xf32, #tpu.memory_space<vmem>>, vector<2x512xf32>
    %723 = arith.select %2, %721, %722 : vector<2x512xi1>, vector<2x512xf32>
    %724 = arith.addf %723, %720 : vector<2x512xf32>
    %725 = vector.extract_strided_slice %724 {offsets = [0, 0], sizes = [2, 384], strides = [1, 1]} : vector<2x512xf32> to vector<2x384xf32>
    %726 = arith.negf %725 : vector<2x384xf32>
    %727 = math.exp %726 : vector<2x384xf32>
    %cst_369 = arith.constant 1.000000e+00 : f32
    %728 = vector.broadcast %cst_369 : f32 to vector<2x384xf32>
    %729 = arith.addf %728, %727 : vector<2x384xf32>
    %730 = arith.divf %728, %729 : vector<2x384xf32>
    %731 = vector.extract_strided_slice %724 {offsets = [0, 384], sizes = [2, 128], strides = [1, 1]} : vector<2x512xf32> to vector<2x128xf32>
    %732 = math.tanh %731 : vector<2x128xf32>
    %733 = vector.extract_strided_slice %730 {offsets = [0, 0], sizes = [2, 128], strides = [1, 1]} : vector<2x384xf32> to vector<2x128xf32>
    %734 = vector.extract_strided_slice %730 {offsets = [0, 128], sizes = [2, 128], strides = [1, 1]} : vector<2x384xf32> to vector<2x128xf32>
    %735 = vector.extract_strided_slice %730 {offsets = [0, 256], sizes = [2, 128], strides = [1, 1]} : vector<2x384xf32> to vector<2x128xf32>
    %736 = arith.mulf %734, %711 : vector<2x128xf32>
    %737 = arith.mulf %733, %732 : vector<2x128xf32>
    %738 = arith.addf %736, %737 : vector<2x128xf32>
    %739 = math.tanh %738 : vector<2x128xf32>
    %740 = arith.mulf %735, %739 : vector<2x128xf32>
    %c10_370 = arith.constant 10 : index
    %c0_371 = arith.constant 0 : index
    %741 = vector.load %arg1[%c10_370, %c0_371] : memref<16x128xf32, #tpu.memory_space<vmem>>, vector<2x128xf32>
    %cst_372 = arith.constant 5.000000e-01 : f32
    %742 = vector.broadcast %cst_372 : f32 to vector<2x128xf32>
    %743 = arith.cmpf ogt, %741, %742 : vector<2x128xf32>
    %744 = arith.select %743, %738, %711 : vector<2x128xi1>, vector<2x128xf32>
    %745 = arith.select %743, %740, %712 : vector<2x128xi1>, vector<2x128xf32>
    %cst_373 = arith.constant 0.000000e+00 : f32
    %746 = vector.broadcast %cst_373 : f32 to vector<2x128xf32>
    %747 = arith.select %743, %740, %746 : vector<2x128xi1>, vector<2x128xf32>
    %748 = vector.extract_strided_slice %747 {offsets = [0, 0], sizes = [2, 64], strides = [1, 1]} : vector<2x128xf32> to vector<2x64xf32>
    %c10_374 = arith.constant 10 : index
    %c0_375 = arith.constant 0 : index
    %749 = vector.load %arg21[%c10_374, %c0_375] : memref<16x128xf32, #tpu.memory_space<vmem>>, vector<2x64xf32>
    tpu.vector_store %arg21[%c10_374, %c0_375], %748 {strides = array<i32>} : memref<16x128xf32, #tpu.memory_space<vmem>>, vector<2x64xf32>,
    %750 = vector.extract_strided_slice %747 {offsets = [0, 64], sizes = [2, 64], strides = [1, 1]} : vector<2x128xf32> to vector<2x64xf32>
    %c4_376 = arith.constant 4 : index
    %c64_377 = arith.constant 64 : index
    %751 = vector.load %arg21[%c4_376, %c64_377] : memref<16x128xf32, #tpu.memory_space<vmem>>, vector<2x64xf32>
    tpu.vector_store %arg21[%c4_376, %c64_377], %750 {strides = array<i32>} : memref<16x128xf32, #tpu.memory_space<vmem>>, vector<2x64xf32>,
    %c0_378 = arith.constant 0 : index
    %c0_379 = arith.constant 0 : index
    %752 = vector.load %arg10[%c0_378, %c0_379] : memref<128x512xf32, #tpu.memory_space<vmem>>, vector<128x512xf32>
    %cst_380 = arith.constant dense<0.000000e+00> : vector<2x512xf32>
    %753 = tpu.matmul %745, %752, %cst_380 {dimension_numbers = #tpu.dot_dimension_numbers<[1], [0], [0], [1], [0, 0, 1, 1], [], []>} : vector<2x128xf32>, vector<128x512xf32>, vector<2x512xf32> -> vector<2x512xf32>
    %c12_381 = arith.constant 12 : index
    %c0_382 = arith.constant 0 : index
    %754 = vector.load %arg20[%c12_381, %c0_382] : memref<16x512xf32, #tpu.memory_space<vmem>>, vector<2x512xf32>
    %c2_383 = arith.constant 2 : index
    %c0_384 = arith.constant 0 : index
    %755 = vector.load %arg20[%c2_383, %c0_384] : memref<16x512xf32, #tpu.memory_space<vmem>>, vector<2x512xf32>
    %756 = arith.select %2, %754, %755 : vector<2x512xi1>, vector<2x512xf32>
    %757 = arith.addf %756, %753 : vector<2x512xf32>
    %758 = vector.extract_strided_slice %757 {offsets = [0, 0], sizes = [2, 384], strides = [1, 1]} : vector<2x512xf32> to vector<2x384xf32>
    %759 = arith.negf %758 : vector<2x384xf32>
    %760 = math.exp %759 : vector<2x384xf32>
    %cst_385 = arith.constant 1.000000e+00 : f32
    %761 = vector.broadcast %cst_385 : f32 to vector<2x384xf32>
    %762 = arith.addf %761, %760 : vector<2x384xf32>
    %763 = arith.divf %761, %762 : vector<2x384xf32>
    %764 = vector.extract_strided_slice %757 {offsets = [0, 384], sizes = [2, 128], strides = [1, 1]} : vector<2x512xf32> to vector<2x128xf32>
    %765 = math.tanh %764 : vector<2x128xf32>
    %766 = vector.extract_strided_slice %763 {offsets = [0, 0], sizes = [2, 128], strides = [1, 1]} : vector<2x384xf32> to vector<2x128xf32>
    %767 = vector.extract_strided_slice %763 {offsets = [0, 128], sizes = [2, 128], strides = [1, 1]} : vector<2x384xf32> to vector<2x128xf32>
    %768 = vector.extract_strided_slice %763 {offsets = [0, 256], sizes = [2, 128], strides = [1, 1]} : vector<2x384xf32> to vector<2x128xf32>
    %769 = arith.mulf %767, %744 : vector<2x128xf32>
    %770 = arith.mulf %766, %765 : vector<2x128xf32>
    %771 = arith.addf %769, %770 : vector<2x128xf32>
    %772 = math.tanh %771 : vector<2x128xf32>
    %773 = arith.mulf %768, %772 : vector<2x128xf32>
    %c12_386 = arith.constant 12 : index
    %c0_387 = arith.constant 0 : index
    %774 = vector.load %arg1[%c12_386, %c0_387] : memref<16x128xf32, #tpu.memory_space<vmem>>, vector<2x128xf32>
    %cst_388 = arith.constant 5.000000e-01 : f32
    %775 = vector.broadcast %cst_388 : f32 to vector<2x128xf32>
    %776 = arith.cmpf ogt, %774, %775 : vector<2x128xf32>
    %777 = arith.select %776, %771, %744 : vector<2x128xi1>, vector<2x128xf32>
    %778 = arith.select %776, %773, %745 : vector<2x128xi1>, vector<2x128xf32>
    %cst_389 = arith.constant 0.000000e+00 : f32
    %779 = vector.broadcast %cst_389 : f32 to vector<2x128xf32>
    %780 = arith.select %776, %773, %779 : vector<2x128xi1>, vector<2x128xf32>
    %781 = vector.extract_strided_slice %780 {offsets = [0, 0], sizes = [2, 64], strides = [1, 1]} : vector<2x128xf32> to vector<2x64xf32>
    %c12_390 = arith.constant 12 : index
    %c0_391 = arith.constant 0 : index
    %782 = vector.load %arg21[%c12_390, %c0_391] : memref<16x128xf32, #tpu.memory_space<vmem>>, vector<2x64xf32>
    tpu.vector_store %arg21[%c12_390, %c0_391], %781 {strides = array<i32>} : memref<16x128xf32, #tpu.memory_space<vmem>>, vector<2x64xf32>,
    %783 = vector.extract_strided_slice %780 {offsets = [0, 64], sizes = [2, 64], strides = [1, 1]} : vector<2x128xf32> to vector<2x64xf32>
    %c2_392 = arith.constant 2 : index
    %c64_393 = arith.constant 64 : index
    %784 = vector.load %arg21[%c2_392, %c64_393] : memref<16x128xf32, #tpu.memory_space<vmem>>, vector<2x64xf32>
    tpu.vector_store %arg21[%c2_392, %c64_393], %783 {strides = array<i32>} : memref<16x128xf32, #tpu.memory_space<vmem>>, vector<2x64xf32>,
    %c0_394 = arith.constant 0 : index
    %c0_395 = arith.constant 0 : index
    %785 = vector.load %arg10[%c0_394, %c0_395] : memref<128x512xf32, #tpu.memory_space<vmem>>, vector<128x512xf32>
    %cst_396 = arith.constant dense<0.000000e+00> : vector<2x512xf32>
    %786 = tpu.matmul %778, %785, %cst_396 {dimension_numbers = #tpu.dot_dimension_numbers<[1], [0], [0], [1], [0, 0, 1, 1], [], []>} : vector<2x128xf32>, vector<128x512xf32>, vector<2x512xf32> -> vector<2x512xf32>
    %c14_397 = arith.constant 14 : index
    %c0_398 = arith.constant 0 : index
    %787 = vector.load %arg20[%c14_397, %c0_398] : memref<16x512xf32, #tpu.memory_space<vmem>>, vector<2x512xf32>
    %c0_399 = arith.constant 0 : index
    %c0_400 = arith.constant 0 : index
    %788 = vector.load %arg20[%c0_399, %c0_400] : memref<16x512xf32, #tpu.memory_space<vmem>>, vector<2x512xf32>
    %789 = arith.select %2, %787, %788 : vector<2x512xi1>, vector<2x512xf32>
    %790 = arith.addf %789, %786 : vector<2x512xf32>
    %791 = vector.extract_strided_slice %790 {offsets = [0, 0], sizes = [2, 384], strides = [1, 1]} : vector<2x512xf32> to vector<2x384xf32>
    %792 = arith.negf %791 : vector<2x384xf32>
    %793 = math.exp %792 : vector<2x384xf32>
    %cst_401 = arith.constant 1.000000e+00 : f32
    %794 = vector.broadcast %cst_401 : f32 to vector<2x384xf32>
    %795 = arith.addf %794, %793 : vector<2x384xf32>
    %796 = arith.divf %794, %795 : vector<2x384xf32>
    %797 = vector.extract_strided_slice %790 {offsets = [0, 384], sizes = [2, 128], strides = [1, 1]} : vector<2x512xf32> to vector<2x128xf32>
    %798 = math.tanh %797 : vector<2x128xf32>
    %799 = vector.extract_strided_slice %796 {offsets = [0, 0], sizes = [2, 128], strides = [1, 1]} : vector<2x384xf32> to vector<2x128xf32>
    %800 = vector.extract_strided_slice %796 {offsets = [0, 128], sizes = [2, 128], strides = [1, 1]} : vector<2x384xf32> to vector<2x128xf32>
    %801 = vector.extract_strided_slice %796 {offsets = [0, 256], sizes = [2, 128], strides = [1, 1]} : vector<2x384xf32> to vector<2x128xf32>
    %802 = arith.mulf %800, %777 : vector<2x128xf32>
    %803 = arith.mulf %799, %798 : vector<2x128xf32>
    %804 = arith.addf %802, %803 : vector<2x128xf32>
    %805 = math.tanh %804 : vector<2x128xf32>
    %806 = arith.mulf %801, %805 : vector<2x128xf32>
    %c14_402 = arith.constant 14 : index
    %c0_403 = arith.constant 0 : index
    %807 = vector.load %arg1[%c14_402, %c0_403] : memref<16x128xf32, #tpu.memory_space<vmem>>, vector<2x128xf32>
    %cst_404 = arith.constant 5.000000e-01 : f32
    %808 = vector.broadcast %cst_404 : f32 to vector<2x128xf32>
    %809 = arith.cmpf ogt, %807, %808 : vector<2x128xf32>
    %cst_405 = arith.constant 0.000000e+00 : f32
    %810 = vector.broadcast %cst_405 : f32 to vector<2x128xf32>
    %811 = arith.select %809, %806, %810 : vector<2x128xi1>, vector<2x128xf32>
    %812 = vector.extract_strided_slice %811 {offsets = [0, 0], sizes = [2, 64], strides = [1, 1]} : vector<2x128xf32> to vector<2x64xf32>
    %c14_406 = arith.constant 14 : index
    %c0_407 = arith.constant 0 : index
    %813 = vector.load %arg21[%c14_406, %c0_407] : memref<16x128xf32, #tpu.memory_space<vmem>>, vector<2x64xf32>
    tpu.vector_store %arg21[%c14_406, %c0_407], %812 {strides = array<i32>} : memref<16x128xf32, #tpu.memory_space<vmem>>, vector<2x64xf32>,
    %814 = vector.extract_strided_slice %811 {offsets = [0, 64], sizes = [2, 64], strides = [1, 1]} : vector<2x128xf32> to vector<2x64xf32>
    %c0_408 = arith.constant 0 : index
    %c64_409 = arith.constant 64 : index
    %815 = vector.load %arg21[%c0_408, %c64_409] : memref<16x128xf32, #tpu.memory_space<vmem>>, vector<2x64xf32>
    tpu.vector_store %arg21[%c0_408, %c64_409], %814 {strides = array<i32>} : memref<16x128xf32, #tpu.memory_space<vmem>>, vector<2x64xf32>,
    %c0_410 = arith.constant 0 : index
    %c0_411 = arith.constant 0 : index
    %816 = vector.load %arg21[%c0_410, %c0_411] : memref<16x128xf32, #tpu.memory_space<vmem>>, vector<16x128xf32>
    %c0_412 = arith.constant 0 : index
    %c0_413 = arith.constant 0 : index
    %817 = vector.load %arg12[%c0_412, %c0_413] : memref<16x16xf32, #tpu.memory_space<vmem>>, vector<16x16xf32>
    %cst_414 = arith.constant dense<0.000000e+00> : vector<16x128xf32>
    %818 = tpu.matmul %817, %816, %cst_414 {dimension_numbers = #tpu.dot_dimension_numbers<[1], [0], [0], [1], [0, 0, 1, 1], [], []>} : vector<16x16xf32>, vector<16x128xf32>, vector<16x128xf32> -> vector<16x128xf32>
    %c0_415 = arith.constant 0 : index
    %c0_416 = arith.constant 0 : index
    %819 = vector.load %arg13[%c0_415, %c0_416] : memref<128x512xf32, #tpu.memory_space<vmem>>, vector<128x512xf32>
    %cst_417 = arith.constant dense<0.000000e+00> : vector<16x512xf32>
    %820 = tpu.matmul %818, %819, %cst_417 {dimension_numbers = #tpu.dot_dimension_numbers<[1], [0], [0], [1], [0, 0, 1, 1], [], []>} : vector<16x128xf32>, vector<128x512xf32>, vector<16x512xf32> -> vector<16x512xf32>
    %c0_418 = arith.constant 0 : index
    %c0_419 = arith.constant 0 : index
    %821 = vector.load %arg14[%c0_418, %c0_419] : memref<1x512xf32, #tpu.memory_space<vmem>>, vector<1x512xf32>
    %822 = vector.broadcast %821 : vector<1x512xf32> to vector<16x512xf32>
    %823 = arith.addf %820, %822 : vector<16x512xf32>
    %cst_420 = arith.constant 0.000000e+00 : f32
    %824 = vector.broadcast %cst_420 : f32 to vector<16x512xf32>
    %825 = arith.cmpf ogt, %823, %824 : vector<16x512xf32>
    %cst_421 = arith.constant 1.000000e-01 : f32
    %826 = vector.broadcast %cst_421 : f32 to vector<16x512xf32>
    %827 = arith.mulf %826, %823 : vector<16x512xf32>
    %828 = arith.select %825, %823, %827 : vector<16x512xi1>, vector<16x512xf32>
    %c0_422 = arith.constant 0 : index
    %c0_423 = arith.constant 0 : index
    %829 = vector.load %arg16[%c0_422, %c0_423] : memref<1x128xf32, #tpu.memory_space<vmem>>, vector<1x128xf32>
    %830 = vector.extract_strided_slice %828 {offsets = [0, 0], sizes = [8, 512], strides = [1, 1]} : vector<16x512xf32> to vector<8x512xf32>
    %831 = vector.extract_strided_slice %830 {offsets = [0, 0], sizes = [8, 128], strides = [1, 1]} : vector<8x512xf32> to vector<8x128xf32>
    %832 = vector.extract_strided_slice %830 {offsets = [0, 128], sizes = [8, 128], strides = [1, 1]} : vector<8x512xf32> to vector<8x128xf32>
    %c0_424 = arith.constant 0 : index
    %c0_425 = arith.constant 0 : index
    %833 = vector.load %arg15[%c0_424, %c0_425] : memref<128x128xf32, #tpu.memory_space<vmem>>, vector<128x128xf32>
    %cst_426 = arith.constant dense<0.000000e+00> : vector<8x128xf32>
    %834 = tpu.matmul %831, %833, %cst_426 {dimension_numbers = #tpu.dot_dimension_numbers<[1], [0], [0], [1], [0, 0, 1, 1], [], []>} : vector<8x128xf32>, vector<128x128xf32>, vector<8x128xf32> -> vector<8x128xf32>
    %835 = vector.broadcast %829 : vector<1x128xf32> to vector<8x128xf32>
    %836 = arith.addf %834, %835 : vector<8x128xf32>
    %cst_427 = arith.constant dense<0.000000e+00> : vector<8x8xf32>
    %837 = tpu.matmul %836, %832, %cst_427 {dimension_numbers = #tpu.dot_dimension_numbers<[1], [1], [0], [0], [0, 0, 1, 0], [], []>} : vector<8x128xf32>, vector<8x128xf32>, vector<8x8xf32> -> vector<8x8xf32>
    %c0_428 = arith.constant 0 : index
    %c0_429 = arith.constant 0 : index
    %c0_430 = arith.constant 0 : index
    %838 = vector.load %arg18[%c0_428, %c0_429, %c0_430] : memref<2x8x8xf32, #tpu.memory_space<vmem>>, vector<1x8x8xf32>
    %839 = vector.shape_cast %838 : vector<1x8x8xf32> to vector<8x8xf32>
    %840 = vector.shape_cast %837 : vector<8x8xf32> to vector<1x8x8xf32>
    tpu.vector_store %arg18[%c0_428, %c0_429, %c0_430], %840 {strides = array<i32>} : memref<2x8x8xf32, #tpu.memory_space<vmem>>, vector<1x8x8xf32>,
    %841 = vector.extract_strided_slice %830 {offsets = [0, 256], sizes = [8, 128], strides = [1, 1]} : vector<8x512xf32> to vector<8x128xf32>
    %842 = vector.extract_strided_slice %830 {offsets = [0, 384], sizes = [8, 128], strides = [1, 1]} : vector<8x512xf32> to vector<8x128xf32>
    %c0_431 = arith.constant 0 : index
    %c0_432 = arith.constant 0 : index
    %843 = vector.load %arg17[%c0_431, %c0_432] : memref<128x1024xf32, #tpu.memory_space<vmem>>, vector<128x1024xf32>
    %cst_433 = arith.constant dense<0.000000e+00> : vector<8x1024xf32>
    %844 = tpu.matmul %841, %843, %cst_433 {dimension_numbers = #tpu.dot_dimension_numbers<[1], [0], [0], [1], [0, 0, 1, 1], [], []>} : vector<8x128xf32>, vector<128x1024xf32>, vector<8x1024xf32> -> vector<8x1024xf32>
    %845 = vector.extract_strided_slice %844 {offsets = [0, 0], sizes = [8, 128], strides = [1, 1]} : vector<8x1024xf32> to vector<8x128xf32>
    %cst_434 = arith.constant dense<0.000000e+00> : vector<8x8xf32>
    %846 = tpu.matmul %845, %842, %cst_434 {dimension_numbers = #tpu.dot_dimension_numbers<[1], [1], [0], [0], [0, 0, 1, 0], [], []>} : vector<8x128xf32>, vector<8x128xf32>, vector<8x8xf32> -> vector<8x8xf32>
    %c0_435 = arith.constant 0 : index
    %c0_436 = arith.constant 0 : index
    %c0_437 = arith.constant 0 : index
    %c0_438 = arith.constant 0 : index
    %847 = vector.load %arg19[%c0_435, %c0_436, %c0_437, %c0_438] : memref<2x8x8x8xf32, #tpu.memory_space<vmem>>, vector<1x1x8x8xf32>
    %848 = vector.shape_cast %847 : vector<1x1x8x8xf32> to vector<8x8xf32>
    %849 = vector.shape_cast %846 : vector<8x8xf32> to vector<1x1x8x8xf32>
    tpu.vector_store %arg19[%c0_435, %c0_436, %c0_437, %c0_438], %849 {strides = array<i32>} : memref<2x8x8x8xf32, #tpu.memory_space<vmem>>, vector<1x1x8x8xf32>,
    %850 = vector.extract_strided_slice %844 {offsets = [0, 128], sizes = [8, 128], strides = [1, 1]} : vector<8x1024xf32> to vector<8x128xf32>
    %cst_439 = arith.constant dense<0.000000e+00> : vector<8x8xf32>
    %851 = tpu.matmul %850, %842, %cst_439 {dimension_numbers = #tpu.dot_dimension_numbers<[1], [1], [0], [0], [0, 0, 1, 0], [], []>} : vector<8x128xf32>, vector<8x128xf32>, vector<8x8xf32> -> vector<8x8xf32>
    %c0_440 = arith.constant 0 : index
    %c1 = arith.constant 1 : index
    %c0_441 = arith.constant 0 : index
    %c0_442 = arith.constant 0 : index
    %852 = vector.load %arg19[%c0_440, %c1, %c0_441, %c0_442] : memref<2x8x8x8xf32, #tpu.memory_space<vmem>>, vector<1x1x8x8xf32>
    %853 = vector.shape_cast %852 : vector<1x1x8x8xf32> to vector<8x8xf32>
    %854 = vector.shape_cast %851 : vector<8x8xf32> to vector<1x1x8x8xf32>
    tpu.vector_store %arg19[%c0_440, %c1, %c0_441, %c0_442], %854 {strides = array<i32>} : memref<2x8x8x8xf32, #tpu.memory_space<vmem>>, vector<1x1x8x8xf32>,
    %855 = vector.extract_strided_slice %844 {offsets = [0, 256], sizes = [8, 128], strides = [1, 1]} : vector<8x1024xf32> to vector<8x128xf32>
    %cst_443 = arith.constant dense<0.000000e+00> : vector<8x8xf32>
    %856 = tpu.matmul %855, %842, %cst_443 {dimension_numbers = #tpu.dot_dimension_numbers<[1], [1], [0], [0], [0, 0, 1, 0], [], []>} : vector<8x128xf32>, vector<8x128xf32>, vector<8x8xf32> -> vector<8x8xf32>
    %c0_444 = arith.constant 0 : index
    %c2_445 = arith.constant 2 : index
    %c0_446 = arith.constant 0 : index
    %c0_447 = arith.constant 0 : index
    %857 = vector.load %arg19[%c0_444, %c2_445, %c0_446, %c0_447] : memref<2x8x8x8xf32, #tpu.memory_space<vmem>>, vector<1x1x8x8xf32>
    %858 = vector.shape_cast %857 : vector<1x1x8x8xf32> to vector<8x8xf32>
    %859 = vector.shape_cast %856 : vector<8x8xf32> to vector<1x1x8x8xf32>
    tpu.vector_store %arg19[%c0_444, %c2_445, %c0_446, %c0_447], %859 {strides = array<i32>} : memref<2x8x8x8xf32, #tpu.memory_space<vmem>>, vector<1x1x8x8xf32>,
    %860 = vector.extract_strided_slice %844 {offsets = [0, 384], sizes = [8, 128], strides = [1, 1]} : vector<8x1024xf32> to vector<8x128xf32>
    %cst_448 = arith.constant dense<0.000000e+00> : vector<8x8xf32>
    %861 = tpu.matmul %860, %842, %cst_448 {dimension_numbers = #tpu.dot_dimension_numbers<[1], [1], [0], [0], [0, 0, 1, 0], [], []>} : vector<8x128xf32>, vector<8x128xf32>, vector<8x8xf32> -> vector<8x8xf32>
    %c0_449 = arith.constant 0 : index
    %c3 = arith.constant 3 : index
    %c0_450 = arith.constant 0 : index
    %c0_451 = arith.constant 0 : index
    %862 = vector.load %arg19[%c0_449, %c3, %c0_450, %c0_451] : memref<2x8x8x8xf32, #tpu.memory_space<vmem>>, vector<1x1x8x8xf32>
    %863 = vector.shape_cast %862 : vector<1x1x8x8xf32> to vector<8x8xf32>
    %864 = vector.shape_cast %861 : vector<8x8xf32> to vector<1x1x8x8xf32>
    tpu.vector_store %arg19[%c0_449, %c3, %c0_450, %c0_451], %864 {strides = array<i32>} : memref<2x8x8x8xf32, #tpu.memory_space<vmem>>, vector<1x1x8x8xf32>,
    %865 = vector.extract_strided_slice %844 {offsets = [0, 512], sizes = [8, 128], strides = [1, 1]} : vector<8x1024xf32> to vector<8x128xf32>
    %cst_452 = arith.constant dense<0.000000e+00> : vector<8x8xf32>
    %866 = tpu.matmul %865, %842, %cst_452 {dimension_numbers = #tpu.dot_dimension_numbers<[1], [1], [0], [0], [0, 0, 1, 0], [], []>} : vector<8x128xf32>, vector<8x128xf32>, vector<8x8xf32> -> vector<8x8xf32>
    %c0_453 = arith.constant 0 : index
    %c4_454 = arith.constant 4 : index
    %c0_455 = arith.constant 0 : index
    %c0_456 = arith.constant 0 : index
    %867 = vector.load %arg19[%c0_453, %c4_454, %c0_455, %c0_456] : memref<2x8x8x8xf32, #tpu.memory_space<vmem>>, vector<1x1x8x8xf32>
    %868 = vector.shape_cast %867 : vector<1x1x8x8xf32> to vector<8x8xf32>
    %869 = vector.shape_cast %866 : vector<8x8xf32> to vector<1x1x8x8xf32>
    tpu.vector_store %arg19[%c0_453, %c4_454, %c0_455, %c0_456], %869 {strides = array<i32>} : memref<2x8x8x8xf32, #tpu.memory_space<vmem>>, vector<1x1x8x8xf32>,
    %870 = vector.extract_strided_slice %844 {offsets = [0, 640], sizes = [8, 128], strides = [1, 1]} : vector<8x1024xf32> to vector<8x128xf32>
    %cst_457 = arith.constant dense<0.000000e+00> : vector<8x8xf32>
    %871 = tpu.matmul %870, %842, %cst_457 {dimension_numbers = #tpu.dot_dimension_numbers<[1], [1], [0], [0], [0, 0, 1, 0], [], []>} : vector<8x128xf32>, vector<8x128xf32>, vector<8x8xf32> -> vector<8x8xf32>
    %c0_458 = arith.constant 0 : index
    %c5 = arith.constant 5 : index
    %c0_459 = arith.constant 0 : index
    %c0_460 = arith.constant 0 : index
    %872 = vector.load %arg19[%c0_458, %c5, %c0_459, %c0_460] : memref<2x8x8x8xf32, #tpu.memory_space<vmem>>, vector<1x1x8x8xf32>
    %873 = vector.shape_cast %872 : vector<1x1x8x8xf32> to vector<8x8xf32>
    %874 = vector.shape_cast %871 : vector<8x8xf32> to vector<1x1x8x8xf32>
    tpu.vector_store %arg19[%c0_458, %c5, %c0_459, %c0_460], %874 {strides = array<i32>} : memref<2x8x8x8xf32, #tpu.memory_space<vmem>>, vector<1x1x8x8xf32>,
    %875 = vector.extract_strided_slice %844 {offsets = [0, 768], sizes = [8, 128], strides = [1, 1]} : vector<8x1024xf32> to vector<8x128xf32>
    %cst_461 = arith.constant dense<0.000000e+00> : vector<8x8xf32>
    %876 = tpu.matmul %875, %842, %cst_461 {dimension_numbers = #tpu.dot_dimension_numbers<[1], [1], [0], [0], [0, 0, 1, 0], [], []>} : vector<8x128xf32>, vector<8x128xf32>, vector<8x8xf32> -> vector<8x8xf32>
    %c0_462 = arith.constant 0 : index
    %c6_463 = arith.constant 6 : index
    %c0_464 = arith.constant 0 : index
    %c0_465 = arith.constant 0 : index
    %877 = vector.load %arg19[%c0_462, %c6_463, %c0_464, %c0_465] : memref<2x8x8x8xf32, #tpu.memory_space<vmem>>, vector<1x1x8x8xf32>
    %878 = vector.shape_cast %877 : vector<1x1x8x8xf32> to vector<8x8xf32>
    %879 = vector.shape_cast %876 : vector<8x8xf32> to vector<1x1x8x8xf32>
    tpu.vector_store %arg19[%c0_462, %c6_463, %c0_464, %c0_465], %879 {strides = array<i32>} : memref<2x8x8x8xf32, #tpu.memory_space<vmem>>, vector<1x1x8x8xf32>,
    %880 = vector.extract_strided_slice %844 {offsets = [0, 896], sizes = [8, 128], strides = [1, 1]} : vector<8x1024xf32> to vector<8x128xf32>
    %cst_466 = arith.constant dense<0.000000e+00> : vector<8x8xf32>
    %881 = tpu.matmul %880, %842, %cst_466 {dimension_numbers = #tpu.dot_dimension_numbers<[1], [1], [0], [0], [0, 0, 1, 0], [], []>} : vector<8x128xf32>, vector<8x128xf32>, vector<8x8xf32> -> vector<8x8xf32>
    %c0_467 = arith.constant 0 : index
    %c7 = arith.constant 7 : index
    %c0_468 = arith.constant 0 : index
    %c0_469 = arith.constant 0 : index
    %882 = vector.load %arg19[%c0_467, %c7, %c0_468, %c0_469] : memref<2x8x8x8xf32, #tpu.memory_space<vmem>>, vector<1x1x8x8xf32>
    %883 = vector.shape_cast %882 : vector<1x1x8x8xf32> to vector<8x8xf32>
    %884 = vector.shape_cast %881 : vector<8x8xf32> to vector<1x1x8x8xf32>
    tpu.vector_store %arg19[%c0_467, %c7, %c0_468, %c0_469], %884 {strides = array<i32>} : memref<2x8x8x8xf32, #tpu.memory_space<vmem>>, vector<1x1x8x8xf32>,
    %885 = vector.extract_strided_slice %828 {offsets = [8, 0], sizes = [8, 512], strides = [1, 1]} : vector<16x512xf32> to vector<8x512xf32>
    %886 = vector.extract_strided_slice %885 {offsets = [0, 0], sizes = [8, 128], strides = [1, 1]} : vector<8x512xf32> to vector<8x128xf32>
    %887 = vector.extract_strided_slice %885 {offsets = [0, 128], sizes = [8, 128], strides = [1, 1]} : vector<8x512xf32> to vector<8x128xf32>
    %c0_470 = arith.constant 0 : index
    %c0_471 = arith.constant 0 : index
    %888 = vector.load %arg15[%c0_470, %c0_471] : memref<128x128xf32, #tpu.memory_space<vmem>>, vector<128x128xf32>
    %cst_472 = arith.constant dense<0.000000e+00> : vector<8x128xf32>
    %889 = tpu.matmul %886, %888, %cst_472 {dimension_numbers = #tpu.dot_dimension_numbers<[1], [0], [0], [1], [0, 0, 1, 1], [], []>} : vector<8x128xf32>, vector<128x128xf32>, vector<8x128xf32> -> vector<8x128xf32>
    %890 = vector.broadcast %829 : vector<1x128xf32> to vector<8x128xf32>
    %891 = arith.addf %889, %890 : vector<8x128xf32>
    %cst_473 = arith.constant dense<0.000000e+00> : vector<8x8xf32>
    %892 = tpu.matmul %891, %887, %cst_473 {dimension_numbers = #tpu.dot_dimension_numbers<[1], [1], [0], [0], [0, 0, 1, 0], [], []>} : vector<8x128xf32>, vector<8x128xf32>, vector<8x8xf32> -> vector<8x8xf32>
    %c1_474 = arith.constant 1 : index
    %c0_475 = arith.constant 0 : index
    %c0_476 = arith.constant 0 : index
    %893 = vector.load %arg18[%c1_474, %c0_475, %c0_476] : memref<2x8x8xf32, #tpu.memory_space<vmem>>, vector<1x8x8xf32>
    %894 = vector.shape_cast %893 : vector<1x8x8xf32> to vector<8x8xf32>
    %895 = vector.shape_cast %892 : vector<8x8xf32> to vector<1x8x8xf32>
    tpu.vector_store %arg18[%c1_474, %c0_475, %c0_476], %895 {strides = array<i32>} : memref<2x8x8xf32, #tpu.memory_space<vmem>>, vector<1x8x8xf32>,
    %896 = vector.extract_strided_slice %885 {offsets = [0, 256], sizes = [8, 128], strides = [1, 1]} : vector<8x512xf32> to vector<8x128xf32>
    %897 = vector.extract_strided_slice %885 {offsets = [0, 384], sizes = [8, 128], strides = [1, 1]} : vector<8x512xf32> to vector<8x128xf32>
    %c0_477 = arith.constant 0 : index
    %c0_478 = arith.constant 0 : index
    %898 = vector.load %arg17[%c0_477, %c0_478] : memref<128x1024xf32, #tpu.memory_space<vmem>>, vector<128x1024xf32>
    %cst_479 = arith.constant dense<0.000000e+00> : vector<8x1024xf32>
    %899 = tpu.matmul %896, %898, %cst_479 {dimension_numbers = #tpu.dot_dimension_numbers<[1], [0], [0], [1], [0, 0, 1, 1], [], []>} : vector<8x128xf32>, vector<128x1024xf32>, vector<8x1024xf32> -> vector<8x1024xf32>
    %900 = vector.extract_strided_slice %899 {offsets = [0, 0], sizes = [8, 128], strides = [1, 1]} : vector<8x1024xf32> to vector<8x128xf32>
    %cst_480 = arith.constant dense<0.000000e+00> : vector<8x8xf32>
    %901 = tpu.matmul %900, %897, %cst_480 {dimension_numbers = #tpu.dot_dimension_numbers<[1], [1], [0], [0], [0, 0, 1, 0], [], []>} : vector<8x128xf32>, vector<8x128xf32>, vector<8x8xf32> -> vector<8x8xf32>
    %c1_481 = arith.constant 1 : index
    %c0_482 = arith.constant 0 : index
    %c0_483 = arith.constant 0 : index
    %c0_484 = arith.constant 0 : index
    %902 = vector.load %arg19[%c1_481, %c0_482, %c0_483, %c0_484] : memref<2x8x8x8xf32, #tpu.memory_space<vmem>>, vector<1x1x8x8xf32>
    %903 = vector.shape_cast %902 : vector<1x1x8x8xf32> to vector<8x8xf32>
    %904 = vector.shape_cast %901 : vector<8x8xf32> to vector<1x1x8x8xf32>
    tpu.vector_store %arg19[%c1_481, %c0_482, %c0_483, %c0_484], %904 {strides = array<i32>} : memref<2x8x8x8xf32, #tpu.memory_space<vmem>>, vector<1x1x8x8xf32>,
    %905 = vector.extract_strided_slice %899 {offsets = [0, 128], sizes = [8, 128], strides = [1, 1]} : vector<8x1024xf32> to vector<8x128xf32>
    %cst_485 = arith.constant dense<0.000000e+00> : vector<8x8xf32>
    %906 = tpu.matmul %905, %897, %cst_485 {dimension_numbers = #tpu.dot_dimension_numbers<[1], [1], [0], [0], [0, 0, 1, 0], [], []>} : vector<8x128xf32>, vector<8x128xf32>, vector<8x8xf32> -> vector<8x8xf32>
    %c1_486 = arith.constant 1 : index
    %c1_487 = arith.constant 1 : index
    %c0_488 = arith.constant 0 : index
    %c0_489 = arith.constant 0 : index
    %907 = vector.load %arg19[%c1_486, %c1_487, %c0_488, %c0_489] : memref<2x8x8x8xf32, #tpu.memory_space<vmem>>, vector<1x1x8x8xf32>
    %908 = vector.shape_cast %907 : vector<1x1x8x8xf32> to vector<8x8xf32>
    %909 = vector.shape_cast %906 : vector<8x8xf32> to vector<1x1x8x8xf32>
    tpu.vector_store %arg19[%c1_486, %c1_487, %c0_488, %c0_489], %909 {strides = array<i32>} : memref<2x8x8x8xf32, #tpu.memory_space<vmem>>, vector<1x1x8x8xf32>,
    %910 = vector.extract_strided_slice %899 {offsets = [0, 256], sizes = [8, 128], strides = [1, 1]} : vector<8x1024xf32> to vector<8x128xf32>
    %cst_490 = arith.constant dense<0.000000e+00> : vector<8x8xf32>
    %911 = tpu.matmul %910, %897, %cst_490 {dimension_numbers = #tpu.dot_dimension_numbers<[1], [1], [0], [0], [0, 0, 1, 0], [], []>} : vector<8x128xf32>, vector<8x128xf32>, vector<8x8xf32> -> vector<8x8xf32>
    %c1_491 = arith.constant 1 : index
    %c2_492 = arith.constant 2 : index
    %c0_493 = arith.constant 0 : index
    %c0_494 = arith.constant 0 : index
    %912 = vector.load %arg19[%c1_491, %c2_492, %c0_493, %c0_494] : memref<2x8x8x8xf32, #tpu.memory_space<vmem>>, vector<1x1x8x8xf32>
    %913 = vector.shape_cast %912 : vector<1x1x8x8xf32> to vector<8x8xf32>
    %914 = vector.shape_cast %911 : vector<8x8xf32> to vector<1x1x8x8xf32>
    tpu.vector_store %arg19[%c1_491, %c2_492, %c0_493, %c0_494], %914 {strides = array<i32>} : memref<2x8x8x8xf32, #tpu.memory_space<vmem>>, vector<1x1x8x8xf32>,
    %915 = vector.extract_strided_slice %899 {offsets = [0, 384], sizes = [8, 128], strides = [1, 1]} : vector<8x1024xf32> to vector<8x128xf32>
    %cst_495 = arith.constant dense<0.000000e+00> : vector<8x8xf32>
    %916 = tpu.matmul %915, %897, %cst_495 {dimension_numbers = #tpu.dot_dimension_numbers<[1], [1], [0], [0], [0, 0, 1, 0], [], []>} : vector<8x128xf32>, vector<8x128xf32>, vector<8x8xf32> -> vector<8x8xf32>
    %c1_496 = arith.constant 1 : index
    %c3_497 = arith.constant 3 : index
    %c0_498 = arith.constant 0 : index
    %c0_499 = arith.constant 0 : index
    %917 = vector.load %arg19[%c1_496, %c3_497, %c0_498, %c0_499] : memref<2x8x8x8xf32, #tpu.memory_space<vmem>>, vector<1x1x8x8xf32>
    %918 = vector.shape_cast %917 : vector<1x1x8x8xf32> to vector<8x8xf32>
    %919 = vector.shape_cast %916 : vector<8x8xf32> to vector<1x1x8x8xf32>
    tpu.vector_store %arg19[%c1_496, %c3_497, %c0_498, %c0_499], %919 {strides = array<i32>} : memref<2x8x8x8xf32, #tpu.memory_space<vmem>>, vector<1x1x8x8xf32>,
    %920 = vector.extract_strided_slice %899 {offsets = [0, 512], sizes = [8, 128], strides = [1, 1]} : vector<8x1024xf32> to vector<8x128xf32>
    %cst_500 = arith.constant dense<0.000000e+00> : vector<8x8xf32>
    %921 = tpu.matmul %920, %897, %cst_500 {dimension_numbers = #tpu.dot_dimension_numbers<[1], [1], [0], [0], [0, 0, 1, 0], [], []>} : vector<8x128xf32>, vector<8x128xf32>, vector<8x8xf32> -> vector<8x8xf32>
    %c1_501 = arith.constant 1 : index
    %c4_502 = arith.constant 4 : index
    %c0_503 = arith.constant 0 : index
    %c0_504 = arith.constant 0 : index
    %922 = vector.load %arg19[%c1_501, %c4_502, %c0_503, %c0_504] : memref<2x8x8x8xf32, #tpu.memory_space<vmem>>, vector<1x1x8x8xf32>
    %923 = vector.shape_cast %922 : vector<1x1x8x8xf32> to vector<8x8xf32>
    %924 = vector.shape_cast %921 : vector<8x8xf32> to vector<1x1x8x8xf32>
    tpu.vector_store %arg19[%c1_501, %c4_502, %c0_503, %c0_504], %924 {strides = array<i32>} : memref<2x8x8x8xf32, #tpu.memory_space<vmem>>, vector<1x1x8x8xf32>,
    %925 = vector.extract_strided_slice %899 {offsets = [0, 640], sizes = [8, 128], strides = [1, 1]} : vector<8x1024xf32> to vector<8x128xf32>
    %cst_505 = arith.constant dense<0.000000e+00> : vector<8x8xf32>
    %926 = tpu.matmul %925, %897, %cst_505 {dimension_numbers = #tpu.dot_dimension_numbers<[1], [1], [0], [0], [0, 0, 1, 0], [], []>} : vector<8x128xf32>, vector<8x128xf32>, vector<8x8xf32> -> vector<8x8xf32>
    %c1_506 = arith.constant 1 : index
    %c5_507 = arith.constant 5 : index
    %c0_508 = arith.constant 0 : index
    %c0_509 = arith.constant 0 : index
    %927 = vector.load %arg19[%c1_506, %c5_507, %c0_508, %c0_509] : memref<2x8x8x8xf32, #tpu.memory_space<vmem>>, vector<1x1x8x8xf32>
    %928 = vector.shape_cast %927 : vector<1x1x8x8xf32> to vector<8x8xf32>
    %929 = vector.shape_cast %926 : vector<8x8xf32> to vector<1x1x8x8xf32>
    tpu.vector_store %arg19[%c1_506, %c5_507, %c0_508, %c0_509], %929 {strides = array<i32>} : memref<2x8x8x8xf32, #tpu.memory_space<vmem>>, vector<1x1x8x8xf32>,
    %930 = vector.extract_strided_slice %899 {offsets = [0, 768], sizes = [8, 128], strides = [1, 1]} : vector<8x1024xf32> to vector<8x128xf32>
    %cst_510 = arith.constant dense<0.000000e+00> : vector<8x8xf32>
    %931 = tpu.matmul %930, %897, %cst_510 {dimension_numbers = #tpu.dot_dimension_numbers<[1], [1], [0], [0], [0, 0, 1, 0], [], []>} : vector<8x128xf32>, vector<8x128xf32>, vector<8x8xf32> -> vector<8x8xf32>
    %c1_511 = arith.constant 1 : index
    %c6_512 = arith.constant 6 : index
    %c0_513 = arith.constant 0 : index
    %c0_514 = arith.constant 0 : index
    %932 = vector.load %arg19[%c1_511, %c6_512, %c0_513, %c0_514] : memref<2x8x8x8xf32, #tpu.memory_space<vmem>>, vector<1x1x8x8xf32>
    %933 = vector.shape_cast %932 : vector<1x1x8x8xf32> to vector<8x8xf32>
    %934 = vector.shape_cast %931 : vector<8x8xf32> to vector<1x1x8x8xf32>
    tpu.vector_store %arg19[%c1_511, %c6_512, %c0_513, %c0_514], %934 {strides = array<i32>} : memref<2x8x8x8xf32, #tpu.memory_space<vmem>>, vector<1x1x8x8xf32>,
    %935 = vector.extract_strided_slice %899 {offsets = [0, 896], sizes = [8, 128], strides = [1, 1]} : vector<8x1024xf32> to vector<8x128xf32>
    %cst_515 = arith.constant dense<0.000000e+00> : vector<8x8xf32>
    %936 = tpu.matmul %935, %897, %cst_515 {dimension_numbers = #tpu.dot_dimension_numbers<[1], [1], [0], [0], [0, 0, 1, 0], [], []>} : vector<8x128xf32>, vector<8x128xf32>, vector<8x8xf32> -> vector<8x8xf32>
    %c1_516 = arith.constant 1 : index
    %c7_517 = arith.constant 7 : index
    %c0_518 = arith.constant 0 : index
    %c0_519 = arith.constant 0 : index
    %937 = vector.load %arg19[%c1_516, %c7_517, %c0_518, %c0_519] : memref<2x8x8x8xf32, #tpu.memory_space<vmem>>, vector<1x1x8x8xf32>
    %938 = vector.shape_cast %937 : vector<1x1x8x8xf32> to vector<8x8xf32>
    %939 = vector.shape_cast %936 : vector<8x8xf32> to vector<1x1x8x8xf32>
    tpu.vector_store %arg19[%c1_516, %c7_517, %c0_518, %c0_519], %939 {strides = array<i32>} : memref<2x8x8x8xf32, #tpu.memory_space<vmem>>, vector<1x1x8x8xf32>,
    return
  }
}

</mosaic_0001>

<bundles_post_ra>
// kernel: forward.1
= control target key start
LH: loop header
LB: loop body
LE: loop exit
PB: predicated region body
PF: predicated region fallthrough
CT: control target
= control target key end

     0   :  { %s18898_s0 = inlined_call_operand.vmem [shape: f32[16,32], index: 0, kind: input, shape index: {}]   ;;  %s18899_s1 = inlined_call_operand.vmem [shape: f32[16,128], index: 1, kind: input, shape index: {}]   ;;  %s18900_s2 = inlined_call_operand.vmem [shape: f32[2,512], index: 2, kind: input, shape index: {}]   ;;  %s18901_s3 = inlined_call_operand.vmem [shape: f32[32,512], index: 3, kind: input, shape index: {}]   ;;  %s18902_s4 = inlined_call_operand.vmem [shape: f32[128,512], index: 4, kind: input, shape index: {}]   ;;  %s18903_s5 = inlined_call_operand.vmem [shape: f32[1,512], index: 5, kind: input, shape index: {}]   ;;  %s18904_s6 = inlined_call_operand.vmem [shape: f32[128,512], index: 6, kind: input, shape index: {}]   ;;  %s18905_s7 = inlined_call_operand.vmem [shape: f32[128,512], index: 7, kind: input, shape index: {}]   ;;  %s18906_s8 = inlined_call_operand.vmem [shape: f32[1,512], index: 8, kind: input, shape index: {}]   ;;  %s18907_s9 = inlined_call_operand.vmem [shape: f32[128,512], index: 9, kind: input, shape index: {}]   ;;  %s18908_s10 = inlined_call_operand.vmem [shape: f32[128,512], index: 10, kind: input, shape index: {}]   ;;  %s18909_s11 = inlined_call_operand.vmem [shape: f32[1,512], index: 11, kind: input, shape index: {}]   ;;  %s18910_s12 = inlined_call_operand.vmem [shape: f32[16,16], index: 12, kind: input, shape index: {}]   ;;  %s18911_s13 = inlined_call_operand.vmem [shape: f32[128,512], index: 13, kind: input, shape index: {}]   ;;  %s18912_s14 = inlined_call_operand.vmem [shape: f32[1,512], index: 14, kind: input, shape index: {}]   ;;  %s18913_s15 = inlined_call_operand.vmem [shape: f32[128,128], index: 15, kind: input, shape index: {}]   ;;  %s18914_s16 = inlined_call_operand.vmem [shape: f32[1,128], index: 16, kind: input, shape index: {}]   ;;  %s18915_s17 = inlined_call_operand.vmem [shape: f32[128,1024], index: 17, kind: input, shape index: {}]   ;;  %s18916_s18 = inlined_call_operand.hbm [shape: f32[2,8,8], index: 18, kind: output, shape index: {0}]   ;;  %s18917_s19 = inlined_call_operand.vmem [shape: f32[2,8,8,8], index: 19, kind: output, shape index: {1}]  }
   0x1   :  { %18949 = sst [smem:[#allocation31_spill]] %s18898_s0 }
   0x2   :  { %18950 = sst [smem:[#allocation32_spill]] %s18899_s1 }
   0x3   :  { %18951 = sst [smem:[#allocation33_spill]] %s18900_s2 }
   0x4   :  { %18952 = sst [smem:[#allocation34_spill]] %s18901_s3 }
   0x5   :  { %s18953_s20 = sld [smem:[#allocation34_spill]]  ;;  %v18923_v7 = vmov 0.0   ;;  %v274_v24 = vld [vmem:[%s18902_s4 + $0x8] sm:$0xff]  ;;  %v276_v27 = vld [vmem:[%s18902_s4 + $0x18] sm:$0xff]  ;;  %v273_v31 = vld [vmem:[%s18902_s4] sm:$0xff]  ;;  %s18954_s2 = sld [smem:[#allocation31_spill]] }
   0x6   :  { %175 = vmatprep.mubr.f32.mxu0 %v18923_v7  ;;  %252 = vmatprep.mubr.f32.mxu1 %v18923_v7  ;;  %v278_v26 = vld [vmem:[%s18902_s4 + $0x28] sm:$0xff]  ;;  %v280_v28 = vld [vmem:[%s18902_s4 + $0x38] sm:$0xff]  ;;  %v277_v32 = vld [vmem:[%s18902_s4 + $0x20] sm:$0xff]  ;;  %vm104_vm0 = vcmask 261120  }
   0x7   :  { %v13683_v29 = vpack.c.bf16 %v278_v26, %v274_v24  ;;  %v13685_v30 = vpack.c.bf16 %v280_v28, %v276_v27  ;;  %v275_v33 = vld [vmem:[%s18902_s4 + $0x10] sm:$0xff]  ;;  %v13699_v35 = vpack.c.bf16 %v277_v32, %v273_v31  ;;  %v282_v37 = vld [vmem:[%s18902_s4 + $0x48] sm:$0xff]  ;;  %v284_v40 = vld [vmem:[%s18902_s4 + $0x58] sm:$0xff] }
   0x8   :  { %v279_v36 = vld [vmem:[%s18902_s4 + $0x30] sm:$0xff]  ;;  %v286_v39 = vld [vmem:[%s18902_s4 + $0x68] sm:$0xff]  ;;  %v288_v41 = vld [vmem:[%s18902_s4 + $0x78] sm:$0xff] }
   0x9   :  { %v13708_v38 = vpack.c.bf16 %v279_v36, %v275_v33  ;;  %v13720_v42 = vpack.c.bf16 %v286_v39, %v282_v37  ;;  %v281_v43 = vld [vmem:[%s18902_s4 + $0x40] sm:$0xff]  ;;  %v283_v45 = vld [vmem:[%s18902_s4 + $0x50] sm:$0xff]  ;;  %v13732_v46 = vpack.c.bf16 %v288_v41, %v284_v40  ;;  %v290_v48 = vld [vmem:[%s18902_s4 + $0x88] sm:$0xff] }
   0xa   :  { %v285_v44 = vld [vmem:[%s18902_s4 + $0x60] sm:$0xff]  ;;  %v287_v47 = vld [vmem:[%s18902_s4 + $0x70] sm:$0xff]  ;;  %v294_v49 = vld [vmem:[%s18902_s4 + $0xa8] sm:$0xff] }
   0xb   :  { %v67_v0 = vld [vmem:[%s18953_s20 + $0x8] sm:$0xff]  ;;  %v69_v2 = vld [vmem:[%s18953_s20 + $0x18] sm:$0xff]  ;;  %v66_v5 = vld [vmem:[%s18953_s20] sm:$0xff]  ;;  %v13748_v51 = vpack.c.bf16 %v285_v44, %v281_v43  ;;  %v13758_v54 = vpack.c.bf16 %v287_v47, %v283_v45  ;;  %v13760_v55 = vpack.c.bf16 %v294_v49, %v290_v48 }
   0xc   :  { %v71_v1 = vld [vmem:[%s18953_s20 + $0x28] sm:$0xff]  ;;  %v73_v4 = vld [vmem:[%s18953_s20 + $0x38] sm:$0xff]  ;;  %v70_v6 = vld [vmem:[%s18953_s20 + $0x20] sm:$0xff] }
   0xd   :  { %v11143_v3 = vpack.c.bf16 %v71_v1, %v67_v0  ;;  %v11151_v8 = vpack.c.bf16 %v73_v4, %v69_v2  ;;  %v11145_v9 = vpack.c.bf16 %v70_v6, %v66_v5  ;;  %v68_v10 = vld [vmem:[%s18953_s20 + $0x10] sm:$0xff]  ;;  %v75_v12 = vld [vmem:[%s18953_s20 + $0x48] sm:$0xff]  ;;  %v77_v15 = vld [vmem:[%s18953_s20 + $0x58] sm:$0xff] }
   0xe   :  { %v72_v11 = vld [vmem:[%s18953_s20 + $0x30] sm:$0xff]  ;;  %v79_v14 = vld [vmem:[%s18953_s20 + $0x68] sm:$0xff]  ;;  %v81_v16 = vld [vmem:[%s18953_s20 + $0x78] sm:$0xff] }
   0xf   :  { %11144 = vmatprep.subr.bf16.mxu0 %v11143_v3  ;;  %v11153_v13 = vpack.c.bf16 %v72_v11, %v68_v10  ;;  %11152 = vmatprep.subr.bf16.mxu1 %v11151_v8  ;;  %v11147_v17 = vpack.c.bf16 %v79_v14, %v75_v12  ;;  %v11155_v18 = vpack.c.bf16 %v81_v16, %v77_v15  ;;  %v74_v19 = vld [vmem:[%s18953_s20 + $0x40] sm:$0xff]  ;;  %v76_v21 = vld [vmem:[%s18953_s20 + $0x50] sm:$0xff]  ;;  %v65_v50 = vld [vmem:[%s18954_s2 + $0x8] sm:$0xff] }
  0x10   :  { %11146 = vmatpush1.bf16.msra.mxu0 %v11145_v9  ;;  %v78_v20 = vld [vmem:[%s18953_s20 + $0x60] sm:$0xff]  ;;  %v80_v23 = vld [vmem:[%s18953_s20 + $0x70] sm:$0xff]  ;;  %v292_v52 = vld [vmem:[%s18902_s4 + $0x98] sm:$0xff] }
  0x11   :  { %11154 = vmatpush1.bf16.msra.mxu1 %v11153_v13  ;;  %v11149_v22 = vpack.c.bf16 %v78_v20, %v74_v19  ;;  %11148 = vmatprep.subr.bf16.mxu0 %v11147_v17  ;;  %v11157_v25 = vpack.c.bf16 %v80_v23, %v76_v21  ;;  %v64_v34 = vld [vmem:[%s18954_s2] sm:$0xff]  ;;  %v296_v53 = vld [vmem:[%s18902_s4 + $0xb8] sm:$0xff]  ;;  %v291_v58 = vld [vmem:[%s18902_s4 + $0x90] sm:$0xff] }
  0x12   :  { %11156 = vmatprep.subr.bf16.mxu1 %v11155_v18  ;;  %v289_v56 = vld [vmem:[%s18902_s4 + $0x80] sm:$0xff]  ;;  %v13773_v59 = vpack.c.bf16 %v296_v53, %v292_v52  ;;  %v295_v60 = vld [vmem:[%s18902_s4 + $0xb0] sm:$0xff]  ;;  %v298_v61 = vld [vmem:[%s18902_s4 + $0xc8] sm:$0xff] }
  0x13   :  { %v293_v57 = vld [vmem:[%s18902_s4 + $0xa0] sm:$0xff]  ;;  %v302_v62 = vld [vmem:[%s18902_s4 + $0xe8] sm:$0xff]  ;;  %v300_v63 = vld [vmem:[%s18902_s4 + $0xd8] sm:$0xff]  ;;  %v13798_v2 = vpack.c.bf16 %v295_v60, %v291_v58 }
  0x14   :  { %11150 = vmatpush1.bf16.msra.mxu0 %v11149_v22  ;;  %v304_v0 = vld [vmem:[%s18902_s4 + $0xf8] sm:$0xff]  ;;  %v13794_v1 = vpack.c.bf16 %v293_v57, %v289_v56  ;;  %v13800_v3 = vpack.c.bf16 %v302_v62, %v298_v61  ;;  %v297_v4 = vld [vmem:[%s18902_s4 + $0xc0] sm:$0xff]  ;;  %v299_v6 = vld [vmem:[%s18902_s4 + $0xd0] sm:$0xff] }
  0x15   :  { %11158 = vmatpush1.bf16.msra.mxu1 %v11157_v25  ;;  %11160 = vmatprep.subr.bf16.mxu0 %v13683_v29  ;;  %v301_v5 = vld [vmem:[%s18902_s4 + $0xe0] sm:$0xff]  ;;  %v13812_v8 = vpack.c.bf16 %v304_v0, %v300_v63  ;;  %v303_v9 = vld [vmem:[%s18902_s4 + $0xf0] sm:$0xff]  ;;  %v306_v10 = vld [vmem:[%s18902_s4 + $0x108] sm:$0xff] }
  0x16   :  { %11192 = vmatprep.subr.bf16.mxu1 %v13685_v30  ;;  %v310_v11 = vld [vmem:[%s18902_s4 + $0x128] sm:$0xff]  ;;  %v308_v12 = vld [vmem:[%s18902_s4 + $0x118] sm:$0xff]  ;;  %v13832_v14 = vpack.c.bf16 %v301_v5, %v297_v4  ;;  %v13836_v15 = vpack.c.bf16 %v303_v9, %v299_v6  ;;  %v305_v17 = vld [vmem:[%s18902_s4 + $0x100] sm:$0xff] }
  0x17   :  { %10850 = vmatmul.mubr.msk.f32.vlgmr.msra.gmra.mrb[0].mxu0 %vm104_vm0, %v64_v34  ;;  %v312_v13 = vld [vmem:[%s18902_s4 + $0x138] sm:$0xff]  ;;  %v13838_v16 = vpack.c.bf16 %v310_v11, %v306_v10  ;;  %v309_v18 = vld [vmem:[%s18902_s4 + $0x120] sm:$0xff]  ;;  %v307_v19 = vld [vmem:[%s18902_s4 + $0x110] sm:$0xff] }
  0x18   :  { %10852 = vmatmul.mubr.msk.f32.vlgmr.msra.gmra.mrb[0].mxu1 %vm104_vm0, %v64_v34  ;;  %11162 = vmatpush1.bf16.msra.mxu0 %v13699_v35  ;;  %v13850_v20 = vpack.c.bf16 %v312_v13, %v308_v12  ;;  %v311_v21 = vld [vmem:[%s18902_s4 + $0x130] sm:$0xff]  ;;  %v314_v22 = vld [vmem:[%s18902_s4 + $0x148] sm:$0xff]  ;;  %v316_v24 = vld [vmem:[%s18902_s4 + $0x158] sm:$0xff]  ;;  %v13868_v26 = vpack.c.bf16 %v309_v18, %v305_v17 }
  0x19   :  { %11194 = vmatpush1.bf16.msra.mxu1 %v13708_v38  ;;  %181 = vmatprep.mubr.f32.mxu0 %v18923_v7  ;;  %v318_v23 = vld [vmem:[%s18902_s4 + $0x168] sm:$0xff]  ;;  %v320_v25 = vld [vmem:[%s18902_s4 + $0x178] sm:$0xff]  ;;  %v13872_v27 = vpack.c.bf16 %v311_v21, %v307_v19  ;;  %v313_v31 = vld [vmem:[%s18902_s4 + $0x140] sm:$0xff] }
  0x1a   :  { %258 = vmatprep.mubr.f32.mxu1 %v18923_v7  ;;  %11164 = vmatprep.subr.bf16.mxu0 %v13720_v42  ;;  %v13874_v28 = vpack.c.bf16 %v318_v23, %v314_v22  ;;  %v317_v32 = vld [vmem:[%s18902_s4 + $0x160] sm:$0xff]  ;;  %v315_v33 = vld [vmem:[%s18902_s4 + $0x150] sm:$0xff]  ;;  %v13886_v34 = vpack.c.bf16 %v320_v25, %v316_v24  ;;  %v322_v37 = vld [vmem:[%s18902_s4 + $0x188] sm:$0xff] }
  0x1b   :  { %10851 = vmatmul.mubr.msk.f32.gmra.mrb[2].mxu0 %vm104_vm0, %v65_v50  ;;  %11196 = vmatprep.subr.bf16.mxu1 %v13732_v46  ;;  %v319_v36 = vld [vmem:[%s18902_s4 + $0x170] sm:$0xff]  ;;  %v326_v39 = vld [vmem:[%s18902_s4 + $0x1a8] sm:$0xff]  ;;  %v324_v40 = vld [vmem:[%s18902_s4 + $0x198] sm:$0xff] }
  0x1c   :  { %10853 = vmatmul.mubr.msk.f32.gmra.mrb[2].mxu1 %vm104_vm0, %v65_v50  ;;  %11166 = vmatpush1.bf16.msra.mxu0 %v13748_v51  ;;  %v328_v41 = vld [vmem:[%s18902_s4 + $0x1b8] sm:$0xff] }
  0x1d   :  { %11198 = vmatpush1.bf16.msra.mxu1 %v13758_v54  ;;  %11168 = vmatprep.subr.bf16.mxu0 %v13760_v55 }
  0x1e   :  { %11200 = vmatprep.subr.bf16.mxu1 %v13773_v59  ;;  %401 = vmatprep.mubr.f32.mxu0 %v18923_v7 }
  0x1f   :  { %472 = vmatprep.mubr.f32.mxu1 %v18923_v7 }
  0x20   :  { %11170 = vmatpush1.bf16.msra.mxu0 %v13794_v1 }
  0x21   :  { %11202 = vmatpush1.bf16.msra.mxu1 %v13798_v2  ;;  %11172 = vmatprep.subr.bf16.mxu0 %v13800_v3 }
  0x22   :  { %11204 = vmatprep.subr.bf16.mxu1 %v13812_v8 }
  0x24   :  { %11174 = vmatpush1.bf16.msra.mxu0 %v13832_v14 }
  0x25   :  { %11206 = vmatpush1.bf16.msra.mxu1 %v13836_v15  ;;  %11176 = vmatprep.subr.bf16.mxu0 %v13838_v16 }
  0x26   :  { %11208 = vmatprep.subr.bf16.mxu1 %v13850_v20 }
  0x27   :  { %25 = vsyncpa [#allocation5], 0  ;;  %v13904_v43 = vpack.c.bf16 %v317_v32, %v313_v31  ;;  %v13908_v44 = vpack.c.bf16 %v319_v36, %v315_v33  ;;  %v13910_v45 = vpack.c.bf16 %v326_v39, %v322_v37  ;;  %v321_v47 = vld [vmem:[%s18902_s4 + $0x180] sm:$0xff]  ;;  %v323_v49 = vld [vmem:[%s18902_s4 + $0x190] sm:$0xff]  ;;  %v13922_v50 = vpack.c.bf16 %v328_v41, %v324_v40  ;;  %s18955_s2 = sld [smem:[#allocation33_spill]]  ;;  %s18956_s3 = sld [smem:[#allocation32_spill]] }
  0x28   :  { %11178 = vmatpush1.bf16.msra.mxu0 %v13868_v26  ;;  %v325_v48 = vld [vmem:[%s18902_s4 + $0x1a0] sm:$0xff]  ;;  %v327_v52 = vld [vmem:[%s18902_s4 + $0x1b0] sm:$0xff]  ;;  %v330_v53 = vld [vmem:[%s18902_s4 + $0x1c8] sm:$0xff]  ;;  %v84_v11 = vlaneseq  ;;  %vm579_vm3 = vcmask 517120   ;;  %vm581_vm4 = vcmask 1041920  }
  0x29   :  { %11210 = vmatpush1.bf16.msra.mxu1 %v13872_v27  ;;  %11180 = vmatprep.subr.bf16.mxu0 %v13874_v28  ;;  %v334_v56 = vld [vmem:[%s18902_s4 + $0x1e8] sm:$0xff]  ;;  %v332_v57 = vld [vmem:[%s18902_s4 + $0x1d8] sm:$0xff]  ;;  %v13940_v60 = vpack.c.bf16 %v325_v48, %v321_v47  ;;  %v13944_v61 = vpack.c.bf16 %v327_v52, %v323_v49  ;;  %v329_v63 = vld [vmem:[%s18902_s4 + $0x1c0] sm:$0xff] }
  0x2a   :  { %11212 = vmatprep.subr.bf16.mxu1 %v13886_v34  ;;  %v336_v58 = vld [vmem:[%s18902_s4 + $0x1f8] sm:$0xff]  ;;  %v13946_v62 = vpack.c.bf16 %v334_v56, %v330_v53  ;;  %v333_v0 = vld [vmem:[%s18902_s4 + $0x1e0] sm:$0xff]  ;;  %v331_v5 = vld [vmem:[%s18902_s4 + $0x1d0] sm:$0xff]  ;;  %v85_v12 = vshrl.u32 %v84_v11, 7 }
  0x2b   :  { %v13955_v4 = vpack.c.bf16 %v336_v58, %v332_v57  ;;  %v335_v6 = vld [vmem:[%s18902_s4 + $0x1f0] sm:$0xff]  ;;  %v13964_v9 = vpack.c.bf16 %v333_v0, %v329_v63  ;;  %v82_v17 = vld [vmem:[%s18903_s5] sm:$0xf]  ;;  %v13515_v57 = vmov 1983009808  }
  0x2c   :  { %11182 = vmatpush1.bf16.msra.mxu0 %v13904_v43  ;;  %v13968_v10 = vpack.c.bf16 %v335_v6, %v331_v5  ;;  %v14011_v13 = vsub.s32 0, %v85_v12  ;;  %v14016_v18 = vsub.s32 2, %v85_v12  ;;  %v14018_v19 = vsub.s32 1, %v85_v12 }
  0x2d   :  { %11214 = vmatpush1.bf16.msra.mxu1 %v13908_v44  ;;  %11184 = vmatprep.subr.bf16.mxu0 %v13910_v45  ;;  %v14020_v21 = vsub.s32 3, %v85_v12  ;;  %v494_v58 = vunpack.c.l.s4 %v13515_v57 }
  0x2e   :  { %11216 = vmatprep.subr.bf16.mxu1 %v13922_v50  ;;  %v87_v22 = vrot.slane %v82_v17, %v14011_v13 }
  0x2f   :  { %v99_v23 = vrot.slane %v82_v17, %v14020_v21  ;;  %v495_v63 = vunpack.c.0.s8 %v494_v58 }
  0x30   :  { %11186 = vmatpush1.bf16.msra.mxu0 %v13940_v60 }
  0x31   :  { %11218 = vmatpush1.bf16.msra.mxu1 %v13944_v61  ;;  %11188 = vmatprep.subr.bf16.mxu0 %v13946_v62 }
  0x32   :  { %11220 = vmatprep.subr.bf16.mxu1 %v13955_v4 }
  0x34   :  { %11190 = vmatpush1.bf16.msra.mxu0 %v13964_v9 }
  0x35   :  { %11222 = vmatpush1.bf16.msra.mxu1 %v13968_v10  ;;  %11224 = vmatprep.subr.bf16.mxu0 %v13683_v29 }
  0x36   :  { %11256 = vmatprep.subr.bf16.mxu1 %v13685_v30 }
  0x37   :  { %402 = vmatmul.mubr.f32.vlgmr.msra.gmra.mrb[4].mxu0 %v18923_v7 }
  0x38   :  { %473 = vmatmul.mubr.f32.vlgmr.msra.gmra.mrb[4].mxu1 %v18923_v7  ;;  %11226 = vmatpush1.bf16.msra.mxu0 %v13699_v35 }
  0x39   :  { %11258 = vmatpush1.bf16.msra.mxu1 %v13708_v38  ;;  %11228 = vmatprep.subr.bf16.mxu0 %v13720_v42 }
  0x3a   :  { %11260 = vmatprep.subr.bf16.mxu1 %v13732_v46  ;;  %711 = vmatprep.mubr.f32.mxu0 %v18923_v7 }
  0x3b   :  { %782 = vmatprep.mubr.f32.mxu1 %v18923_v7 }
  0x3c   :  { %11230 = vmatpush1.bf16.msra.mxu0 %v13748_v51 }
  0x3d   :  { %11262 = vmatpush1.bf16.msra.mxu1 %v13758_v54  ;;  %11232 = vmatprep.subr.bf16.mxu0 %v13760_v55 }
  0x3e   :  { %11264 = vmatprep.subr.bf16.mxu1 %v13773_v59 }
  0x40   :  { %11234 = vmatpush1.bf16.msra.mxu0 %v13794_v1 }
  0x41   :  { %11266 = vmatpush1.bf16.msra.mxu1 %v13798_v2  ;;  %11236 = vmatprep.subr.bf16.mxu0 %v13800_v3 }
  0x42   :  { %11268 = vmatprep.subr.bf16.mxu1 %v13812_v8 }
  0x44   :  { %11238 = vmatpush1.bf16.msra.mxu0 %v13832_v14 }
  0x45   :  { %11270 = vmatpush1.bf16.msra.mxu1 %v13836_v15  ;;  %11240 = vmatprep.subr.bf16.mxu0 %v13838_v16 }
  0x46   :  { %11272 = vmatprep.subr.bf16.mxu1 %v13850_v20 }
  0x48   :  { %11242 = vmatpush1.bf16.msra.mxu0 %v13868_v26 }
  0x49   :  { %11274 = vmatpush1.bf16.msra.mxu1 %v13872_v27  ;;  %11244 = vmatprep.subr.bf16.mxu0 %v13874_v28 }
  0x4a   :  { %11276 = vmatprep.subr.bf16.mxu1 %v13886_v34 }
  0x4c   :  { %11246 = vmatpush1.bf16.msra.mxu0 %v13904_v43 }
  0x4d   :  { %11278 = vmatpush1.bf16.msra.mxu1 %v13908_v44  ;;  %11248 = vmatprep.subr.bf16.mxu0 %v13910_v45 }
  0x4e   :  { %11280 = vmatprep.subr.bf16.mxu1 %v13922_v50 }
  0x50   :  { %11250 = vmatpush1.bf16.msra.mxu0 %v13940_v60 }
  0x51   :  { %11282 = vmatpush1.bf16.msra.mxu1 %v13944_v61  ;;  %11252 = vmatprep.subr.bf16.mxu0 %v13946_v62 }
  0x52   :  { %11284 = vmatprep.subr.bf16.mxu1 %v13955_v4 }
  0x54   :  { %11254 = vmatpush1.bf16.msra.mxu0 %v13964_v9 }
  0x55   :  { %11286 = vmatpush1.bf16.msra.mxu1 %v13968_v10  ;;  %11288 = vmatprep.subr.bf16.mxu0 %v13683_v29  ;;  %v95_v29 = vrot.slane %v82_v17, %v14016_v18 }
  0x56   :  { %11320 = vmatprep.subr.bf16.mxu1 %v13685_v30  ;;  %v91_v30 = vrot.slane %v82_v17, %v14018_v19  ;;  %v14026_v17 = vsub.s32 %v495_v63, %v85_v12 }
  0xea   :  { %v177_v24 = vpop.f32.mrb[0].mxu0 }
  0xeb   :  { %v178_v25 = vadd.f32 %v177_v24, %v87_v22  ;;  %v254_v31 = vpop.f32.mrb[0].mxu1  ;;  %v179_v32 = vpop.f32.mrb[1].mxu0 }
  0xec   :  { %v255_v33 = vadd.f32 %v254_v31, %v95_v29  ;;  %v180_v36 = vadd.f32 %v179_v32, %v91_v30  ;;  %v256_v37 = vpop.f32.mrb[1].mxu1 }
  0xed   :  { %265 = vst [vmem:[#allocation2] sm:$0xff] %v178_v25  ;;  %v257_v39 = vadd.f32 %v256_v37, %v99_v23 }
  0xee   :  { %267 = vst [vmem:[#allocation2 + $0x10] sm:$0xff] %v255_v33  ;;  %266 = vst [vmem:[#allocation2 + $0x8] sm:$0xff] %v180_v36  ;;  %v183_v40 = vpop.f32.mrb[2].mxu0 }
  0xef   :  { %268 = vst [vmem:[#allocation2 + $0x18] sm:$0xff] %v257_v39  ;;  %v184_v41 = vadd.f32 %v183_v40, %v87_v22  ;;  %v260_v47 = vpop.f32.mrb[2].mxu1  ;;  %v185_v48 = vpop.f32.mrb[3].mxu0 }
  0xf0   :  { %v261_v49 = vadd.f32 %v260_v47, %v95_v29  ;;  %v186_v52 = vadd.f32 %v185_v48, %v91_v30  ;;  %v262_v53 = vpop.f32.mrb[3].mxu1  ;;  %v14031_v29 = vld [vmem:[%s18955_s2] sm:$0xff] }
  0xf1   :  { %269 = vst [vmem:[#allocation2 + $0x20] sm:$0xff] %v184_v41  ;;  %v263_v56 = vadd.f32 %v262_v53, %v99_v23  ;;  %vm63_vm1 = vcmp.gt.f32.partialorder %v14031_v29, 0.5  ;;  %v8177_v29 = vld [vmem:[%s18956_s3 + $0xe] sm:$0x3] }
  0xf2   :  { %271 = vst [vmem:[#allocation2 + $0x30] sm:$0xff] %v261_v49  ;;  %270 = vst [vmem:[#allocation2 + $0x28] sm:$0xff] %v186_v52 }
  0xf3   :  { %272 = vst [vmem:[#allocation2 + $0x38] sm:$0xff] %v263_v56 }
  0xf5   :  { %v13202_v6 = vld [vmem:[#allocation2] ss:$8 sps:$4 sm:$0x33]  }
  0xf6   :  { %v13203_v11 = vld [vmem:[#allocation2 + $0x10] ss:$8 sps:$4 sm:$0x33]   ;;  %v499_v33 = vrot.slane %v13202_v6, %v14026_v17 }
  0xf7   :  { %v506_v36 = vrot.slane %v13203_v11, %v14026_v17 }
  0xf9   :  { %v13204_v0 = vld [vmem:[#allocation2 + $0x24] ss:$8 sps:$4 sm:$0xcc]   ;;  %v507_v41 = vcombine.low %v499_v33, %v506_v36 }
  0xfa   :  { %v13205_v5 = vld [vmem:[#allocation2 + $0x34] ss:$8 sps:$4 sm:$0xcc]   ;;  %v521_v30 = vrot.slane %v13204_v0, %v14026_v17  ;;  %v575_v0 = vld [vmem:[%s18956_s3] sm:$0x3] }
  0xfb   :  { %v528_v23 = vrot.slane %v13205_v5, %v14026_v17  ;;  %vm576_vm2 = vcmp.gt.f32.partialorder %v575_v0, 0.5  ;;  %v1203_v0 = vld [vmem:[%s18902_s4 + $0x10] sm:$0xff] }
  0xfd   :  { %v529_v39 = vcombine.high %v521_v30, %v528_v23 }
  0xff   :  { %v531_v48 = vsel %vm63_vm1, %v507_v41, %v529_v39 }
 0x10a   :  { %v403_v22 = vpop.f32.mrb[4].mxu0 }
 0x10b   :  { %v474_v24 = vpop.f32.mrb[4].mxu1  ;;  %v405_v25 = vpop.f32.mrb[5].mxu0 }
 0x10c   :  { %v536_v31 = vcombine.low %v403_v22, %v405_v25  ;;  %v476_v32 = vpop.f32.mrb[5].mxu1 }
 0x10d   :  { %v537_v12 = vcombine.low %v474_v24, %v476_v32 }
 0x10e   :  { %v544_v37 = vrot.slane %v536_v31, %v14026_v17 }
 0x10f   :  { %v551_v40 = vrot.slane %v537_v12, %v14026_v17 }
 0x111   :  { %v552_v47 = vcombine.low %v544_v37, %v551_v40 }
 0x113   :  { %v554_v49 = vadd.f32 %v552_v47, %v531_v48  ;;  %v1202_v47 = vld [vmem:[%s18902_s4 + $0x8] sm:$0xff] }
 0x114   :  { %v1206_v48 = vld [vmem:[%s18902_s4 + $0x28] sm:$0xff] }
 0x115   :  { %v10854_v52 = vmul.f32 -1.442695, %v554_v49  ;;  %v562_v57 = vrot.slane %v554_v49, 6  ;;  %v1204_v49 = vld [vmem:[%s18902_s4 + $0x18] sm:$0xff] }
 0x117   :  { %13298 = vpow2.f32 %v10854_v52  ;;  %v14118_v52 = vpack.c.bf16 %v1206_v48, %v1202_v47  ;;  %v1235_v47 = vld [vmem:[%s18902_s4 + $0x110] sm:$0xff] }
 0x121   :  { %v13299_v53 = vpop.eup %13298 }
 0x122   :  { %v558_v56 = vadd.f32 1.0, %v13299_v53  ;;  %v1208_v53 = vld [vmem:[%s18902_s4 + $0x38] sm:$0xff] }
 0x124   :  { %13300 = vrcp.f32 %v558_v56  ;;  %v1201_v56 = vld [vmem:[%s18902_s4] sm:$0xff] }
 0x125   :  { %13302 = vtanh.f32 %v562_v57  ;;  %v1205_v57 = vld [vmem:[%s18902_s4 + $0x20] sm:$0xff] }
 0x12e   :  { %v13301_v58 = vpop.eup %13300 }
 0x12f   :  { %v566_v63 = vrot.slane %v13301_v58, 2  ;;  %v13303_v5 = vpop.eup %13302  ;;  %v572_v23 = vrot.slane %v13301_v58, 4 }
 0x130   :  { %v569_v11 = vmul.f32 %v13303_v5, %v13301_v58  ;;  %v14129_v58 = vpack.c.bf16 %v1208_v53, %v1204_v49  ;;  %v1207_v5 = vld [vmem:[%s18902_s4 + $0x30] sm:$0xff]  ;;  %v1242_v53 = vld [vmem:[%s18902_s4 + $0x148] sm:$0xff] }
 0x131   :  { %v568_v6 = vmul.f32 0.0, %v566_v63  ;;  %v14131_v63 = vpack.c.bf16 %v1205_v57, %v1201_v56  ;;  %v1239_v49 = vld [vmem:[%s18902_s4 + $0x130] sm:$0xff]  ;;  %v1246_v56 = vld [vmem:[%s18902_s4 + $0x168] sm:$0xff]  ;;  %v1244_v57 = vld [vmem:[%s18902_s4 + $0x158] sm:$0xff] }
 0x133   :  { %v570_v22 = vadd.f32 %v569_v11, %v568_v6  ;;  %v1210_v6 = vld [vmem:[%s18902_s4 + $0x48] sm:$0xff]  ;;  %v14143_v11 = vpack.c.bf16 %v1207_v5, %v1203_v0  ;;  %v1248_v0 = vld [vmem:[%s18902_s4 + $0x178] sm:$0xff] }
 0x135   :  { %13304 = vtanh.f32 %v570_v22  ;;  %v14045_v30 = vsel %vm576_vm2, %v570_v22, 0.0  ;;  %v1214_v22 = vld [vmem:[%s18902_s4 + $0x68] sm:$0xff] }
 0x13f   :  { %v13305_v24 = vpop.eup %13304 }
 0x140   :  { %v574_v25 = vmul.f32 %v13305_v24, %v572_v23  ;;  %v1216_v23 = vld [vmem:[%s18902_s4 + $0x78] sm:$0xff]  ;;  %v14156_v24 = vpack.c.bf16 %v1214_v22, %v1210_v6  ;;  %v14296_v6 = vpack.c.bf16 %v1239_v49, %v1235_v47  ;;  %v14298_v22 = vpack.c.bf16 %v1246_v56, %v1242_v53  ;;  %v1263_v47 = vld [vmem:[%s18902_s4 + $0x1f0] sm:$0xff]  ;;  %v13212_v56 = vld [vmem:[#allocation2 + $0x20] ss:$8 sps:$4 sm:$0xcc]  }
 0x142   :  { %10855 = vmatmul.mubr.msk.f32.vlgmr.msra.gmra.mrb[6].mxu0 %vm576_vm2, %v574_v25  ;;  %10856 = vmatmul.mubr.msk.f32.vlgmr.msra.gmra.mrb[6].mxu1 %vm576_vm2, %v574_v25  ;;  %v14047_v31 = vsel %vm576_vm2, %v574_v25, 0.0 }
 0x143   :  { %11290 = vmatpush1.bf16.msra.mxu0 %v13699_v35  ;;  %11322 = vmatpush1.bf16.msra.mxu1 %v13708_v38  ;;  %580 = vst.msk [vmem:[#allocation3] sm:$0x3] %vm579_vm3, %v14047_v31  ;;  %v13208_v35 = vld [vmem:[#allocation2 + $0x24] ss:$8 sps:$4 sm:$0x33]  }
 0x144   :  { %582 = vst.msk [vmem:[#allocation3 + $0xe] sm:$0x3] %vm581_vm4, %v14047_v31  ;;  %11292 = vmatprep.subr.bf16.mxu0 %v13720_v42  ;;  %11324 = vmatprep.subr.bf16.mxu1 %v13732_v46  ;;  %v13209_v38 = vld [vmem:[#allocation2 + $0x34] ss:$8 sps:$4 sm:$0x33]  }
 0x145   :  { %1020 = vmatprep.mubr.f32.mxu0 %v18923_v7  ;;  %1091 = vmatprep.mubr.f32.mxu1 %v18923_v7  ;;  %v13206_v42 = vld [vmem:[#allocation2] ss:$8 sps:$4 sm:$0xcc]   ;;  %v13207_v46 = vld [vmem:[#allocation2 + $0x10] ss:$8 sps:$4 sm:$0xcc]  }
 0x147   :  { %11294 = vmatpush1.bf16.msra.mxu0 %v13748_v51  ;;  %11326 = vmatpush1.bf16.msra.mxu1 %v13758_v54  ;;  %v831_v51 = vrot.slane %v13208_v35, %v14026_v17  ;;  %v838_v54 = vrot.slane %v13209_v38, %v14026_v17  ;;  %v1213_v35 = vld [vmem:[%s18902_s4 + $0x60] sm:$0xff]  ;;  %v1211_v38 = vld [vmem:[%s18902_s4 + $0x50] sm:$0xff] }
 0x148   :  { %11296 = vmatprep.subr.bf16.mxu0 %v13760_v55  ;;  %11328 = vmatprep.subr.bf16.mxu1 %v13773_v59 }
 0x14b   :  { %11298 = vmatpush1.bf16.msra.mxu0 %v13794_v1  ;;  %11330 = vmatpush1.bf16.msra.mxu1 %v13798_v2 }
 0x14c   :  { %11300 = vmatprep.subr.bf16.mxu0 %v13800_v3  ;;  %11332 = vmatprep.subr.bf16.mxu1 %v13812_v8  ;;  %v809_v3 = vrot.slane %v13206_v42, %v14026_v17  ;;  %v816_v8 = vrot.slane %v13207_v46, %v14026_v17  ;;  %v1215_v46 = vld [vmem:[%s18902_s4 + $0x70] sm:$0xff] }
 0x14f   :  { %11302 = vmatpush1.bf16.msra.mxu0 %v13832_v14  ;;  %11334 = vmatpush1.bf16.msra.mxu1 %v13836_v15 }
 0x150   :  { %11304 = vmatprep.subr.bf16.mxu0 %v13838_v16  ;;  %11336 = vmatprep.subr.bf16.mxu1 %v13850_v20  ;;  %v839_v16 = vcombine.low %v831_v51, %v838_v54  ;;  %v1218_v51 = vld [vmem:[%s18902_s4 + $0x88] sm:$0xff] }
 0x151   :  { %v1222_v54 = vld [vmem:[%s18902_s4 + $0xa8] sm:$0xff] }
 0x153   :  { %11306 = vmatpush1.bf16.msra.mxu0 %v13868_v26  ;;  %11338 = vmatpush1.bf16.msra.mxu1 %v13872_v27  ;;  %v817_v27 = vcombine.high %v809_v3, %v816_v8  ;;  %v1217_v3 = vld [vmem:[%s18902_s4 + $0x80] sm:$0xff] }
 0x154   :  { %11308 = vmatprep.subr.bf16.mxu0 %v13874_v28  ;;  %11340 = vmatprep.subr.bf16.mxu1 %v13886_v34 }
 0x155   :  { %v841_v34 = vsel %vm63_vm1, %v817_v27, %v839_v16  ;;  %v1223_v16 = vld [vmem:[%s18902_s4 + $0xb0] sm:$0xff]  ;;  %v1230_v27 = vld [vmem:[%s18902_s4 + $0xe8] sm:$0xff] }
 0x157   :  { %11310 = vmatpush1.bf16.msra.mxu0 %v13904_v43  ;;  %11342 = vmatpush1.bf16.msra.mxu1 %v13908_v44 }
 0x158   :  { %11312 = vmatprep.subr.bf16.mxu0 %v13910_v45  ;;  %11344 = vmatprep.subr.bf16.mxu1 %v13922_v50 }
 0x15b   :  { %11314 = vmatpush1.bf16.msra.mxu0 %v13940_v60  ;;  %11346 = vmatpush1.bf16.msra.mxu1 %v13944_v61 }
 0x15c   :  { %11316 = vmatprep.subr.bf16.mxu0 %v13946_v62  ;;  %11348 = vmatprep.subr.bf16.mxu1 %v13955_v4  ;;  %v885_v4 = vld [vmem:[%s18956_s3 + $0x2] sm:$0x3] }
 0x15d   :  { %vm886_vm5 = vcmp.gt.f32.partialorder %v885_v4, 0.5  ;;  %v1234_v4 = vld [vmem:[%s18902_s4 + $0x108] sm:$0xff] }
 0x15f   :  { %11318 = vmatpush1.bf16.msra.mxu0 %v13964_v9  ;;  %11350 = vmatpush1.bf16.msra.mxu1 %v13968_v10 }
 0x160   :  { %11352 = vmatprep.subr.bf16.mxu0 %v14118_v52  ;;  %11384 = vmatprep.subr.bf16.mxu1 %v14129_v58 }
 0x215   :  { %v713_v55 = vpop.f32.mrb[6].mxu0  ;;  %v784_v59 = vpop.f32.mrb[6].mxu1 }
 0x216   :  { %v715_v1 = vpop.f32.mrb[7].mxu0  ;;  %v786_v2 = vpop.f32.mrb[7].mxu1 }
 0x217   :  { %v846_v14 = vcombine.low %v713_v55, %v715_v1  ;;  %v847_v15 = vcombine.low %v784_v59, %v786_v2  ;;  %v14183_v55 = vpack.c.bf16 %v1215_v46, %v1211_v38  ;;  %v14185_v59 = vpack.c.bf16 %v1222_v54, %v1218_v51  ;;  %v1220_v1 = vld [vmem:[%s18902_s4 + $0x98] sm:$0xff]  ;;  %v1247_v38 = vld [vmem:[%s18902_s4 + $0x170] sm:$0xff]  ;;  %v1250_v46 = vld [vmem:[%s18902_s4 + $0x188] sm:$0xff] }
 0x218   :  { %v1224_v2 = vld [vmem:[%s18902_s4 + $0xb8] sm:$0xff]  ;;  %v1254_v51 = vld [vmem:[%s18902_s4 + $0x1a8] sm:$0xff] }
 0x219   :  { %v854_v20 = vrot.slane %v846_v14, %v14026_v17  ;;  %v861_v26 = vrot.slane %v847_v15, %v14026_v17  ;;  %v14196_v8 = vpack.c.bf16 %v1224_v2, %v1220_v1  ;;  %v1221_v14 = vld [vmem:[%s18902_s4 + $0xa0] sm:$0xff]  ;;  %v1219_v15 = vld [vmem:[%s18902_s4 + $0x90] sm:$0xff]  ;;  %v1252_v54 = vld [vmem:[%s18902_s4 + $0x198] sm:$0xff] }
 0x21a   :  { %v1256_v1 = vld [vmem:[%s18902_s4 + $0x1b8] sm:$0xff] }
 0x21b   :  { %v862_v28 = vcombine.low %v854_v20, %v861_v26  ;;  %v14208_v20 = vpack.c.bf16 %v1221_v14, %v1217_v3  ;;  %v1226_v26 = vld [vmem:[%s18902_s4 + $0xc8] sm:$0xff]  ;;  %v14334_v14 = vpack.c.bf16 %v1254_v51, %v1250_v46 }
 0x21d   :  { %v864_v43 = vadd.f32 %v862_v28, %v841_v34  ;;  %v1228_v28 = vld [vmem:[%s18902_s4 + $0xd8] sm:$0xff]  ;;  %v14221_v34 = vpack.c.bf16 %v1223_v16, %v1219_v15  ;;  %v1249_v15 = vld [vmem:[%s18902_s4 + $0x180] sm:$0xff] }
 0x21e   :  { %v1253_v16 = vld [vmem:[%s18902_s4 + $0x1a0] sm:$0xff] }
 0x21f   :  { %v10857_v44 = vmul.f32 -1.442695, %v864_v43  ;;  %v872_v60 = vrot.slane %v864_v43, 6  ;;  %v14223_v43 = vpack.c.bf16 %v1230_v27, %v1226_v26  ;;  %v1251_v26 = vld [vmem:[%s18902_s4 + $0x190] sm:$0xff]  ;;  %v14346_v27 = vpack.c.bf16 %v1256_v1, %v1252_v54 }
 0x221   :  { %13306 = vpow2.f32 %v10857_v44  ;;  %v1232_v44 = vld [vmem:[%s18902_s4 + $0xf8] sm:$0xff] }
 0x22b   :  { %v13307_v45 = vpop.eup %13306 }
 0x22c   :  { %v868_v50 = vadd.f32 1.0, %v13307_v45  ;;  %v1225_v45 = vld [vmem:[%s18902_s4 + $0xc0] sm:$0xff] }
 0x22e   :  { %13308 = vrcp.f32 %v868_v50  ;;  %v1229_v50 = vld [vmem:[%s18902_s4 + $0xe0] sm:$0xff] }
 0x22f   :  { %13310 = vtanh.f32 %v872_v60  ;;  %v14235_v60 = vpack.c.bf16 %v1232_v44, %v1228_v28  ;;  %v1255_v28 = vld [vmem:[%s18902_s4 + $0x1b0] sm:$0xff]  ;;  %v1258_v44 = vld [vmem:[%s18902_s4 + $0x1c8] sm:$0xff] }
 0x238   :  { %v13309_v61 = vpop.eup %13308 }
 0x239   :  { %v876_v62 = vrot.slane %v13309_v61, 2  ;;  %v13311_v9 = vpop.eup %13310  ;;  %v882_v12 = vrot.slane %v13309_v61, 4 }
 0x23a   :  { %v879_v32 = vmul.f32 %v13311_v9, %v13309_v61  ;;  %v1227_v61 = vld [vmem:[%s18902_s4 + $0xd0] sm:$0xff]  ;;  %v1238_v9 = vld [vmem:[%s18902_s4 + $0x128] sm:$0xff] }
 0x23b   :  { %v878_v10 = vmul.f32 %v876_v62, %v14045_v30  ;;  %v1231_v62 = vld [vmem:[%s18902_s4 + $0xf0] sm:$0xff] }
 0x23d   :  { %v880_v33 = vadd.f32 %v879_v32, %v878_v10  ;;  %v1236_v10 = vld [vmem:[%s18902_s4 + $0x118] sm:$0xff] }
 0x23e   :  { %v1240_v32 = vld [vmem:[%s18902_s4 + $0x138] sm:$0xff] }
 0x23f   :  { %13312 = vtanh.f32 %v880_v33  ;;  %v14098_v36 = vsel %vm886_vm5, %v880_v33, %v14045_v30  ;;  %v1212_v30 = vld [vmem:[%s18902_s4 + $0x58] sm:$0xff]  ;;  %v14256_v33 = vpack.c.bf16 %v1229_v50, %v1225_v45  ;;  %v14274_v48 = vpack.c.bf16 %v1240_v32, %v1236_v10  ;;  %v1262_v45 = vld [vmem:[%s18902_s4 + $0x1e8] sm:$0xff]  ;;  %v1257_v10 = vld [vmem:[%s18902_s4 + $0x1c0] sm:$0xff] }
 0x240   :  { %v14158_v25 = vpack.c.bf16 %v1216_v23, %v1212_v30  ;;  %v1241_v30 = vld [vmem:[%s18902_s4 + $0x140] sm:$0xff]  ;;  %v1260_v50 = vld [vmem:[%s18902_s4 + $0x1d8] sm:$0xff] }
 0x241   :  { %v1245_v23 = vld [vmem:[%s18902_s4 + $0x160] sm:$0xff] }
 0x242   :  { %v14328_v2 = vpack.c.bf16 %v1245_v23, %v1241_v30  ;;  %v1261_v32 = vld [vmem:[%s18902_s4 + $0x1e0] sm:$0xff]  ;;  %v13211_v30 = vld [vmem:[#allocation2 + $0x14] ss:$8 sps:$4 sm:$0x33]   ;;  %v1140_v23 = vrot.slane %v13212_v56, %v14026_v17 }
 0x243   :  { %v14388_v49 = vpack.c.bf16 %v1261_v32, %v1257_v10 }
 0x249   :  { %v13313_v37 = vpop.eup %13312 }
 0x24a   :  { %v884_v39 = vmul.f32 %v13313_v37, %v882_v12  ;;  %v14260_v12 = vpack.c.bf16 %v1231_v62, %v1227_v61  ;;  %v14262_v37 = vpack.c.bf16 %v1238_v9, %v1234_v4  ;;  %v1264_v61 = vld [vmem:[%s18902_s4 + $0x1f8] sm:$0xff]  ;;  %v14364_v62 = vpack.c.bf16 %v1253_v16, %v1249_v15 }
 0x24b   :  { %v14368_v4 = vpack.c.bf16 %v1255_v28, %v1251_v26  ;;  %v14370_v9 = vpack.c.bf16 %v1262_v45, %v1258_v44  ;;  %v1125_v15 = vrot.slane %v13211_v30, %v14026_v17 }
 0x24c   :  { %v14101_v40 = vsel %vm886_vm5, %v884_v39, %v14047_v31  ;;  %v889_v41 = vsel %vm886_vm5, %v884_v39, 0.0  ;;  %v1209_v31 = vld [vmem:[%s18902_s4 + $0x40] sm:$0xff] }
 0x24d   :  { %890 = vst.msk [vmem:[#allocation3 + $0x2] sm:$0x3] %vm579_vm3, %v889_v41  ;;  %1021 = vmatmul.mubr.f32.vlgmr.msra.gmra.mrb[8].mxu0 %v14101_v40  ;;  %1092 = vmatmul.mubr.f32.vlgmr.msra.gmra.mrb[8].mxu1 %v14101_v40  ;;  %v14170_v42 = vpack.c.bf16 %v1213_v35, %v1209_v31  ;;  %v1233_v39 = vld [vmem:[%s18902_s4 + $0x100] sm:$0xff]  ;;  %v1243_v31 = vld [vmem:[%s18902_s4 + $0x150] sm:$0xff]  ;;  %v14310_v35 = vpack.c.bf16 %v1248_v0, %v1244_v57 }
 0x24e   :  { %891 = vst.msk [vmem:[#allocation3 + $0xc] sm:$0x3] %vm581_vm4, %v889_v41  ;;  %1329 = vmatprep.mubr.f32.mxu0 %v18923_v7  ;;  %1400 = vmatprep.mubr.f32.mxu1 %v18923_v7  ;;  %v1237_v41 = vld [vmem:[%s18902_s4 + $0x120] sm:$0xff]  ;;  %v14332_v3 = vpack.c.bf16 %v1247_v38, %v1243_v31  ;;  %v13213_v57 = vld [vmem:[#allocation2 + $0x30] ss:$8 sps:$4 sm:$0xcc]  }
 0x24f   :  { %11354 = vmatpush1.bf16.msra.mxu0 %v14131_v63  ;;  %11386 = vmatpush1.bf16.msra.mxu1 %v14143_v11  ;;  %v14292_v5 = vpack.c.bf16 %v1237_v41, %v1233_v39  ;;  %v14379_v39 = vpack.c.bf16 %v1264_v61, %v1260_v50  ;;  %v1259_v41 = vld [vmem:[%s18902_s4 + $0x1d0] sm:$0xff]  ;;  %v13210_v0 = vld [vmem:[#allocation2 + $0x4] ss:$8 sps:$4 sm:$0x33]   ;;  %v1147_v31 = vrot.slane %v13213_v57, %v14026_v17 }
 0x250   :  { %11356 = vmatprep.subr.bf16.mxu0 %v14156_v24  ;;  %11388 = vmatprep.subr.bf16.mxu1 %v14158_v25  ;;  %v14392_v53 = vpack.c.bf16 %v1263_v47, %v1259_v41  ;;  %v1118_v1 = vrot.slane %v13210_v0, %v14026_v17 }
 0x251   :  { %v1148_v28 = vcombine.high %v1140_v23, %v1147_v31  ;;  %v1194_v23 = vld [vmem:[%s18956_s3 + $0x4] sm:$0x3] }
 0x252   :  { %v1126_v50 = vcombine.low %v1118_v1, %v1125_v15  ;;  %vm1195_vm6 = vcmp.gt.f32.partialorder %v1194_v23, 0.5 }
 0x253   :  { %11358 = vmatpush1.bf16.msra.mxu0 %v14170_v42  ;;  %11390 = vmatpush1.bf16.msra.mxu1 %v14183_v55 }
 0x254   :  { %11360 = vmatprep.subr.bf16.mxu0 %v14185_v59  ;;  %11392 = vmatprep.subr.bf16.mxu1 %v14196_v8  ;;  %v1150_v10 = vsel %vm63_vm1, %v1126_v50, %v1148_v28 }
 0x257   :  { %11362 = vmatpush1.bf16.msra.mxu0 %v14208_v20  ;;  %11394 = vmatpush1.bf16.msra.mxu1 %v14221_v34 }
 0x258   :  { %11364 = vmatprep.subr.bf16.mxu0 %v14223_v43  ;;  %11396 = vmatprep.subr.bf16.mxu1 %v14235_v60 }
 0x25b   :  { %11366 = vmatpush1.bf16.msra.mxu0 %v14256_v33  ;;  %11398 = vmatpush1.bf16.msra.mxu1 %v14260_v12 }
 0x25c   :  { %11368 = vmatprep.subr.bf16.mxu0 %v14262_v37  ;;  %11400 = vmatprep.subr.bf16.mxu1 %v14274_v48 }
 0x25f   :  { %11370 = vmatpush1.bf16.msra.mxu0 %v14292_v5  ;;  %11402 = vmatpush1.bf16.msra.mxu1 %v14296_v6 }
 0x260   :  { %11372 = vmatprep.subr.bf16.mxu0 %v14298_v22  ;;  %11404 = vmatprep.subr.bf16.mxu1 %v14310_v35 }
 0x263   :  { %11374 = vmatpush1.bf16.msra.mxu0 %v14328_v2  ;;  %11406 = vmatpush1.bf16.msra.mxu1 %v14332_v3 }
 0x264   :  { %11376 = vmatprep.subr.bf16.mxu0 %v14334_v14  ;;  %11408 = vmatprep.subr.bf16.mxu1 %v14346_v27 }
 0x267   :  { %11378 = vmatpush1.bf16.msra.mxu0 %v14364_v62  ;;  %11410 = vmatpush1.bf16.msra.mxu1 %v14368_v4 }
 0x268   :  { %11380 = vmatprep.subr.bf16.mxu0 %v14370_v9  ;;  %11412 = vmatprep.subr.bf16.mxu1 %v14379_v39 }
 0x26b   :  { %11382 = vmatpush1.bf16.msra.mxu0 %v14388_v49  ;;  %11414 = vmatpush1.bf16.msra.mxu1 %v14392_v53 }
 0x26c   :  { %11416 = vmatprep.subr.bf16.mxu0 %v14118_v52  ;;  %11448 = vmatprep.subr.bf16.mxu1 %v14129_v58 }
 0x320   :  { %v1022_v38 = vpop.f32.mrb[8].mxu0  ;;  %v1093_v46 = vpop.f32.mrb[8].mxu1 }
 0x321   :  { %v1024_v51 = vpop.f32.mrb[9].mxu0  ;;  %v1095_v54 = vpop.f32.mrb[9].mxu1 }
 0x322   :  { %v1155_v16 = vcombine.low %v1022_v38, %v1024_v51  ;;  %v1156_v26 = vcombine.low %v1093_v46, %v1095_v54 }
 0x324   :  { %v1163_v44 = vrot.slane %v1155_v16, %v14026_v17  ;;  %v1170_v45 = vrot.slane %v1156_v26, %v14026_v17 }
 0x326   :  { %v1171_v61 = vcombine.low %v1163_v44, %v1170_v45  ;;  %v13214_v44 = vld [vmem:[#allocation2 + $0x4] ss:$8 sps:$4 sm:$0xcc]   ;;  %v13215_v45 = vld [vmem:[#allocation2 + $0x14] ss:$8 sps:$4 sm:$0xcc]  }
 0x328   :  { %v1173_v32 = vadd.f32 %v1171_v61, %v1150_v10 }
 0x32a   :  { %v10858_v41 = vmul.f32 -1.442695, %v1173_v32  ;;  %v1181_v57 = vrot.slane %v1173_v32, 6 }
 0x32c   :  { %13314 = vpow2.f32 %v10858_v41 }
 0x336   :  { %v13315_v47 = vpop.eup %13314 }
 0x337   :  { %v1177_v56 = vadd.f32 1.0, %v13315_v47 }
 0x339   :  { %13316 = vrcp.f32 %v1177_v56  ;;  %v1427_v56 = vrot.slane %v13214_v44, %v14026_v17  ;;  %v1503_v44 = vld [vmem:[%s18956_s3 + $0x6] sm:$0x3] }
 0x33a   :  { %13318 = vtanh.f32 %v1181_v57  ;;  %v1434_v57 = vrot.slane %v13215_v45, %v14026_v17  ;;  %vm1504_vm7 = vcmp.gt.f32.partialorder %v1503_v44, 0.5 }
 0x343   :  { %v13317_v0 = vpop.eup %13316 }
 0x344   :  { %v1185_v30 = vrot.slane %v13317_v0, 2  ;;  %v13319_v31 = vpop.eup %13318  ;;  %v1191_v1 = vrot.slane %v13317_v0, 4 }
 0x345   :  { %v1188_v46 = vmul.f32 %v13319_v31, %v13317_v0  ;;  %v1435_v31 = vcombine.high %v1427_v56, %v1434_v57 }
 0x346   :  { %v1187_v38 = vmul.f32 %v1185_v30, %v14098_v36 }
 0x348   :  { %v1189_v51 = vadd.f32 %v1188_v46, %v1187_v38 }
 0x34a   :  { %13320 = vtanh.f32 %v1189_v51  ;;  %v14412_v54 = vsel %vm1195_vm6, %v1189_v51, %v14098_v36  ;;  %v13216_v36 = vld [vmem:[#allocation2 + $0x20] ss:$8 sps:$4 sm:$0x33]  }
 0x34b   :  { %v1449_v50 = vrot.slane %v13216_v36, %v14026_v17 }
 0x354   :  { %v13321_v15 = vpop.eup %13320 }
 0x355   :  { %v1193_v16 = vmul.f32 %v13321_v15, %v1191_v1 }
 0x357   :  { %v14415_v26 = vsel %vm1195_vm6, %v1193_v16, %v14101_v40  ;;  %v1198_v28 = vsel %vm1195_vm6, %v1193_v16, 0.0  ;;  %v13217_v40 = vld [vmem:[#allocation2 + $0x30] ss:$8 sps:$4 sm:$0x33]  }
 0x358   :  { %1199 = vst.msk [vmem:[#allocation3 + $0x4] sm:$0x3] %vm579_vm3, %v1198_v28  ;;  %1330 = vmatmul.mubr.f32.vlgmr.msra.gmra.mrb[10].mxu0 %v14415_v26  ;;  %1401 = vmatmul.mubr.f32.vlgmr.msra.gmra.mrb[10].mxu1 %v14415_v26  ;;  %v1456_v61 = vrot.slane %v13217_v40, %v14026_v17 }
 0x359   :  { %1200 = vst.msk [vmem:[#allocation3 + $0xa] sm:$0x3] %vm581_vm4, %v1198_v28  ;;  %11418 = vmatpush1.bf16.msra.mxu0 %v14131_v63  ;;  %11450 = vmatpush1.bf16.msra.mxu1 %v14143_v11 }
 0x35a   :  { %11420 = vmatprep.subr.bf16.mxu0 %v14156_v24  ;;  %11452 = vmatprep.subr.bf16.mxu1 %v14158_v25  ;;  %v1457_v30 = vcombine.low %v1449_v50, %v1456_v61 }
 0x35b   :  { %1638 = vmatprep.mubr.f32.mxu0 %v18923_v7  ;;  %1709 = vmatprep.mubr.f32.mxu1 %v18923_v7 }
 0x35c   :  { %v1459_v46 = vsel %vm63_vm1, %v1435_v31, %v1457_v30 }
 0x35d   :  { %11422 = vmatpush1.bf16.msra.mxu0 %v14170_v42  ;;  %11454 = vmatpush1.bf16.msra.mxu1 %v14183_v55 }
 0x35e   :  { %11424 = vmatprep.subr.bf16.mxu0 %v14185_v59  ;;  %11456 = vmatprep.subr.bf16.mxu1 %v14196_v8 }
 0x361   :  { %11426 = vmatpush1.bf16.msra.mxu0 %v14208_v20  ;;  %11458 = vmatpush1.bf16.msra.mxu1 %v14221_v34 }
 0x362   :  { %11428 = vmatprep.subr.bf16.mxu0 %v14223_v43  ;;  %11460 = vmatprep.subr.bf16.mxu1 %v14235_v60 }
 0x365   :  { %11430 = vmatpush1.bf16.msra.mxu0 %v14256_v33  ;;  %11462 = vmatpush1.bf16.msra.mxu1 %v14260_v12 }
 0x366   :  { %11432 = vmatprep.subr.bf16.mxu0 %v14262_v37  ;;  %11464 = vmatprep.subr.bf16.mxu1 %v14274_v48 }
 0x369   :  { %11434 = vmatpush1.bf16.msra.mxu0 %v14292_v5  ;;  %11466 = vmatpush1.bf16.msra.mxu1 %v14296_v6 }
 0x36a   :  { %11436 = vmatprep.subr.bf16.mxu0 %v14298_v22  ;;  %11468 = vmatprep.subr.bf16.mxu1 %v14310_v35 }
 0x36d   :  { %11438 = vmatpush1.bf16.msra.mxu0 %v14328_v2  ;;  %11470 = vmatpush1.bf16.msra.mxu1 %v14332_v3 }
 0x36e   :  { %11440 = vmatprep.subr.bf16.mxu0 %v14334_v14  ;;  %11472 = vmatprep.subr.bf16.mxu1 %v14346_v27 }
 0x371   :  { %11442 = vmatpush1.bf16.msra.mxu0 %v14364_v62  ;;  %11474 = vmatpush1.bf16.msra.mxu1 %v14368_v4 }
 0x372   :  { %11444 = vmatprep.subr.bf16.mxu0 %v14370_v9  ;;  %11476 = vmatprep.subr.bf16.mxu1 %v14379_v39 }
 0x375   :  { %11446 = vmatpush1.bf16.msra.mxu0 %v14388_v49  ;;  %11478 = vmatpush1.bf16.msra.mxu1 %v14392_v53 }
 0x376   :  { %11480 = vmatprep.subr.bf16.mxu0 %v14118_v52  ;;  %11512 = vmatprep.subr.bf16.mxu1 %v14129_v58 }
 0x42b   :  { %v1331_v10 = vpop.f32.mrb[10].mxu0  ;;  %v1402_v32 = vpop.f32.mrb[10].mxu1 }
 0x42c   :  { %v1333_v41 = vpop.f32.mrb[11].mxu0  ;;  %v1404_v47 = vpop.f32.mrb[11].mxu1 }
 0x42d   :  { %v1464_v0 = vcombine.low %v1331_v10, %v1333_v41  ;;  %v1465_v52 = vcombine.low %v1402_v32, %v1404_v47 }
 0x42f   :  { %v1472_v58 = vrot.slane %v1464_v0, %v14026_v17  ;;  %v1479_v23 = vrot.slane %v1465_v52, %v14026_v17 }
 0x431   :  { %v1480_v38 = vcombine.low %v1472_v58, %v1479_v23 }
 0x433   :  { %v1482_v51 = vadd.f32 %v1480_v38, %v1459_v46  ;;  %v2129_v46 = vld [vmem:[%s18902_s4 + $0x8] sm:$0xff] }
 0x435   :  { %v10859_v1 = vmul.f32 -1.442695, %v1482_v51  ;;  %v1490_v28 = vrot.slane %v1482_v51, 6  ;;  %v2133_v51 = vld [vmem:[%s18902_s4 + $0x28] sm:$0xff] }
 0x437   :  { %13322 = vpow2.f32 %v10859_v1  ;;  %v2131_v1 = vld [vmem:[%s18902_s4 + $0x18] sm:$0xff] }
 0x441   :  { %v13323_v15 = vpop.eup %13322 }
 0x442   :  { %v1486_v16 = vadd.f32 1.0, %v13323_v15  ;;  %v14542_v15 = vpack.c.bf16 %v2133_v51, %v2129_v46  ;;  %v2162_v46 = vld [vmem:[%s18902_s4 + $0x110] sm:$0xff] }
 0x444   :  { %13324 = vrcp.f32 %v1486_v16  ;;  %v2135_v16 = vld [vmem:[%s18902_s4 + $0x38] sm:$0xff] }
 0x445   :  { %13326 = vtanh.f32 %v1490_v28  ;;  %v2128_v28 = vld [vmem:[%s18902_s4] sm:$0xff] }
 0x44e   :  { %v13325_v36 = vpop.eup %13324 }
 0x44f   :  { %v1494_v40 = vrot.slane %v13325_v36, 2  ;;  %v13327_v45 = vpop.eup %13326  ;;  %v1500_v41 = vrot.slane %v13325_v36, 4 }
 0x450   :  { %v1497_v61 = vmul.f32 %v13327_v45, %v13325_v36  ;;  %v2132_v36 = vld [vmem:[%s18902_s4 + $0x20] sm:$0xff]  ;;  %v2130_v45 = vld [vmem:[%s18902_s4 + $0x10] sm:$0xff] }
 0x451   :  { %v1496_v50 = vmul.f32 %v1494_v40, %v14412_v54  ;;  %v14553_v40 = vpack.c.bf16 %v2135_v16, %v2131_v1  ;;  %v14555_v44 = vpack.c.bf16 %v2132_v36, %v2128_v28  ;;  %v2166_v1 = vld [vmem:[%s18902_s4 + $0x130] sm:$0xff]  ;;  %v2169_v16 = vld [vmem:[%s18902_s4 + $0x148] sm:$0xff]  ;;  %v2171_v36 = vld [vmem:[%s18902_s4 + $0x158] sm:$0xff] }
 0x452   :  { %v2173_v28 = vld [vmem:[%s18902_s4 + $0x168] sm:$0xff] }
 0x453   :  { %v1498_v10 = vadd.f32 %v1497_v61, %v1496_v50  ;;  %v2134_v50 = vld [vmem:[%s18902_s4 + $0x30] sm:$0xff]  ;;  %v2137_v61 = vld [vmem:[%s18902_s4 + $0x48] sm:$0xff] }
 0x455   :  { %13328 = vtanh.f32 %v1498_v10  ;;  %v14468_v32 = vsel %vm1504_vm7, %v1498_v10, %v14412_v54  ;;  %v14567_v10 = vpack.c.bf16 %v2134_v50, %v2130_v45  ;;  %v2175_v45 = vld [vmem:[%s18902_s4 + $0x178] sm:$0xff] }
 0x45f   :  { %v13329_v47 = vpop.eup %13328 }
 0x460   :  { %v1502_v56 = vmul.f32 %v13329_v47, %v1500_v41  ;;  %v2139_v41 = vld [vmem:[%s18902_s4 + $0x58] sm:$0xff] }
 0x461   :  { %v2143_v47 = vld [vmem:[%s18902_s4 + $0x78] sm:$0xff] }
 0x462   :  { %v14471_v57 = vsel %vm1504_vm7, %v1502_v56, %v14415_v26  ;;  %v1507_v0 = vsel %vm1504_vm7, %v1502_v56, 0.0 }
 0x463   :  { %1508 = vst.msk [vmem:[#allocation3 + $0x6] sm:$0x3] %vm579_vm3, %v1507_v0  ;;  %1639 = vmatmul.mubr.f32.vlgmr.msra.gmra.mrb[12].mxu0 %v14471_v57  ;;  %1710 = vmatmul.mubr.f32.vlgmr.msra.gmra.mrb[12].mxu1 %v14471_v57 }
 0x464   :  { %1509 = vst.msk [vmem:[#allocation3 + $0x8] sm:$0x3] %vm581_vm4, %v1507_v0  ;;  %11482 = vmatpush1.bf16.msra.mxu0 %v14131_v63  ;;  %11514 = vmatpush1.bf16.msra.mxu1 %v14143_v11  ;;  %v13218_v63 = vld [vmem:[#allocation2 + $0x20] ss:$8 sps:$4 sm:$0x33]  }
 0x465   :  { %11484 = vmatprep.subr.bf16.mxu0 %v14156_v24  ;;  %11516 = vmatprep.subr.bf16.mxu1 %v14158_v25  ;;  %v13219_v11 = vld [vmem:[#allocation2 + $0x30] ss:$8 sps:$4 sm:$0x33]   ;;  %v13220_v24 = vld [vmem:[#allocation2 + $0x4] ss:$8 sps:$4 sm:$0xcc]  }
 0x466   :  { %1947 = vmatprep.mubr.f32.mxu0 %v18923_v7  ;;  %2018 = vmatprep.mubr.f32.mxu1 %v18923_v7  ;;  %v13221_v25 = vld [vmem:[#allocation2 + $0x14] ss:$8 sps:$4 sm:$0xcc]   ;;  %v2136_v0 = vld [vmem:[%s18902_s4 + $0x40] sm:$0xff] }
 0x468   :  { %11486 = vmatpush1.bf16.msra.mxu0 %v14170_v42  ;;  %11518 = vmatpush1.bf16.msra.mxu1 %v14183_v55  ;;  %v1736_v42 = vrot.slane %v13218_v63, %v14026_v17  ;;  %v1743_v55 = vrot.slane %v13219_v11, %v14026_v17  ;;  %v2140_v63 = vld [vmem:[%s18902_s4 + $0x60] sm:$0xff]  ;;  %v2138_v11 = vld [vmem:[%s18902_s4 + $0x50] sm:$0xff] }
 0x469   :  { %11488 = vmatprep.subr.bf16.mxu0 %v14185_v59  ;;  %11520 = vmatprep.subr.bf16.mxu1 %v14196_v8 }
 0x46c   :  { %11490 = vmatpush1.bf16.msra.mxu0 %v14208_v20  ;;  %11522 = vmatpush1.bf16.msra.mxu1 %v14221_v34 }
 0x46d   :  { %11492 = vmatprep.subr.bf16.mxu0 %v14223_v43  ;;  %11524 = vmatprep.subr.bf16.mxu1 %v14235_v60  ;;  %v1758_v43 = vrot.slane %v13220_v24, %v14026_v17  ;;  %v1765_v60 = vrot.slane %v13221_v25, %v14026_v17  ;;  %v14594_v24 = vpack.c.bf16 %v2140_v63, %v2136_v0  ;;  %v2142_v25 = vld [vmem:[%s18902_s4 + $0x70] sm:$0xff] }
 0x46e   :  { %v2170_v0 = vld [vmem:[%s18902_s4 + $0x150] sm:$0xff]  ;;  %v14734_v63 = vpack.c.bf16 %v2175_v45, %v2171_v36  ;;  %v13224_v45 = vld [vmem:[#allocation2 + $0x4] ss:$8 sps:$4 sm:$0x33]  }
 0x46f   :  { %v13223_v36 = vld [vmem:[#allocation2 + $0x30] ss:$8 sps:$4 sm:$0xcc]  }
 0x470   :  { %11494 = vmatpush1.bf16.msra.mxu0 %v14256_v33  ;;  %11526 = vmatpush1.bf16.msra.mxu1 %v14260_v12 }
 0x471   :  { %11496 = vmatprep.subr.bf16.mxu0 %v14262_v37  ;;  %11528 = vmatprep.subr.bf16.mxu1 %v14274_v48  ;;  %v1744_v37 = vcombine.low %v1736_v42, %v1743_v55  ;;  %v2145_v42 = vld [vmem:[%s18902_s4 + $0x88] sm:$0xff] }
 0x472   :  { %v2149_v55 = vld [vmem:[%s18902_s4 + $0xa8] sm:$0xff] }
 0x474   :  { %11498 = vmatpush1.bf16.msra.mxu0 %v14292_v5  ;;  %11530 = vmatpush1.bf16.msra.mxu1 %v14296_v6  ;;  %v1766_v6 = vcombine.high %v1758_v43, %v1765_v60  ;;  %v2144_v43 = vld [vmem:[%s18902_s4 + $0x80] sm:$0xff] }
 0x475   :  { %11500 = vmatprep.subr.bf16.mxu0 %v14298_v22  ;;  %11532 = vmatprep.subr.bf16.mxu1 %v14310_v35 }
 0x476   :  { %v1768_v35 = vsel %vm63_vm1, %v1744_v37, %v1766_v6  ;;  %v2150_v37 = vld [vmem:[%s18902_s4 + $0xb0] sm:$0xff]  ;;  %v2157_v6 = vld [vmem:[%s18902_s4 + $0xe8] sm:$0xff] }
 0x478   :  { %11502 = vmatpush1.bf16.msra.mxu0 %v14328_v2  ;;  %11534 = vmatpush1.bf16.msra.mxu1 %v14332_v3 }
 0x479   :  { %11504 = vmatprep.subr.bf16.mxu0 %v14334_v14  ;;  %11536 = vmatprep.subr.bf16.mxu1 %v14346_v27 }
 0x47c   :  { %11506 = vmatpush1.bf16.msra.mxu0 %v14364_v62  ;;  %11538 = vmatpush1.bf16.msra.mxu1 %v14368_v4 }
 0x47d   :  { %11508 = vmatprep.subr.bf16.mxu0 %v14370_v9  ;;  %11540 = vmatprep.subr.bf16.mxu1 %v14379_v39  ;;  %v1812_v39 = vld [vmem:[%s18956_s3 + $0x8] sm:$0x3] }
 0x47e   :  { %vm1813_vm8 = vcmp.gt.f32.partialorder %v1812_v39, 0.5  ;;  %v2161_v39 = vld [vmem:[%s18902_s4 + $0x108] sm:$0xff] }
 0x480   :  { %11510 = vmatpush1.bf16.msra.mxu0 %v14388_v49  ;;  %11542 = vmatpush1.bf16.msra.mxu1 %v14392_v53 }
 0x481   :  { %11544 = vmatprep.subr.bf16.mxu0 %v14542_v15  ;;  %11576 = vmatprep.subr.bf16.mxu1 %v14553_v40 }
 0x536   :  { %v1640_v59 = vpop.f32.mrb[12].mxu0  ;;  %v1711_v8 = vpop.f32.mrb[12].mxu1 }
 0x537   :  { %v1642_v20 = vpop.f32.mrb[13].mxu0  ;;  %v1713_v34 = vpop.f32.mrb[13].mxu1 }
 0x538   :  { %v1773_v33 = vcombine.low %v1640_v59, %v1642_v20  ;;  %v1774_v12 = vcombine.low %v1711_v8, %v1713_v34  ;;  %v14607_v59 = vpack.c.bf16 %v2142_v25, %v2138_v11  ;;  %v14609_v8 = vpack.c.bf16 %v2149_v55, %v2145_v42  ;;  %v2147_v20 = vld [vmem:[%s18902_s4 + $0x98] sm:$0xff]  ;;  %v2174_v11 = vld [vmem:[%s18902_s4 + $0x170] sm:$0xff]  ;;  %v2177_v25 = vld [vmem:[%s18902_s4 + $0x188] sm:$0xff] }
 0x539   :  { %v2151_v34 = vld [vmem:[%s18902_s4 + $0xb8] sm:$0xff]  ;;  %v2181_v42 = vld [vmem:[%s18902_s4 + $0x1a8] sm:$0xff] }
 0x53a   :  { %v1781_v48 = vrot.slane %v1773_v33, %v14026_v17  ;;  %v1788_v5 = vrot.slane %v1774_v12, %v14026_v17  ;;  %v14620_v60 = vpack.c.bf16 %v2151_v34, %v2147_v20  ;;  %v2148_v33 = vld [vmem:[%s18902_s4 + $0xa0] sm:$0xff]  ;;  %v2146_v12 = vld [vmem:[%s18902_s4 + $0x90] sm:$0xff]  ;;  %v2179_v55 = vld [vmem:[%s18902_s4 + $0x198] sm:$0xff] }
 0x53b   :  { %v2183_v20 = vld [vmem:[%s18902_s4 + $0x1b8] sm:$0xff] }
 0x53c   :  { %v1789_v22 = vcombine.low %v1781_v48, %v1788_v5  ;;  %v14632_v48 = vpack.c.bf16 %v2148_v33, %v2144_v43  ;;  %v2153_v5 = vld [vmem:[%s18902_s4 + $0xc8] sm:$0xff]  ;;  %v14756_v43 = vpack.c.bf16 %v2174_v11, %v2170_v0  ;;  %v14758_v33 = vpack.c.bf16 %v2181_v42, %v2177_v25 }
 0x53d   :  { %v2052_v0 = vrot.slane %v13223_v36, %v14026_v17 }
 0x53e   :  { %v1791_v2 = vadd.f32 %v1789_v22, %v1768_v35  ;;  %v2155_v22 = vld [vmem:[%s18902_s4 + $0xd8] sm:$0xff]  ;;  %v14645_v35 = vpack.c.bf16 %v2150_v37, %v2146_v12  ;;  %v2176_v12 = vld [vmem:[%s18902_s4 + $0x180] sm:$0xff] }
 0x53f   :  { %v2180_v37 = vld [vmem:[%s18902_s4 + $0x1a0] sm:$0xff] }
 0x540   :  { %v10860_v3 = vmul.f32 -1.442695, %v1791_v2  ;;  %v1799_v62 = vrot.slane %v1791_v2, 6  ;;  %v14647_v2 = vpack.c.bf16 %v2157_v6, %v2153_v5  ;;  %v2178_v5 = vld [vmem:[%s18902_s4 + $0x190] sm:$0xff]  ;;  %v14770_v6 = vpack.c.bf16 %v2183_v20, %v2179_v55 }
 0x541   :  { %v2067_v20 = vrot.slane %v13224_v45, %v14026_v17  ;;  %v2121_v45 = vld [vmem:[%s18956_s3 + $0xa] sm:$0x3] }
 0x542   :  { %13330 = vpow2.f32 %v10860_v3  ;;  %v2159_v3 = vld [vmem:[%s18902_s4 + $0xf8] sm:$0xff]  ;;  %vm2122_vm9 = vcmp.gt.f32.partialorder %v2121_v45, 0.5 }
 0x54c   :  { %v13331_v14 = vpop.eup %13330 }
 0x54d   :  { %v1795_v27 = vadd.f32 1.0, %v13331_v14  ;;  %v2152_v14 = vld [vmem:[%s18902_s4 + $0xc0] sm:$0xff] }
 0x54f   :  { %13332 = vrcp.f32 %v1795_v27  ;;  %v2156_v27 = vld [vmem:[%s18902_s4 + $0xe0] sm:$0xff] }
 0x550   :  { %13334 = vtanh.f32 %v1799_v62  ;;  %v14659_v62 = vpack.c.bf16 %v2159_v3, %v2155_v22  ;;  %v2182_v22 = vld [vmem:[%s18902_s4 + $0x1b0] sm:$0xff]  ;;  %v2185_v3 = vld [vmem:[%s18902_s4 + $0x1c8] sm:$0xff] }
 0x559   :  { %v13333_v4 = vpop.eup %13332 }
 0x55a   :  { %v1803_v9 = vrot.slane %v13333_v4, 2  ;;  %v13335_v49 = vpop.eup %13334  ;;  %v1809_v30 = vrot.slane %v13333_v4, 4 }
 0x55b   :  { %v1806_v54 = vmul.f32 %v13335_v49, %v13333_v4  ;;  %v2154_v4 = vld [vmem:[%s18902_s4 + $0xd0] sm:$0xff]  ;;  %v2165_v49 = vld [vmem:[%s18902_s4 + $0x128] sm:$0xff] }
 0x55c   :  { %v1805_v53 = vmul.f32 %v1803_v9, %v14468_v32  ;;  %v2158_v9 = vld [vmem:[%s18902_s4 + $0xf0] sm:$0xff] }
 0x55e   :  { %v1807_v26 = vadd.f32 %v1806_v54, %v1805_v53  ;;  %v2163_v53 = vld [vmem:[%s18902_s4 + $0x118] sm:$0xff] }
 0x55f   :  { %v2167_v54 = vld [vmem:[%s18902_s4 + $0x138] sm:$0xff] }
 0x560   :  { %13336 = vtanh.f32 %v1807_v26  ;;  %v14522_v52 = vsel %vm1813_vm8, %v1807_v26, %v14468_v32  ;;  %v2141_v32 = vld [vmem:[%s18902_s4 + $0x68] sm:$0xff]  ;;  %v14680_v26 = vpack.c.bf16 %v2156_v27, %v2152_v14  ;;  %v14698_v51 = vpack.c.bf16 %v2167_v54, %v2163_v53  ;;  %v2187_v27 = vld [vmem:[%s18902_s4 + $0x1d8] sm:$0xff]  ;;  %v2184_v53 = vld [vmem:[%s18902_s4 + $0x1c0] sm:$0xff] }
 0x561   :  { %v14580_v56 = vpack.c.bf16 %v2141_v32, %v2137_v61  ;;  %v14720_v61 = vpack.c.bf16 %v2166_v1, %v2162_v46  ;;  %v14722_v32 = vpack.c.bf16 %v2173_v28, %v2169_v16  ;;  %v2189_v14 = vld [vmem:[%s18902_s4 + $0x1e8] sm:$0xff]  ;;  %v2188_v54 = vld [vmem:[%s18902_s4 + $0x1e0] sm:$0xff]  ;;  %v2190_v46 = vld [vmem:[%s18902_s4 + $0x1f0] sm:$0xff] }
 0x562   :  { %v14812_v1 = vpack.c.bf16 %v2188_v54, %v2184_v53  ;;  %v13222_v28 = vld [vmem:[#allocation2 + $0x20] ss:$8 sps:$4 sm:$0xcc]  }
 0x56a   :  { %v13337_v58 = vpop.eup %13336 }
 0x56b   :  { %v1811_v23 = vmul.f32 %v13337_v58, %v1809_v30  ;;  %v14684_v30 = vpack.c.bf16 %v2158_v9, %v2154_v4  ;;  %v14686_v58 = vpack.c.bf16 %v2165_v49, %v2161_v39  ;;  %v2191_v4 = vld [vmem:[%s18902_s4 + $0x1f8] sm:$0xff]  ;;  %v14788_v9 = vpack.c.bf16 %v2180_v37, %v2176_v12 }
 0x56c   :  { %v14792_v39 = vpack.c.bf16 %v2182_v22, %v2178_v5  ;;  %v14794_v49 = vpack.c.bf16 %v2189_v14, %v2185_v3 }
 0x56d   :  { %v14525_v31 = vsel %vm1813_vm8, %v1811_v23, %v14471_v57  ;;  %v1816_v38 = vsel %vm1813_vm8, %v1811_v23, 0.0  ;;  %v14582_v57 = vpack.c.bf16 %v2143_v47, %v2139_v41  ;;  %v2160_v23 = vld [vmem:[%s18902_s4 + $0x100] sm:$0xff] }
 0x56e   :  { %1817 = vst.msk [vmem:[#allocation3 + $0x8] sm:$0x3] %vm579_vm3, %v1816_v38  ;;  %1948 = vmatmul.mubr.f32.vlgmr.msra.gmra.mrb[14].mxu0 %v14525_v31  ;;  %2019 = vmatmul.mubr.f32.vlgmr.msra.gmra.mrb[14].mxu1 %v14525_v31  ;;  %v2168_v41 = vld [vmem:[%s18902_s4 + $0x140] sm:$0xff] }
 0x56f   :  { %1818 = vst.msk [vmem:[#allocation3 + $0x6] sm:$0x3] %vm581_vm4, %v1816_v38  ;;  %2256 = vmatprep.mubr.f32.mxu0 %v18923_v7  ;;  %2327 = vmatprep.mubr.f32.mxu1 %v18923_v7  ;;  %v2164_v38 = vld [vmem:[%s18902_s4 + $0x120] sm:$0xff] }
 0x570   :  { %11546 = vmatpush1.bf16.msra.mxu0 %v14555_v44  ;;  %11578 = vmatpush1.bf16.msra.mxu1 %v14567_v10  ;;  %v14716_v50 = vpack.c.bf16 %v2164_v38, %v2160_v23  ;;  %v2172_v47 = vld [vmem:[%s18902_s4 + $0x160] sm:$0xff]  ;;  %v14803_v23 = vpack.c.bf16 %v2191_v4, %v2187_v27  ;;  %v2186_v38 = vld [vmem:[%s18902_s4 + $0x1d0] sm:$0xff] }
 0x571   :  { %11548 = vmatprep.subr.bf16.mxu0 %v14580_v56  ;;  %11580 = vmatprep.subr.bf16.mxu1 %v14582_v57  ;;  %v14752_v34 = vpack.c.bf16 %v2172_v47, %v2168_v41  ;;  %v14816_v16 = vpack.c.bf16 %v2190_v46, %v2186_v38  ;;  %v13225_v41 = vld [vmem:[#allocation2 + $0x14] ss:$8 sps:$4 sm:$0x33]   ;;  %v2045_v47 = vrot.slane %v13222_v28, %v14026_v17 }
 0x572   :  { %v2074_v12 = vrot.slane %v13225_v41, %v14026_v17 }
 0x573   :  { %v2053_v5 = vcombine.high %v2045_v47, %v2052_v0 }
 0x574   :  { %11550 = vmatpush1.bf16.msra.mxu0 %v14594_v24  ;;  %11582 = vmatpush1.bf16.msra.mxu1 %v14607_v59  ;;  %v2075_v3 = vcombine.low %v2067_v20, %v2074_v12 }
 0x575   :  { %11552 = vmatprep.subr.bf16.mxu0 %v14609_v8  ;;  %11584 = vmatprep.subr.bf16.mxu1 %v14620_v60 }
 0x576   :  { %v2077_v27 = vsel %vm63_vm1, %v2053_v5, %v2075_v3 }
 0x578   :  { %11554 = vmatpush1.bf16.msra.mxu0 %v14632_v48  ;;  %11586 = vmatpush1.bf16.msra.mxu1 %v14645_v35 }
 0x579   :  { %11556 = vmatprep.subr.bf16.mxu0 %v14647_v2  ;;  %11588 = vmatprep.subr.bf16.mxu1 %v14659_v62 }
 0x57c   :  { %11558 = vmatpush1.bf16.msra.mxu0 %v14680_v26  ;;  %11590 = vmatpush1.bf16.msra.mxu1 %v14684_v30 }
 0x57d   :  { %11560 = vmatprep.subr.bf16.mxu0 %v14686_v58  ;;  %11592 = vmatprep.subr.bf16.mxu1 %v14698_v51 }
 0x580   :  { %11562 = vmatpush1.bf16.msra.mxu0 %v14716_v50  ;;  %11594 = vmatpush1.bf16.msra.mxu1 %v14720_v61 }
 0x581   :  { %11564 = vmatprep.subr.bf16.mxu0 %v14722_v32  ;;  %11596 = vmatprep.subr.bf16.mxu1 %v14734_v63 }
 0x584   :  { %11566 = vmatpush1.bf16.msra.mxu0 %v14752_v34  ;;  %11598 = vmatpush1.bf16.msra.mxu1 %v14756_v43 }
 0x585   :  { %11568 = vmatprep.subr.bf16.mxu0 %v14758_v33  ;;  %11600 = vmatprep.subr.bf16.mxu1 %v14770_v6 }
 0x588   :  { %11570 = vmatpush1.bf16.msra.mxu0 %v14788_v9  ;;  %11602 = vmatpush1.bf16.msra.mxu1 %v14792_v39 }
 0x589   :  { %11572 = vmatprep.subr.bf16.mxu0 %v14794_v49  ;;  %11604 = vmatprep.subr.bf16.mxu1 %v14803_v23 }
 0x58c   :  { %11574 = vmatpush1.bf16.msra.mxu0 %v14812_v1  ;;  %11606 = vmatpush1.bf16.msra.mxu1 %v14816_v16 }
 0x58d   :  { %11608 = vmatprep.subr.bf16.mxu0 %v14542_v15  ;;  %11640 = vmatprep.subr.bf16.mxu1 %v14553_v40 }
 0x641   :  { %v1949_v11 = vpop.f32.mrb[14].mxu0  ;;  %v2020_v25 = vpop.f32.mrb[14].mxu1 }
 0x642   :  { %v1951_v42 = vpop.f32.mrb[15].mxu0  ;;  %v2022_v55 = vpop.f32.mrb[15].mxu1 }
 0x643   :  { %v2082_v37 = vcombine.low %v1949_v11, %v1951_v42  ;;  %v2083_v15 = vcombine.low %v2020_v25, %v2022_v55 }
 0x645   :  { %v2090_v40 = vrot.slane %v2082_v37, %v14026_v17  ;;  %v2097_v22 = vrot.slane %v2083_v15, %v14026_v17 }
 0x647   :  { %v2098_v14 = vcombine.low %v2090_v40, %v2097_v22 }
 0x649   :  { %v2100_v4 = vadd.f32 %v2098_v14, %v2077_v27  ;;  %v2747_v27 = vld [vmem:[%s18904_s6 + $0x8] sm:$0xff] }
 0x64b   :  { %v10861_v53 = vmul.f32 -1.442695, %v2100_v4  ;;  %v2108_v46 = vrot.slane %v2100_v4, 6  ;;  %v2751_v4 = vld [vmem:[%s18904_s6 + $0x28] sm:$0xff] }
 0x64d   :  { %13338 = vpow2.f32 %v10861_v53  ;;  %v2749_v53 = vld [vmem:[%s18904_s6 + $0x18] sm:$0xff] }
 0x657   :  { %v13339_v54 = vpop.eup %13338 }
 0x658   :  { %v2104_v38 = vadd.f32 1.0, %v13339_v54  ;;  %v11671_v54 = vpack.c.bf16 %v2751_v4, %v2747_v27  ;;  %v2784_v4 = vld [vmem:[%s18904_s6 + $0x130] sm:$0xff] }
 0x65a   :  { %13340 = vrcp.f32 %v2104_v38  ;;  %v2753_v38 = vld [vmem:[%s18904_s6 + $0x38] sm:$0xff] }
 0x65b   :  { %13342 = vtanh.f32 %v2108_v46  ;;  %v2746_v46 = vld [vmem:[%s18904_s6] sm:$0xff] }
 0x664   :  { %v13341_v28 = vpop.eup %13340 }
 0x665   :  { %v2112_v36 = vrot.slane %v13341_v28, 2  ;;  %v13343_v41 = vpop.eup %13342  ;;  %v2118_v42 = vrot.slane %v13341_v28, 4 }
 0x666   :  { %v2115_v0 = vmul.f32 %v13343_v41, %v13341_v28  ;;  %v2750_v28 = vld [vmem:[%s18904_s6 + $0x20] sm:$0xff]  ;;  %v2748_v41 = vld [vmem:[%s18904_s6 + $0x10] sm:$0xff] }
 0x667   :  { %v2114_v47 = vmul.f32 %v2112_v36, %v14522_v52  ;;  %v11703_v36 = vpack.c.bf16 %v2753_v38, %v2749_v53  ;;  %v11673_v45 = vpack.c.bf16 %v2750_v28, %v2746_v46  ;;  %v2787_v53 = vld [vmem:[%s18904_s6 + $0x148] sm:$0xff]  ;;  %v2789_v38 = vld [vmem:[%s18904_s6 + $0x158] sm:$0xff] }
 0x668   :  { %v2793_v46 = vld [vmem:[%s18904_s6 + $0x178] sm:$0xff] }
 0x669   :  { %v2116_v11 = vadd.f32 %v2115_v0, %v2114_v47  ;;  %v2752_v47 = vld [vmem:[%s18904_s6 + $0x30] sm:$0xff]  ;;  %v2755_v0 = vld [vmem:[%s18904_s6 + $0x48] sm:$0xff] }
 0x66b   :  { %13344 = vtanh.f32 %v2116_v11  ;;  %v14836_v25 = vsel %vm2122_vm9, %v2116_v11, %v14522_v52  ;;  %v13226_v52 = vld [vmem:[#allocation2 + $0x24] ss:$8 sps:$4 sm:$0x33]   ;;  %v11705_v11 = vpack.c.bf16 %v2752_v47, %v2748_v41 }
 0x66c   :  { %v2786_v41 = vld [vmem:[%s18904_s6 + $0x140] sm:$0xff] }
 0x66d   :  { %v2790_v47 = vld [vmem:[%s18904_s6 + $0x160] sm:$0xff] }
 0x675   :  { %v13345_v55 = vpop.eup %13344 }
 0x676   :  { %v2120_v20 = vmul.f32 %v13345_v55, %v2118_v42  ;;  %v2757_v42 = vld [vmem:[%s18904_s6 + $0x58] sm:$0xff] }
 0x677   :  { %v2761_v55 = vld [vmem:[%s18904_s6 + $0x78] sm:$0xff] }
 0x678   :  { %v14839_v12 = vsel %vm2122_vm9, %v2120_v20, %v14525_v31  ;;  %v2125_v37 = vsel %vm2122_vm9, %v2120_v20, 0.0  ;;  %v13227_v31 = vld [vmem:[#allocation2 + $0x34] ss:$8 sps:$4 sm:$0x33]  }
 0x679   :  { %2126 = vst.msk [vmem:[#allocation3 + $0xa] sm:$0x3] %vm579_vm3, %v2125_v37  ;;  %2257 = vmatmul.mubr.f32.vlgmr.msra.gmra.mrb[16].mxu0 %v14839_v12  ;;  %2328 = vmatmul.mubr.f32.vlgmr.msra.gmra.mrb[16].mxu1 %v14839_v12 }
 0x67a   :  { %2127 = vst.msk [vmem:[#allocation3 + $0x4] sm:$0x3] %vm581_vm4, %v2125_v37  ;;  %11610 = vmatpush1.bf16.msra.mxu0 %v14555_v44  ;;  %11642 = vmatpush1.bf16.msra.mxu1 %v14567_v10  ;;  %v13228_v44 = vld [vmem:[#allocation2] ss:$8 sps:$4 sm:$0xcc]  }
 0x67b   :  { %11612 = vmatprep.subr.bf16.mxu0 %v14580_v56  ;;  %11644 = vmatprep.subr.bf16.mxu1 %v14582_v57  ;;  %v13229_v10 = vld [vmem:[#allocation2 + $0x10] ss:$8 sps:$4 sm:$0xcc]   ;;  %v2354_v56 = vrot.slane %v13226_v52, %v14026_v17  ;;  %v2361_v57 = vrot.slane %v13227_v31, %v14026_v17  ;;  %v2754_v37 = vld [vmem:[%s18904_s6 + $0x40] sm:$0xff] }
 0x67c   :  { %2565 = vmatprep.mubr.f32.mxu0 %v18923_v7  ;;  %2636 = vmatprep.mubr.f32.mxu1 %v18923_v7  ;;  %v2758_v52 = vld [vmem:[%s18904_s6 + $0x60] sm:$0xff]  ;;  %v2756_v31 = vld [vmem:[%s18904_s6 + $0x50] sm:$0xff] }
 0x67e   :  { %11614 = vmatpush1.bf16.msra.mxu0 %v14594_v24  ;;  %11646 = vmatpush1.bf16.msra.mxu1 %v14607_v59 }
 0x67f   :  { %11616 = vmatprep.subr.bf16.mxu0 %v14609_v8  ;;  %11648 = vmatprep.subr.bf16.mxu1 %v14620_v60 }
 0x682   :  { %11618 = vmatpush1.bf16.msra.mxu0 %v14632_v48  ;;  %11650 = vmatpush1.bf16.msra.mxu1 %v14645_v35  ;;  %v2376_v48 = vrot.slane %v13228_v44, %v14026_v17  ;;  %v2383_v35 = vrot.slane %v13229_v10, %v14026_v17  ;;  %v11677_v44 = vpack.c.bf16 %v2758_v52, %v2754_v37  ;;  %v2760_v10 = vld [vmem:[%s18904_s6 + $0x70] sm:$0xff] }
 0x683   :  { %11620 = vmatprep.subr.bf16.mxu0 %v14647_v2  ;;  %11652 = vmatprep.subr.bf16.mxu1 %v14659_v62  ;;  %v11693_v37 = vpack.c.bf16 %v2790_v47, %v2786_v41 }
 0x686   :  { %11622 = vmatpush1.bf16.msra.mxu0 %v14680_v26  ;;  %11654 = vmatpush1.bf16.msra.mxu1 %v14684_v30  ;;  %v2362_v26 = vcombine.low %v2354_v56, %v2361_v57  ;;  %v2763_v56 = vld [vmem:[%s18904_s6 + $0x88] sm:$0xff] }
 0x687   :  { %11624 = vmatprep.subr.bf16.mxu0 %v14686_v58  ;;  %11656 = vmatprep.subr.bf16.mxu1 %v14698_v51  ;;  %v2384_v51 = vcombine.high %v2376_v48, %v2383_v35  ;;  %v2767_v57 = vld [vmem:[%s18904_s6 + $0xa8] sm:$0xff]  ;;  %v2762_v48 = vld [vmem:[%s18904_s6 + $0x80] sm:$0xff] }
 0x68a   :  { %11626 = vmatpush1.bf16.msra.mxu0 %v14716_v50  ;;  %11658 = vmatpush1.bf16.msra.mxu1 %v14720_v61  ;;  %v2386_v61 = vsel %vm63_vm1, %v2362_v26, %v2384_v51  ;;  %v2768_v26 = vld [vmem:[%s18904_s6 + $0xb0] sm:$0xff]  ;;  %v2775_v51 = vld [vmem:[%s18904_s6 + $0xe8] sm:$0xff] }
 0x68b   :  { %11628 = vmatprep.subr.bf16.mxu0 %v14722_v32  ;;  %11660 = vmatprep.subr.bf16.mxu1 %v14734_v63 }
 0x68e   :  { %11630 = vmatpush1.bf16.msra.mxu0 %v14752_v34  ;;  %11662 = vmatpush1.bf16.msra.mxu1 %v14756_v43 }
 0x68f   :  { %11632 = vmatprep.subr.bf16.mxu0 %v14758_v33  ;;  %11664 = vmatprep.subr.bf16.mxu1 %v14770_v6 }
 0x692   :  { %11634 = vmatpush1.bf16.msra.mxu0 %v14788_v9  ;;  %11666 = vmatpush1.bf16.msra.mxu1 %v14792_v39  ;;  %v2430_v39 = vld [vmem:[%s18956_s3 + $0xc] sm:$0x3] }
 0x693   :  { %11636 = vmatprep.subr.bf16.mxu0 %v14794_v49  ;;  %11668 = vmatprep.subr.bf16.mxu1 %v14803_v23  ;;  %vm2431_vm10 = vcmp.gt.f32.partialorder %v2430_v39, 0.5  ;;  %v2779_v39 = vld [vmem:[%s18904_s6 + $0x108] sm:$0xff] }
 0x696   :  { %11638 = vmatpush1.bf16.msra.mxu0 %v14812_v1  ;;  %11670 = vmatpush1.bf16.msra.mxu1 %v14816_v16 }
 0x697   :  { %11672 = vmatprep.subr.bf16.mxu0 %v11671_v54  ;;  %11704 = vmatprep.subr.bf16.mxu1 %v11703_v36  ;;  %v2791_v54 = vld [vmem:[%s18904_s6 + $0x168] sm:$0xff] }
 0x74c   :  { %v2258_v24 = vpop.f32.mrb[16].mxu0  ;;  %v2329_v59 = vpop.f32.mrb[16].mxu1 }
 0x74d   :  { %v2260_v8 = vpop.f32.mrb[17].mxu0  ;;  %v2331_v60 = vpop.f32.mrb[17].mxu1 }
 0x74e   :  { %v2391_v2 = vcombine.low %v2258_v24, %v2260_v8  ;;  %v2392_v62 = vcombine.low %v2329_v59, %v2331_v60  ;;  %v11709_v24 = vpack.c.bf16 %v2760_v10, %v2756_v31  ;;  %v11679_v59 = vpack.c.bf16 %v2767_v57, %v2763_v56  ;;  %v2765_v8 = vld [vmem:[%s18904_s6 + $0x98] sm:$0xff]  ;;  %v2798_v10 = vld [vmem:[%s18904_s6 + $0x1a0] sm:$0xff]  ;;  %v2796_v56 = vld [vmem:[%s18904_s6 + $0x190] sm:$0xff] }
 0x74f   :  { %v2769_v60 = vld [vmem:[%s18904_s6 + $0xb8] sm:$0xff] }
 0x750   :  { %v2399_v30 = vrot.slane %v2391_v2, %v14026_v17  ;;  %v2406_v58 = vrot.slane %v2392_v62, %v14026_v17  ;;  %v11711_v35 = vpack.c.bf16 %v2769_v60, %v2765_v8  ;;  %v2766_v2 = vld [vmem:[%s18904_s6 + $0xa0] sm:$0xff]  ;;  %v2764_v62 = vld [vmem:[%s18904_s6 + $0x90] sm:$0xff]  ;;  %v2807_v8 = vld [vmem:[%s18904_s6 + $0x1e8] sm:$0xff] }
 0x751   :  { %v2805_v60 = vld [vmem:[%s18904_s6 + $0x1d8] sm:$0xff] }
 0x752   :  { %v2407_v50 = vcombine.low %v2399_v30, %v2406_v58  ;;  %v11681_v30 = vpack.c.bf16 %v2766_v2, %v2762_v48  ;;  %v2771_v58 = vld [vmem:[%s18904_s6 + $0xc8] sm:$0xff]  ;;  %v2809_v48 = vld [vmem:[%s18904_s6 + $0x1f8] sm:$0xff] }
 0x754   :  { %v2409_v32 = vadd.f32 %v2407_v50, %v2386_v61  ;;  %v2773_v50 = vld [vmem:[%s18904_s6 + $0xd8] sm:$0xff]  ;;  %v11713_v61 = vpack.c.bf16 %v2768_v26, %v2764_v62  ;;  %v2802_v26 = vld [vmem:[%s18904_s6 + $0x1c0] sm:$0xff] }
 0x756   :  { %v10862_v63 = vmul.f32 -1.442695, %v2409_v32  ;;  %v2417_v33 = vrot.slane %v2409_v32, 6  ;;  %v11683_v32 = vpack.c.bf16 %v2775_v51, %v2771_v58  ;;  %v2804_v58 = vld [vmem:[%s18904_s6 + $0x1d0] sm:$0xff]  ;;  %v11731_v51 = vpack.c.bf16 %v2809_v48, %v2805_v60  ;;  %v3003_v48 = vld [vmem:[%s18905_s7 + $0x48] sm:$0xff] }
 0x757   :  { %v3000_v60 = vld [vmem:[%s18905_s7 + $0x30] sm:$0xff] }
 0x758   :  { %13346 = vpow2.f32 %v10862_v63  ;;  %v2777_v63 = vld [vmem:[%s18904_s6 + $0xf8] sm:$0xff] }
 0x762   :  { %v13347_v34 = vpop.eup %13346 }
 0x763   :  { %v2413_v43 = vadd.f32 1.0, %v13347_v34  ;;  %v2770_v34 = vld [vmem:[%s18904_s6 + $0xc0] sm:$0xff] }
 0x765   :  { %13348 = vrcp.f32 %v2413_v43  ;;  %v2774_v43 = vld [vmem:[%s18904_s6 + $0xe0] sm:$0xff] }
 0x766   :  { %13350 = vtanh.f32 %v2417_v33  ;;  %v11715_v33 = vpack.c.bf16 %v2777_v63, %v2773_v50  ;;  %v2808_v50 = vld [vmem:[%s18904_s6 + $0x1f0] sm:$0xff]  ;;  %v2997_v63 = vld [vmem:[%s18905_s7 + $0x18] sm:$0xff] }
 0x76f   :  { %v13349_v6 = vpop.eup %13348 }
 0x770   :  { %v2421_v9 = vrot.slane %v13349_v6, 2  ;;  %v13351_v49 = vpop.eup %13350  ;;  %v2427_v5 = vrot.slane %v13349_v6, 4 }
 0x771   :  { %v2424_v1 = vmul.f32 %v13351_v49, %v13349_v6  ;;  %v2772_v6 = vld [vmem:[%s18904_s6 + $0xd0] sm:$0xff]  ;;  %v2783_v49 = vld [vmem:[%s18904_s6 + $0x128] sm:$0xff] }
 0x772   :  { %v2423_v23 = vmul.f32 %v2421_v9, %v14836_v25  ;;  %v2776_v9 = vld [vmem:[%s18904_s6 + $0xf0] sm:$0xff] }
 0x774   :  { %v2425_v16 = vadd.f32 %v2424_v1, %v2423_v23  ;;  %v2781_v23 = vld [vmem:[%s18904_s6 + $0x118] sm:$0xff] }
 0x775   :  { %v2785_v1 = vld [vmem:[%s18904_s6 + $0x138] sm:$0xff] }
 0x776   :  { %13352 = vtanh.f32 %v2425_v16  ;;  %v14890_v15 = vsel %vm2431_vm10, %v2425_v16, %v14836_v25  ;;  %v2759_v25 = vld [vmem:[%s18904_s6 + $0x68] sm:$0xff]  ;;  %v11685_v16 = vpack.c.bf16 %v2774_v43, %v2770_v34  ;;  %v11719_v27 = vpack.c.bf16 %v2785_v1, %v2781_v23  ;;  %v3001_v34 = vld [vmem:[%s18905_s7 + $0x38] sm:$0xff] }
 0x777   :  { %v11675_v20 = vpack.c.bf16 %v2759_v25, %v2755_v0  ;;  %v2788_v0 = vld [vmem:[%s18904_s6 + $0x150] sm:$0xff]  ;;  %v13232_v23 = vld [vmem:[#allocation2] ss:$8 sps:$4 sm:$0x33]  }
 0x778   :  { %v2792_v25 = vld [vmem:[%s18904_s6 + $0x170] sm:$0xff] }
 0x779   :  { %v11725_v52 = vpack.c.bf16 %v2792_v25, %v2788_v0  ;;  %v13233_v1 = vld [vmem:[#allocation2 + $0x10] ss:$8 sps:$4 sm:$0x33]  }
 0x780   :  { %v13353_v40 = vpop.eup %13352 }
 0x781   :  { %v2429_v22 = vmul.f32 %v13353_v40, %v2427_v5  ;;  %v11717_v5 = vpack.c.bf16 %v2776_v9, %v2772_v6  ;;  %v11687_v40 = vpack.c.bf16 %v2783_v49, %v2779_v39  ;;  %v15103_v9 = vpack.c.bf16 %v3001_v34, %v2997_v63  ;;  %v13230_v39 = vld [vmem:[#allocation2 + $0x24] ss:$8 sps:$4 sm:$0xcc]   ;;  %v13231_v49 = vld [vmem:[#allocation2 + $0x34] ss:$8 sps:$4 sm:$0xcc]  }
 0x782   :  { %v3015_v63 = vld [vmem:[%s18905_s7 + $0xa8] sm:$0xff] }
 0x783   :  { %v2433_v3 = vsel %vm2431_vm10, %v2429_v22, %v14839_v12  ;;  %v2434_v14 = vsel %vm2431_vm10, %v2429_v22, 0.0  ;;  %v11707_v12 = vpack.c.bf16 %v2761_v55, %v2757_v42  ;;  %v2778_v22 = vld [vmem:[%s18904_s6 + $0x100] sm:$0xff]  ;;  %v2795_v42 = vld [vmem:[%s18904_s6 + $0x188] sm:$0xff] }
 0x784   :  { %2435 = vst.msk [vmem:[#allocation3 + $0xc] sm:$0x3] %vm579_vm3, %v2434_v14  ;;  %2566 = vmatmul.mubr.f32.vlgmr.msra.gmra.mrb[18].mxu0 %v2433_v3  ;;  %2637 = vmatmul.mubr.f32.vlgmr.msra.gmra.mrb[18].mxu1 %v2433_v3  ;;  %v2782_v3 = vld [vmem:[%s18904_s6 + $0x120] sm:$0xff]  ;;  %v2799_v55 = vld [vmem:[%s18904_s6 + $0x1a8] sm:$0xff] }
 0x785   :  { %2436 = vst.msk [vmem:[#allocation3 + $0x2] sm:$0x3] %vm581_vm4, %v2434_v14  ;;  %2896 = vmatprep.mubr.f32.mxu0 %v18923_v7  ;;  %2973 = vmatprep.mubr.f32.mxu1 %v18923_v7  ;;  %v2780_v14 = vld [vmem:[%s18904_s6 + $0x110] sm:$0xff]  ;;  %v11689_v28 = vpack.c.bf16 %v2782_v3, %v2778_v22  ;;  %v11695_v31 = vpack.c.bf16 %v2799_v55, %v2795_v42 }
 0x786   :  { %11674 = vmatpush1.bf16.msra.mxu0 %v11673_v45  ;;  %11706 = vmatpush1.bf16.msra.mxu1 %v11705_v11  ;;  %v11721_v36 = vpack.c.bf16 %v2784_v4, %v2780_v14  ;;  %v11691_v45 = vpack.c.bf16 %v2791_v54, %v2787_v53  ;;  %v11723_v11 = vpack.c.bf16 %v2793_v46, %v2789_v38 }
 0x787   :  { %11676 = vmatprep.subr.bf16.mxu0 %v11675_v20  ;;  %11708 = vmatprep.subr.bf16.mxu1 %v11707_v12  ;;  %v2797_v20 = vld [vmem:[%s18904_s6 + $0x198] sm:$0xff]  ;;  %v2692_v4 = vrot.slane %v13233_v1, %v14026_v17 }
 0x788   :  { %v2801_v12 = vld [vmem:[%s18904_s6 + $0x1b8] sm:$0xff] }
 0x789   :  { %v11727_v57 = vpack.c.bf16 %v2801_v12, %v2797_v20 }
 0x78a   :  { %11678 = vmatpush1.bf16.msra.mxu0 %v11677_v44  ;;  %11710 = vmatpush1.bf16.msra.mxu1 %v11709_v24  ;;  %v2794_v44 = vld [vmem:[%s18904_s6 + $0x180] sm:$0xff]  ;;  %v2800_v24 = vld [vmem:[%s18904_s6 + $0x1b0] sm:$0xff] }
 0x78b   :  { %11680 = vmatprep.subr.bf16.mxu0 %v11679_v59  ;;  %11712 = vmatprep.subr.bf16.mxu1 %v11711_v35  ;;  %v2803_v59 = vld [vmem:[%s18904_s6 + $0x1c8] sm:$0xff]  ;;  %v11697_v35 = vpack.c.bf16 %v2798_v10, %v2794_v44  ;;  %v11729_v2 = vpack.c.bf16 %v2800_v24, %v2796_v56 }
 0x78c   :  { %v11699_v62 = vpack.c.bf16 %v2807_v8, %v2803_v59  ;;  %v2739_v44 = vld [vmem:[%s18956_s3 + $0xe] sm:$0x3]  ;;  %v2998_v59 = vld [vmem:[%s18905_s7 + $0x20] sm:$0xff]  ;;  %v2996_v8 = vld [vmem:[%s18905_s7 + $0x10] sm:$0xff] }
 0x78d   :  { %vm2740_vm11 = vcmp.gt.f32.partialorder %v2739_v44, 0.5 }
 0x78e   :  { %11682 = vmatpush1.bf16.msra.mxu0 %v11681_v30  ;;  %11714 = vmatpush1.bf16.msra.mxu1 %v11713_v61  ;;  %v2806_v30 = vld [vmem:[%s18904_s6 + $0x1e0] sm:$0xff]  ;;  %v2995_v61 = vld [vmem:[%s18905_s7 + $0x8] sm:$0xff] }
 0x78f   :  { %11684 = vmatprep.subr.bf16.mxu0 %v11683_v32  ;;  %11716 = vmatprep.subr.bf16.mxu1 %v11715_v33  ;;  %v2999_v32 = vld [vmem:[%s18905_s7 + $0x28] sm:$0xff]  ;;  %v11701_v43 = vpack.c.bf16 %v2806_v30, %v2802_v26  ;;  %v11733_v33 = vpack.c.bf16 %v2808_v50, %v2804_v58  ;;  %v15147_v30 = vpack.c.bf16 %v3000_v60, %v2996_v8  ;;  %v3002_v58 = vld [vmem:[%s18905_s7 + $0x40] sm:$0xff]  ;;  %v3004_v50 = vld [vmem:[%s18905_s7 + $0x50] sm:$0xff] }
 0x790   :  { %v15101_v6 = vpack.c.bf16 %v2999_v32, %v2995_v61  ;;  %v3008_v61 = vld [vmem:[%s18905_s7 + $0x70] sm:$0xff]  ;;  %v3011_v32 = vld [vmem:[%s18905_s7 + $0x88] sm:$0xff]  ;;  %v3041_v8 = vld [vmem:[%s18905_s7 + $0x178] sm:$0xff] }
 0x791   :  { %v15181_v1 = vpack.c.bf16 %v3008_v61, %v3004_v50  ;;  %v3040_v50 = vld [vmem:[%s18905_s7 + $0x170] sm:$0xff]  ;;  %v3043_v61 = vld [vmem:[%s18905_s7 + $0x188] sm:$0xff] }
 0x792   :  { %11686 = vmatpush1.bf16.msra.mxu0 %v11685_v16  ;;  %11718 = vmatpush1.bf16.msra.mxu1 %v11717_v5  ;;  %v2663_v16 = vrot.slane %v13230_v39, %v14026_v17  ;;  %v2670_v5 = vrot.slane %v13231_v49, %v14026_v17  ;;  %v3013_v39 = vld [vmem:[%s18905_s7 + $0x98] sm:$0xff] }
 0x793   :  { %11688 = vmatprep.subr.bf16.mxu0 %v11687_v40  ;;  %11720 = vmatprep.subr.bf16.mxu1 %v11719_v27  ;;  %v2685_v27 = vrot.slane %v13232_v23, %v14026_v17  ;;  %v3017_v49 = vld [vmem:[%s18905_s7 + $0xb8] sm:$0xff] }
 0x794   :  { %v2671_v38 = vcombine.high %v2663_v16, %v2670_v5  ;;  %v3010_v16 = vld [vmem:[%s18905_s7 + $0x80] sm:$0xff] }
 0x795   :  { %v3014_v5 = vld [vmem:[%s18905_s7 + $0xa0] sm:$0xff] }
 0x796   :  { %11690 = vmatpush1.bf16.msra.mxu0 %v11689_v28  ;;  %11722 = vmatpush1.bf16.msra.mxu1 %v11721_v36  ;;  %v2693_v36 = vcombine.low %v2685_v27, %v2692_v4  ;;  %v3019_v27 = vld [vmem:[%s18905_s7 + $0xc8] sm:$0xff] }
 0x797   :  { %11692 = vmatprep.subr.bf16.mxu0 %v11691_v45  ;;  %11724 = vmatprep.subr.bf16.mxu1 %v11723_v11  ;;  %v3023_v4 = vld [vmem:[%s18905_s7 + $0xe8] sm:$0xff] }
 0x798   :  { %v2695_v41 = vsel %vm63_vm1, %v2671_v38, %v2693_v36  ;;  %v3025_v38 = vld [vmem:[%s18905_s7 + $0xf8] sm:$0xff]  ;;  %v3018_v36 = vld [vmem:[%s18905_s7 + $0xc0] sm:$0xff] }
 0x79a   :  { %11694 = vmatpush1.bf16.msra.mxu0 %v11693_v37  ;;  %11726 = vmatpush1.bf16.msra.mxu1 %v11725_v52 }
 0x79b   :  { %11696 = vmatprep.subr.bf16.mxu0 %v11695_v31  ;;  %11728 = vmatprep.subr.bf16.mxu1 %v11727_v57 }
 0x79e   :  { %11698 = vmatpush1.bf16.msra.mxu0 %v11697_v35  ;;  %11730 = vmatpush1.bf16.msra.mxu1 %v11729_v2  ;;  %v3007_v35 = vld [vmem:[%s18905_s7 + $0x68] sm:$0xff]  ;;  %v3005_v2 = vld [vmem:[%s18905_s7 + $0x58] sm:$0xff] }
 0x79f   :  { %11700 = vmatprep.subr.bf16.mxu0 %v11699_v62  ;;  %11732 = vmatprep.subr.bf16.mxu1 %v11731_v51  ;;  %v3009_v62 = vld [vmem:[%s18905_s7 + $0x78] sm:$0xff]  ;;  %v3006_v51 = vld [vmem:[%s18905_s7 + $0x60] sm:$0xff] }
 0x7a0   :  { %v15179_v23 = vpack.c.bf16 %v3006_v51, %v3002_v58  ;;  %v3036_v51 = vld [vmem:[%s18905_s7 + $0x150] sm:$0xff] }
 0x7a2   :  { %11702 = vmatpush1.bf16.msra.mxu0 %v11701_v43  ;;  %11734 = vmatpush1.bf16.msra.mxu1 %v11733_v33  ;;  %v15167_v43 = vpack.c.bf16 %v3007_v35, %v3003_v48  ;;  %v15169_v33 = vpack.c.bf16 %v3009_v62, %v3005_v2  ;;  %v3034_v35 = vld [vmem:[%s18905_s7 + $0x140] sm:$0xff] }
 0x7a3   :  { %11736 = vmatprep.subr.bf16.mxu0 %v15101_v6  ;;  %11768 = vmatprep.subr.bf16.mxu1 %v15103_v9  ;;  %v3038_v2 = vld [vmem:[%s18905_s7 + $0x160] sm:$0xff] }
 0x857   :  { %v2567_v40 = vpop.f32.mrb[18].mxu0  ;;  %v2638_v22 = vpop.f32.mrb[18].mxu1 }
 0x858   :  { %v2569_v3 = vpop.f32.mrb[19].mxu0  ;;  %v2640_v14 = vpop.f32.mrb[19].mxu1 }
 0x859   :  { %v2700_v53 = vcombine.low %v2567_v40, %v2569_v3  ;;  %v2701_v54 = vcombine.low %v2638_v22, %v2640_v14  ;;  %v3012_v40 = vld [vmem:[%s18905_s7 + $0x90] sm:$0xff]  ;;  %v15194_v22 = vpack.c.bf16 %v3015_v63, %v3011_v32  ;;  %v15196_v3 = vpack.c.bf16 %v3017_v49, %v3013_v39  ;;  %v3047_v32 = vld [vmem:[%s18905_s7 + $0x1a8] sm:$0xff]  ;;  %v3045_v63 = vld [vmem:[%s18905_s7 + $0x198] sm:$0xff] }
 0x85a   :  { %v3016_v14 = vld [vmem:[%s18905_s7 + $0xb0] sm:$0xff]  ;;  %v15327_v39 = vpack.c.bf16 %v3038_v2, %v3034_v35  ;;  %v15329_v49 = vpack.c.bf16 %v3040_v50, %v3036_v51 }
 0x85b   :  { %v2708_v46 = vrot.slane %v2700_v53, %v14026_v17  ;;  %v2715_v28 = vrot.slane %v2701_v54, %v14026_v17  ;;  %v3021_v54 = vld [vmem:[%s18905_s7 + $0xd8] sm:$0xff] }
 0x85d   :  { %v2716_v45 = vcombine.low %v2708_v46, %v2715_v28  ;;  %v15217_v46 = vpack.c.bf16 %v3014_v5, %v3010_v16  ;;  %v15219_v28 = vpack.c.bf16 %v3016_v14, %v3012_v40  ;;  %v3042_v16 = vld [vmem:[%s18905_s7 + $0x180] sm:$0xff]  ;;  %v15339_v40 = vpack.c.bf16 %v3047_v32, %v3043_v61 }
 0x85e   :  { %v3046_v5 = vld [vmem:[%s18905_s7 + $0x1a0] sm:$0xff] }
 0x85f   :  { %v2718_v47 = vadd.f32 %v2716_v45, %v2695_v41  ;;  %v3022_v45 = vld [vmem:[%s18905_s7 + $0xe0] sm:$0xff]  ;;  %v15229_v41 = vpack.c.bf16 %v3023_v4, %v3019_v27  ;;  %v3044_v27 = vld [vmem:[%s18905_s7 + $0x190] sm:$0xff] }
 0x860   :  { %v3048_v4 = vld [vmem:[%s18905_s7 + $0x1b0] sm:$0xff] }
 0x861   :  { %v10863_v0 = vmul.f32 -1.442695, %v2718_v47  ;;  %v2726_v42 = vrot.slane %v2718_v47, 6  ;;  %v15231_v47 = vpack.c.bf16 %v3025_v38, %v3021_v54  ;;  %v3055_v54 = vld [vmem:[%s18905_s7 + $0x1e8] sm:$0xff]  ;;  %v3053_v38 = vld [vmem:[%s18905_s7 + $0x1d8] sm:$0xff] }
 0x863   :  { %13354 = vpow2.f32 %v10863_v0  ;;  %v3020_v0 = vld [vmem:[%s18905_s7 + $0xd0] sm:$0xff] }
 0x86d   :  { %v13355_v11 = vpop.eup %13354 }
 0x86e   :  { %v2722_v25 = vadd.f32 1.0, %v13355_v11  ;;  %v3024_v11 = vld [vmem:[%s18905_s7 + $0xf0] sm:$0xff] }
 0x870   :  { %13356 = vrcp.f32 %v2722_v25  ;;  %v3027_v25 = vld [vmem:[%s18905_s7 + $0x108] sm:$0xff] }
 0x871   :  { %13358 = vtanh.f32 %v2726_v42  ;;  %v3031_v42 = vld [vmem:[%s18905_s7 + $0x128] sm:$0xff] }
 0x872   :  { %v15267_v44 = vpack.c.bf16 %v3031_v42, %v3027_v25 }
 0x87a   :  { %v13357_v55 = vpop.eup %13356 }
 0x87b   :  { %v2730_v20 = vrot.slane %v13357_v55, 2  ;;  %v13359_v12 = vpop.eup %13358  ;;  %v2736_v10 = vrot.slane %v13357_v55, 4 }
 0x87c   :  { %v2733_v52 = vmul.f32 %v13359_v12, %v13357_v55  ;;  %v3029_v55 = vld [vmem:[%s18905_s7 + $0x118] sm:$0xff]  ;;  %v15255_v12 = vpack.c.bf16 %v3022_v45, %v3018_v36  ;;  %v15363_v45 = vpack.c.bf16 %v3046_v5, %v3042_v16 }
 0x87d   :  { %v2732_v37 = vmul.f32 %v2730_v20, %v14890_v15  ;;  %v2994_v15 = vld [vmem:[%s18905_s7] sm:$0xff]  ;;  %v3033_v20 = vld [vmem:[%s18905_s7 + $0x138] sm:$0xff] }
 0x87e   :  { %v15145_v26 = vpack.c.bf16 %v2998_v59, %v2994_v15  ;;  %v3039_v15 = vld [vmem:[%s18905_s7 + $0x168] sm:$0xff]  ;;  %v3037_v59 = vld [vmem:[%s18905_s7 + $0x158] sm:$0xff] }
 0x87f   :  { %v2734_v31 = vadd.f32 %v2733_v52, %v2732_v37  ;;  %v15257_v37 = vpack.c.bf16 %v3024_v11, %v3020_v0  ;;  %v3026_v52 = vld [vmem:[%s18905_s7 + $0x100] sm:$0xff]  ;;  %v15305_v58 = vpack.c.bf16 %v3041_v8, %v3037_v59  ;;  %v3057_v36 = vld [vmem:[%s18905_s7 + $0x1f8] sm:$0xff]  ;;  %v15365_v0 = vpack.c.bf16 %v3048_v4, %v3044_v27 }
 0x880   :  { %v3050_v11 = vld [vmem:[%s18905_s7 + $0x1c0] sm:$0xff]  ;;  %v15374_v42 = vpack.c.bf16 %v3057_v36, %v3053_v38 }
 0x881   :  { %13360 = vtanh.f32 %v2734_v31  ;;  %v3030_v31 = vld [vmem:[%s18905_s7 + $0x120] sm:$0xff] }
 0x882   :  { %v15291_v60 = vpack.c.bf16 %v3030_v31, %v3026_v52  ;;  %v3056_v52 = vld [vmem:[%s18905_s7 + $0x1f0] sm:$0xff] }
 0x88b   :  { %v13361_v56 = vpop.eup %13360 }
 0x88c   :  { %v2738_v57 = vmul.f32 %v13361_v56, %v2736_v10  ;;  %v15269_v10 = vpack.c.bf16 %v3033_v20, %v3029_v55  ;;  %v3028_v56 = vld [vmem:[%s18905_s7 + $0x110] sm:$0xff]  ;;  %v3054_v55 = vld [vmem:[%s18905_s7 + $0x1e0] sm:$0xff] }
 0x88d   :  { %v3052_v20 = vld [vmem:[%s18905_s7 + $0x1d0] sm:$0xff]  ;;  %v15387_v31 = vpack.c.bf16 %v3054_v55, %v3050_v11 }
 0x88e   :  { %v2741_v24 = vsel %vm2740_vm11, %v2738_v57, 0.0  ;;  %v3032_v57 = vld [vmem:[%s18905_s7 + $0x130] sm:$0xff] }
 0x88f   :  { %2742 = vst.msk [vmem:[#allocation3 + $0xe] sm:$0x3] %vm579_vm3, %v2741_v24  ;;  %v15293_v48 = vpack.c.bf16 %v3032_v57, %v3028_v56  ;;  %v15389_v56 = vpack.c.bf16 %v3056_v52, %v3052_v20  ;;  %v2810_v57 = vld [vmem:[%s18906_s8] sm:$0xf] }
 0x890   :  { %2743 = vst.msk [vmem:[#allocation3] sm:$0x3] %vm581_vm4, %v2741_v24  ;;  %v3035_v24 = vld [vmem:[%s18905_s7 + $0x148] sm:$0xff]  ;;  %v2819_v59 = vrot.slane %v2810_v57, %v14018_v19  ;;  %v2827_v8 = vrot.slane %v2810_v57, %v14020_v21 }
 0x891   :  { %v15303_v62 = vpack.c.bf16 %v3039_v15, %v3035_v24  ;;  %v2815_v24 = vrot.slane %v2810_v57, %v14011_v13  ;;  %v2823_v15 = vrot.slane %v2810_v57, %v14016_v18 }
 0x896   :  { %v2745_v53 = vld [vmem:[#allocation3 + $0x8] sm:$0xff] }
 0x897   :  { %v2744_v34 = vld [vmem:[#allocation3] sm:$0xff] }
 0x898   :  { %2897 = vmatmul.mubr.f32.vlgmr.msra.gmra.mrb[20].mxu0 %v2744_v34  ;;  %2974 = vmatmul.mubr.f32.vlgmr.msra.gmra.mrb[20].mxu1 %v2744_v34  ;;  %v3049_v34 = vld [vmem:[%s18905_s7 + $0x1b8] sm:$0xff] }
 0x899   :  { %11738 = vmatpush1.bf16.msra.mxu0 %v15145_v26  ;;  %11770 = vmatpush1.bf16.msra.mxu1 %v15147_v30  ;;  %v15341_v14 = vpack.c.bf16 %v3049_v34, %v3045_v63 }
 0x89a   :  { %2902 = vmatprep.mubr.f32.mxu0 %v18923_v7  ;;  %2979 = vmatprep.mubr.f32.mxu1 %v18923_v7 }
 0x89b   :  { %11740 = vmatprep.subr.bf16.mxu0 %v15167_v43  ;;  %11772 = vmatprep.subr.bf16.mxu1 %v15169_v33 }
 0x89c   :  { %2903 = vmatmul.mubr.f32.gmra.mrb[22].mxu0 %v2745_v53  ;;  %2980 = vmatmul.mubr.f32.gmra.mrb[22].mxu1 %v2745_v53  ;;  %v3051_v53 = vld [vmem:[%s18905_s7 + $0x1c8] sm:$0xff] }
 0x89d   :  { %11742 = vmatpush1.bf16.msra.mxu0 %v15179_v23  ;;  %11774 = vmatpush1.bf16.msra.mxu1 %v15181_v1  ;;  %v15372_v25 = vpack.c.bf16 %v3055_v54, %v3051_v53 }
 0x89e   :  { %11744 = vmatprep.subr.bf16.mxu0 %v15194_v22  ;;  %11776 = vmatprep.subr.bf16.mxu1 %v15196_v3 }
 0x89f   :  { %3122 = vmatprep.mubr.f32.mxu0 %v18923_v7  ;;  %3193 = vmatprep.mubr.f32.mxu1 %v18923_v7 }
 0x8a1   :  { %11746 = vmatpush1.bf16.msra.mxu0 %v15217_v46  ;;  %11778 = vmatpush1.bf16.msra.mxu1 %v15219_v28 }
 0x8a2   :  { %11748 = vmatprep.subr.bf16.mxu0 %v15229_v41  ;;  %11780 = vmatprep.subr.bf16.mxu1 %v15231_v47 }
 0x8a5   :  { %11750 = vmatpush1.bf16.msra.mxu0 %v15255_v12  ;;  %11782 = vmatpush1.bf16.msra.mxu1 %v15257_v37 }
 0x8a6   :  { %11752 = vmatprep.subr.bf16.mxu0 %v15267_v44  ;;  %11784 = vmatprep.subr.bf16.mxu1 %v15269_v10 }
 0x8a9   :  { %11754 = vmatpush1.bf16.msra.mxu0 %v15291_v60  ;;  %11786 = vmatpush1.bf16.msra.mxu1 %v15293_v48 }
 0x8aa   :  { %11756 = vmatprep.subr.bf16.mxu0 %v15303_v62  ;;  %11788 = vmatprep.subr.bf16.mxu1 %v15305_v58 }
 0x8ad   :  { %11758 = vmatpush1.bf16.msra.mxu0 %v15327_v39  ;;  %11790 = vmatpush1.bf16.msra.mxu1 %v15329_v49 }
 0x8ae   :  { %11760 = vmatprep.subr.bf16.mxu0 %v15339_v40  ;;  %11792 = vmatprep.subr.bf16.mxu1 %v15341_v14 }
 0x8b1   :  { %11762 = vmatpush1.bf16.msra.mxu0 %v15363_v45  ;;  %11794 = vmatpush1.bf16.msra.mxu1 %v15365_v0 }
 0x8b2   :  { %11764 = vmatprep.subr.bf16.mxu0 %v15372_v25  ;;  %11796 = vmatprep.subr.bf16.mxu1 %v15374_v42 }
 0x8b5   :  { %11766 = vmatpush1.bf16.msra.mxu0 %v15387_v31  ;;  %11798 = vmatpush1.bf16.msra.mxu1 %v15389_v56 }
 0x8b6   :  { %11800 = vmatprep.subr.bf16.mxu0 %v15101_v6  ;;  %11832 = vmatprep.subr.bf16.mxu1 %v15103_v9 }
 0x8b8   :  { %3123 = vmatmul.mubr.f32.vlgmr.msra.gmra.mrb[24].mxu0 %v18923_v7  ;;  %3194 = vmatmul.mubr.f32.vlgmr.msra.gmra.mrb[24].mxu1 %v18923_v7 }
 0x8b9   :  { %11802 = vmatpush1.bf16.msra.mxu0 %v15145_v26  ;;  %11834 = vmatpush1.bf16.msra.mxu1 %v15147_v30 }
 0x8ba   :  { %11804 = vmatprep.subr.bf16.mxu0 %v15167_v43  ;;  %11836 = vmatprep.subr.bf16.mxu1 %v15169_v33 }
 0x8bb   :  { %3430 = vmatprep.mubr.f32.mxu0 %v18923_v7  ;;  %3501 = vmatprep.mubr.f32.mxu1 %v18923_v7 }
 0x8bd   :  { %11806 = vmatpush1.bf16.msra.mxu0 %v15179_v23  ;;  %11838 = vmatpush1.bf16.msra.mxu1 %v15181_v1 }
 0x8be   :  { %11808 = vmatprep.subr.bf16.mxu0 %v15194_v22  ;;  %11840 = vmatprep.subr.bf16.mxu1 %v15196_v3 }
 0x8c1   :  { %11810 = vmatpush1.bf16.msra.mxu0 %v15217_v46  ;;  %11842 = vmatpush1.bf16.msra.mxu1 %v15219_v28 }
 0x8c2   :  { %11812 = vmatprep.subr.bf16.mxu0 %v15229_v41  ;;  %11844 = vmatprep.subr.bf16.mxu1 %v15231_v47 }
 0x8c5   :  { %11814 = vmatpush1.bf16.msra.mxu0 %v15255_v12  ;;  %11846 = vmatpush1.bf16.msra.mxu1 %v15257_v37 }
 0x8c6   :  { %11816 = vmatprep.subr.bf16.mxu0 %v15267_v44  ;;  %11848 = vmatprep.subr.bf16.mxu1 %v15269_v10 }
 0x8c9   :  { %11818 = vmatpush1.bf16.msra.mxu0 %v15291_v60  ;;  %11850 = vmatpush1.bf16.msra.mxu1 %v15293_v48 }
 0x8ca   :  { %11820 = vmatprep.subr.bf16.mxu0 %v15303_v62  ;;  %11852 = vmatprep.subr.bf16.mxu1 %v15305_v58 }
 0x8cd   :  { %11822 = vmatpush1.bf16.msra.mxu0 %v15327_v39  ;;  %11854 = vmatpush1.bf16.msra.mxu1 %v15329_v49 }
 0x8ce   :  { %11824 = vmatprep.subr.bf16.mxu0 %v15339_v40  ;;  %11856 = vmatprep.subr.bf16.mxu1 %v15341_v14 }
 0x8d1   :  { %11826 = vmatpush1.bf16.msra.mxu0 %v15363_v45  ;;  %11858 = vmatpush1.bf16.msra.mxu1 %v15365_v0 }
 0x8d2   :  { %11828 = vmatprep.subr.bf16.mxu0 %v15372_v25  ;;  %11860 = vmatprep.subr.bf16.mxu1 %v15374_v42 }
 0x8d5   :  { %11830 = vmatpush1.bf16.msra.mxu0 %v15387_v31  ;;  %11862 = vmatpush1.bf16.msra.mxu1 %v15389_v56 }
 0x8d6   :  { %11864 = vmatprep.subr.bf16.mxu0 %v15101_v6  ;;  %11896 = vmatprep.subr.bf16.mxu1 %v15103_v9 }
 0x96b   :  { %v2898_v35 = vpop.f32.mrb[20].mxu0  ;;  %v2975_v2 = vpop.f32.mrb[20].mxu1 }
 0x96c   :  { %v2899_v51 = vadd.f32 %v2898_v35, %v2815_v24  ;;  %v2976_v50 = vadd.f32 %v2975_v2, %v2823_v15  ;;  %v2900_v61 = vpop.f32.mrb[21].mxu0  ;;  %v2977_v6 = vpop.f32.mrb[21].mxu1 }
 0x96d   :  { %v2901_v32 = vadd.f32 %v2900_v61, %v2819_v59  ;;  %v2978_v9 = vadd.f32 %v2977_v6, %v2827_v8 }
 0x96e   :  { %2986 = vst [vmem:[#allocation2] sm:$0xff] %v2899_v51  ;;  %2988 = vst [vmem:[#allocation2 + $0x10] sm:$0xff] %v2976_v50 }
 0x96f   :  { %2987 = vst [vmem:[#allocation2 + $0x8] sm:$0xff] %v2901_v32  ;;  %2989 = vst [vmem:[#allocation2 + $0x18] sm:$0xff] %v2978_v9  ;;  %v2904_v63 = vpop.f32.mrb[22].mxu0  ;;  %v2981_v34 = vpop.f32.mrb[22].mxu1 }
 0x970   :  { %v2905_v16 = vadd.f32 %v2904_v63, %v2815_v24  ;;  %v2982_v5 = vadd.f32 %v2981_v34, %v2823_v15  ;;  %v2906_v27 = vpop.f32.mrb[23].mxu0  ;;  %v2983_v4 = vpop.f32.mrb[23].mxu1 }
 0x971   :  { %v2907_v53 = vadd.f32 %v2906_v27, %v2819_v59  ;;  %v2984_v54 = vadd.f32 %v2983_v4, %v2827_v8 }
 0x972   :  { %2990 = vst [vmem:[#allocation2 + $0x20] sm:$0xff] %v2905_v16  ;;  %2992 = vst [vmem:[#allocation2 + $0x30] sm:$0xff] %v2982_v5 }
 0x973   :  { %2991 = vst [vmem:[#allocation2 + $0x28] sm:$0xff] %v2907_v53  ;;  %2993 = vst [vmem:[#allocation2 + $0x38] sm:$0xff] %v2984_v54 }
 0x976   :  { %v13234_v11 = vld [vmem:[#allocation2] ss:$8 sps:$4 sm:$0x33]   ;;  %v13235_v55 = vld [vmem:[#allocation2 + $0x10] ss:$8 sps:$4 sm:$0x33]  }
 0x977   :  { %v3220_v2 = vrot.slane %v13234_v11, %v14026_v17  ;;  %v3227_v59 = vrot.slane %v13235_v55, %v14026_v17 }
 0x979   :  { %v3228_v32 = vcombine.low %v3220_v2, %v3227_v59 }
 0x97a   :  { %v13236_v38 = vld [vmem:[#allocation2 + $0x24] ss:$8 sps:$4 sm:$0xcc]   ;;  %v13237_v36 = vld [vmem:[#allocation2 + $0x34] ss:$8 sps:$4 sm:$0xcc]  }
 0x97b   :  { %v3242_v20 = vrot.slane %v13236_v38, %v14026_v17  ;;  %v3249_v52 = vrot.slane %v13237_v36, %v14026_v17  ;;  %v3296_v38 = vld [vmem:[%s18956_s3] sm:$0x3] }
 0x97c   :  { %vm3297_vm12 = vcmp.gt.f32.partialorder %v3296_v38, 0.5  ;;  %v3922_v38 = vld [vmem:[%s18905_s7 + $0x10] sm:$0xff] }
 0x97d   :  { %v3250_v50 = vcombine.high %v3242_v20, %v3249_v52 }
 0x97f   :  { %v3252_v63 = vsel %vm63_vm1, %v3228_v32, %v3250_v50 }
 0x98b   :  { %v3124_v57 = vpop.f32.mrb[24].mxu0  ;;  %v3195_v35 = vpop.f32.mrb[24].mxu1 }
 0x98c   :  { %v3126_v24 = vpop.f32.mrb[25].mxu0  ;;  %v3197_v15 = vpop.f32.mrb[25].mxu1 }
 0x98d   :  { %v3257_v8 = vcombine.low %v3124_v57, %v3126_v24  ;;  %v3258_v51 = vcombine.low %v3195_v35, %v3197_v15 }
 0x98f   :  { %v3265_v61 = vrot.slane %v3257_v8, %v14026_v17  ;;  %v3272_v6 = vrot.slane %v3258_v51, %v14026_v17 }
 0x991   :  { %v3273_v9 = vcombine.low %v3265_v61, %v3272_v6 }
 0x993   :  { %v3275_v34 = vadd.f32 %v3273_v9, %v3252_v63  ;;  %v3921_v9 = vld [vmem:[%s18905_s7 + $0x8] sm:$0xff] }
 0x994   :  { %v3925_v63 = vld [vmem:[%s18905_s7 + $0x28] sm:$0xff] }
 0x995   :  { %v10864_v16 = vmul.f32 -1.442695, %v3275_v34  ;;  %v3283_v4 = vrot.slane %v3275_v34, 6  ;;  %v3923_v34 = vld [vmem:[%s18905_s7 + $0x18] sm:$0xff] }
 0x997   :  { %13362 = vpow2.f32 %v10864_v16  ;;  %v15524_v16 = vpack.c.bf16 %v3925_v63, %v3921_v9  ;;  %v3954_v9 = vld [vmem:[%s18905_s7 + $0x110] sm:$0xff] }
 0x9a1   :  { %v13363_v5 = vpop.eup %13362 }
 0x9a2   :  { %v3279_v27 = vadd.f32 1.0, %v13363_v5  ;;  %v3927_v5 = vld [vmem:[%s18905_s7 + $0x38] sm:$0xff] }
 0x9a4   :  { %13364 = vrcp.f32 %v3279_v27  ;;  %v3920_v27 = vld [vmem:[%s18905_s7] sm:$0xff] }
 0x9a5   :  { %13366 = vtanh.f32 %v3283_v4  ;;  %v3924_v4 = vld [vmem:[%s18905_s7 + $0x20] sm:$0xff] }
 0x9ae   :  { %v13365_v53 = vpop.eup %13364 }
 0x9af   :  { %v3287_v54 = vrot.slane %v13365_v53, 2  ;;  %v13367_v36 = vpop.eup %13366  ;;  %v3293_v57 = vrot.slane %v13365_v53, 4 }
 0x9b0   :  { %v3290_v55 = vmul.f32 %v13367_v36, %v13365_v53  ;;  %v15535_v53 = vpack.c.bf16 %v3927_v5, %v3923_v34  ;;  %v3926_v36 = vld [vmem:[%s18905_s7 + $0x30] sm:$0xff]  ;;  %v3961_v5 = vld [vmem:[%s18905_s7 + $0x148] sm:$0xff] }
 0x9b1   :  { %v3289_v11 = vmul.f32 0.0, %v3287_v54  ;;  %v15537_v54 = vpack.c.bf16 %v3924_v4, %v3920_v27  ;;  %v3958_v34 = vld [vmem:[%s18905_s7 + $0x130] sm:$0xff]  ;;  %v3965_v27 = vld [vmem:[%s18905_s7 + $0x168] sm:$0xff]  ;;  %v3963_v4 = vld [vmem:[%s18905_s7 + $0x158] sm:$0xff] }
 0x9b3   :  { %v3291_v20 = vadd.f32 %v3290_v55, %v3289_v11  ;;  %v3929_v11 = vld [vmem:[%s18905_s7 + $0x48] sm:$0xff]  ;;  %v15549_v55 = vpack.c.bf16 %v3926_v36, %v3922_v38  ;;  %v3967_v38 = vld [vmem:[%s18905_s7 + $0x178] sm:$0xff] }
 0x9b5   :  { %13368 = vtanh.f32 %v3291_v20  ;;  %v15451_v52 = vsel %vm3297_vm12, %v3291_v20, 0.0  ;;  %v3933_v20 = vld [vmem:[%s18905_s7 + $0x68] sm:$0xff] }
 0x9bf   :  { %v13369_v35 = vpop.eup %13368 }
 0x9c0   :  { %v3295_v24 = vmul.f32 %v13369_v35, %v3293_v57  ;;  %v3935_v57 = vld [vmem:[%s18905_s7 + $0x78] sm:$0xff]  ;;  %v15562_v35 = vpack.c.bf16 %v3933_v20, %v3929_v11  ;;  %v15702_v11 = vpack.c.bf16 %v3958_v34, %v3954_v9  ;;  %v15704_v20 = vpack.c.bf16 %v3965_v27, %v3961_v5  ;;  %v3982_v9 = vld [vmem:[%s18905_s7 + $0x1f0] sm:$0xff]  ;;  %v13244_v27 = vld [vmem:[#allocation2 + $0x20] ss:$8 sps:$4 sm:$0xcc]  }
 0x9c2   :  { %10865 = vmatmul.mubr.msk.f32.vlgmr.msra.gmra.mrb[26].mxu0 %vm3297_vm12, %v3295_v24  ;;  %10866 = vmatmul.mubr.msk.f32.vlgmr.msra.gmra.mrb[26].mxu1 %vm3297_vm12, %v3295_v24  ;;  %v15453_v15 = vsel %vm3297_vm12, %v3295_v24, 0.0 }
 0x9c3   :  { %11866 = vmatpush1.bf16.msra.mxu0 %v15145_v26  ;;  %11898 = vmatpush1.bf16.msra.mxu1 %v15147_v30  ;;  %3300 = vst.msk [vmem:[#allocation3] sm:$0x3] %vm579_vm3, %v15453_v15  ;;  %v13240_v26 = vld [vmem:[#allocation2 + $0x24] ss:$8 sps:$4 sm:$0x33]  }
 0x9c4   :  { %3301 = vst.msk [vmem:[#allocation3 + $0xe] sm:$0x3] %vm581_vm4, %v15453_v15  ;;  %11868 = vmatprep.subr.bf16.mxu0 %v15167_v43  ;;  %11900 = vmatprep.subr.bf16.mxu1 %v15169_v33  ;;  %v13241_v30 = vld [vmem:[#allocation2 + $0x34] ss:$8 sps:$4 sm:$0x33]  }
 0x9c5   :  { %3739 = vmatprep.mubr.f32.mxu0 %v18923_v7  ;;  %3810 = vmatprep.mubr.f32.mxu1 %v18923_v7  ;;  %v13238_v43 = vld [vmem:[#allocation2] ss:$8 sps:$4 sm:$0xcc]   ;;  %v13239_v33 = vld [vmem:[#allocation2 + $0x10] ss:$8 sps:$4 sm:$0xcc]  }
 0x9c7   :  { %11870 = vmatpush1.bf16.msra.mxu0 %v15179_v23  ;;  %11902 = vmatpush1.bf16.msra.mxu1 %v15181_v1  ;;  %v3550_v23 = vrot.slane %v13240_v26, %v14026_v17  ;;  %v3557_v1 = vrot.slane %v13241_v30, %v14026_v17  ;;  %v3932_v26 = vld [vmem:[%s18905_s7 + $0x60] sm:$0xff]  ;;  %v3930_v30 = vld [vmem:[%s18905_s7 + $0x50] sm:$0xff] }
 0x9c8   :  { %11872 = vmatprep.subr.bf16.mxu0 %v15194_v22  ;;  %11904 = vmatprep.subr.bf16.mxu1 %v15196_v3 }
 0x9cb   :  { %11874 = vmatpush1.bf16.msra.mxu0 %v15217_v46  ;;  %11906 = vmatpush1.bf16.msra.mxu1 %v15219_v28 }
 0x9cc   :  { %11876 = vmatprep.subr.bf16.mxu0 %v15229_v41  ;;  %11908 = vmatprep.subr.bf16.mxu1 %v15231_v47  ;;  %v3528_v41 = vrot.slane %v13238_v43, %v14026_v17  ;;  %v3535_v47 = vrot.slane %v13239_v33, %v14026_v17  ;;  %v3934_v33 = vld [vmem:[%s18905_s7 + $0x70] sm:$0xff] }
 0x9cf   :  { %11878 = vmatpush1.bf16.msra.mxu0 %v15255_v12  ;;  %11910 = vmatpush1.bf16.msra.mxu1 %v15257_v37 }
 0x9d0   :  { %11880 = vmatprep.subr.bf16.mxu0 %v15267_v44  ;;  %11912 = vmatprep.subr.bf16.mxu1 %v15269_v10  ;;  %v3558_v44 = vcombine.low %v3550_v23, %v3557_v1  ;;  %v3937_v23 = vld [vmem:[%s18905_s7 + $0x88] sm:$0xff] }
 0x9d1   :  { %v3941_v1 = vld [vmem:[%s18905_s7 + $0xa8] sm:$0xff] }
 0x9d3   :  { %11882 = vmatpush1.bf16.msra.mxu0 %v15291_v60  ;;  %11914 = vmatpush1.bf16.msra.mxu1 %v15293_v48  ;;  %v3536_v48 = vcombine.high %v3528_v41, %v3535_v47  ;;  %v3936_v41 = vld [vmem:[%s18905_s7 + $0x80] sm:$0xff] }
 0x9d4   :  { %11884 = vmatprep.subr.bf16.mxu0 %v15303_v62  ;;  %11916 = vmatprep.subr.bf16.mxu1 %v15305_v58 }
 0x9d5   :  { %v3560_v58 = vsel %vm63_vm1, %v3536_v48, %v3558_v44  ;;  %v3942_v44 = vld [vmem:[%s18905_s7 + $0xb0] sm:$0xff]  ;;  %v3949_v48 = vld [vmem:[%s18905_s7 + $0xe8] sm:$0xff] }
 0x9d7   :  { %11886 = vmatpush1.bf16.msra.mxu0 %v15327_v39  ;;  %11918 = vmatpush1.bf16.msra.mxu1 %v15329_v49 }
 0x9d8   :  { %11888 = vmatprep.subr.bf16.mxu0 %v15339_v40  ;;  %11920 = vmatprep.subr.bf16.mxu1 %v15341_v14 }
 0x9db   :  { %11890 = vmatpush1.bf16.msra.mxu0 %v15363_v45  ;;  %11922 = vmatpush1.bf16.msra.mxu1 %v15365_v0 }
 0x9dc   :  { %11892 = vmatprep.subr.bf16.mxu0 %v15372_v25  ;;  %11924 = vmatprep.subr.bf16.mxu1 %v15374_v42  ;;  %v3604_v42 = vld [vmem:[%s18956_s3 + $0x2] sm:$0x3] }
 0x9dd   :  { %vm3605_vm13 = vcmp.gt.f32.partialorder %v3604_v42, 0.5  ;;  %v3953_v42 = vld [vmem:[%s18905_s7 + $0x108] sm:$0xff] }
 0x9df   :  { %11894 = vmatpush1.bf16.msra.mxu0 %v15387_v31  ;;  %11926 = vmatpush1.bf16.msra.mxu1 %v15389_v56 }
 0x9e0   :  { %11928 = vmatprep.subr.bf16.mxu0 %v15524_v16  ;;  %11960 = vmatprep.subr.bf16.mxu1 %v15535_v53 }
 0xa95   :  { %v3432_v22 = vpop.f32.mrb[26].mxu0  ;;  %v3503_v3 = vpop.f32.mrb[26].mxu1 }
 0xa96   :  { %v3434_v46 = vpop.f32.mrb[27].mxu0  ;;  %v3505_v28 = vpop.f32.mrb[27].mxu1 }
 0xa97   :  { %v3565_v12 = vcombine.low %v3432_v22, %v3434_v46  ;;  %v3566_v37 = vcombine.low %v3503_v3, %v3505_v28  ;;  %v15589_v22 = vpack.c.bf16 %v3934_v33, %v3930_v30  ;;  %v15591_v3 = vpack.c.bf16 %v3941_v1, %v3937_v23  ;;  %v3939_v46 = vld [vmem:[%s18905_s7 + $0x98] sm:$0xff]  ;;  %v3966_v30 = vld [vmem:[%s18905_s7 + $0x170] sm:$0xff]  ;;  %v3969_v33 = vld [vmem:[%s18905_s7 + $0x188] sm:$0xff] }
 0xa98   :  { %v3943_v28 = vld [vmem:[%s18905_s7 + $0xb8] sm:$0xff]  ;;  %v3973_v23 = vld [vmem:[%s18905_s7 + $0x1a8] sm:$0xff] }
 0xa99   :  { %v3573_v10 = vrot.slane %v3565_v12, %v14026_v17  ;;  %v3580_v60 = vrot.slane %v3566_v37, %v14026_v17  ;;  %v15602_v47 = vpack.c.bf16 %v3943_v28, %v3939_v46  ;;  %v3940_v12 = vld [vmem:[%s18905_s7 + $0xa0] sm:$0xff]  ;;  %v3938_v37 = vld [vmem:[%s18905_s7 + $0x90] sm:$0xff]  ;;  %v3971_v1 = vld [vmem:[%s18905_s7 + $0x198] sm:$0xff] }
 0xa9a   :  { %v3975_v46 = vld [vmem:[%s18905_s7 + $0x1b8] sm:$0xff] }
 0xa9b   :  { %v3581_v62 = vcombine.low %v3573_v10, %v3580_v60  ;;  %v15614_v10 = vpack.c.bf16 %v3940_v12, %v3936_v41  ;;  %v3945_v60 = vld [vmem:[%s18905_s7 + $0xc8] sm:$0xff]  ;;  %v15740_v12 = vpack.c.bf16 %v3973_v23, %v3969_v33 }
 0xa9d   :  { %v3583_v39 = vadd.f32 %v3581_v62, %v3560_v58  ;;  %v3947_v62 = vld [vmem:[%s18905_s7 + $0xd8] sm:$0xff]  ;;  %v15627_v58 = vpack.c.bf16 %v3942_v44, %v3938_v37  ;;  %v3968_v37 = vld [vmem:[%s18905_s7 + $0x180] sm:$0xff] }
 0xa9e   :  { %v3972_v44 = vld [vmem:[%s18905_s7 + $0x1a0] sm:$0xff] }
 0xa9f   :  { %v10867_v49 = vmul.f32 -1.442695, %v3583_v39  ;;  %v3591_v45 = vrot.slane %v3583_v39, 6  ;;  %v15629_v39 = vpack.c.bf16 %v3949_v48, %v3945_v60  ;;  %v3970_v60 = vld [vmem:[%s18905_s7 + $0x190] sm:$0xff]  ;;  %v15752_v48 = vpack.c.bf16 %v3975_v46, %v3971_v1 }
 0xaa1   :  { %13370 = vpow2.f32 %v10867_v49  ;;  %v3951_v49 = vld [vmem:[%s18905_s7 + $0xf8] sm:$0xff] }
 0xaab   :  { %v13371_v40 = vpop.eup %13370 }
 0xaac   :  { %v3587_v14 = vadd.f32 1.0, %v13371_v40  ;;  %v3944_v40 = vld [vmem:[%s18905_s7 + $0xc0] sm:$0xff] }
 0xaae   :  { %13372 = vrcp.f32 %v3587_v14  ;;  %v3948_v14 = vld [vmem:[%s18905_s7 + $0xe0] sm:$0xff] }
 0xaaf   :  { %13374 = vtanh.f32 %v3591_v45  ;;  %v15641_v45 = vpack.c.bf16 %v3951_v49, %v3947_v62  ;;  %v3974_v62 = vld [vmem:[%s18905_s7 + $0x1b0] sm:$0xff]  ;;  %v3977_v49 = vld [vmem:[%s18905_s7 + $0x1c8] sm:$0xff] }
 0xab8   :  { %v13373_v0 = vpop.eup %13372 }
 0xab9   :  { %v3595_v25 = vrot.slane %v13373_v0, 2  ;;  %v13375_v31 = vpop.eup %13374  ;;  %v3601_v51 = vrot.slane %v13373_v0, 4 }
 0xaba   :  { %v3598_v2 = vmul.f32 %v13375_v31, %v13373_v0  ;;  %v3946_v0 = vld [vmem:[%s18905_s7 + $0xd0] sm:$0xff]  ;;  %v3957_v31 = vld [vmem:[%s18905_s7 + $0x128] sm:$0xff] }
 0xabb   :  { %v3597_v56 = vmul.f32 %v3595_v25, %v15451_v52  ;;  %v3950_v25 = vld [vmem:[%s18905_s7 + $0xf0] sm:$0xff] }
 0xabd   :  { %v3599_v59 = vadd.f32 %v3598_v2, %v3597_v56  ;;  %v3955_v56 = vld [vmem:[%s18905_s7 + $0x118] sm:$0xff] }
 0xabe   :  { %v3959_v2 = vld [vmem:[%s18905_s7 + $0x138] sm:$0xff] }
 0xabf   :  { %13376 = vtanh.f32 %v3599_v59  ;;  %v15504_v8 = vsel %vm3605_vm13, %v3599_v59, %v15451_v52  ;;  %v3931_v52 = vld [vmem:[%s18905_s7 + $0x58] sm:$0xff]  ;;  %v15662_v59 = vpack.c.bf16 %v3948_v14, %v3944_v40  ;;  %v15680_v63 = vpack.c.bf16 %v3959_v2, %v3955_v56  ;;  %v3981_v40 = vld [vmem:[%s18905_s7 + $0x1e8] sm:$0xff]  ;;  %v3976_v56 = vld [vmem:[%s18905_s7 + $0x1c0] sm:$0xff] }
 0xac0   :  { %v15564_v24 = vpack.c.bf16 %v3935_v57, %v3931_v52  ;;  %v3960_v52 = vld [vmem:[%s18905_s7 + $0x140] sm:$0xff]  ;;  %v3979_v14 = vld [vmem:[%s18905_s7 + $0x1d8] sm:$0xff] }
 0xac1   :  { %v3964_v57 = vld [vmem:[%s18905_s7 + $0x160] sm:$0xff] }
 0xac2   :  { %v15734_v28 = vpack.c.bf16 %v3964_v57, %v3960_v52  ;;  %v3980_v2 = vld [vmem:[%s18905_s7 + $0x1e0] sm:$0xff]  ;;  %v13243_v52 = vld [vmem:[#allocation2 + $0x14] ss:$8 sps:$4 sm:$0x33]   ;;  %v3859_v57 = vrot.slane %v13244_v27, %v14026_v17 }
 0xac3   :  { %v15794_v34 = vpack.c.bf16 %v3980_v2, %v3976_v56 }
 0xac9   :  { %v13377_v50 = vpop.eup %13376 }
 0xaca   :  { %v3603_v61 = vmul.f32 %v13377_v50, %v3601_v51  ;;  %v15666_v51 = vpack.c.bf16 %v3950_v25, %v3946_v0  ;;  %v15668_v50 = vpack.c.bf16 %v3957_v31, %v3953_v42  ;;  %v3983_v0 = vld [vmem:[%s18905_s7 + $0x1f8] sm:$0xff]  ;;  %v15770_v25 = vpack.c.bf16 %v3972_v44, %v3968_v37 }
 0xacb   :  { %v15774_v42 = vpack.c.bf16 %v3974_v62, %v3970_v60  ;;  %v15776_v31 = vpack.c.bf16 %v3981_v40, %v3977_v49  ;;  %v3844_v37 = vrot.slane %v13243_v52, %v14026_v17 }
 0xacc   :  { %v15507_v6 = vsel %vm3605_vm13, %v3603_v61, %v15453_v15  ;;  %v3608_v32 = vsel %vm3605_vm13, %v3603_v61, 0.0  ;;  %v3928_v15 = vld [vmem:[%s18905_s7 + $0x40] sm:$0xff] }
 0xacd   :  { %3609 = vst.msk [vmem:[#allocation3 + $0x2] sm:$0x3] %vm579_vm3, %v3608_v32  ;;  %3740 = vmatmul.mubr.f32.vlgmr.msra.gmra.mrb[28].mxu0 %v15507_v6  ;;  %3811 = vmatmul.mubr.f32.vlgmr.msra.gmra.mrb[28].mxu1 %v15507_v6  ;;  %v15576_v43 = vpack.c.bf16 %v3932_v26, %v3928_v15  ;;  %v3952_v61 = vld [vmem:[%s18905_s7 + $0x100] sm:$0xff]  ;;  %v3962_v15 = vld [vmem:[%s18905_s7 + $0x150] sm:$0xff]  ;;  %v15716_v26 = vpack.c.bf16 %v3967_v38, %v3963_v4 }
 0xace   :  { %3610 = vst.msk [vmem:[#allocation3 + $0xc] sm:$0x3] %vm581_vm4, %v3608_v32  ;;  %4048 = vmatprep.mubr.f32.mxu0 %v18923_v7  ;;  %4119 = vmatprep.mubr.f32.mxu1 %v18923_v7  ;;  %v3956_v32 = vld [vmem:[%s18905_s7 + $0x120] sm:$0xff]  ;;  %v15738_v41 = vpack.c.bf16 %v3966_v30, %v3962_v15  ;;  %v13245_v4 = vld [vmem:[#allocation2 + $0x30] ss:$8 sps:$4 sm:$0xcc]  }
 0xacf   :  { %11930 = vmatpush1.bf16.msra.mxu0 %v15537_v54  ;;  %11962 = vmatpush1.bf16.msra.mxu1 %v15549_v55  ;;  %v15698_v36 = vpack.c.bf16 %v3956_v32, %v3952_v61  ;;  %v15785_v61 = vpack.c.bf16 %v3983_v0, %v3979_v14  ;;  %v3978_v32 = vld [vmem:[%s18905_s7 + $0x1d0] sm:$0xff]  ;;  %v13242_v38 = vld [vmem:[#allocation2 + $0x4] ss:$8 sps:$4 sm:$0x33]   ;;  %v3866_v15 = vrot.slane %v13245_v4, %v14026_v17 }
 0xad0   :  { %11932 = vmatprep.subr.bf16.mxu0 %v15562_v35  ;;  %11964 = vmatprep.subr.bf16.mxu1 %v15564_v24  ;;  %v15798_v5 = vpack.c.bf16 %v3982_v9, %v3978_v32  ;;  %v3837_v46 = vrot.slane %v13242_v38, %v14026_v17 }
 0xad1   :  { %v3867_v62 = vcombine.high %v3859_v57, %v3866_v15  ;;  %v3913_v57 = vld [vmem:[%s18956_s3 + $0x4] sm:$0x3] }
 0xad2   :  { %v3845_v14 = vcombine.low %v3837_v46, %v3844_v37  ;;  %vm3914_vm14 = vcmp.gt.f32.partialorder %v3913_v57, 0.5 }
 0xad3   :  { %11934 = vmatpush1.bf16.msra.mxu0 %v15576_v43  ;;  %11966 = vmatpush1.bf16.msra.mxu1 %v15589_v22 }
 0xad4   :  { %11936 = vmatprep.subr.bf16.mxu0 %v15591_v3  ;;  %11968 = vmatprep.subr.bf16.mxu1 %v15602_v47  ;;  %v3869_v56 = vsel %vm63_vm1, %v3845_v14, %v3867_v62 }
 0xad7   :  { %11938 = vmatpush1.bf16.msra.mxu0 %v15614_v10  ;;  %11970 = vmatpush1.bf16.msra.mxu1 %v15627_v58 }
 0xad8   :  { %11940 = vmatprep.subr.bf16.mxu0 %v15629_v39  ;;  %11972 = vmatprep.subr.bf16.mxu1 %v15641_v45 }
 0xadb   :  { %11942 = vmatpush1.bf16.msra.mxu0 %v15662_v59  ;;  %11974 = vmatpush1.bf16.msra.mxu1 %v15666_v51 }
 0xadc   :  { %11944 = vmatprep.subr.bf16.mxu0 %v15668_v50  ;;  %11976 = vmatprep.subr.bf16.mxu1 %v15680_v63 }
 0xadf   :  { %11946 = vmatpush1.bf16.msra.mxu0 %v15698_v36  ;;  %11978 = vmatpush1.bf16.msra.mxu1 %v15702_v11 }
 0xae0   :  { %11948 = vmatprep.subr.bf16.mxu0 %v15704_v20  ;;  %11980 = vmatprep.subr.bf16.mxu1 %v15716_v26 }
 0xae3   :  { %11950 = vmatpush1.bf16.msra.mxu0 %v15734_v28  ;;  %11982 = vmatpush1.bf16.msra.mxu1 %v15738_v41 }
 0xae4   :  { %11952 = vmatprep.subr.bf16.mxu0 %v15740_v12  ;;  %11984 = vmatprep.subr.bf16.mxu1 %v15752_v48 }
 0xae7   :  { %11954 = vmatpush1.bf16.msra.mxu0 %v15770_v25  ;;  %11986 = vmatpush1.bf16.msra.mxu1 %v15774_v42 }
 0xae8   :  { %11956 = vmatprep.subr.bf16.mxu0 %v15776_v31  ;;  %11988 = vmatprep.subr.bf16.mxu1 %v15785_v61 }
 0xaeb   :  { %11958 = vmatpush1.bf16.msra.mxu0 %v15794_v34  ;;  %11990 = vmatpush1.bf16.msra.mxu1 %v15798_v5 }
 0xaec   :  { %11992 = vmatprep.subr.bf16.mxu0 %v15524_v16  ;;  %12024 = vmatprep.subr.bf16.mxu1 %v15535_v53 }
 0xba0   :  { %v3741_v30 = vpop.f32.mrb[28].mxu0  ;;  %v3812_v33 = vpop.f32.mrb[28].mxu1 }
 0xba1   :  { %v3743_v23 = vpop.f32.mrb[29].mxu0  ;;  %v3814_v1 = vpop.f32.mrb[29].mxu1 }
 0xba2   :  { %v3874_v44 = vcombine.low %v3741_v30, %v3743_v23  ;;  %v3875_v60 = vcombine.low %v3812_v33, %v3814_v1 }
 0xba4   :  { %v3882_v49 = vrot.slane %v3874_v44, %v14026_v17  ;;  %v3889_v40 = vrot.slane %v3875_v60, %v14026_v17 }
 0xba6   :  { %v3890_v0 = vcombine.low %v3882_v49, %v3889_v40  ;;  %v13246_v49 = vld [vmem:[#allocation2 + $0x4] ss:$8 sps:$4 sm:$0xcc]   ;;  %v13247_v40 = vld [vmem:[#allocation2 + $0x14] ss:$8 sps:$4 sm:$0xcc]  }
 0xba8   :  { %v3892_v2 = vadd.f32 %v3890_v0, %v3869_v56 }
 0xbaa   :  { %v10868_v32 = vmul.f32 -1.442695, %v3892_v2  ;;  %v3900_v4 = vrot.slane %v3892_v2, 6 }
 0xbac   :  { %13378 = vpow2.f32 %v10868_v32 }
 0xbb6   :  { %v13379_v9 = vpop.eup %13378 }
 0xbb7   :  { %v3896_v27 = vadd.f32 1.0, %v13379_v9 }
 0xbb9   :  { %13380 = vrcp.f32 %v3896_v27  ;;  %v4146_v27 = vrot.slane %v13246_v49, %v14026_v17  ;;  %v4222_v49 = vld [vmem:[%s18956_s3 + $0x6] sm:$0x3] }
 0xbba   :  { %13382 = vtanh.f32 %v3900_v4  ;;  %v4153_v4 = vrot.slane %v13247_v40, %v14026_v17  ;;  %vm4223_vm15 = vcmp.gt.f32.partialorder %v4222_v49, 0.5 }
 0xbc3   :  { %v13381_v38 = vpop.eup %13380 }
 0xbc4   :  { %v3904_v52 = vrot.slane %v13381_v38, 2  ;;  %v13383_v15 = vpop.eup %13382  ;;  %v3910_v46 = vrot.slane %v13381_v38, 4 }
 0xbc5   :  { %v3907_v33 = vmul.f32 %v13383_v15, %v13381_v38  ;;  %v4154_v15 = vcombine.high %v4146_v27, %v4153_v4 }
 0xbc6   :  { %v3906_v30 = vmul.f32 %v3904_v52, %v15504_v8 }
 0xbc8   :  { %v3908_v23 = vadd.f32 %v3907_v33, %v3906_v30 }
 0xbca   :  { %13384 = vtanh.f32 %v3908_v23  ;;  %v15818_v1 = vsel %vm3914_vm14, %v3908_v23, %v15504_v8  ;;  %v13248_v8 = vld [vmem:[#allocation2 + $0x20] ss:$8 sps:$4 sm:$0x33]  }
 0xbcb   :  { %v4168_v14 = vrot.slane %v13248_v8, %v14026_v17 }
 0xbd4   :  { %v13385_v37 = vpop.eup %13384 }
 0xbd5   :  { %v3912_v44 = vmul.f32 %v13385_v37, %v3910_v46 }
 0xbd7   :  { %v15821_v60 = vsel %vm3914_vm14, %v3912_v44, %v15507_v6  ;;  %v3917_v62 = vsel %vm3914_vm14, %v3912_v44, 0.0  ;;  %v13249_v6 = vld [vmem:[#allocation2 + $0x30] ss:$8 sps:$4 sm:$0x33]   ;;  %vm8186_vm14 = vcmask 130048  }
 0xbd8   :  { %3918 = vst.msk [vmem:[#allocation3 + $0x4] sm:$0x3] %vm579_vm3, %v3917_v62  ;;  %4049 = vmatmul.mubr.f32.vlgmr.msra.gmra.mrb[30].mxu0 %v15821_v60  ;;  %4120 = vmatmul.mubr.f32.vlgmr.msra.gmra.mrb[30].mxu1 %v15821_v60  ;;  %v4175_v0 = vrot.slane %v13249_v6, %v14026_v17 }
 0xbd9   :  { %3919 = vst.msk [vmem:[#allocation3 + $0xa] sm:$0x3] %vm581_vm4, %v3917_v62  ;;  %11994 = vmatpush1.bf16.msra.mxu0 %v15537_v54  ;;  %12026 = vmatpush1.bf16.msra.mxu1 %v15549_v55 }
 0xbda   :  { %11996 = vmatprep.subr.bf16.mxu0 %v15562_v35  ;;  %12028 = vmatprep.subr.bf16.mxu1 %v15564_v24  ;;  %v4176_v52 = vcombine.low %v4168_v14, %v4175_v0 }
 0xbdb   :  { %4357 = vmatprep.mubr.f32.mxu0 %v18923_v7  ;;  %4428 = vmatprep.mubr.f32.mxu1 %v18923_v7 }
 0xbdc   :  { %v4178_v33 = vsel %vm63_vm1, %v4154_v15, %v4176_v52 }
 0xbdd   :  { %11998 = vmatpush1.bf16.msra.mxu0 %v15576_v43  ;;  %12030 = vmatpush1.bf16.msra.mxu1 %v15589_v22 }
 0xbde   :  { %12000 = vmatprep.subr.bf16.mxu0 %v15591_v3  ;;  %12032 = vmatprep.subr.bf16.mxu1 %v15602_v47 }
 0xbe1   :  { %12002 = vmatpush1.bf16.msra.mxu0 %v15614_v10  ;;  %12034 = vmatpush1.bf16.msra.mxu1 %v15627_v58 }
 0xbe2   :  { %12004 = vmatprep.subr.bf16.mxu0 %v15629_v39  ;;  %12036 = vmatprep.subr.bf16.mxu1 %v15641_v45 }
 0xbe5   :  { %12006 = vmatpush1.bf16.msra.mxu0 %v15662_v59  ;;  %12038 = vmatpush1.bf16.msra.mxu1 %v15666_v51 }
 0xbe6   :  { %12008 = vmatprep.subr.bf16.mxu0 %v15668_v50  ;;  %12040 = vmatprep.subr.bf16.mxu1 %v15680_v63 }
 0xbe9   :  { %12010 = vmatpush1.bf16.msra.mxu0 %v15698_v36  ;;  %12042 = vmatpush1.bf16.msra.mxu1 %v15702_v11 }
 0xbea   :  { %12012 = vmatprep.subr.bf16.mxu0 %v15704_v20  ;;  %12044 = vmatprep.subr.bf16.mxu1 %v15716_v26 }
 0xbed   :  { %12014 = vmatpush1.bf16.msra.mxu0 %v15734_v28  ;;  %12046 = vmatpush1.bf16.msra.mxu1 %v15738_v41 }
 0xbee   :  { %12016 = vmatprep.subr.bf16.mxu0 %v15740_v12  ;;  %12048 = vmatprep.subr.bf16.mxu1 %v15752_v48 }
 0xbf1   :  { %12018 = vmatpush1.bf16.msra.mxu0 %v15770_v25  ;;  %12050 = vmatpush1.bf16.msra.mxu1 %v15774_v42 }
 0xbf2   :  { %12020 = vmatprep.subr.bf16.mxu0 %v15776_v31  ;;  %12052 = vmatprep.subr.bf16.mxu1 %v15785_v61 }
 0xbf5   :  { %12022 = vmatpush1.bf16.msra.mxu0 %v15794_v34  ;;  %12054 = vmatpush1.bf16.msra.mxu1 %v15798_v5 }
 0xbf6   :  { %12056 = vmatprep.subr.bf16.mxu0 %v15524_v16  ;;  %12088 = vmatprep.subr.bf16.mxu1 %v15535_v53 }
 0xcab   :  { %v4050_v56 = vpop.f32.mrb[30].mxu0  ;;  %v4121_v2 = vpop.f32.mrb[30].mxu1 }
 0xcac   :  { %v4052_v32 = vpop.f32.mrb[31].mxu0  ;;  %v4123_v9 = vpop.f32.mrb[31].mxu1 }
 0xcad   :  { %v4183_v38 = vcombine.low %v4050_v56, %v4052_v32  ;;  %v4184_v16 = vcombine.low %v4121_v2, %v4123_v9 }
 0xcaf   :  { %v4191_v53 = vrot.slane %v4183_v38, %v14026_v17  ;;  %v4198_v57 = vrot.slane %v4184_v16, %v14026_v17 }
 0xcb1   :  { %v4199_v30 = vcombine.low %v4191_v53, %v4198_v57 }
 0xcb3   :  { %v4201_v23 = vadd.f32 %v4199_v30, %v4178_v33  ;;  %v4848_v33 = vld [vmem:[%s18905_s7 + $0x8] sm:$0xff] }
 0xcb5   :  { %v10869_v46 = vmul.f32 -1.442695, %v4201_v23  ;;  %v4209_v62 = vrot.slane %v4201_v23, 6  ;;  %v4852_v23 = vld [vmem:[%s18905_s7 + $0x28] sm:$0xff] }
 0xcb7   :  { %13386 = vpow2.f32 %v10869_v46  ;;  %v4850_v46 = vld [vmem:[%s18905_s7 + $0x18] sm:$0xff] }
 0xcc1   :  { %v13387_v37 = vpop.eup %13386 }
 0xcc2   :  { %v4205_v44 = vadd.f32 1.0, %v13387_v37  ;;  %v15948_v37 = vpack.c.bf16 %v4852_v23, %v4848_v33  ;;  %v4881_v33 = vld [vmem:[%s18905_s7 + $0x110] sm:$0xff] }
 0xcc4   :  { %13388 = vrcp.f32 %v4205_v44  ;;  %v4854_v44 = vld [vmem:[%s18905_s7 + $0x38] sm:$0xff] }
 0xcc5   :  { %13390 = vtanh.f32 %v4209_v62  ;;  %v4847_v62 = vld [vmem:[%s18905_s7] sm:$0xff] }
 0xcce   :  { %v13389_v8 = vpop.eup %13388 }
 0xccf   :  { %v4213_v6 = vrot.slane %v13389_v8, 2  ;;  %v13391_v40 = vpop.eup %13390  ;;  %v4219_v32 = vrot.slane %v13389_v8, 4 }
 0xcd0   :  { %v4216_v0 = vmul.f32 %v13391_v40, %v13389_v8  ;;  %v4851_v8 = vld [vmem:[%s18905_s7 + $0x20] sm:$0xff]  ;;  %v4849_v40 = vld [vmem:[%s18905_s7 + $0x10] sm:$0xff] }
 0xcd1   :  { %v4215_v14 = vmul.f32 %v4213_v6, %v15818_v1  ;;  %v15959_v6 = vpack.c.bf16 %v4854_v44, %v4850_v46  ;;  %v15961_v49 = vpack.c.bf16 %v4851_v8, %v4847_v62  ;;  %v4885_v46 = vld [vmem:[%s18905_s7 + $0x130] sm:$0xff]  ;;  %v4888_v44 = vld [vmem:[%s18905_s7 + $0x148] sm:$0xff]  ;;  %v4890_v8 = vld [vmem:[%s18905_s7 + $0x158] sm:$0xff] }
 0xcd2   :  { %v4892_v62 = vld [vmem:[%s18905_s7 + $0x168] sm:$0xff] }
 0xcd3   :  { %v4217_v56 = vadd.f32 %v4216_v0, %v4215_v14  ;;  %v4853_v14 = vld [vmem:[%s18905_s7 + $0x30] sm:$0xff]  ;;  %v4856_v0 = vld [vmem:[%s18905_s7 + $0x48] sm:$0xff] }
 0xcd5   :  { %13392 = vtanh.f32 %v4217_v56  ;;  %v15874_v2 = vsel %vm4223_vm15, %v4217_v56, %v15818_v1  ;;  %v15973_v56 = vpack.c.bf16 %v4853_v14, %v4849_v40  ;;  %v4894_v40 = vld [vmem:[%s18905_s7 + $0x178] sm:$0xff] }
 0xcdf   :  { %v13393_v9 = vpop.eup %13392 }
 0xce0   :  { %v4221_v27 = vmul.f32 %v13393_v9, %v4219_v32  ;;  %v4858_v32 = vld [vmem:[%s18905_s7 + $0x58] sm:$0xff] }
 0xce1   :  { %v4862_v9 = vld [vmem:[%s18905_s7 + $0x78] sm:$0xff] }
 0xce2   :  { %v15877_v4 = vsel %vm4223_vm15, %v4221_v27, %v15821_v60  ;;  %v4226_v38 = vsel %vm4223_vm15, %v4221_v27, 0.0 }
 0xce3   :  { %4227 = vst.msk [vmem:[#allocation3 + $0x6] sm:$0x3] %vm579_vm3, %v4226_v38  ;;  %4358 = vmatmul.mubr.f32.vlgmr.msra.gmra.mrb[32].mxu0 %v15877_v4  ;;  %4429 = vmatmul.mubr.f32.vlgmr.msra.gmra.mrb[32].mxu1 %v15877_v4 }
 0xce4   :  { %4228 = vst.msk [vmem:[#allocation3 + $0x8] sm:$0x3] %vm581_vm4, %v4226_v38  ;;  %12058 = vmatpush1.bf16.msra.mxu0 %v15537_v54  ;;  %12090 = vmatpush1.bf16.msra.mxu1 %v15549_v55  ;;  %v13250_v54 = vld [vmem:[#allocation2 + $0x20] ss:$8 sps:$4 sm:$0x33]  }
 0xce5   :  { %12060 = vmatprep.subr.bf16.mxu0 %v15562_v35  ;;  %12092 = vmatprep.subr.bf16.mxu1 %v15564_v24  ;;  %v13251_v55 = vld [vmem:[#allocation2 + $0x30] ss:$8 sps:$4 sm:$0x33]   ;;  %v13252_v35 = vld [vmem:[#allocation2 + $0x4] ss:$8 sps:$4 sm:$0xcc]  }
 0xce6   :  { %4666 = vmatprep.mubr.f32.mxu0 %v18923_v7  ;;  %4737 = vmatprep.mubr.f32.mxu1 %v18923_v7  ;;  %v13253_v24 = vld [vmem:[#allocation2 + $0x14] ss:$8 sps:$4 sm:$0xcc]   ;;  %v4855_v38 = vld [vmem:[%s18905_s7 + $0x40] sm:$0xff] }
 0xce8   :  { %12062 = vmatpush1.bf16.msra.mxu0 %v15576_v43  ;;  %12094 = vmatpush1.bf16.msra.mxu1 %v15589_v22  ;;  %v4455_v43 = vrot.slane %v13250_v54, %v14026_v17  ;;  %v4462_v22 = vrot.slane %v13251_v55, %v14026_v17  ;;  %v4859_v54 = vld [vmem:[%s18905_s7 + $0x60] sm:$0xff]  ;;  %v4857_v55 = vld [vmem:[%s18905_s7 + $0x50] sm:$0xff] }
 0xce9   :  { %12064 = vmatprep.subr.bf16.mxu0 %v15591_v3  ;;  %12096 = vmatprep.subr.bf16.mxu1 %v15602_v47 }
 0xcec   :  { %12066 = vmatpush1.bf16.msra.mxu0 %v15614_v10  ;;  %12098 = vmatpush1.bf16.msra.mxu1 %v15627_v58 }
 0xced   :  { %12068 = vmatprep.subr.bf16.mxu0 %v15629_v39  ;;  %12100 = vmatprep.subr.bf16.mxu1 %v15641_v45  ;;  %v4477_v39 = vrot.slane %v13252_v35, %v14026_v17  ;;  %v4484_v45 = vrot.slane %v13253_v24, %v14026_v17  ;;  %v16000_v35 = vpack.c.bf16 %v4859_v54, %v4855_v38  ;;  %v4861_v24 = vld [vmem:[%s18905_s7 + $0x70] sm:$0xff] }
 0xcee   :  { %v4889_v38 = vld [vmem:[%s18905_s7 + $0x150] sm:$0xff]  ;;  %v16140_v54 = vpack.c.bf16 %v4894_v40, %v4890_v8  ;;  %v13256_v40 = vld [vmem:[#allocation2 + $0x4] ss:$8 sps:$4 sm:$0x33]  }
 0xcef   :  { %v13255_v8 = vld [vmem:[#allocation2 + $0x30] ss:$8 sps:$4 sm:$0xcc]  }
 0xcf0   :  { %12070 = vmatpush1.bf16.msra.mxu0 %v15662_v59  ;;  %12102 = vmatpush1.bf16.msra.mxu1 %v15666_v51 }
 0xcf1   :  { %12072 = vmatprep.subr.bf16.mxu0 %v15668_v50  ;;  %12104 = vmatprep.subr.bf16.mxu1 %v15680_v63  ;;  %v4463_v50 = vcombine.low %v4455_v43, %v4462_v22  ;;  %v4864_v43 = vld [vmem:[%s18905_s7 + $0x88] sm:$0xff] }
 0xcf2   :  { %v4868_v22 = vld [vmem:[%s18905_s7 + $0xa8] sm:$0xff] }
 0xcf4   :  { %12074 = vmatpush1.bf16.msra.mxu0 %v15698_v36  ;;  %12106 = vmatpush1.bf16.msra.mxu1 %v15702_v11  ;;  %v4485_v11 = vcombine.high %v4477_v39, %v4484_v45  ;;  %v4863_v39 = vld [vmem:[%s18905_s7 + $0x80] sm:$0xff] }
 0xcf5   :  { %12076 = vmatprep.subr.bf16.mxu0 %v15704_v20  ;;  %12108 = vmatprep.subr.bf16.mxu1 %v15716_v26 }
 0xcf6   :  { %v4487_v26 = vsel %vm63_vm1, %v4463_v50, %v4485_v11  ;;  %v4869_v50 = vld [vmem:[%s18905_s7 + $0xb0] sm:$0xff]  ;;  %v4876_v11 = vld [vmem:[%s18905_s7 + $0xe8] sm:$0xff] }
 0xcf8   :  { %12078 = vmatpush1.bf16.msra.mxu0 %v15734_v28  ;;  %12110 = vmatpush1.bf16.msra.mxu1 %v15738_v41 }
 0xcf9   :  { %12080 = vmatprep.subr.bf16.mxu0 %v15740_v12  ;;  %12112 = vmatprep.subr.bf16.mxu1 %v15752_v48 }
 0xcfc   :  { %12082 = vmatpush1.bf16.msra.mxu0 %v15770_v25  ;;  %12114 = vmatpush1.bf16.msra.mxu1 %v15774_v42 }
 0xcfd   :  { %12084 = vmatprep.subr.bf16.mxu0 %v15776_v31  ;;  %12116 = vmatprep.subr.bf16.mxu1 %v15785_v61  ;;  %v4531_v61 = vld [vmem:[%s18956_s3 + $0x8] sm:$0x3] }
 0xcfe   :  { %vm4532_vm0 = vcmp.gt.f32.partialorder %v4531_v61, 0.5  ;;  %v4880_v61 = vld [vmem:[%s18905_s7 + $0x108] sm:$0xff] }
 0xd00   :  { %12086 = vmatpush1.bf16.msra.mxu0 %v15794_v34  ;;  %12118 = vmatpush1.bf16.msra.mxu1 %v15798_v5 }
 0xd01   :  { %12120 = vmatprep.subr.bf16.mxu0 %v15948_v37  ;;  %12152 = vmatprep.subr.bf16.mxu1 %v15959_v6 }
 0xdb6   :  { %v4359_v3 = vpop.f32.mrb[32].mxu0  ;;  %v4430_v47 = vpop.f32.mrb[32].mxu1 }
 0xdb7   :  { %v4361_v10 = vpop.f32.mrb[33].mxu0  ;;  %v4432_v58 = vpop.f32.mrb[33].mxu1 }
 0xdb8   :  { %v4492_v59 = vcombine.low %v4359_v3, %v4361_v10  ;;  %v4493_v51 = vcombine.low %v4430_v47, %v4432_v58  ;;  %v16013_v3 = vpack.c.bf16 %v4861_v24, %v4857_v55  ;;  %v16015_v47 = vpack.c.bf16 %v4868_v22, %v4864_v43  ;;  %v4866_v10 = vld [vmem:[%s18905_s7 + $0x98] sm:$0xff]  ;;  %v4893_v55 = vld [vmem:[%s18905_s7 + $0x170] sm:$0xff]  ;;  %v4896_v24 = vld [vmem:[%s18905_s7 + $0x188] sm:$0xff] }
 0xdb9   :  { %v4870_v58 = vld [vmem:[%s18905_s7 + $0xb8] sm:$0xff]  ;;  %v4900_v43 = vld [vmem:[%s18905_s7 + $0x1a8] sm:$0xff] }
 0xdba   :  { %v4500_v63 = vrot.slane %v4492_v59, %v14026_v17  ;;  %v4507_v36 = vrot.slane %v4493_v51, %v14026_v17  ;;  %v16026_v45 = vpack.c.bf16 %v4870_v58, %v4866_v10  ;;  %v4867_v59 = vld [vmem:[%s18905_s7 + $0xa0] sm:$0xff]  ;;  %v4865_v51 = vld [vmem:[%s18905_s7 + $0x90] sm:$0xff]  ;;  %v4898_v22 = vld [vmem:[%s18905_s7 + $0x198] sm:$0xff] }
 0xdbb   :  { %v4902_v10 = vld [vmem:[%s18905_s7 + $0x1b8] sm:$0xff] }
 0xdbc   :  { %v4508_v20 = vcombine.low %v4500_v63, %v4507_v36  ;;  %v16038_v63 = vpack.c.bf16 %v4867_v59, %v4863_v39  ;;  %v4872_v36 = vld [vmem:[%s18905_s7 + $0xc8] sm:$0xff]  ;;  %v16162_v39 = vpack.c.bf16 %v4893_v55, %v4889_v38  ;;  %v16164_v59 = vpack.c.bf16 %v4900_v43, %v4896_v24 }
 0xdbd   :  { %v4771_v38 = vrot.slane %v13255_v8, %v14026_v17 }
 0xdbe   :  { %v4510_v28 = vadd.f32 %v4508_v20, %v4487_v26  ;;  %v4874_v20 = vld [vmem:[%s18905_s7 + $0xd8] sm:$0xff]  ;;  %v16051_v26 = vpack.c.bf16 %v4869_v50, %v4865_v51  ;;  %v4895_v51 = vld [vmem:[%s18905_s7 + $0x180] sm:$0xff] }
 0xdbf   :  { %v4899_v50 = vld [vmem:[%s18905_s7 + $0x1a0] sm:$0xff] }
 0xdc0   :  { %v10870_v41 = vmul.f32 -1.442695, %v4510_v28  ;;  %v4518_v25 = vrot.slane %v4510_v28, 6  ;;  %v16053_v28 = vpack.c.bf16 %v4876_v11, %v4872_v36  ;;  %v4897_v36 = vld [vmem:[%s18905_s7 + $0x190] sm:$0xff]  ;;  %v16176_v11 = vpack.c.bf16 %v4902_v10, %v4898_v22 }
 0xdc1   :  { %v4786_v10 = vrot.slane %v13256_v40, %v14026_v17  ;;  %v4840_v40 = vld [vmem:[%s18956_s3 + $0xa] sm:$0x3] }
 0xdc2   :  { %13394 = vpow2.f32 %v10870_v41  ;;  %v4878_v41 = vld [vmem:[%s18905_s7 + $0xf8] sm:$0xff]  ;;  %vm4841_vm2 = vcmp.gt.f32.partialorder %v4840_v40, 0.5 }
 0xdcc   :  { %v13395_v12 = vpop.eup %13394 }
 0xdcd   :  { %v4514_v48 = vadd.f32 1.0, %v13395_v12  ;;  %v4871_v12 = vld [vmem:[%s18905_s7 + $0xc0] sm:$0xff] }
 0xdcf   :  { %13396 = vrcp.f32 %v4514_v48  ;;  %v4875_v48 = vld [vmem:[%s18905_s7 + $0xe0] sm:$0xff] }
 0xdd0   :  { %13398 = vtanh.f32 %v4518_v25  ;;  %v16065_v25 = vpack.c.bf16 %v4878_v41, %v4874_v20  ;;  %v4901_v20 = vld [vmem:[%s18905_s7 + $0x1b0] sm:$0xff]  ;;  %v4904_v41 = vld [vmem:[%s18905_s7 + $0x1c8] sm:$0xff] }
 0xdd9   :  { %v13397_v42 = vpop.eup %13396 }
 0xdda   :  { %v4522_v31 = vrot.slane %v13397_v42, 2  ;;  %v13399_v34 = vpop.eup %13398  ;;  %v4528_v52 = vrot.slane %v13397_v42, 4 }
 0xddb   :  { %v4525_v1 = vmul.f32 %v13399_v34, %v13397_v42  ;;  %v4873_v42 = vld [vmem:[%s18905_s7 + $0xd0] sm:$0xff]  ;;  %v4884_v34 = vld [vmem:[%s18905_s7 + $0x128] sm:$0xff] }
 0xddc   :  { %v4524_v5 = vmul.f32 %v4522_v31, %v15874_v2  ;;  %v4877_v31 = vld [vmem:[%s18905_s7 + $0xf0] sm:$0xff] }
 0xdde   :  { %v4526_v60 = vadd.f32 %v4525_v1, %v4524_v5  ;;  %v4882_v5 = vld [vmem:[%s18905_s7 + $0x118] sm:$0xff] }
 0xddf   :  { %v4886_v1 = vld [vmem:[%s18905_s7 + $0x138] sm:$0xff] }
 0xde0   :  { %13400 = vtanh.f32 %v4526_v60  ;;  %v15928_v16 = vsel %vm4532_vm0, %v4526_v60, %v15874_v2  ;;  %v4860_v2 = vld [vmem:[%s18905_s7 + $0x68] sm:$0xff]  ;;  %v16086_v60 = vpack.c.bf16 %v4875_v48, %v4871_v12  ;;  %v16104_v23 = vpack.c.bf16 %v4886_v1, %v4882_v5  ;;  %v4906_v48 = vld [vmem:[%s18905_s7 + $0x1d8] sm:$0xff]  ;;  %v4903_v5 = vld [vmem:[%s18905_s7 + $0x1c0] sm:$0xff] }
 0xde1   :  { %v15986_v27 = vpack.c.bf16 %v4860_v2, %v4856_v0  ;;  %v16126_v0 = vpack.c.bf16 %v4885_v46, %v4881_v33  ;;  %v16128_v2 = vpack.c.bf16 %v4892_v62, %v4888_v44  ;;  %v4908_v12 = vld [vmem:[%s18905_s7 + $0x1e8] sm:$0xff]  ;;  %v4907_v1 = vld [vmem:[%s18905_s7 + $0x1e0] sm:$0xff]  ;;  %v4909_v33 = vld [vmem:[%s18905_s7 + $0x1f0] sm:$0xff] }
 0xde2   :  { %v16218_v46 = vpack.c.bf16 %v4907_v1, %v4903_v5  ;;  %v13254_v62 = vld [vmem:[#allocation2 + $0x20] ss:$8 sps:$4 sm:$0xcc]  }
 0xdea   :  { %v13401_v53 = vpop.eup %13400 }
 0xdeb   :  { %v4530_v57 = vmul.f32 %v13401_v53, %v4528_v52  ;;  %v16090_v52 = vpack.c.bf16 %v4877_v31, %v4873_v42  ;;  %v16092_v53 = vpack.c.bf16 %v4884_v34, %v4880_v61  ;;  %v4910_v42 = vld [vmem:[%s18905_s7 + $0x1f8] sm:$0xff]  ;;  %v16194_v31 = vpack.c.bf16 %v4899_v50, %v4895_v51 }
 0xdec   :  { %v16198_v61 = vpack.c.bf16 %v4901_v20, %v4897_v36  ;;  %v16200_v34 = vpack.c.bf16 %v4908_v12, %v4904_v41 }
 0xded   :  { %v15931_v15 = vsel %vm4532_vm0, %v4530_v57, %v15877_v4  ;;  %v4535_v30 = vsel %vm4532_vm0, %v4530_v57, 0.0  ;;  %v15988_v4 = vpack.c.bf16 %v4862_v9, %v4858_v32  ;;  %v4879_v57 = vld [vmem:[%s18905_s7 + $0x100] sm:$0xff] }
 0xdee   :  { %4536 = vst.msk [vmem:[#allocation3 + $0x8] sm:$0x3] %vm579_vm3, %v4535_v30  ;;  %4667 = vmatmul.mubr.f32.vlgmr.msra.gmra.mrb[34].mxu0 %v15931_v15  ;;  %4738 = vmatmul.mubr.f32.vlgmr.msra.gmra.mrb[34].mxu1 %v15931_v15  ;;  %v4887_v32 = vld [vmem:[%s18905_s7 + $0x140] sm:$0xff] }
 0xdef   :  { %4537 = vst.msk [vmem:[#allocation3 + $0x6] sm:$0x3] %vm581_vm4, %v4535_v30  ;;  %4975 = vmatprep.mubr.f32.mxu0 %v18923_v7  ;;  %5046 = vmatprep.mubr.f32.mxu1 %v18923_v7  ;;  %v4883_v30 = vld [vmem:[%s18905_s7 + $0x120] sm:$0xff] }
 0xdf0   :  { %12122 = vmatpush1.bf16.msra.mxu0 %v15961_v49  ;;  %12154 = vmatpush1.bf16.msra.mxu1 %v15973_v56  ;;  %v16122_v14 = vpack.c.bf16 %v4883_v30, %v4879_v57  ;;  %v4891_v9 = vld [vmem:[%s18905_s7 + $0x160] sm:$0xff]  ;;  %v16209_v57 = vpack.c.bf16 %v4910_v42, %v4906_v48  ;;  %v4905_v30 = vld [vmem:[%s18905_s7 + $0x1d0] sm:$0xff] }
 0xdf1   :  { %12124 = vmatprep.subr.bf16.mxu0 %v15986_v27  ;;  %12156 = vmatprep.subr.bf16.mxu1 %v15988_v4  ;;  %v16158_v58 = vpack.c.bf16 %v4891_v9, %v4887_v32  ;;  %v16222_v44 = vpack.c.bf16 %v4909_v33, %v4905_v30  ;;  %v13257_v32 = vld [vmem:[#allocation2 + $0x14] ss:$8 sps:$4 sm:$0x33]   ;;  %v4764_v9 = vrot.slane %v13254_v62, %v14026_v17 }
 0xdf2   :  { %v4793_v51 = vrot.slane %v13257_v32, %v14026_v17 }
 0xdf3   :  { %v4772_v36 = vcombine.high %v4764_v9, %v4771_v38 }
 0xdf4   :  { %12126 = vmatpush1.bf16.msra.mxu0 %v16000_v35  ;;  %12158 = vmatpush1.bf16.msra.mxu1 %v16013_v3  ;;  %v4794_v41 = vcombine.low %v4786_v10, %v4793_v51 }
 0xdf5   :  { %12128 = vmatprep.subr.bf16.mxu0 %v16015_v47  ;;  %12160 = vmatprep.subr.bf16.mxu1 %v16026_v45 }
 0xdf6   :  { %v4796_v48 = vsel %vm63_vm1, %v4772_v36, %v4794_v41 }
 0xdf8   :  { %12130 = vmatpush1.bf16.msra.mxu0 %v16038_v63  ;;  %12162 = vmatpush1.bf16.msra.mxu1 %v16051_v26 }
 0xdf9   :  { %12132 = vmatprep.subr.bf16.mxu0 %v16053_v28  ;;  %12164 = vmatprep.subr.bf16.mxu1 %v16065_v25 }
 0xdfc   :  { %12134 = vmatpush1.bf16.msra.mxu0 %v16086_v60  ;;  %12166 = vmatpush1.bf16.msra.mxu1 %v16090_v52 }
 0xdfd   :  { %12136 = vmatprep.subr.bf16.mxu0 %v16092_v53  ;;  %12168 = vmatprep.subr.bf16.mxu1 %v16104_v23 }
 0xe00   :  { %12138 = vmatpush1.bf16.msra.mxu0 %v16122_v14  ;;  %12170 = vmatpush1.bf16.msra.mxu1 %v16126_v0 }
 0xe01   :  { %12140 = vmatprep.subr.bf16.mxu0 %v16128_v2  ;;  %12172 = vmatprep.subr.bf16.mxu1 %v16140_v54 }
 0xe04   :  { %12142 = vmatpush1.bf16.msra.mxu0 %v16158_v58  ;;  %12174 = vmatpush1.bf16.msra.mxu1 %v16162_v39 }
 0xe05   :  { %12144 = vmatprep.subr.bf16.mxu0 %v16164_v59  ;;  %12176 = vmatprep.subr.bf16.mxu1 %v16176_v11 }
 0xe08   :  { %12146 = vmatpush1.bf16.msra.mxu0 %v16194_v31  ;;  %12178 = vmatpush1.bf16.msra.mxu1 %v16198_v61 }
 0xe09   :  { %12148 = vmatprep.subr.bf16.mxu0 %v16200_v34  ;;  %12180 = vmatprep.subr.bf16.mxu1 %v16209_v57 }
 0xe0c   :  { %12150 = vmatpush1.bf16.msra.mxu0 %v16218_v46  ;;  %12182 = vmatpush1.bf16.msra.mxu1 %v16222_v44 }
 0xe0d   :  { %12184 = vmatprep.subr.bf16.mxu0 %v15948_v37  ;;  %12216 = vmatprep.subr.bf16.mxu1 %v15959_v6 }
 0xec1   :  { %v4668_v55 = vpop.f32.mrb[34].mxu0  ;;  %v4739_v24 = vpop.f32.mrb[34].mxu1 }
 0xec2   :  { %v4670_v43 = vpop.f32.mrb[35].mxu0  ;;  %v4741_v22 = vpop.f32.mrb[35].mxu1 }
 0xec3   :  { %v4801_v50 = vcombine.low %v4668_v55, %v4670_v43  ;;  %v4802_v37 = vcombine.low %v4739_v24, %v4741_v22 }
 0xec5   :  { %v4809_v6 = vrot.slane %v4801_v50, %v14026_v17  ;;  %v4816_v20 = vrot.slane %v4802_v37, %v14026_v17 }
 0xec7   :  { %v4817_v12 = vcombine.low %v4809_v6, %v4816_v20 }
 0xec9   :  { %v4819_v42 = vadd.f32 %v4817_v12, %v4796_v48  ;;  %v5466_v48 = vld [vmem:[%s18907_s9 + $0x8] sm:$0xff] }
 0xecb   :  { %v10871_v5 = vmul.f32 -1.442695, %v4819_v42  ;;  %v4827_v33 = vrot.slane %v4819_v42, 6  ;;  %v5470_v42 = vld [vmem:[%s18907_s9 + $0x28] sm:$0xff] }
 0xecd   :  { %13402 = vpow2.f32 %v10871_v5  ;;  %v5468_v5 = vld [vmem:[%s18907_s9 + $0x18] sm:$0xff] }
 0xed7   :  { %v13403_v1 = vpop.eup %13402 }
 0xed8   :  { %v4823_v30 = vadd.f32 1.0, %v13403_v1  ;;  %v12247_v1 = vpack.c.bf16 %v5470_v42, %v5466_v48  ;;  %v5503_v42 = vld [vmem:[%s18907_s9 + $0x130] sm:$0xff] }
 0xeda   :  { %13404 = vrcp.f32 %v4823_v30  ;;  %v5472_v30 = vld [vmem:[%s18907_s9 + $0x38] sm:$0xff] }
 0xedb   :  { %13406 = vtanh.f32 %v4827_v33  ;;  %v5465_v33 = vld [vmem:[%s18907_s9] sm:$0xff] }
 0xee4   :  { %v13405_v62 = vpop.eup %13404 }
 0xee5   :  { %v4831_v8 = vrot.slane %v13405_v62, 2  ;;  %v13407_v32 = vpop.eup %13406  ;;  %v4837_v43 = vrot.slane %v13405_v62, 4 }
 0xee6   :  { %v4834_v38 = vmul.f32 %v13407_v32, %v13405_v62  ;;  %v5469_v62 = vld [vmem:[%s18907_s9 + $0x20] sm:$0xff]  ;;  %v5467_v32 = vld [vmem:[%s18907_s9 + $0x10] sm:$0xff] }
 0xee7   :  { %v4833_v9 = vmul.f32 %v4831_v8, %v15928_v16  ;;  %v12279_v8 = vpack.c.bf16 %v5472_v30, %v5468_v5  ;;  %v12249_v40 = vpack.c.bf16 %v5469_v62, %v5465_v33  ;;  %v5506_v5 = vld [vmem:[%s18907_s9 + $0x148] sm:$0xff]  ;;  %v5508_v30 = vld [vmem:[%s18907_s9 + $0x158] sm:$0xff] }
 0xee8   :  { %v5512_v33 = vld [vmem:[%s18907_s9 + $0x178] sm:$0xff] }
 0xee9   :  { %v4835_v55 = vadd.f32 %v4834_v38, %v4833_v9  ;;  %v5471_v9 = vld [vmem:[%s18907_s9 + $0x30] sm:$0xff]  ;;  %v5474_v38 = vld [vmem:[%s18907_s9 + $0x48] sm:$0xff] }
 0xeeb   :  { %13408 = vtanh.f32 %v4835_v55  ;;  %v16242_v24 = vsel %vm4841_vm2, %v4835_v55, %v15928_v16  ;;  %v13258_v16 = vld [vmem:[#allocation2 + $0x24] ss:$8 sps:$4 sm:$0x33]   ;;  %v12281_v55 = vpack.c.bf16 %v5471_v9, %v5467_v32 }
 0xeec   :  { %v5505_v32 = vld [vmem:[%s18907_s9 + $0x140] sm:$0xff] }
 0xeed   :  { %v5509_v9 = vld [vmem:[%s18907_s9 + $0x160] sm:$0xff] }
 0xef5   :  { %v13409_v22 = vpop.eup %13408 }
 0xef6   :  { %v4839_v10 = vmul.f32 %v13409_v22, %v4837_v43  ;;  %v5476_v43 = vld [vmem:[%s18907_s9 + $0x58] sm:$0xff] }
 0xef7   :  { %v5480_v22 = vld [vmem:[%s18907_s9 + $0x78] sm:$0xff] }
 0xef8   :  { %v16245_v51 = vsel %vm4841_vm2, %v4839_v10, %v15931_v15  ;;  %v4844_v50 = vsel %vm4841_vm2, %v4839_v10, 0.0  ;;  %v13259_v15 = vld [vmem:[#allocation2 + $0x34] ss:$8 sps:$4 sm:$0x33]  }
 0xef9   :  { %4845 = vst.msk [vmem:[#allocation3 + $0xa] sm:$0x3] %vm579_vm3, %v4844_v50  ;;  %4976 = vmatmul.mubr.f32.vlgmr.msra.gmra.mrb[36].mxu0 %v16245_v51  ;;  %5047 = vmatmul.mubr.f32.vlgmr.msra.gmra.mrb[36].mxu1 %v16245_v51 }
 0xefa   :  { %4846 = vst.msk [vmem:[#allocation3 + $0x4] sm:$0x3] %vm581_vm4, %v4844_v50  ;;  %12186 = vmatpush1.bf16.msra.mxu0 %v15961_v49  ;;  %12218 = vmatpush1.bf16.msra.mxu1 %v15973_v56  ;;  %v13260_v49 = vld [vmem:[#allocation2] ss:$8 sps:$4 sm:$0xcc]  }
 0xefb   :  { %12188 = vmatprep.subr.bf16.mxu0 %v15986_v27  ;;  %12220 = vmatprep.subr.bf16.mxu1 %v15988_v4  ;;  %v13261_v56 = vld [vmem:[#allocation2 + $0x10] ss:$8 sps:$4 sm:$0xcc]   ;;  %v5073_v27 = vrot.slane %v13258_v16, %v14026_v17  ;;  %v5080_v4 = vrot.slane %v13259_v15, %v14026_v17  ;;  %v5473_v50 = vld [vmem:[%s18907_s9 + $0x40] sm:$0xff] }
 0xefc   :  { %5284 = vmatprep.mubr.f32.mxu0 %v18923_v7  ;;  %5355 = vmatprep.mubr.f32.mxu1 %v18923_v7  ;;  %v5477_v16 = vld [vmem:[%s18907_s9 + $0x60] sm:$0xff]  ;;  %v5475_v15 = vld [vmem:[%s18907_s9 + $0x50] sm:$0xff] }
 0xefe   :  { %12190 = vmatpush1.bf16.msra.mxu0 %v16000_v35  ;;  %12222 = vmatpush1.bf16.msra.mxu1 %v16013_v3 }
 0xeff   :  { %12192 = vmatprep.subr.bf16.mxu0 %v16015_v47  ;;  %12224 = vmatprep.subr.bf16.mxu1 %v16026_v45 }
 0xf02   :  { %12194 = vmatpush1.bf16.msra.mxu0 %v16038_v63  ;;  %12226 = vmatpush1.bf16.msra.mxu1 %v16051_v26  ;;  %v5095_v63 = vrot.slane %v13260_v49, %v14026_v17  ;;  %v5102_v26 = vrot.slane %v13261_v56, %v14026_v17  ;;  %v12253_v49 = vpack.c.bf16 %v5477_v16, %v5473_v50  ;;  %v5479_v56 = vld [vmem:[%s18907_s9 + $0x70] sm:$0xff] }
 0xf03   :  { %12196 = vmatprep.subr.bf16.mxu0 %v16053_v28  ;;  %12228 = vmatprep.subr.bf16.mxu1 %v16065_v25  ;;  %v12269_v50 = vpack.c.bf16 %v5509_v9, %v5505_v32 }
 0xf06   :  { %12198 = vmatpush1.bf16.msra.mxu0 %v16086_v60  ;;  %12230 = vmatpush1.bf16.msra.mxu1 %v16090_v52  ;;  %v5081_v60 = vcombine.low %v5073_v27, %v5080_v4  ;;  %v5482_v27 = vld [vmem:[%s18907_s9 + $0x88] sm:$0xff] }
 0xf07   :  { %12200 = vmatprep.subr.bf16.mxu0 %v16092_v53  ;;  %12232 = vmatprep.subr.bf16.mxu1 %v16104_v23  ;;  %v5103_v23 = vcombine.high %v5095_v63, %v5102_v26  ;;  %v5486_v4 = vld [vmem:[%s18907_s9 + $0xa8] sm:$0xff]  ;;  %v5481_v63 = vld [vmem:[%s18907_s9 + $0x80] sm:$0xff] }
 0xf0a   :  { %12202 = vmatpush1.bf16.msra.mxu0 %v16122_v14  ;;  %12234 = vmatpush1.bf16.msra.mxu1 %v16126_v0  ;;  %v5105_v0 = vsel %vm63_vm1, %v5081_v60, %v5103_v23  ;;  %v5487_v60 = vld [vmem:[%s18907_s9 + $0xb0] sm:$0xff]  ;;  %v5494_v23 = vld [vmem:[%s18907_s9 + $0xe8] sm:$0xff] }
 0xf0b   :  { %12204 = vmatprep.subr.bf16.mxu0 %v16128_v2  ;;  %12236 = vmatprep.subr.bf16.mxu1 %v16140_v54 }
 0xf0e   :  { %12206 = vmatpush1.bf16.msra.mxu0 %v16158_v58  ;;  %12238 = vmatpush1.bf16.msra.mxu1 %v16162_v39 }
 0xf0f   :  { %12208 = vmatprep.subr.bf16.mxu0 %v16164_v59  ;;  %12240 = vmatprep.subr.bf16.mxu1 %v16176_v11 }
 0xf12   :  { %12210 = vmatpush1.bf16.msra.mxu0 %v16194_v31  ;;  %12242 = vmatpush1.bf16.msra.mxu1 %v16198_v61  ;;  %v5149_v61 = vld [vmem:[%s18956_s3 + $0xc] sm:$0x3] }
 0xf13   :  { %12212 = vmatprep.subr.bf16.mxu0 %v16200_v34  ;;  %12244 = vmatprep.subr.bf16.mxu1 %v16209_v57  ;;  %vm5150_vm5 = vcmp.gt.f32.partialorder %v5149_v61, 0.5  ;;  %v5498_v61 = vld [vmem:[%s18907_s9 + $0x108] sm:$0xff] }
 0xf16   :  { %12214 = vmatpush1.bf16.msra.mxu0 %v16218_v46  ;;  %12246 = vmatpush1.bf16.msra.mxu1 %v16222_v44 }
 0xf17   :  { %12248 = vmatprep.subr.bf16.mxu0 %v12247_v1  ;;  %12280 = vmatprep.subr.bf16.mxu1 %v12279_v8  ;;  %v5510_v1 = vld [vmem:[%s18907_s9 + $0x168] sm:$0xff] }
 0xfcc   :  { %v4977_v35 = vpop.f32.mrb[36].mxu0  ;;  %v5048_v3 = vpop.f32.mrb[36].mxu1 }
 0xfcd   :  { %v4979_v47 = vpop.f32.mrb[37].mxu0  ;;  %v5050_v45 = vpop.f32.mrb[37].mxu1 }
 0xfce   :  { %v5110_v28 = vcombine.low %v4977_v35, %v4979_v47  ;;  %v5111_v25 = vcombine.low %v5048_v3, %v5050_v45  ;;  %v12285_v35 = vpack.c.bf16 %v5479_v56, %v5475_v15  ;;  %v12255_v3 = vpack.c.bf16 %v5486_v4, %v5482_v27  ;;  %v5484_v47 = vld [vmem:[%s18907_s9 + $0x98] sm:$0xff]  ;;  %v5517_v56 = vld [vmem:[%s18907_s9 + $0x1a0] sm:$0xff]  ;;  %v5515_v27 = vld [vmem:[%s18907_s9 + $0x190] sm:$0xff] }
 0xfcf   :  { %v5488_v45 = vld [vmem:[%s18907_s9 + $0xb8] sm:$0xff] }
 0xfd0   :  { %v5118_v52 = vrot.slane %v5110_v28, %v14026_v17  ;;  %v5125_v53 = vrot.slane %v5111_v25, %v14026_v17  ;;  %v12287_v26 = vpack.c.bf16 %v5488_v45, %v5484_v47  ;;  %v5485_v28 = vld [vmem:[%s18907_s9 + $0xa0] sm:$0xff]  ;;  %v5483_v25 = vld [vmem:[%s18907_s9 + $0x90] sm:$0xff]  ;;  %v5526_v47 = vld [vmem:[%s18907_s9 + $0x1e8] sm:$0xff] }
 0xfd1   :  { %v5524_v45 = vld [vmem:[%s18907_s9 + $0x1d8] sm:$0xff] }
 0xfd2   :  { %v5126_v14 = vcombine.low %v5118_v52, %v5125_v53  ;;  %v12257_v52 = vpack.c.bf16 %v5485_v28, %v5481_v63  ;;  %v5490_v53 = vld [vmem:[%s18907_s9 + $0xc8] sm:$0xff]  ;;  %v5528_v63 = vld [vmem:[%s18907_s9 + $0x1f8] sm:$0xff] }
 0xfd4   :  { %v5128_v2 = vadd.f32 %v5126_v14, %v5105_v0  ;;  %v5492_v14 = vld [vmem:[%s18907_s9 + $0xd8] sm:$0xff]  ;;  %v12289_v0 = vpack.c.bf16 %v5487_v60, %v5483_v25  ;;  %v5521_v60 = vld [vmem:[%s18907_s9 + $0x1c0] sm:$0xff] }
 0xfd6   :  { %v10872_v54 = vmul.f32 -1.442695, %v5128_v2  ;;  %v5136_v59 = vrot.slane %v5128_v2, 6  ;;  %v12259_v2 = vpack.c.bf16 %v5494_v23, %v5490_v53  ;;  %v5523_v53 = vld [vmem:[%s18907_s9 + $0x1d0] sm:$0xff]  ;;  %v12307_v23 = vpack.c.bf16 %v5528_v63, %v5524_v45  ;;  %v5722_v63 = vld [vmem:[%s18908_s10 + $0x48] sm:$0xff] }
 0xfd7   :  { %v5719_v45 = vld [vmem:[%s18908_s10 + $0x30] sm:$0xff] }
 0xfd8   :  { %13410 = vpow2.f32 %v10872_v54  ;;  %v5496_v54 = vld [vmem:[%s18907_s9 + $0xf8] sm:$0xff] }
 0xfe2   :  { %v13411_v58 = vpop.eup %13410 }
 0xfe3   :  { %v5132_v39 = vadd.f32 1.0, %v13411_v58  ;;  %v5489_v58 = vld [vmem:[%s18907_s9 + $0xc0] sm:$0xff] }
 0xfe5   :  { %13412 = vrcp.f32 %v5132_v39  ;;  %v5493_v39 = vld [vmem:[%s18907_s9 + $0xe0] sm:$0xff] }
 0xfe6   :  { %13414 = vtanh.f32 %v5136_v59  ;;  %v12291_v59 = vpack.c.bf16 %v5496_v54, %v5492_v14  ;;  %v5527_v14 = vld [vmem:[%s18907_s9 + $0x1f0] sm:$0xff]  ;;  %v5716_v54 = vld [vmem:[%s18908_s10 + $0x18] sm:$0xff] }
 0xfef   :  { %v13413_v11 = vpop.eup %13412 }
 0xff0   :  { %v5140_v31 = vrot.slane %v13413_v11, 2  ;;  %v13415_v34 = vpop.eup %13414  ;;  %v5146_v36 = vrot.slane %v13413_v11, 4 }
 0xff1   :  { %v5143_v46 = vmul.f32 %v13415_v34, %v13413_v11  ;;  %v5491_v11 = vld [vmem:[%s18907_s9 + $0xd0] sm:$0xff]  ;;  %v5502_v34 = vld [vmem:[%s18907_s9 + $0x128] sm:$0xff] }
 0xff2   :  { %v5142_v57 = vmul.f32 %v5140_v31, %v16242_v24  ;;  %v5495_v31 = vld [vmem:[%s18907_s9 + $0xf0] sm:$0xff] }
 0xff4   :  { %v5144_v44 = vadd.f32 %v5143_v46, %v5142_v57  ;;  %v5500_v57 = vld [vmem:[%s18907_s9 + $0x118] sm:$0xff] }
 0xff5   :  { %v5504_v46 = vld [vmem:[%s18907_s9 + $0x138] sm:$0xff] }
 0xff6   :  { %13416 = vtanh.f32 %v5144_v44  ;;  %v16296_v37 = vsel %vm5150_vm5, %v5144_v44, %v16242_v24  ;;  %v5478_v24 = vld [vmem:[%s18907_s9 + $0x68] sm:$0xff]  ;;  %v12261_v44 = vpack.c.bf16 %v5493_v39, %v5489_v58  ;;  %v12295_v48 = vpack.c.bf16 %v5504_v46, %v5500_v57  ;;  %v5720_v58 = vld [vmem:[%s18908_s10 + $0x38] sm:$0xff] }
 0xff7   :  { %v12251_v10 = vpack.c.bf16 %v5478_v24, %v5474_v38  ;;  %v5507_v38 = vld [vmem:[%s18907_s9 + $0x150] sm:$0xff]  ;;  %v13264_v57 = vld [vmem:[#allocation2] ss:$8 sps:$4 sm:$0x33]  }
 0xff8   :  { %v5511_v24 = vld [vmem:[%s18907_s9 + $0x170] sm:$0xff] }
 0xff9   :  { %v12301_v16 = vpack.c.bf16 %v5511_v24, %v5507_v38  ;;  %v13265_v46 = vld [vmem:[#allocation2 + $0x10] ss:$8 sps:$4 sm:$0x33]  }
0x1000   :  { %v13417_v6 = vpop.eup %13416 }
0x1001   :  { %v5148_v20 = vmul.f32 %v13417_v6, %v5146_v36  ;;  %v12293_v36 = vpack.c.bf16 %v5495_v31, %v5491_v11  ;;  %v12263_v6 = vpack.c.bf16 %v5502_v34, %v5498_v61  ;;  %v16509_v31 = vpack.c.bf16 %v5720_v58, %v5716_v54  ;;  %v13262_v61 = vld [vmem:[#allocation2 + $0x24] ss:$8 sps:$4 sm:$0xcc]   ;;  %v13263_v34 = vld [vmem:[#allocation2 + $0x34] ss:$8 sps:$4 sm:$0xcc]  }
0x1002   :  { %v5734_v54 = vld [vmem:[%s18908_s10 + $0xa8] sm:$0xff] }
0x1003   :  { %v5152_v41 = vsel %vm5150_vm5, %v5148_v20, %v16245_v51  ;;  %v5153_v12 = vsel %vm5150_vm5, %v5148_v20, 0.0  ;;  %v12283_v51 = vpack.c.bf16 %v5480_v22, %v5476_v43  ;;  %v5497_v20 = vld [vmem:[%s18907_s9 + $0x100] sm:$0xff]  ;;  %v5514_v43 = vld [vmem:[%s18907_s9 + $0x188] sm:$0xff] }
0x1004   :  { %5154 = vst.msk [vmem:[#allocation3 + $0xc] sm:$0x3] %vm579_vm3, %v5153_v12  ;;  %5285 = vmatmul.mubr.f32.vlgmr.msra.gmra.mrb[38].mxu0 %v5152_v41  ;;  %5356 = vmatmul.mubr.f32.vlgmr.msra.gmra.mrb[38].mxu1 %v5152_v41  ;;  %v5501_v41 = vld [vmem:[%s18907_s9 + $0x120] sm:$0xff]  ;;  %v5518_v22 = vld [vmem:[%s18907_s9 + $0x1a8] sm:$0xff] }
0x1005   :  { %5155 = vst.msk [vmem:[#allocation3 + $0x2] sm:$0x3] %vm581_vm4, %v5153_v12  ;;  %5615 = vmatprep.mubr.f32.mxu0 %v18923_v7  ;;  %5692 = vmatprep.mubr.f32.mxu1 %v18923_v7  ;;  %v5499_v12 = vld [vmem:[%s18907_s9 + $0x110] sm:$0xff]  ;;  %v12265_v62 = vpack.c.bf16 %v5501_v41, %v5497_v20  ;;  %v12271_v15 = vpack.c.bf16 %v5518_v22, %v5514_v43 }
0x1006   :  { %12250 = vmatpush1.bf16.msra.mxu0 %v12249_v40  ;;  %12282 = vmatpush1.bf16.msra.mxu1 %v12281_v55  ;;  %v12297_v8 = vpack.c.bf16 %v5503_v42, %v5499_v12  ;;  %v12267_v40 = vpack.c.bf16 %v5510_v1, %v5506_v5  ;;  %v12299_v55 = vpack.c.bf16 %v5512_v33, %v5508_v30 }
0x1007   :  { %12252 = vmatprep.subr.bf16.mxu0 %v12251_v10  ;;  %12284 = vmatprep.subr.bf16.mxu1 %v12283_v51  ;;  %v5516_v10 = vld [vmem:[%s18907_s9 + $0x198] sm:$0xff]  ;;  %v5411_v42 = vrot.slane %v13265_v46, %v14026_v17 }
0x1008   :  { %v5520_v51 = vld [vmem:[%s18907_s9 + $0x1b8] sm:$0xff] }
0x1009   :  { %v12303_v4 = vpack.c.bf16 %v5520_v51, %v5516_v10 }
0x100a   :  { %12254 = vmatpush1.bf16.msra.mxu0 %v12253_v49  ;;  %12286 = vmatpush1.bf16.msra.mxu1 %v12285_v35  ;;  %v5513_v49 = vld [vmem:[%s18907_s9 + $0x180] sm:$0xff]  ;;  %v5519_v35 = vld [vmem:[%s18907_s9 + $0x1b0] sm:$0xff] }
0x100b   :  { %12256 = vmatprep.subr.bf16.mxu0 %v12255_v3  ;;  %12288 = vmatprep.subr.bf16.mxu1 %v12287_v26  ;;  %v5522_v3 = vld [vmem:[%s18907_s9 + $0x1c8] sm:$0xff]  ;;  %v12273_v26 = vpack.c.bf16 %v5517_v56, %v5513_v49  ;;  %v12305_v28 = vpack.c.bf16 %v5519_v35, %v5515_v27 }
0x100c   :  { %v12275_v25 = vpack.c.bf16 %v5526_v47, %v5522_v3  ;;  %v5458_v49 = vld [vmem:[%s18956_s3 + $0xe] sm:$0x3]  ;;  %v5717_v3 = vld [vmem:[%s18908_s10 + $0x20] sm:$0xff]  ;;  %v5715_v47 = vld [vmem:[%s18908_s10 + $0x10] sm:$0xff] }
0x100d   :  { %vm5459_vm6 = vcmp.gt.f32.partialorder %v5458_v49, 0.5 }
0x100e   :  { %12258 = vmatpush1.bf16.msra.mxu0 %v12257_v52  ;;  %12290 = vmatpush1.bf16.msra.mxu1 %v12289_v0  ;;  %v5525_v52 = vld [vmem:[%s18907_s9 + $0x1e0] sm:$0xff]  ;;  %v5714_v0 = vld [vmem:[%s18908_s10 + $0x8] sm:$0xff] }
0x100f   :  { %12260 = vmatprep.subr.bf16.mxu0 %v12259_v2  ;;  %12292 = vmatprep.subr.bf16.mxu1 %v12291_v59  ;;  %v5718_v2 = vld [vmem:[%s18908_s10 + $0x28] sm:$0xff]  ;;  %v12277_v39 = vpack.c.bf16 %v5525_v52, %v5521_v60  ;;  %v12309_v59 = vpack.c.bf16 %v5527_v14, %v5523_v53  ;;  %v16553_v52 = vpack.c.bf16 %v5719_v45, %v5715_v47  ;;  %v5721_v53 = vld [vmem:[%s18908_s10 + $0x40] sm:$0xff]  ;;  %v5723_v14 = vld [vmem:[%s18908_s10 + $0x50] sm:$0xff] }
0x1010   :  { %v16507_v11 = vpack.c.bf16 %v5718_v2, %v5714_v0  ;;  %v5727_v0 = vld [vmem:[%s18908_s10 + $0x70] sm:$0xff]  ;;  %v5730_v2 = vld [vmem:[%s18908_s10 + $0x88] sm:$0xff]  ;;  %v5760_v47 = vld [vmem:[%s18908_s10 + $0x178] sm:$0xff] }
0x1011   :  { %v16587_v46 = vpack.c.bf16 %v5727_v0, %v5723_v14  ;;  %v5759_v14 = vld [vmem:[%s18908_s10 + $0x170] sm:$0xff]  ;;  %v5762_v0 = vld [vmem:[%s18908_s10 + $0x188] sm:$0xff] }
0x1012   :  { %12262 = vmatpush1.bf16.msra.mxu0 %v12261_v44  ;;  %12294 = vmatpush1.bf16.msra.mxu1 %v12293_v36  ;;  %v5382_v44 = vrot.slane %v13262_v61, %v14026_v17  ;;  %v5389_v36 = vrot.slane %v13263_v34, %v14026_v17  ;;  %v5732_v61 = vld [vmem:[%s18908_s10 + $0x98] sm:$0xff] }
0x1013   :  { %12264 = vmatprep.subr.bf16.mxu0 %v12263_v6  ;;  %12296 = vmatprep.subr.bf16.mxu1 %v12295_v48  ;;  %v5404_v48 = vrot.slane %v13264_v57, %v14026_v17  ;;  %v5736_v34 = vld [vmem:[%s18908_s10 + $0xb8] sm:$0xff] }
0x1014   :  { %v5390_v30 = vcombine.high %v5382_v44, %v5389_v36  ;;  %v5729_v44 = vld [vmem:[%s18908_s10 + $0x80] sm:$0xff] }
0x1015   :  { %v5733_v36 = vld [vmem:[%s18908_s10 + $0xa0] sm:$0xff] }
0x1016   :  { %12266 = vmatpush1.bf16.msra.mxu0 %v12265_v62  ;;  %12298 = vmatpush1.bf16.msra.mxu1 %v12297_v8  ;;  %v5412_v8 = vcombine.low %v5404_v48, %v5411_v42  ;;  %v5738_v48 = vld [vmem:[%s18908_s10 + $0xc8] sm:$0xff] }
0x1017   :  { %12268 = vmatprep.subr.bf16.mxu0 %v12267_v40  ;;  %12300 = vmatprep.subr.bf16.mxu1 %v12299_v55  ;;  %v5742_v42 = vld [vmem:[%s18908_s10 + $0xe8] sm:$0xff] }
0x1018   :  { %v5414_v32 = vsel %vm63_vm1, %v5390_v30, %v5412_v8  ;;  %v5744_v30 = vld [vmem:[%s18908_s10 + $0xf8] sm:$0xff]  ;;  %v5737_v8 = vld [vmem:[%s18908_s10 + $0xc0] sm:$0xff] }
0x101a   :  { %12270 = vmatpush1.bf16.msra.mxu0 %v12269_v50  ;;  %12302 = vmatpush1.bf16.msra.mxu1 %v12301_v16 }
0x101b   :  { %12272 = vmatprep.subr.bf16.mxu0 %v12271_v15  ;;  %12304 = vmatprep.subr.bf16.mxu1 %v12303_v4 }
0x101e   :  { %12274 = vmatpush1.bf16.msra.mxu0 %v12273_v26  ;;  %12306 = vmatpush1.bf16.msra.mxu1 %v12305_v28  ;;  %v5726_v26 = vld [vmem:[%s18908_s10 + $0x68] sm:$0xff]  ;;  %v5724_v28 = vld [vmem:[%s18908_s10 + $0x58] sm:$0xff] }
0x101f   :  { %12276 = vmatprep.subr.bf16.mxu0 %v12275_v25  ;;  %12308 = vmatprep.subr.bf16.mxu1 %v12307_v23  ;;  %v5728_v25 = vld [vmem:[%s18908_s10 + $0x78] sm:$0xff]  ;;  %v5725_v23 = vld [vmem:[%s18908_s10 + $0x60] sm:$0xff] }
0x1020   :  { %v16585_v57 = vpack.c.bf16 %v5725_v23, %v5721_v53  ;;  %v5755_v23 = vld [vmem:[%s18908_s10 + $0x150] sm:$0xff] }
0x1022   :  { %12278 = vmatpush1.bf16.msra.mxu0 %v12277_v39  ;;  %12310 = vmatpush1.bf16.msra.mxu1 %v12309_v59  ;;  %v16573_v39 = vpack.c.bf16 %v5726_v26, %v5722_v63  ;;  %v16575_v59 = vpack.c.bf16 %v5728_v25, %v5724_v28  ;;  %v5753_v26 = vld [vmem:[%s18908_s10 + $0x140] sm:$0xff] }
0x1023   :  { %12312 = vmatprep.subr.bf16.mxu0 %v16507_v11  ;;  %12344 = vmatprep.subr.bf16.mxu1 %v16509_v31  ;;  %v5757_v28 = vld [vmem:[%s18908_s10 + $0x160] sm:$0xff] }
0x10d7   :  { %v5286_v6 = vpop.f32.mrb[38].mxu0  ;;  %v5357_v20 = vpop.f32.mrb[38].mxu1 }
0x10d8   :  { %v5288_v41 = vpop.f32.mrb[39].mxu0  ;;  %v5359_v12 = vpop.f32.mrb[39].mxu1 }
0x10d9   :  { %v5419_v5 = vcombine.low %v5286_v6, %v5288_v41  ;;  %v5420_v1 = vcombine.low %v5357_v20, %v5359_v12  ;;  %v5731_v6 = vld [vmem:[%s18908_s10 + $0x90] sm:$0xff]  ;;  %v16600_v20 = vpack.c.bf16 %v5734_v54, %v5730_v2  ;;  %v16602_v41 = vpack.c.bf16 %v5736_v34, %v5732_v61  ;;  %v5766_v2 = vld [vmem:[%s18908_s10 + $0x1a8] sm:$0xff]  ;;  %v5764_v54 = vld [vmem:[%s18908_s10 + $0x198] sm:$0xff] }
0x10da   :  { %v5735_v12 = vld [vmem:[%s18908_s10 + $0xb0] sm:$0xff]  ;;  %v16733_v61 = vpack.c.bf16 %v5757_v28, %v5753_v26  ;;  %v16735_v34 = vpack.c.bf16 %v5759_v14, %v5755_v23 }
0x10db   :  { %v5427_v33 = vrot.slane %v5419_v5, %v14026_v17  ;;  %v5434_v62 = vrot.slane %v5420_v1, %v14026_v17  ;;  %v5740_v1 = vld [vmem:[%s18908_s10 + $0xd8] sm:$0xff] }
0x10dd   :  { %v5435_v40 = vcombine.low %v5427_v33, %v5434_v62  ;;  %v16623_v33 = vpack.c.bf16 %v5733_v36, %v5729_v44  ;;  %v16625_v62 = vpack.c.bf16 %v5735_v12, %v5731_v6  ;;  %v5761_v44 = vld [vmem:[%s18908_s10 + $0x180] sm:$0xff]  ;;  %v16745_v6 = vpack.c.bf16 %v5766_v2, %v5762_v0 }
0x10de   :  { %v5765_v36 = vld [vmem:[%s18908_s10 + $0x1a0] sm:$0xff] }
0x10df   :  { %v5437_v9 = vadd.f32 %v5435_v40, %v5414_v32  ;;  %v5741_v40 = vld [vmem:[%s18908_s10 + $0xe0] sm:$0xff]  ;;  %v16635_v32 = vpack.c.bf16 %v5742_v42, %v5738_v48  ;;  %v5763_v48 = vld [vmem:[%s18908_s10 + $0x190] sm:$0xff] }
0x10e0   :  { %v5767_v42 = vld [vmem:[%s18908_s10 + $0x1b0] sm:$0xff] }
0x10e1   :  { %v10873_v38 = vmul.f32 -1.442695, %v5437_v9  ;;  %v5445_v43 = vrot.slane %v5437_v9, 6  ;;  %v16637_v9 = vpack.c.bf16 %v5744_v30, %v5740_v1  ;;  %v5774_v1 = vld [vmem:[%s18908_s10 + $0x1e8] sm:$0xff]  ;;  %v5772_v30 = vld [vmem:[%s18908_s10 + $0x1d8] sm:$0xff] }
0x10e3   :  { %13418 = vpow2.f32 %v10873_v38  ;;  %v5739_v38 = vld [vmem:[%s18908_s10 + $0xd0] sm:$0xff] }
0x10ed   :  { %v13419_v55 = vpop.eup %13418 }
0x10ee   :  { %v5441_v24 = vadd.f32 1.0, %v13419_v55  ;;  %v5743_v55 = vld [vmem:[%s18908_s10 + $0xf0] sm:$0xff] }
0x10f0   :  { %13420 = vrcp.f32 %v5441_v24  ;;  %v5746_v24 = vld [vmem:[%s18908_s10 + $0x108] sm:$0xff] }
0x10f1   :  { %13422 = vtanh.f32 %v5445_v43  ;;  %v5750_v43 = vld [vmem:[%s18908_s10 + $0x128] sm:$0xff] }
0x10f2   :  { %v16673_v49 = vpack.c.bf16 %v5750_v43, %v5746_v24 }
0x10fa   :  { %v13421_v22 = vpop.eup %13420 }
0x10fb   :  { %v5449_v10 = vrot.slane %v13421_v22, 2  ;;  %v13423_v51 = vpop.eup %13422  ;;  %v5455_v56 = vrot.slane %v13421_v22, 4 }
0x10fc   :  { %v5452_v16 = vmul.f32 %v13423_v51, %v13421_v22  ;;  %v5748_v22 = vld [vmem:[%s18908_s10 + $0x118] sm:$0xff]  ;;  %v16661_v51 = vpack.c.bf16 %v5741_v40, %v5737_v8  ;;  %v16769_v40 = vpack.c.bf16 %v5765_v36, %v5761_v44 }
0x10fd   :  { %v5451_v50 = vmul.f32 %v5449_v10, %v16296_v37  ;;  %v5713_v37 = vld [vmem:[%s18908_s10] sm:$0xff]  ;;  %v5752_v10 = vld [vmem:[%s18908_s10 + $0x138] sm:$0xff] }
0x10fe   :  { %v16551_v60 = vpack.c.bf16 %v5717_v3, %v5713_v37  ;;  %v5758_v37 = vld [vmem:[%s18908_s10 + $0x168] sm:$0xff]  ;;  %v5756_v3 = vld [vmem:[%s18908_s10 + $0x158] sm:$0xff] }
0x10ff   :  { %v5453_v15 = vadd.f32 %v5452_v16, %v5451_v50  ;;  %v16663_v50 = vpack.c.bf16 %v5743_v55, %v5739_v38  ;;  %v5745_v16 = vld [vmem:[%s18908_s10 + $0x100] sm:$0xff]  ;;  %v16711_v53 = vpack.c.bf16 %v5760_v47, %v5756_v3  ;;  %v5776_v8 = vld [vmem:[%s18908_s10 + $0x1f8] sm:$0xff]  ;;  %v16771_v38 = vpack.c.bf16 %v5767_v42, %v5763_v48 }
0x1100   :  { %v5769_v55 = vld [vmem:[%s18908_s10 + $0x1c0] sm:$0xff]  ;;  %v16780_v43 = vpack.c.bf16 %v5776_v8, %v5772_v30 }
0x1101   :  { %13424 = vtanh.f32 %v5453_v15  ;;  %v5749_v15 = vld [vmem:[%s18908_s10 + $0x120] sm:$0xff] }
0x1102   :  { %v16697_v45 = vpack.c.bf16 %v5749_v15, %v5745_v16  ;;  %v5775_v16 = vld [vmem:[%s18908_s10 + $0x1f0] sm:$0xff] }
0x110b   :  { %v13425_v27 = vpop.eup %13424 }
0x110c   :  { %v5457_v4 = vmul.f32 %v13425_v27, %v5455_v56  ;;  %v16675_v56 = vpack.c.bf16 %v5752_v10, %v5748_v22  ;;  %v5747_v27 = vld [vmem:[%s18908_s10 + $0x110] sm:$0xff]  ;;  %v5773_v22 = vld [vmem:[%s18908_s10 + $0x1e0] sm:$0xff] }
0x110d   :  { %v5771_v10 = vld [vmem:[%s18908_s10 + $0x1d0] sm:$0xff]  ;;  %v16793_v15 = vpack.c.bf16 %v5773_v22, %v5769_v55 }
0x110e   :  { %v5460_v35 = vsel %vm5459_vm6, %v5457_v4, 0.0  ;;  %v5751_v4 = vld [vmem:[%s18908_s10 + $0x130] sm:$0xff] }
0x110f   :  { %5461 = vst.msk [vmem:[#allocation3 + $0xe] sm:$0x3] %vm579_vm3, %v5460_v35  ;;  %v16699_v63 = vpack.c.bf16 %v5751_v4, %v5747_v27  ;;  %v16795_v27 = vpack.c.bf16 %v5775_v16, %v5771_v10  ;;  %v5529_v4 = vld [vmem:[%s18909_s11] sm:$0xf]  ;;  %s13518_s11 = smov [#allocation4]  }
0x1110   :  { %5462 = vst.msk [vmem:[#allocation3] sm:$0x3] %vm581_vm4, %v5460_v35  ;;  %v5754_v35 = vld [vmem:[%s18908_s10 + $0x148] sm:$0xff]  ;;  %v5538_v3 = vrot.slane %v5529_v4, %v14018_v19  ;;  %v5546_v47 = vrot.slane %v5529_v4, %v14020_v21  ;;  %s10835_s2 = sshll.u32 %s13518_s11, 4  ;;  %s10836_s2 = int_to_ptr.vmem [resolvable:$true] %s10835_s2 }
0x1111   :  { %v16709_v25 = vpack.c.bf16 %v5758_v37, %v5754_v35  ;;  %v5534_v35 = vrot.slane %v5529_v4, %v14011_v13  ;;  %v5542_v37 = vrot.slane %v5529_v4, %v14016_v18  ;;  %p13495_p1 = scmp.lt.s32.totalorder %s10836_s2, %s10836_s2 }
0x1116   :  { %v5464_v5 = vld [vmem:[#allocation3 + $0x8] sm:$0xff] }
0x1117   :  { %v5463_v58 = vld [vmem:[#allocation3] sm:$0xff] }
0x1118   :  { %5616 = vmatmul.mubr.f32.vlgmr.msra.gmra.mrb[40].mxu0 %v5463_v58  ;;  %5693 = vmatmul.mubr.f32.vlgmr.msra.gmra.mrb[40].mxu1 %v5463_v58  ;;  %v5768_v58 = vld [vmem:[%s18908_s10 + $0x1b8] sm:$0xff] }
0x1119   :  { %12314 = vmatpush1.bf16.msra.mxu0 %v16551_v60  ;;  %12346 = vmatpush1.bf16.msra.mxu1 %v16553_v52  ;;  %v16747_v12 = vpack.c.bf16 %v5768_v58, %v5764_v54 }
0x111a   :  { %5621 = vmatprep.mubr.f32.mxu0 %v18923_v7  ;;  %5698 = vmatprep.mubr.f32.mxu1 %v18923_v7 }
0x111b   :  { %12316 = vmatprep.subr.bf16.mxu0 %v16573_v39  ;;  %12348 = vmatprep.subr.bf16.mxu1 %v16575_v59 }
0x111c   :  { %5622 = vmatmul.mubr.f32.gmra.mrb[42].mxu0 %v5464_v5  ;;  %5699 = vmatmul.mubr.f32.gmra.mrb[42].mxu1 %v5464_v5  ;;  %v5770_v5 = vld [vmem:[%s18908_s10 + $0x1c8] sm:$0xff] }
0x111d   :  { %12318 = vmatpush1.bf16.msra.mxu0 %v16585_v57  ;;  %12350 = vmatpush1.bf16.msra.mxu1 %v16587_v46  ;;  %v16778_v24 = vpack.c.bf16 %v5774_v1, %v5770_v5 }
0x111e   :  { %12320 = vmatprep.subr.bf16.mxu0 %v16600_v20  ;;  %12352 = vmatprep.subr.bf16.mxu1 %v16602_v41 }
0x111f   :  { %5841 = vmatprep.mubr.f32.mxu0 %v18923_v7  ;;  %5912 = vmatprep.mubr.f32.mxu1 %v18923_v7 }
0x1121   :  { %12322 = vmatpush1.bf16.msra.mxu0 %v16623_v33  ;;  %12354 = vmatpush1.bf16.msra.mxu1 %v16625_v62 }
0x1122   :  { %12324 = vmatprep.subr.bf16.mxu0 %v16635_v32  ;;  %12356 = vmatprep.subr.bf16.mxu1 %v16637_v9 }
0x1125   :  { %12326 = vmatpush1.bf16.msra.mxu0 %v16661_v51  ;;  %12358 = vmatpush1.bf16.msra.mxu1 %v16663_v50 }
0x1126   :  { %12328 = vmatprep.subr.bf16.mxu0 %v16673_v49  ;;  %12360 = vmatprep.subr.bf16.mxu1 %v16675_v56 }
0x1129   :  { %12330 = vmatpush1.bf16.msra.mxu0 %v16697_v45  ;;  %12362 = vmatpush1.bf16.msra.mxu1 %v16699_v63 }
0x112a   :  { %12332 = vmatprep.subr.bf16.mxu0 %v16709_v25  ;;  %12364 = vmatprep.subr.bf16.mxu1 %v16711_v53 }
0x112d   :  { %12334 = vmatpush1.bf16.msra.mxu0 %v16733_v61  ;;  %12366 = vmatpush1.bf16.msra.mxu1 %v16735_v34 }
0x112e   :  { %12336 = vmatprep.subr.bf16.mxu0 %v16745_v6  ;;  %12368 = vmatprep.subr.bf16.mxu1 %v16747_v12 }
0x1131   :  { %12338 = vmatpush1.bf16.msra.mxu0 %v16769_v40  ;;  %12370 = vmatpush1.bf16.msra.mxu1 %v16771_v38 }
0x1132   :  { %12340 = vmatprep.subr.bf16.mxu0 %v16778_v24  ;;  %12372 = vmatprep.subr.bf16.mxu1 %v16780_v43 }
0x1135   :  { %12342 = vmatpush1.bf16.msra.mxu0 %v16793_v15  ;;  %12374 = vmatpush1.bf16.msra.mxu1 %v16795_v27 }
0x1136   :  { %12376 = vmatprep.subr.bf16.mxu0 %v16507_v11  ;;  %12408 = vmatprep.subr.bf16.mxu1 %v16509_v31 }
0x1138   :  { %5842 = vmatmul.mubr.f32.vlgmr.msra.gmra.mrb[44].mxu0 %v18923_v7  ;;  %5913 = vmatmul.mubr.f32.vlgmr.msra.gmra.mrb[44].mxu1 %v18923_v7 }
0x1139   :  { %12378 = vmatpush1.bf16.msra.mxu0 %v16551_v60  ;;  %12410 = vmatpush1.bf16.msra.mxu1 %v16553_v52 }
0x113a   :  { %12380 = vmatprep.subr.bf16.mxu0 %v16573_v39  ;;  %12412 = vmatprep.subr.bf16.mxu1 %v16575_v59 }
0x113b   :  { %6149 = vmatprep.mubr.f32.mxu0 %v18923_v7  ;;  %6220 = vmatprep.mubr.f32.mxu1 %v18923_v7 }
0x113d   :  { %12382 = vmatpush1.bf16.msra.mxu0 %v16585_v57  ;;  %12414 = vmatpush1.bf16.msra.mxu1 %v16587_v46 }
0x113e   :  { %12384 = vmatprep.subr.bf16.mxu0 %v16600_v20  ;;  %12416 = vmatprep.subr.bf16.mxu1 %v16602_v41 }
0x1141   :  { %12386 = vmatpush1.bf16.msra.mxu0 %v16623_v33  ;;  %12418 = vmatpush1.bf16.msra.mxu1 %v16625_v62 }
0x1142   :  { %12388 = vmatprep.subr.bf16.mxu0 %v16635_v32  ;;  %12420 = vmatprep.subr.bf16.mxu1 %v16637_v9 }
0x1145   :  { %12390 = vmatpush1.bf16.msra.mxu0 %v16661_v51  ;;  %12422 = vmatpush1.bf16.msra.mxu1 %v16663_v50 }
0x1146   :  { %12392 = vmatprep.subr.bf16.mxu0 %v16673_v49  ;;  %12424 = vmatprep.subr.bf16.mxu1 %v16675_v56 }
0x1149   :  { %12394 = vmatpush1.bf16.msra.mxu0 %v16697_v45  ;;  %12426 = vmatpush1.bf16.msra.mxu1 %v16699_v63 }
0x114a   :  { %12396 = vmatprep.subr.bf16.mxu0 %v16709_v25  ;;  %12428 = vmatprep.subr.bf16.mxu1 %v16711_v53 }
0x114d   :  { %12398 = vmatpush1.bf16.msra.mxu0 %v16733_v61  ;;  %12430 = vmatpush1.bf16.msra.mxu1 %v16735_v34 }
0x114e   :  { %12400 = vmatprep.subr.bf16.mxu0 %v16745_v6  ;;  %12432 = vmatprep.subr.bf16.mxu1 %v16747_v12 }
0x1151   :  { %12402 = vmatpush1.bf16.msra.mxu0 %v16769_v40  ;;  %12434 = vmatpush1.bf16.msra.mxu1 %v16771_v38 }
0x1152   :  { %12404 = vmatprep.subr.bf16.mxu0 %v16778_v24  ;;  %12436 = vmatprep.subr.bf16.mxu1 %v16780_v43 }
0x1155   :  { %12406 = vmatpush1.bf16.msra.mxu0 %v16793_v15  ;;  %12438 = vmatpush1.bf16.msra.mxu1 %v16795_v27 }
0x1156   :  { %12440 = vmatprep.subr.bf16.mxu0 %v16507_v11  ;;  %12472 = vmatprep.subr.bf16.mxu1 %v16509_v31 }
0x11eb   :  { %v5617_v26 = vpop.f32.mrb[40].mxu0  ;;  %v5694_v28 = vpop.f32.mrb[40].mxu1 }
0x11ec   :  { %v5618_v23 = vadd.f32 %v5617_v26, %v5534_v35  ;;  %v5695_v14 = vadd.f32 %v5694_v28, %v5542_v37  ;;  %v5619_v0 = vpop.f32.mrb[41].mxu0  ;;  %v5696_v11 = vpop.f32.mrb[41].mxu1 }
0x11ed   :  { %v5620_v2 = vadd.f32 %v5619_v0, %v5538_v3  ;;  %v5697_v31 = vadd.f32 %v5696_v11, %v5546_v47 }
0x11ee   :  { %5705 = vst [vmem:[#allocation2] sm:$0xff] %v5618_v23  ;;  %5707 = vst [vmem:[#allocation2 + $0x10] sm:$0xff] %v5695_v14 }
0x11ef   :  { %5706 = vst [vmem:[#allocation2 + $0x8] sm:$0xff] %v5620_v2  ;;  %5708 = vst [vmem:[#allocation2 + $0x18] sm:$0xff] %v5697_v31  ;;  %v5623_v54 = vpop.f32.mrb[42].mxu0  ;;  %v5700_v58 = vpop.f32.mrb[42].mxu1 }
0x11f0   :  { %v5624_v44 = vadd.f32 %v5623_v54, %v5534_v35  ;;  %v5701_v36 = vadd.f32 %v5700_v58, %v5542_v37  ;;  %v5625_v48 = vpop.f32.mrb[43].mxu0  ;;  %v5702_v42 = vpop.f32.mrb[43].mxu1 }
0x11f1   :  { %v5626_v5 = vadd.f32 %v5625_v48, %v5538_v3  ;;  %v5703_v1 = vadd.f32 %v5702_v42, %v5546_v47 }
0x11f2   :  { %5709 = vst [vmem:[#allocation2 + $0x20] sm:$0xff] %v5624_v44  ;;  %5711 = vst [vmem:[#allocation2 + $0x30] sm:$0xff] %v5701_v36 }
0x11f3   :  { %5710 = vst [vmem:[#allocation2 + $0x28] sm:$0xff] %v5626_v5  ;;  %5712 = vst [vmem:[#allocation2 + $0x38] sm:$0xff] %v5703_v1 }
0x11f6   :  { %v13266_v55 = vld [vmem:[#allocation2] ss:$8 sps:$4 sm:$0x33]   ;;  %v13267_v22 = vld [vmem:[#allocation2 + $0x10] ss:$8 sps:$4 sm:$0x33]  }
0x11f7   :  { %v5939_v28 = vrot.slane %v13266_v55, %v14026_v17  ;;  %v5946_v3 = vrot.slane %v13267_v22, %v14026_v17 }
0x11f9   :  { %v5947_v2 = vcombine.low %v5939_v28, %v5946_v3 }
0x11fa   :  { %v13268_v30 = vld [vmem:[#allocation2 + $0x24] ss:$8 sps:$4 sm:$0xcc]   ;;  %v13269_v8 = vld [vmem:[#allocation2 + $0x34] ss:$8 sps:$4 sm:$0xcc]  }
0x11fb   :  { %v5961_v10 = vrot.slane %v13268_v30, %v14026_v17  ;;  %v5968_v16 = vrot.slane %v13269_v8, %v14026_v17  ;;  %v6015_v30 = vld [vmem:[%s18956_s3] sm:$0x3] }
0x11fc   :  { %vm6016_vm7 = vcmp.gt.f32.partialorder %v6015_v30, 0.5  ;;  %v6641_v30 = vld [vmem:[%s18908_s10 + $0x10] sm:$0xff] }
0x11fd   :  { %v5969_v14 = vcombine.high %v5961_v10, %v5968_v16 }
0x11ff   :  { %v5971_v54 = vsel %vm63_vm1, %v5947_v2, %v5969_v14 }
0x120b   :  { %v5843_v4 = vpop.f32.mrb[44].mxu0  ;;  %v5914_v26 = vpop.f32.mrb[44].mxu1 }
0x120c   :  { %v5845_v35 = vpop.f32.mrb[45].mxu0  ;;  %v5916_v37 = vpop.f32.mrb[45].mxu1 }
0x120d   :  { %v5976_v47 = vcombine.low %v5843_v4, %v5845_v35  ;;  %v5977_v23 = vcombine.low %v5914_v26, %v5916_v37 }
0x120f   :  { %v5984_v0 = vrot.slane %v5976_v47, %v14026_v17  ;;  %v5991_v11 = vrot.slane %v5977_v23, %v14026_v17 }
0x1211   :  { %v5992_v31 = vcombine.low %v5984_v0, %v5991_v11 }
0x1213   :  { %v5994_v58 = vadd.f32 %v5992_v31, %v5971_v54  ;;  %v6640_v31 = vld [vmem:[%s18908_s10 + $0x8] sm:$0xff] }
0x1214   :  { %v6644_v54 = vld [vmem:[%s18908_s10 + $0x28] sm:$0xff] }
0x1215   :  { %v10874_v44 = vmul.f32 -1.442695, %v5994_v58  ;;  %v6002_v42 = vrot.slane %v5994_v58, 6  ;;  %v6642_v58 = vld [vmem:[%s18908_s10 + $0x18] sm:$0xff] }
0x1217   :  { %13426 = vpow2.f32 %v10874_v44  ;;  %v16930_v44 = vpack.c.bf16 %v6644_v54, %v6640_v31  ;;  %v6673_v31 = vld [vmem:[%s18908_s10 + $0x110] sm:$0xff] }
0x1221   :  { %v13427_v36 = vpop.eup %13426 }
0x1222   :  { %v5998_v48 = vadd.f32 1.0, %v13427_v36  ;;  %v6646_v36 = vld [vmem:[%s18908_s10 + $0x38] sm:$0xff] }
0x1224   :  { %13428 = vrcp.f32 %v5998_v48  ;;  %v6639_v48 = vld [vmem:[%s18908_s10] sm:$0xff] }
0x1225   :  { %13430 = vtanh.f32 %v6002_v42  ;;  %v6643_v42 = vld [vmem:[%s18908_s10 + $0x20] sm:$0xff] }
0x122e   :  { %v13429_v5 = vpop.eup %13428 }
0x122f   :  { %v6006_v1 = vrot.slane %v13429_v5, 2  ;;  %v13431_v8 = vpop.eup %13430  ;;  %v6012_v4 = vrot.slane %v13429_v5, 4 }
0x1230   :  { %v6009_v22 = vmul.f32 %v13431_v8, %v13429_v5  ;;  %v16941_v5 = vpack.c.bf16 %v6646_v36, %v6642_v58  ;;  %v6645_v8 = vld [vmem:[%s18908_s10 + $0x30] sm:$0xff]  ;;  %v6680_v36 = vld [vmem:[%s18908_s10 + $0x148] sm:$0xff] }
0x1231   :  { %v6008_v55 = vmul.f32 0.0, %v6006_v1  ;;  %v16943_v1 = vpack.c.bf16 %v6643_v42, %v6639_v48  ;;  %v6677_v58 = vld [vmem:[%s18908_s10 + $0x130] sm:$0xff]  ;;  %v6684_v48 = vld [vmem:[%s18908_s10 + $0x168] sm:$0xff]  ;;  %v6682_v42 = vld [vmem:[%s18908_s10 + $0x158] sm:$0xff] }
0x1233   :  { %v6010_v10 = vadd.f32 %v6009_v22, %v6008_v55  ;;  %v6648_v55 = vld [vmem:[%s18908_s10 + $0x48] sm:$0xff]  ;;  %v16955_v22 = vpack.c.bf16 %v6645_v8, %v6641_v30  ;;  %v6686_v30 = vld [vmem:[%s18908_s10 + $0x178] sm:$0xff] }
0x1235   :  { %13432 = vtanh.f32 %v6010_v10  ;;  %v16857_v16 = vsel %vm6016_vm7, %v6010_v10, 0.0  ;;  %v6652_v10 = vld [vmem:[%s18908_s10 + $0x68] sm:$0xff] }
0x123f   :  { %v13433_v26 = vpop.eup %13432 }
0x1240   :  { %v6014_v35 = vmul.f32 %v13433_v26, %v6012_v4  ;;  %v6654_v4 = vld [vmem:[%s18908_s10 + $0x78] sm:$0xff]  ;;  %v16968_v26 = vpack.c.bf16 %v6652_v10, %v6648_v55  ;;  %v17108_v55 = vpack.c.bf16 %v6677_v58, %v6673_v31  ;;  %v17110_v10 = vpack.c.bf16 %v6684_v48, %v6680_v36  ;;  %v6701_v31 = vld [vmem:[%s18908_s10 + $0x1f0] sm:$0xff]  ;;  %v13276_v48 = vld [vmem:[#allocation2 + $0x20] ss:$8 sps:$4 sm:$0xcc]  }
0x1242   :  { %10875 = vmatmul.mubr.msk.f32.vlgmr.msra.gmra.mrb[46].mxu0 %vm6016_vm7, %v6014_v35  ;;  %10876 = vmatmul.mubr.msk.f32.vlgmr.msra.gmra.mrb[46].mxu1 %vm6016_vm7, %v6014_v35  ;;  %v16859_v37 = vsel %vm6016_vm7, %v6014_v35, 0.0 }
0x1243   :  { %12442 = vmatpush1.bf16.msra.mxu0 %v16551_v60  ;;  %12474 = vmatpush1.bf16.msra.mxu1 %v16553_v52  ;;  %6019 = vst.msk [vmem:[#allocation3] sm:$0x3] %vm579_vm3, %v16859_v37  ;;  %v13272_v60 = vld [vmem:[#allocation2 + $0x24] ss:$8 sps:$4 sm:$0x33]  }
0x1244   :  { %6020 = vst.msk [vmem:[#allocation3 + $0xe] sm:$0x3] %vm581_vm4, %v16859_v37  ;;  %12444 = vmatprep.subr.bf16.mxu0 %v16573_v39  ;;  %12476 = vmatprep.subr.bf16.mxu1 %v16575_v59  ;;  %v13273_v52 = vld [vmem:[#allocation2 + $0x34] ss:$8 sps:$4 sm:$0x33]  }
0x1245   :  { %6458 = vmatprep.mubr.f32.mxu0 %v18923_v7  ;;  %6529 = vmatprep.mubr.f32.mxu1 %v18923_v7  ;;  %v13270_v39 = vld [vmem:[#allocation2] ss:$8 sps:$4 sm:$0xcc]   ;;  %v13271_v59 = vld [vmem:[#allocation2 + $0x10] ss:$8 sps:$4 sm:$0xcc]  }
0x1247   :  { %12446 = vmatpush1.bf16.msra.mxu0 %v16585_v57  ;;  %12478 = vmatpush1.bf16.msra.mxu1 %v16587_v46  ;;  %v6269_v57 = vrot.slane %v13272_v60, %v14026_v17  ;;  %v6276_v46 = vrot.slane %v13273_v52, %v14026_v17  ;;  %v6651_v60 = vld [vmem:[%s18908_s10 + $0x60] sm:$0xff]  ;;  %v6649_v52 = vld [vmem:[%s18908_s10 + $0x50] sm:$0xff] }
0x1248   :  { %12448 = vmatprep.subr.bf16.mxu0 %v16600_v20  ;;  %12480 = vmatprep.subr.bf16.mxu1 %v16602_v41 }
0x124b   :  { %12450 = vmatpush1.bf16.msra.mxu0 %v16623_v33  ;;  %12482 = vmatpush1.bf16.msra.mxu1 %v16625_v62 }
0x124c   :  { %12452 = vmatprep.subr.bf16.mxu0 %v16635_v32  ;;  %12484 = vmatprep.subr.bf16.mxu1 %v16637_v9  ;;  %v6247_v32 = vrot.slane %v13270_v39, %v14026_v17  ;;  %v6254_v9 = vrot.slane %v13271_v59, %v14026_v17  ;;  %v6653_v59 = vld [vmem:[%s18908_s10 + $0x70] sm:$0xff] }
0x124f   :  { %12454 = vmatpush1.bf16.msra.mxu0 %v16661_v51  ;;  %12486 = vmatpush1.bf16.msra.mxu1 %v16663_v50 }
0x1250   :  { %12456 = vmatprep.subr.bf16.mxu0 %v16673_v49  ;;  %12488 = vmatprep.subr.bf16.mxu1 %v16675_v56  ;;  %v6277_v49 = vcombine.low %v6269_v57, %v6276_v46  ;;  %v6656_v57 = vld [vmem:[%s18908_s10 + $0x88] sm:$0xff] }
0x1251   :  { %v6660_v46 = vld [vmem:[%s18908_s10 + $0xa8] sm:$0xff] }
0x1253   :  { %12458 = vmatpush1.bf16.msra.mxu0 %v16697_v45  ;;  %12490 = vmatpush1.bf16.msra.mxu1 %v16699_v63  ;;  %v6255_v63 = vcombine.high %v6247_v32, %v6254_v9  ;;  %v6655_v32 = vld [vmem:[%s18908_s10 + $0x80] sm:$0xff] }
0x1254   :  { %12460 = vmatprep.subr.bf16.mxu0 %v16709_v25  ;;  %12492 = vmatprep.subr.bf16.mxu1 %v16711_v53 }
0x1255   :  { %v6279_v53 = vsel %vm63_vm1, %v6255_v63, %v6277_v49  ;;  %v6661_v49 = vld [vmem:[%s18908_s10 + $0xb0] sm:$0xff]  ;;  %v6668_v63 = vld [vmem:[%s18908_s10 + $0xe8] sm:$0xff] }
0x1257   :  { %12462 = vmatpush1.bf16.msra.mxu0 %v16733_v61  ;;  %12494 = vmatpush1.bf16.msra.mxu1 %v16735_v34 }
0x1258   :  { %12464 = vmatprep.subr.bf16.mxu0 %v16745_v6  ;;  %12496 = vmatprep.subr.bf16.mxu1 %v16747_v12 }
0x125b   :  { %12466 = vmatpush1.bf16.msra.mxu0 %v16769_v40  ;;  %12498 = vmatpush1.bf16.msra.mxu1 %v16771_v38 }
0x125c   :  { %12468 = vmatprep.subr.bf16.mxu0 %v16778_v24  ;;  %12500 = vmatprep.subr.bf16.mxu1 %v16780_v43  ;;  %v6323_v43 = vld [vmem:[%s18956_s3 + $0x2] sm:$0x3] }
0x125d   :  { %vm6324_vm8 = vcmp.gt.f32.partialorder %v6323_v43, 0.5  ;;  %v6672_v43 = vld [vmem:[%s18908_s10 + $0x108] sm:$0xff] }
0x125f   :  { %12470 = vmatpush1.bf16.msra.mxu0 %v16793_v15  ;;  %12502 = vmatpush1.bf16.msra.mxu1 %v16795_v27 }
0x1260   :  { %12504 = vmatprep.subr.bf16.mxu0 %v16930_v44  ;;  %12536 = vmatprep.subr.bf16.mxu1 %v16941_v5 }
0x1315   :  { %v6151_v20 = vpop.f32.mrb[46].mxu0  ;;  %v6222_v41 = vpop.f32.mrb[46].mxu1 }
0x1316   :  { %v6153_v33 = vpop.f32.mrb[47].mxu0  ;;  %v6224_v62 = vpop.f32.mrb[47].mxu1 }
0x1317   :  { %v6284_v51 = vcombine.low %v6151_v20, %v6153_v33  ;;  %v6285_v50 = vcombine.low %v6222_v41, %v6224_v62  ;;  %v16995_v20 = vpack.c.bf16 %v6653_v59, %v6649_v52  ;;  %v16997_v41 = vpack.c.bf16 %v6660_v46, %v6656_v57  ;;  %v6658_v33 = vld [vmem:[%s18908_s10 + $0x98] sm:$0xff]  ;;  %v6685_v52 = vld [vmem:[%s18908_s10 + $0x170] sm:$0xff]  ;;  %v6688_v59 = vld [vmem:[%s18908_s10 + $0x188] sm:$0xff] }
0x1318   :  { %v6662_v62 = vld [vmem:[%s18908_s10 + $0xb8] sm:$0xff]  ;;  %v6692_v57 = vld [vmem:[%s18908_s10 + $0x1a8] sm:$0xff] }
0x1319   :  { %v6292_v56 = vrot.slane %v6284_v51, %v14026_v17  ;;  %v6299_v45 = vrot.slane %v6285_v50, %v14026_v17  ;;  %v17008_v9 = vpack.c.bf16 %v6662_v62, %v6658_v33  ;;  %v6659_v51 = vld [vmem:[%s18908_s10 + $0xa0] sm:$0xff]  ;;  %v6657_v50 = vld [vmem:[%s18908_s10 + $0x90] sm:$0xff]  ;;  %v6690_v46 = vld [vmem:[%s18908_s10 + $0x198] sm:$0xff] }
0x131a   :  { %v6694_v33 = vld [vmem:[%s18908_s10 + $0x1b8] sm:$0xff] }
0x131b   :  { %v6300_v25 = vcombine.low %v6292_v56, %v6299_v45  ;;  %v17020_v56 = vpack.c.bf16 %v6659_v51, %v6655_v32  ;;  %v6664_v45 = vld [vmem:[%s18908_s10 + $0xc8] sm:$0xff]  ;;  %v17146_v51 = vpack.c.bf16 %v6692_v57, %v6688_v59 }
0x131d   :  { %v6302_v61 = vadd.f32 %v6300_v25, %v6279_v53  ;;  %v6666_v25 = vld [vmem:[%s18908_s10 + $0xd8] sm:$0xff]  ;;  %v17033_v53 = vpack.c.bf16 %v6661_v49, %v6657_v50  ;;  %v6687_v50 = vld [vmem:[%s18908_s10 + $0x180] sm:$0xff] }
0x131e   :  { %v6691_v49 = vld [vmem:[%s18908_s10 + $0x1a0] sm:$0xff] }
0x131f   :  { %v10877_v34 = vmul.f32 -1.442695, %v6302_v61  ;;  %v6310_v40 = vrot.slane %v6302_v61, 6  ;;  %v17035_v61 = vpack.c.bf16 %v6668_v63, %v6664_v45  ;;  %v6689_v45 = vld [vmem:[%s18908_s10 + $0x190] sm:$0xff]  ;;  %v17158_v63 = vpack.c.bf16 %v6694_v33, %v6690_v46 }
0x1321   :  { %13434 = vpow2.f32 %v10877_v34  ;;  %v6670_v34 = vld [vmem:[%s18908_s10 + $0xf8] sm:$0xff] }
0x132b   :  { %v13435_v6 = vpop.eup %13434 }
0x132c   :  { %v6306_v12 = vadd.f32 1.0, %v13435_v6  ;;  %v6663_v6 = vld [vmem:[%s18908_s10 + $0xc0] sm:$0xff] }
0x132e   :  { %13436 = vrcp.f32 %v6306_v12  ;;  %v6667_v12 = vld [vmem:[%s18908_s10 + $0xe0] sm:$0xff] }
0x132f   :  { %13438 = vtanh.f32 %v6310_v40  ;;  %v17047_v40 = vpack.c.bf16 %v6670_v34, %v6666_v25  ;;  %v6693_v25 = vld [vmem:[%s18908_s10 + $0x1b0] sm:$0xff]  ;;  %v6696_v34 = vld [vmem:[%s18908_s10 + $0x1c8] sm:$0xff] }
0x1338   :  { %v13437_v38 = vpop.eup %13436 }
0x1339   :  { %v6314_v24 = vrot.slane %v13437_v38, 2  ;;  %v13439_v15 = vpop.eup %13438  ;;  %v6320_v23 = vrot.slane %v13437_v38, 4 }
0x133a   :  { %v6317_v28 = vmul.f32 %v13439_v15, %v13437_v38  ;;  %v6665_v38 = vld [vmem:[%s18908_s10 + $0xd0] sm:$0xff]  ;;  %v6676_v15 = vld [vmem:[%s18908_s10 + $0x128] sm:$0xff] }
0x133b   :  { %v6316_v27 = vmul.f32 %v6314_v24, %v16857_v16  ;;  %v6669_v24 = vld [vmem:[%s18908_s10 + $0xf0] sm:$0xff] }
0x133d   :  { %v6318_v3 = vadd.f32 %v6317_v28, %v6316_v27  ;;  %v6674_v27 = vld [vmem:[%s18908_s10 + $0x118] sm:$0xff] }
0x133e   :  { %v6678_v28 = vld [vmem:[%s18908_s10 + $0x138] sm:$0xff] }
0x133f   :  { %13440 = vtanh.f32 %v6318_v3  ;;  %v16910_v47 = vsel %vm6324_vm8, %v6318_v3, %v16857_v16  ;;  %v6650_v16 = vld [vmem:[%s18908_s10 + $0x58] sm:$0xff]  ;;  %v17068_v3 = vpack.c.bf16 %v6667_v12, %v6663_v6  ;;  %v17086_v54 = vpack.c.bf16 %v6678_v28, %v6674_v27  ;;  %v6700_v6 = vld [vmem:[%s18908_s10 + $0x1e8] sm:$0xff]  ;;  %v6695_v27 = vld [vmem:[%s18908_s10 + $0x1c0] sm:$0xff] }
0x1340   :  { %v16970_v35 = vpack.c.bf16 %v6654_v4, %v6650_v16  ;;  %v6679_v16 = vld [vmem:[%s18908_s10 + $0x140] sm:$0xff]  ;;  %v6698_v12 = vld [vmem:[%s18908_s10 + $0x1d8] sm:$0xff] }
0x1341   :  { %v6683_v4 = vld [vmem:[%s18908_s10 + $0x160] sm:$0xff] }
0x1342   :  { %v17140_v62 = vpack.c.bf16 %v6683_v4, %v6679_v16  ;;  %v6699_v28 = vld [vmem:[%s18908_s10 + $0x1e0] sm:$0xff]  ;;  %v13275_v16 = vld [vmem:[#allocation2 + $0x14] ss:$8 sps:$4 sm:$0x33]   ;;  %v6578_v4 = vrot.slane %v13276_v48, %v14026_v17 }
0x1343   :  { %v17200_v58 = vpack.c.bf16 %v6699_v28, %v6695_v27 }
0x1349   :  { %v13441_v14 = vpop.eup %13440 }
0x134a   :  { %v6322_v0 = vmul.f32 %v13441_v14, %v6320_v23  ;;  %v17072_v23 = vpack.c.bf16 %v6669_v24, %v6665_v38  ;;  %v17074_v14 = vpack.c.bf16 %v6676_v15, %v6672_v43  ;;  %v6702_v38 = vld [vmem:[%s18908_s10 + $0x1f8] sm:$0xff]  ;;  %v17176_v24 = vpack.c.bf16 %v6691_v49, %v6687_v50 }
0x134b   :  { %v17180_v43 = vpack.c.bf16 %v6693_v25, %v6689_v45  ;;  %v17182_v15 = vpack.c.bf16 %v6700_v6, %v6696_v34  ;;  %v6563_v50 = vrot.slane %v13275_v16, %v14026_v17 }
0x134c   :  { %v16913_v11 = vsel %vm6324_vm8, %v6322_v0, %v16859_v37  ;;  %v6327_v2 = vsel %vm6324_vm8, %v6322_v0, 0.0  ;;  %v6647_v37 = vld [vmem:[%s18908_s10 + $0x40] sm:$0xff]  ;;  %vm8695_vm8 = vcmask 64512  }
0x134d   :  { %6328 = vst.msk [vmem:[#allocation3 + $0x2] sm:$0x3] %vm579_vm3, %v6327_v2  ;;  %6459 = vmatmul.mubr.f32.vlgmr.msra.gmra.mrb[48].mxu0 %v16913_v11  ;;  %6530 = vmatmul.mubr.f32.vlgmr.msra.gmra.mrb[48].mxu1 %v16913_v11  ;;  %v16982_v39 = vpack.c.bf16 %v6651_v60, %v6647_v37  ;;  %v6671_v0 = vld [vmem:[%s18908_s10 + $0x100] sm:$0xff]  ;;  %v6681_v37 = vld [vmem:[%s18908_s10 + $0x150] sm:$0xff]  ;;  %v17122_v60 = vpack.c.bf16 %v6686_v30, %v6682_v42 }
0x134e   :  { %6329 = vst.msk [vmem:[#allocation3 + $0xc] sm:$0x3] %vm581_vm4, %v6327_v2  ;;  %6767 = vmatprep.mubr.f32.mxu0 %v18923_v7  ;;  %6838 = vmatprep.mubr.f32.mxu1 %v18923_v7  ;;  %v6675_v2 = vld [vmem:[%s18908_s10 + $0x120] sm:$0xff]  ;;  %v17144_v32 = vpack.c.bf16 %v6685_v52, %v6681_v37  ;;  %v13277_v42 = vld [vmem:[#allocation2 + $0x30] ss:$8 sps:$4 sm:$0xcc]  }
0x134f   :  { %12506 = vmatpush1.bf16.msra.mxu0 %v16943_v1  ;;  %12538 = vmatpush1.bf16.msra.mxu1 %v16955_v22  ;;  %v17104_v8 = vpack.c.bf16 %v6675_v2, %v6671_v0  ;;  %v17191_v0 = vpack.c.bf16 %v6702_v38, %v6698_v12  ;;  %v6697_v2 = vld [vmem:[%s18908_s10 + $0x1d0] sm:$0xff]  ;;  %v13274_v30 = vld [vmem:[#allocation2 + $0x4] ss:$8 sps:$4 sm:$0x33]   ;;  %v6585_v37 = vrot.slane %v13277_v42, %v14026_v17 }
0x1350   :  { %12508 = vmatprep.subr.bf16.mxu0 %v16968_v26  ;;  %12540 = vmatprep.subr.bf16.mxu1 %v16970_v35  ;;  %v17204_v36 = vpack.c.bf16 %v6701_v31, %v6697_v2  ;;  %v6556_v33 = vrot.slane %v13274_v30, %v14026_v17 }
0x1351   :  { %v6586_v25 = vcombine.high %v6578_v4, %v6585_v37  ;;  %v6632_v4 = vld [vmem:[%s18956_s3 + $0x4] sm:$0x3] }
0x1352   :  { %v6564_v12 = vcombine.low %v6556_v33, %v6563_v50  ;;  %vm6633_vm9 = vcmp.gt.f32.partialorder %v6632_v4, 0.5 }
0x1353   :  { %12510 = vmatpush1.bf16.msra.mxu0 %v16982_v39  ;;  %12542 = vmatpush1.bf16.msra.mxu1 %v16995_v20 }
0x1354   :  { %12512 = vmatprep.subr.bf16.mxu0 %v16997_v41  ;;  %12544 = vmatprep.subr.bf16.mxu1 %v17008_v9  ;;  %v6588_v27 = vsel %vm63_vm1, %v6564_v12, %v6586_v25 }
0x1357   :  { %12514 = vmatpush1.bf16.msra.mxu0 %v17020_v56  ;;  %12546 = vmatpush1.bf16.msra.mxu1 %v17033_v53 }
0x1358   :  { %12516 = vmatprep.subr.bf16.mxu0 %v17035_v61  ;;  %12548 = vmatprep.subr.bf16.mxu1 %v17047_v40 }
0x135b   :  { %12518 = vmatpush1.bf16.msra.mxu0 %v17068_v3  ;;  %12550 = vmatpush1.bf16.msra.mxu1 %v17072_v23 }
0x135c   :  { %12520 = vmatprep.subr.bf16.mxu0 %v17074_v14  ;;  %12552 = vmatprep.subr.bf16.mxu1 %v17086_v54 }
0x135f   :  { %12522 = vmatpush1.bf16.msra.mxu0 %v17104_v8  ;;  %12554 = vmatpush1.bf16.msra.mxu1 %v17108_v55 }
0x1360   :  { %12524 = vmatprep.subr.bf16.mxu0 %v17110_v10  ;;  %12556 = vmatprep.subr.bf16.mxu1 %v17122_v60 }
0x1363   :  { %12526 = vmatpush1.bf16.msra.mxu0 %v17140_v62  ;;  %12558 = vmatpush1.bf16.msra.mxu1 %v17144_v32 }
0x1364   :  { %12528 = vmatprep.subr.bf16.mxu0 %v17146_v51  ;;  %12560 = vmatprep.subr.bf16.mxu1 %v17158_v63 }
0x1367   :  { %12530 = vmatpush1.bf16.msra.mxu0 %v17176_v24  ;;  %12562 = vmatpush1.bf16.msra.mxu1 %v17180_v43 }
0x1368   :  { %12532 = vmatprep.subr.bf16.mxu0 %v17182_v15  ;;  %12564 = vmatprep.subr.bf16.mxu1 %v17191_v0 }
0x136b   :  { %12534 = vmatpush1.bf16.msra.mxu0 %v17200_v58  ;;  %12566 = vmatpush1.bf16.msra.mxu1 %v17204_v36 }
0x136c   :  { %12568 = vmatprep.subr.bf16.mxu0 %v16930_v44  ;;  %12600 = vmatprep.subr.bf16.mxu1 %v16941_v5 }
0x1420   :  { %v6460_v52 = vpop.f32.mrb[48].mxu0  ;;  %v6531_v59 = vpop.f32.mrb[48].mxu1 }
0x1421   :  { %v6462_v57 = vpop.f32.mrb[49].mxu0  ;;  %v6533_v46 = vpop.f32.mrb[49].mxu1 }
0x1422   :  { %v6593_v49 = vcombine.low %v6460_v52, %v6462_v57  ;;  %v6594_v45 = vcombine.low %v6531_v59, %v6533_v46 }
0x1424   :  { %v6601_v34 = vrot.slane %v6593_v49, %v14026_v17  ;;  %v6608_v6 = vrot.slane %v6594_v45, %v14026_v17 }
0x1426   :  { %v6609_v38 = vcombine.low %v6601_v34, %v6608_v6  ;;  %v13278_v34 = vld [vmem:[#allocation2 + $0x4] ss:$8 sps:$4 sm:$0xcc]   ;;  %v13279_v6 = vld [vmem:[#allocation2 + $0x14] ss:$8 sps:$4 sm:$0xcc]  }
0x1428   :  { %v6611_v28 = vadd.f32 %v6609_v38, %v6588_v27 }
0x142a   :  { %v10878_v2 = vmul.f32 -1.442695, %v6611_v28  ;;  %v6619_v42 = vrot.slane %v6611_v28, 6 }
0x142c   :  { %13442 = vpow2.f32 %v10878_v2 }
0x1436   :  { %v13443_v31 = vpop.eup %13442 }
0x1437   :  { %v6615_v48 = vadd.f32 1.0, %v13443_v31 }
0x1439   :  { %13444 = vrcp.f32 %v6615_v48  ;;  %v6865_v48 = vrot.slane %v13278_v34, %v14026_v17  ;;  %v6941_v34 = vld [vmem:[%s18956_s3 + $0x6] sm:$0x3] }
0x143a   :  { %13446 = vtanh.f32 %v6619_v42  ;;  %v6872_v42 = vrot.slane %v13279_v6, %v14026_v17  ;;  %vm6942_vm10 = vcmp.gt.f32.partialorder %v6941_v34, 0.5 }
0x1443   :  { %v13445_v30 = vpop.eup %13444 }
0x1444   :  { %v6623_v16 = vrot.slane %v13445_v30, 2  ;;  %v13447_v37 = vpop.eup %13446  ;;  %v6629_v33 = vrot.slane %v13445_v30, 4 }
0x1445   :  { %v6626_v59 = vmul.f32 %v13447_v37, %v13445_v30  ;;  %v6873_v37 = vcombine.high %v6865_v48, %v6872_v42 }
0x1446   :  { %v6625_v52 = vmul.f32 %v6623_v16, %v16910_v47 }
0x1448   :  { %v6627_v57 = vadd.f32 %v6626_v59, %v6625_v52 }
0x144a   :  { %13448 = vtanh.f32 %v6627_v57  ;;  %v17224_v46 = vsel %vm6633_vm9, %v6627_v57, %v16910_v47  ;;  %v13280_v47 = vld [vmem:[#allocation2 + $0x20] ss:$8 sps:$4 sm:$0x33]  }
0x144b   :  { %v6887_v12 = vrot.slane %v13280_v47, %v14026_v17 }
0x1454   :  { %v13449_v50 = vpop.eup %13448 }
0x1455   :  { %v6631_v49 = vmul.f32 %v13449_v50, %v6629_v33 }
0x1457   :  { %v17227_v45 = vsel %vm6633_vm9, %v6631_v49, %v16913_v11  ;;  %v6636_v25 = vsel %vm6633_vm9, %v6631_v49, 0.0  ;;  %v13281_v11 = vld [vmem:[#allocation2 + $0x30] ss:$8 sps:$4 sm:$0x33]  }
0x1458   :  { %6637 = vst.msk [vmem:[#allocation3 + $0x4] sm:$0x3] %vm579_vm3, %v6636_v25  ;;  %6768 = vmatmul.mubr.f32.vlgmr.msra.gmra.mrb[50].mxu0 %v17227_v45  ;;  %6839 = vmatmul.mubr.f32.vlgmr.msra.gmra.mrb[50].mxu1 %v17227_v45  ;;  %v6894_v38 = vrot.slane %v13281_v11, %v14026_v17 }
0x1459   :  { %6638 = vst.msk [vmem:[#allocation3 + $0xa] sm:$0x3] %vm581_vm4, %v6636_v25  ;;  %12570 = vmatpush1.bf16.msra.mxu0 %v16943_v1  ;;  %12602 = vmatpush1.bf16.msra.mxu1 %v16955_v22 }
0x145a   :  { %12572 = vmatprep.subr.bf16.mxu0 %v16968_v26  ;;  %12604 = vmatprep.subr.bf16.mxu1 %v16970_v35  ;;  %v6895_v16 = vcombine.low %v6887_v12, %v6894_v38 }
0x145b   :  { %7076 = vmatprep.mubr.f32.mxu0 %v18923_v7  ;;  %7147 = vmatprep.mubr.f32.mxu1 %v18923_v7 }
0x145c   :  { %v6897_v59 = vsel %vm63_vm1, %v6873_v37, %v6895_v16 }
0x145d   :  { %12574 = vmatpush1.bf16.msra.mxu0 %v16982_v39  ;;  %12606 = vmatpush1.bf16.msra.mxu1 %v16995_v20 }
0x145e   :  { %12576 = vmatprep.subr.bf16.mxu0 %v16997_v41  ;;  %12608 = vmatprep.subr.bf16.mxu1 %v17008_v9 }
0x1461   :  { %12578 = vmatpush1.bf16.msra.mxu0 %v17020_v56  ;;  %12610 = vmatpush1.bf16.msra.mxu1 %v17033_v53 }
0x1462   :  { %12580 = vmatprep.subr.bf16.mxu0 %v17035_v61  ;;  %12612 = vmatprep.subr.bf16.mxu1 %v17047_v40 }
0x1465   :  { %12582 = vmatpush1.bf16.msra.mxu0 %v17068_v3  ;;  %12614 = vmatpush1.bf16.msra.mxu1 %v17072_v23 }
0x1466   :  { %12584 = vmatprep.subr.bf16.mxu0 %v17074_v14  ;;  %12616 = vmatprep.subr.bf16.mxu1 %v17086_v54 }
0x1469   :  { %12586 = vmatpush1.bf16.msra.mxu0 %v17104_v8  ;;  %12618 = vmatpush1.bf16.msra.mxu1 %v17108_v55 }
0x146a   :  { %12588 = vmatprep.subr.bf16.mxu0 %v17110_v10  ;;  %12620 = vmatprep.subr.bf16.mxu1 %v17122_v60 }
0x146d   :  { %12590 = vmatpush1.bf16.msra.mxu0 %v17140_v62  ;;  %12622 = vmatpush1.bf16.msra.mxu1 %v17144_v32 }
0x146e   :  { %12592 = vmatprep.subr.bf16.mxu0 %v17146_v51  ;;  %12624 = vmatprep.subr.bf16.mxu1 %v17158_v63 }
0x1471   :  { %12594 = vmatpush1.bf16.msra.mxu0 %v17176_v24  ;;  %12626 = vmatpush1.bf16.msra.mxu1 %v17180_v43 }
0x1472   :  { %12596 = vmatprep.subr.bf16.mxu0 %v17182_v15  ;;  %12628 = vmatprep.subr.bf16.mxu1 %v17191_v0 }
0x1475   :  { %12598 = vmatpush1.bf16.msra.mxu0 %v17200_v58  ;;  %12630 = vmatpush1.bf16.msra.mxu1 %v17204_v36 }
0x1476   :  { %12632 = vmatprep.subr.bf16.mxu0 %v16930_v44  ;;  %12664 = vmatprep.subr.bf16.mxu1 %v16941_v5 }
0x152b   :  { %v6769_v27 = vpop.f32.mrb[50].mxu0  ;;  %v6840_v28 = vpop.f32.mrb[50].mxu1 }
0x152c   :  { %v6771_v2 = vpop.f32.mrb[51].mxu0  ;;  %v6842_v31 = vpop.f32.mrb[51].mxu1 }
0x152d   :  { %v6902_v30 = vcombine.low %v6769_v27, %v6771_v2  ;;  %v6903_v44 = vcombine.low %v6840_v28, %v6842_v31 }
0x152f   :  { %v6910_v5 = vrot.slane %v6902_v30, %v14026_v17  ;;  %v6917_v4 = vrot.slane %v6903_v44, %v14026_v17 }
0x1531   :  { %v6918_v52 = vcombine.low %v6910_v5, %v6917_v4 }
0x1533   :  { %v6920_v57 = vadd.f32 %v6918_v52, %v6897_v59  ;;  %v7567_v59 = vld [vmem:[%s18908_s10 + $0x8] sm:$0xff] }
0x1535   :  { %v10879_v33 = vmul.f32 -1.442695, %v6920_v57  ;;  %v6928_v25 = vrot.slane %v6920_v57, 6  ;;  %v7571_v57 = vld [vmem:[%s18908_s10 + $0x28] sm:$0xff] }
0x1537   :  { %13450 = vpow2.f32 %v10879_v33  ;;  %v7569_v33 = vld [vmem:[%s18908_s10 + $0x18] sm:$0xff] }
0x1541   :  { %v13451_v50 = vpop.eup %13450 }
0x1542   :  { %v6924_v49 = vadd.f32 1.0, %v13451_v50  ;;  %v17354_v50 = vpack.c.bf16 %v7571_v57, %v7567_v59  ;;  %v7600_v59 = vld [vmem:[%s18908_s10 + $0x110] sm:$0xff] }
0x1544   :  { %13452 = vrcp.f32 %v6924_v49  ;;  %v7573_v49 = vld [vmem:[%s18908_s10 + $0x38] sm:$0xff] }
0x1545   :  { %13454 = vtanh.f32 %v6928_v25  ;;  %v7566_v25 = vld [vmem:[%s18908_s10] sm:$0xff] }
0x154e   :  { %v13453_v47 = vpop.eup %13452 }
0x154f   :  { %v6932_v11 = vrot.slane %v13453_v47, 2  ;;  %v13455_v6 = vpop.eup %13454  ;;  %v6938_v2 = vrot.slane %v13453_v47, 4 }
0x1550   :  { %v6935_v38 = vmul.f32 %v13455_v6, %v13453_v47  ;;  %v7570_v47 = vld [vmem:[%s18908_s10 + $0x20] sm:$0xff]  ;;  %v7568_v6 = vld [vmem:[%s18908_s10 + $0x10] sm:$0xff] }
0x1551   :  { %v6934_v12 = vmul.f32 %v6932_v11, %v17224_v46  ;;  %v17365_v11 = vpack.c.bf16 %v7573_v49, %v7569_v33  ;;  %v17367_v34 = vpack.c.bf16 %v7570_v47, %v7566_v25  ;;  %v7604_v33 = vld [vmem:[%s18908_s10 + $0x130] sm:$0xff]  ;;  %v7607_v49 = vld [vmem:[%s18908_s10 + $0x148] sm:$0xff]  ;;  %v7609_v47 = vld [vmem:[%s18908_s10 + $0x158] sm:$0xff] }
0x1552   :  { %v7611_v25 = vld [vmem:[%s18908_s10 + $0x168] sm:$0xff] }
0x1553   :  { %v6936_v27 = vadd.f32 %v6935_v38, %v6934_v12  ;;  %v7572_v12 = vld [vmem:[%s18908_s10 + $0x30] sm:$0xff]  ;;  %v7575_v38 = vld [vmem:[%s18908_s10 + $0x48] sm:$0xff] }
0x1555   :  { %13456 = vtanh.f32 %v6936_v27  ;;  %v17280_v28 = vsel %vm6942_vm10, %v6936_v27, %v17224_v46  ;;  %v17379_v27 = vpack.c.bf16 %v7572_v12, %v7568_v6  ;;  %v7613_v6 = vld [vmem:[%s18908_s10 + $0x178] sm:$0xff] }
0x155f   :  { %v13457_v31 = vpop.eup %13456 }
0x1560   :  { %v6940_v48 = vmul.f32 %v13457_v31, %v6938_v2  ;;  %v7577_v2 = vld [vmem:[%s18908_s10 + $0x58] sm:$0xff] }
0x1561   :  { %v7581_v31 = vld [vmem:[%s18908_s10 + $0x78] sm:$0xff] }
0x1562   :  { %v17283_v42 = vsel %vm6942_vm10, %v6940_v48, %v17227_v45  ;;  %v6945_v30 = vsel %vm6942_vm10, %v6940_v48, 0.0 }
0x1563   :  { %6946 = vst.msk [vmem:[#allocation3 + $0x6] sm:$0x3] %vm579_vm3, %v6945_v30  ;;  %7077 = vmatmul.mubr.f32.vlgmr.msra.gmra.mrb[52].mxu0 %v17283_v42  ;;  %7148 = vmatmul.mubr.f32.vlgmr.msra.gmra.mrb[52].mxu1 %v17283_v42 }
0x1564   :  { %6947 = vst.msk [vmem:[#allocation3 + $0x8] sm:$0x3] %vm581_vm4, %v6945_v30  ;;  %12634 = vmatpush1.bf16.msra.mxu0 %v16943_v1  ;;  %12666 = vmatpush1.bf16.msra.mxu1 %v16955_v22  ;;  %v13282_v1 = vld [vmem:[#allocation2 + $0x20] ss:$8 sps:$4 sm:$0x33]  }
0x1565   :  { %12636 = vmatprep.subr.bf16.mxu0 %v16968_v26  ;;  %12668 = vmatprep.subr.bf16.mxu1 %v16970_v35  ;;  %v13283_v22 = vld [vmem:[#allocation2 + $0x30] ss:$8 sps:$4 sm:$0x33]   ;;  %v13284_v26 = vld [vmem:[#allocation2 + $0x4] ss:$8 sps:$4 sm:$0xcc]  }
0x1566   :  { %7385 = vmatprep.mubr.f32.mxu0 %v18923_v7  ;;  %7456 = vmatprep.mubr.f32.mxu1 %v18923_v7  ;;  %v13285_v35 = vld [vmem:[#allocation2 + $0x14] ss:$8 sps:$4 sm:$0xcc]   ;;  %v7574_v30 = vld [vmem:[%s18908_s10 + $0x40] sm:$0xff] }
0x1568   :  { %12638 = vmatpush1.bf16.msra.mxu0 %v16982_v39  ;;  %12670 = vmatpush1.bf16.msra.mxu1 %v16995_v20  ;;  %v7174_v39 = vrot.slane %v13282_v1, %v14026_v17  ;;  %v7181_v20 = vrot.slane %v13283_v22, %v14026_v17  ;;  %v7578_v1 = vld [vmem:[%s18908_s10 + $0x60] sm:$0xff]  ;;  %v7576_v22 = vld [vmem:[%s18908_s10 + $0x50] sm:$0xff] }
0x1569   :  { %12640 = vmatprep.subr.bf16.mxu0 %v16997_v41  ;;  %12672 = vmatprep.subr.bf16.mxu1 %v17008_v9 }
0x156c   :  { %12642 = vmatpush1.bf16.msra.mxu0 %v17020_v56  ;;  %12674 = vmatpush1.bf16.msra.mxu1 %v17033_v53 }
0x156d   :  { %12644 = vmatprep.subr.bf16.mxu0 %v17035_v61  ;;  %12676 = vmatprep.subr.bf16.mxu1 %v17047_v40  ;;  %v7196_v61 = vrot.slane %v13284_v26, %v14026_v17  ;;  %v7203_v40 = vrot.slane %v13285_v35, %v14026_v17  ;;  %v17406_v26 = vpack.c.bf16 %v7578_v1, %v7574_v30  ;;  %v7580_v35 = vld [vmem:[%s18908_s10 + $0x70] sm:$0xff] }
0x156e   :  { %v7608_v30 = vld [vmem:[%s18908_s10 + $0x150] sm:$0xff]  ;;  %v17546_v1 = vpack.c.bf16 %v7613_v6, %v7609_v47  ;;  %v13288_v6 = vld [vmem:[#allocation2 + $0x4] ss:$8 sps:$4 sm:$0x33]  }
0x156f   :  { %v13287_v47 = vld [vmem:[#allocation2 + $0x30] ss:$8 sps:$4 sm:$0xcc]  }
0x1570   :  { %12646 = vmatpush1.bf16.msra.mxu0 %v17068_v3  ;;  %12678 = vmatpush1.bf16.msra.mxu1 %v17072_v23 }
0x1571   :  { %12648 = vmatprep.subr.bf16.mxu0 %v17074_v14  ;;  %12680 = vmatprep.subr.bf16.mxu1 %v17086_v54  ;;  %v7182_v14 = vcombine.low %v7174_v39, %v7181_v20  ;;  %v7583_v39 = vld [vmem:[%s18908_s10 + $0x88] sm:$0xff] }
0x1572   :  { %v7587_v20 = vld [vmem:[%s18908_s10 + $0xa8] sm:$0xff] }
0x1574   :  { %12650 = vmatpush1.bf16.msra.mxu0 %v17104_v8  ;;  %12682 = vmatpush1.bf16.msra.mxu1 %v17108_v55  ;;  %v7204_v55 = vcombine.high %v7196_v61, %v7203_v40  ;;  %v7582_v61 = vld [vmem:[%s18908_s10 + $0x80] sm:$0xff] }
0x1575   :  { %12652 = vmatprep.subr.bf16.mxu0 %v17110_v10  ;;  %12684 = vmatprep.subr.bf16.mxu1 %v17122_v60 }
0x1576   :  { %v7206_v60 = vsel %vm63_vm1, %v7182_v14, %v7204_v55  ;;  %v7588_v14 = vld [vmem:[%s18908_s10 + $0xb0] sm:$0xff]  ;;  %v7595_v55 = vld [vmem:[%s18908_s10 + $0xe8] sm:$0xff] }
0x1578   :  { %12654 = vmatpush1.bf16.msra.mxu0 %v17140_v62  ;;  %12686 = vmatpush1.bf16.msra.mxu1 %v17144_v32 }
0x1579   :  { %12656 = vmatprep.subr.bf16.mxu0 %v17146_v51  ;;  %12688 = vmatprep.subr.bf16.mxu1 %v17158_v63 }
0x157c   :  { %12658 = vmatpush1.bf16.msra.mxu0 %v17176_v24  ;;  %12690 = vmatpush1.bf16.msra.mxu1 %v17180_v43 }
0x157d   :  { %12660 = vmatprep.subr.bf16.mxu0 %v17182_v15  ;;  %12692 = vmatprep.subr.bf16.mxu1 %v17191_v0  ;;  %v7250_v0 = vld [vmem:[%s18956_s3 + $0x8] sm:$0x3] }
0x157e   :  { %vm7251_vm11 = vcmp.gt.f32.partialorder %v7250_v0, 0.5  ;;  %v7599_v0 = vld [vmem:[%s18908_s10 + $0x108] sm:$0xff] }
0x1580   :  { %12662 = vmatpush1.bf16.msra.mxu0 %v17200_v58  ;;  %12694 = vmatpush1.bf16.msra.mxu1 %v17204_v36 }
0x1581   :  { %12696 = vmatprep.subr.bf16.mxu0 %v17354_v50  ;;  %12728 = vmatprep.subr.bf16.mxu1 %v17365_v11 }
0x1636   :  { %v7078_v41 = vpop.f32.mrb[52].mxu0  ;;  %v7149_v9 = vpop.f32.mrb[52].mxu1 }
0x1637   :  { %v7080_v56 = vpop.f32.mrb[53].mxu0  ;;  %v7151_v53 = vpop.f32.mrb[53].mxu1 }
0x1638   :  { %v7211_v3 = vcombine.low %v7078_v41, %v7080_v56  ;;  %v7212_v23 = vcombine.low %v7149_v9, %v7151_v53  ;;  %v17419_v41 = vpack.c.bf16 %v7580_v35, %v7576_v22  ;;  %v17421_v9 = vpack.c.bf16 %v7587_v20, %v7583_v39  ;;  %v7585_v56 = vld [vmem:[%s18908_s10 + $0x98] sm:$0xff]  ;;  %v7612_v22 = vld [vmem:[%s18908_s10 + $0x170] sm:$0xff]  ;;  %v7615_v35 = vld [vmem:[%s18908_s10 + $0x188] sm:$0xff] }
0x1639   :  { %v7589_v53 = vld [vmem:[%s18908_s10 + $0xb8] sm:$0xff]  ;;  %v7619_v39 = vld [vmem:[%s18908_s10 + $0x1a8] sm:$0xff] }
0x163a   :  { %v7219_v54 = vrot.slane %v7211_v3, %v14026_v17  ;;  %v7226_v8 = vrot.slane %v7212_v23, %v14026_v17  ;;  %v17432_v40 = vpack.c.bf16 %v7589_v53, %v7585_v56  ;;  %v7586_v3 = vld [vmem:[%s18908_s10 + $0xa0] sm:$0xff]  ;;  %v7584_v23 = vld [vmem:[%s18908_s10 + $0x90] sm:$0xff]  ;;  %v7617_v20 = vld [vmem:[%s18908_s10 + $0x198] sm:$0xff] }
0x163b   :  { %v7621_v56 = vld [vmem:[%s18908_s10 + $0x1b8] sm:$0xff] }
0x163c   :  { %v7227_v10 = vcombine.low %v7219_v54, %v7226_v8  ;;  %v17444_v54 = vpack.c.bf16 %v7586_v3, %v7582_v61  ;;  %v7591_v8 = vld [vmem:[%s18908_s10 + $0xc8] sm:$0xff]  ;;  %v17568_v61 = vpack.c.bf16 %v7612_v22, %v7608_v30  ;;  %v17570_v3 = vpack.c.bf16 %v7619_v39, %v7615_v35 }
0x163d   :  { %v7490_v30 = vrot.slane %v13287_v47, %v14026_v17 }
0x163e   :  { %v7229_v62 = vadd.f32 %v7227_v10, %v7206_v60  ;;  %v7593_v10 = vld [vmem:[%s18908_s10 + $0xd8] sm:$0xff]  ;;  %v17457_v60 = vpack.c.bf16 %v7588_v14, %v7584_v23  ;;  %v7614_v23 = vld [vmem:[%s18908_s10 + $0x180] sm:$0xff] }
0x163f   :  { %v7618_v14 = vld [vmem:[%s18908_s10 + $0x1a0] sm:$0xff] }
0x1640   :  { %v10880_v32 = vmul.f32 -1.442695, %v7229_v62  ;;  %v7237_v24 = vrot.slane %v7229_v62, 6  ;;  %v17459_v62 = vpack.c.bf16 %v7595_v55, %v7591_v8  ;;  %v7616_v8 = vld [vmem:[%s18908_s10 + $0x190] sm:$0xff]  ;;  %v17582_v55 = vpack.c.bf16 %v7621_v56, %v7617_v20 }
0x1641   :  { %v7505_v56 = vrot.slane %v13288_v6, %v14026_v17  ;;  %v7559_v6 = vld [vmem:[%s18956_s3 + $0xa] sm:$0x3] }
0x1642   :  { %13458 = vpow2.f32 %v10880_v32  ;;  %v7597_v32 = vld [vmem:[%s18908_s10 + $0xf8] sm:$0xff]  ;;  %vm7560_vm12 = vcmp.gt.f32.partialorder %v7559_v6, 0.5  ;;  %v8281_v6 = vld [vmem:[%s18911_s13 + $0x68] sm:$0xff] }
0x164c   :  { %v13459_v51 = vpop.eup %13458 }
0x164d   :  { %v7233_v63 = vadd.f32 1.0, %v13459_v51  ;;  %v7590_v51 = vld [vmem:[%s18908_s10 + $0xc0] sm:$0xff] }
0x164f   :  { %13460 = vrcp.f32 %v7233_v63  ;;  %v7594_v63 = vld [vmem:[%s18908_s10 + $0xe0] sm:$0xff] }
0x1650   :  { %13462 = vtanh.f32 %v7237_v24  ;;  %v17471_v24 = vpack.c.bf16 %v7597_v32, %v7593_v10  ;;  %v7620_v10 = vld [vmem:[%s18908_s10 + $0x1b0] sm:$0xff]  ;;  %v7623_v32 = vld [vmem:[%s18908_s10 + $0x1c8] sm:$0xff] }
0x1659   :  { %v13461_v43 = vpop.eup %13460 }
0x165a   :  { %v7241_v15 = vrot.slane %v13461_v43, 2  ;;  %v13463_v58 = vpop.eup %13462  ;;  %v7247_v16 = vrot.slane %v13461_v43, 4 }
0x165b   :  { %v7244_v46 = vmul.f32 %v13463_v58, %v13461_v43  ;;  %v7592_v43 = vld [vmem:[%s18908_s10 + $0xd0] sm:$0xff]  ;;  %v7603_v58 = vld [vmem:[%s18908_s10 + $0x128] sm:$0xff] }
0x165c   :  { %v7243_v36 = vmul.f32 %v7241_v15, %v17280_v28  ;;  %v7596_v15 = vld [vmem:[%s18908_s10 + $0xf0] sm:$0xff] }
0x165e   :  { %v7245_v45 = vadd.f32 %v7244_v46, %v7243_v36  ;;  %v7601_v36 = vld [vmem:[%s18908_s10 + $0x118] sm:$0xff] }
0x165f   :  { %v7605_v46 = vld [vmem:[%s18908_s10 + $0x138] sm:$0xff] }
0x1660   :  { %13464 = vtanh.f32 %v7245_v45  ;;  %v17334_v44 = vsel %vm7251_vm11, %v7245_v45, %v17280_v28  ;;  %v7579_v28 = vld [vmem:[%s18908_s10 + $0x68] sm:$0xff]  ;;  %v17492_v45 = vpack.c.bf16 %v7594_v63, %v7590_v51  ;;  %v17510_v57 = vpack.c.bf16 %v7605_v46, %v7601_v36  ;;  %v7625_v63 = vld [vmem:[%s18908_s10 + $0x1d8] sm:$0xff]  ;;  %v7622_v36 = vld [vmem:[%s18908_s10 + $0x1c0] sm:$0xff] }
0x1661   :  { %v17392_v48 = vpack.c.bf16 %v7579_v28, %v7575_v38  ;;  %v17532_v38 = vpack.c.bf16 %v7604_v33, %v7600_v59  ;;  %v17534_v28 = vpack.c.bf16 %v7611_v25, %v7607_v49  ;;  %v7627_v51 = vld [vmem:[%s18908_s10 + $0x1e8] sm:$0xff]  ;;  %v7626_v46 = vld [vmem:[%s18908_s10 + $0x1e0] sm:$0xff]  ;;  %v7628_v59 = vld [vmem:[%s18908_s10 + $0x1f0] sm:$0xff] }
0x1662   :  { %v17624_v33 = vpack.c.bf16 %v7626_v46, %v7622_v36  ;;  %v13286_v25 = vld [vmem:[#allocation2 + $0x20] ss:$8 sps:$4 sm:$0xcc]  }
0x166a   :  { %v13465_v5 = vpop.eup %13464 }
0x166b   :  { %v7249_v4 = vmul.f32 %v13465_v5, %v7247_v16  ;;  %v17496_v16 = vpack.c.bf16 %v7596_v15, %v7592_v43  ;;  %v17498_v5 = vpack.c.bf16 %v7603_v58, %v7599_v0  ;;  %v7629_v43 = vld [vmem:[%s18908_s10 + $0x1f8] sm:$0xff]  ;;  %v17600_v15 = vpack.c.bf16 %v7618_v14, %v7614_v23 }
0x166c   :  { %v17604_v0 = vpack.c.bf16 %v7620_v10, %v7616_v8  ;;  %v17606_v58 = vpack.c.bf16 %v7627_v51, %v7623_v32 }
0x166d   :  { %v17337_v37 = vsel %vm7251_vm11, %v7249_v4, %v17283_v42  ;;  %v7254_v52 = vsel %vm7251_vm11, %v7249_v4, 0.0  ;;  %v17394_v42 = vpack.c.bf16 %v7581_v31, %v7577_v2  ;;  %v7598_v4 = vld [vmem:[%s18908_s10 + $0x100] sm:$0xff] }
0x166e   :  { %7255 = vst.msk [vmem:[#allocation3 + $0x8] sm:$0x3] %vm579_vm3, %v7254_v52  ;;  %7386 = vmatmul.mubr.f32.vlgmr.msra.gmra.mrb[54].mxu0 %v17337_v37  ;;  %7457 = vmatmul.mubr.f32.vlgmr.msra.gmra.mrb[54].mxu1 %v17337_v37  ;;  %v7606_v2 = vld [vmem:[%s18908_s10 + $0x140] sm:$0xff] }
0x166f   :  { %7256 = vst.msk [vmem:[#allocation3 + $0x6] sm:$0x3] %vm581_vm4, %v7254_v52  ;;  %7694 = vmatprep.mubr.f32.mxu0 %v18923_v7  ;;  %7765 = vmatprep.mubr.f32.mxu1 %v18923_v7  ;;  %v7602_v52 = vld [vmem:[%s18908_s10 + $0x120] sm:$0xff] }
0x1670   :  { %12698 = vmatpush1.bf16.msra.mxu0 %v17367_v34  ;;  %12730 = vmatpush1.bf16.msra.mxu1 %v17379_v27  ;;  %v17528_v12 = vpack.c.bf16 %v7602_v52, %v7598_v4  ;;  %v7610_v31 = vld [vmem:[%s18908_s10 + $0x160] sm:$0xff]  ;;  %v17615_v4 = vpack.c.bf16 %v7629_v43, %v7625_v63  ;;  %v7624_v52 = vld [vmem:[%s18908_s10 + $0x1d0] sm:$0xff] }
0x1671   :  { %12700 = vmatprep.subr.bf16.mxu0 %v17392_v48  ;;  %12732 = vmatprep.subr.bf16.mxu1 %v17394_v42  ;;  %v17564_v53 = vpack.c.bf16 %v7610_v31, %v7606_v2  ;;  %v17628_v49 = vpack.c.bf16 %v7628_v59, %v7624_v52  ;;  %v13289_v2 = vld [vmem:[#allocation2 + $0x14] ss:$8 sps:$4 sm:$0x33]   ;;  %v7483_v31 = vrot.slane %v13286_v25, %v14026_v17 }
0x1672   :  { %v7512_v23 = vrot.slane %v13289_v2, %v14026_v17 }
0x1673   :  { %v7491_v8 = vcombine.high %v7483_v31, %v7490_v30 }
0x1674   :  { %12702 = vmatpush1.bf16.msra.mxu0 %v17406_v26  ;;  %12734 = vmatpush1.bf16.msra.mxu1 %v17419_v41  ;;  %v7513_v32 = vcombine.low %v7505_v56, %v7512_v23 }
0x1675   :  { %12704 = vmatprep.subr.bf16.mxu0 %v17421_v9  ;;  %12736 = vmatprep.subr.bf16.mxu1 %v17432_v40 }
0x1676   :  { %v7515_v63 = vsel %vm63_vm1, %v7491_v8, %v7513_v32 }
0x1678   :  { %12706 = vmatpush1.bf16.msra.mxu0 %v17444_v54  ;;  %12738 = vmatpush1.bf16.msra.mxu1 %v17457_v60 }
0x1679   :  { %12708 = vmatprep.subr.bf16.mxu0 %v17459_v62  ;;  %12740 = vmatprep.subr.bf16.mxu1 %v17471_v24 }
0x167c   :  { %12710 = vmatpush1.bf16.msra.mxu0 %v17492_v45  ;;  %12742 = vmatpush1.bf16.msra.mxu1 %v17496_v16 }
0x167d   :  { %12712 = vmatprep.subr.bf16.mxu0 %v17498_v5  ;;  %12744 = vmatprep.subr.bf16.mxu1 %v17510_v57 }
0x1680   :  { %12714 = vmatpush1.bf16.msra.mxu0 %v17528_v12  ;;  %12746 = vmatpush1.bf16.msra.mxu1 %v17532_v38 }
0x1681   :  { %12716 = vmatprep.subr.bf16.mxu0 %v17534_v28  ;;  %12748 = vmatprep.subr.bf16.mxu1 %v17546_v1 }
0x1684   :  { %12718 = vmatpush1.bf16.msra.mxu0 %v17564_v53  ;;  %12750 = vmatpush1.bf16.msra.mxu1 %v17568_v61 }
0x1685   :  { %12720 = vmatprep.subr.bf16.mxu0 %v17570_v3  ;;  %12752 = vmatprep.subr.bf16.mxu1 %v17582_v55 }
0x1688   :  { %12722 = vmatpush1.bf16.msra.mxu0 %v17600_v15  ;;  %12754 = vmatpush1.bf16.msra.mxu1 %v17604_v0 }
0x1689   :  { %12724 = vmatprep.subr.bf16.mxu0 %v17606_v58  ;;  %12756 = vmatprep.subr.bf16.mxu1 %v17615_v4 }
0x168c   :  { %12726 = vmatpush1.bf16.msra.mxu0 %v17624_v33  ;;  %12758 = vmatpush1.bf16.msra.mxu1 %v17628_v49 }
0x168d   :  { %12760 = vmatprep.subr.bf16.mxu0 %v17354_v50  ;;  %12792 = vmatprep.subr.bf16.mxu1 %v17365_v11 }
0x1741   :  { %v7387_v22 = vpop.f32.mrb[54].mxu0  ;;  %v7458_v35 = vpop.f32.mrb[54].mxu1 }
0x1742   :  { %v7389_v39 = vpop.f32.mrb[55].mxu0  ;;  %v7460_v20 = vpop.f32.mrb[55].mxu1 }
0x1743   :  { %v7520_v14 = vcombine.low %v7387_v22, %v7389_v39  ;;  %v7521_v50 = vcombine.low %v7458_v35, %v7460_v20 }
0x1745   :  { %v7528_v11 = vrot.slane %v7520_v14, %v14026_v17  ;;  %v7535_v10 = vrot.slane %v7521_v50, %v14026_v17 }
0x1747   :  { %v7536_v51 = vcombine.low %v7528_v11, %v7535_v10 }
0x1749   :  { %v7538_v43 = vadd.f32 %v7536_v51, %v7515_v63  ;;  %v8184_v63 = vld [vmem:[%s18910_s12] sm:$0xff] }
0x174b   :  { %v10881_v36 = vmul.f32 -1.442695, %v7538_v43  ;;  %v7546_v59 = vrot.slane %v7538_v43, 6  ;;  %v8269_v43 = vld [vmem:[%s18911_s13 + $0x8] sm:$0xff] }
0x174d   :  { %13466 = vpow2.f32 %v10881_v36  ;;  %v8273_v36 = vld [vmem:[%s18911_s13 + $0x28] sm:$0xff] }
0x1757   :  { %v13467_v46 = vpop.eup %13466 }
0x1758   :  { %v7542_v52 = vadd.f32 1.0, %v13467_v46  ;;  %v12827_v46 = vpack.c.bf16 %v8273_v36, %v8269_v43 }
0x175a   :  { %13468 = vrcp.f32 %v7542_v52  ;;  %v8268_v52 = vld [vmem:[%s18911_s13] sm:$0xff] }
0x175b   :  { %13470 = vtanh.f32 %v7546_v59  ;;  %v8272_v59 = vld [vmem:[%s18911_s13 + $0x20] sm:$0xff] }
0x1764   :  { %v13469_v25 = vpop.eup %13468 }
0x1765   :  { %v7550_v47 = vrot.slane %v13469_v25, 2  ;;  %v13471_v2 = vpop.eup %13470  ;;  %v7556_v39 = vrot.slane %v13469_v25, 4 }
0x1766   :  { %v7553_v30 = vmul.f32 %v13471_v2, %v13469_v25  ;;  %v12829_v25 = vpack.c.bf16 %v8272_v59, %v8268_v52 }
0x1767   :  { %v7552_v31 = vmul.f32 %v7550_v47, %v17334_v44  ;;  %v8277_v47 = vld [vmem:[%s18911_s13 + $0x48] sm:$0xff] }
0x1768   :  { %v12831_v2 = vpack.c.bf16 %v8281_v6, %v8277_v47 }
0x1769   :  { %v7554_v22 = vadd.f32 %v7553_v30, %v7552_v31  ;;  %v8276_v31 = vld [vmem:[%s18911_s13 + $0x40] sm:$0xff] }
0x176a   :  { %v8280_v30 = vld [vmem:[%s18911_s13 + $0x60] sm:$0xff] }
0x176b   :  { %13472 = vtanh.f32 %v7554_v22  ;;  %v17648_v35 = vsel %vm7560_vm12, %v7554_v22, %v17334_v44  ;;  %v13290_v44 = vld [vmem:[#allocation2 + $0x24] ss:$8 sps:$4 sm:$0x33]   ;;  %v12833_v22 = vpack.c.bf16 %v8280_v30, %v8276_v31 }
0x1775   :  { %v13473_v20 = vpop.eup %13472 }
0x1776   :  { %v7558_v56 = vmul.f32 %v13473_v20, %v7556_v39  ;;  %v8289_v39 = vld [vmem:[%s18911_s13 + $0xa8] sm:$0xff] }
0x1778   :  { %v17651_v23 = vsel %vm7560_vm12, %v7558_v56, %v17337_v37  ;;  %v7563_v14 = vsel %vm7560_vm12, %v7558_v56, 0.0  ;;  %v13291_v37 = vld [vmem:[#allocation2 + $0x34] ss:$8 sps:$4 sm:$0x33]   ;;  %v8284_v56 = vld [vmem:[%s18911_s13 + $0x80] sm:$0xff] }
0x1779   :  { %7564 = vst.msk [vmem:[#allocation3 + $0xa] sm:$0x3] %vm579_vm3, %v7563_v14  ;;  %7695 = vmatmul.mubr.f32.vlgmr.msra.gmra.mrb[56].mxu0 %v17651_v23  ;;  %7766 = vmatmul.mubr.f32.vlgmr.msra.gmra.mrb[56].mxu1 %v17651_v23 }
0x177a   :  { %7565 = vst.msk [vmem:[#allocation3 + $0x4] sm:$0x3] %vm581_vm4, %v7563_v14  ;;  %12762 = vmatpush1.bf16.msra.mxu0 %v17367_v34  ;;  %12794 = vmatpush1.bf16.msra.mxu1 %v17379_v27  ;;  %v13292_v34 = vld [vmem:[#allocation2] ss:$8 sps:$4 sm:$0xcc]  }
0x177b   :  { %12764 = vmatprep.subr.bf16.mxu0 %v17392_v48  ;;  %12796 = vmatprep.subr.bf16.mxu1 %v17394_v42  ;;  %v13293_v27 = vld [vmem:[#allocation2 + $0x10] ss:$8 sps:$4 sm:$0xcc]   ;;  %v7792_v48 = vrot.slane %v13290_v44, %v14026_v17  ;;  %v7799_v42 = vrot.slane %v13291_v37, %v14026_v17  ;;  %v8293_v44 = vld [vmem:[%s18911_s13 + $0xc8] sm:$0xff] }
0x177c   :  { %8003 = vmatprep.mubr.f32.mxu0 %v18923_v7  ;;  %8074 = vmatprep.mubr.f32.mxu1 %v18923_v7  ;;  %v8297_v37 = vld [vmem:[%s18911_s13 + $0xe8] sm:$0xff] }
0x177e   :  { %12766 = vmatpush1.bf16.msra.mxu0 %v17406_v26  ;;  %12798 = vmatpush1.bf16.msra.mxu1 %v17419_v41 }
0x177f   :  { %12768 = vmatprep.subr.bf16.mxu0 %v17421_v9  ;;  %12800 = vmatprep.subr.bf16.mxu1 %v17432_v40 }
0x1782   :  { %12770 = vmatpush1.bf16.msra.mxu0 %v17444_v54  ;;  %12802 = vmatpush1.bf16.msra.mxu1 %v17457_v60  ;;  %v7814_v54 = vrot.slane %v13292_v34, %v14026_v17  ;;  %v7821_v60 = vrot.slane %v13293_v27, %v14026_v17  ;;  %v12839_v34 = vpack.c.bf16 %v8297_v37, %v8293_v44  ;;  %v8292_v27 = vld [vmem:[%s18911_s13 + $0xc0] sm:$0xff] }
0x1783   :  { %12772 = vmatprep.subr.bf16.mxu0 %v17459_v62  ;;  %12804 = vmatprep.subr.bf16.mxu1 %v17471_v24 }
0x1786   :  { %12774 = vmatpush1.bf16.msra.mxu0 %v17492_v45  ;;  %12806 = vmatpush1.bf16.msra.mxu1 %v17496_v16  ;;  %v7800_v45 = vcombine.low %v7792_v48, %v7799_v42  ;;  %v8296_v48 = vld [vmem:[%s18911_s13 + $0xe0] sm:$0xff] }
0x1787   :  { %12776 = vmatprep.subr.bf16.mxu0 %v17498_v5  ;;  %12808 = vmatprep.subr.bf16.mxu1 %v17510_v57  ;;  %v7822_v57 = vcombine.high %v7814_v54, %v7821_v60  ;;  %v12841_v42 = vpack.c.bf16 %v8296_v48, %v8292_v27  ;;  %v8304_v54 = vld [vmem:[%s18911_s13 + $0x120] sm:$0xff] }
0x178a   :  { %12778 = vmatpush1.bf16.msra.mxu0 %v17528_v12  ;;  %12810 = vmatpush1.bf16.msra.mxu1 %v17532_v38  ;;  %v7824_v38 = vsel %vm63_vm1, %v7800_v45, %v7822_v57 }
0x178b   :  { %12780 = vmatprep.subr.bf16.mxu0 %v17534_v28  ;;  %12812 = vmatprep.subr.bf16.mxu1 %v17546_v1 }
0x178e   :  { %12782 = vmatpush1.bf16.msra.mxu0 %v17564_v53  ;;  %12814 = vmatpush1.bf16.msra.mxu1 %v17568_v61 }
0x178f   :  { %12784 = vmatprep.subr.bf16.mxu0 %v17570_v3  ;;  %12816 = vmatprep.subr.bf16.mxu1 %v17582_v55 }
0x1792   :  { %12786 = vmatpush1.bf16.msra.mxu0 %v17600_v15  ;;  %12818 = vmatpush1.bf16.msra.mxu1 %v17604_v0  ;;  %v7868_v0 = vld [vmem:[%s18956_s3 + $0xc] sm:$0x3] }
0x1793   :  { %12788 = vmatprep.subr.bf16.mxu0 %v17606_v58  ;;  %12820 = vmatprep.subr.bf16.mxu1 %v17615_v4  ;;  %vm7869_vm13 = vcmp.gt.f32.partialorder %v7868_v0, 0.5  ;;  %v8324_v0 = vld [vmem:[%s18911_s13 + $0x1c0] sm:$0xff] }
0x1796   :  { %12790 = vmatpush1.bf16.msra.mxu0 %v17624_v33  ;;  %12822 = vmatpush1.bf16.msra.mxu1 %v17628_v49 }
0x1797   :  { %12828 = vmatprep.subr.bf16.mxu1 %v12827_v46 }
0x184c   :  { %v7696_v26 = vpop.f32.mrb[56].mxu0  ;;  %v7767_v41 = vpop.f32.mrb[56].mxu1 }
0x184d   :  { %v7698_v9 = vpop.f32.mrb[57].mxu0  ;;  %v7769_v40 = vpop.f32.mrb[57].mxu1 }
0x184e   :  { %v7829_v62 = vcombine.low %v7696_v26, %v7698_v9  ;;  %v7830_v24 = vcombine.low %v7767_v41, %v7769_v40  ;;  %v8301_v26 = vld [vmem:[%s18911_s13 + $0x108] sm:$0xff]  ;;  %v8300_v40 = vld [vmem:[%s18911_s13 + $0x100] sm:$0xff] }
0x184f   :  { %v8305_v41 = vld [vmem:[%s18911_s13 + $0x128] sm:$0xff]  ;;  %v12845_v60 = vpack.c.bf16 %v8304_v54, %v8300_v40 }
0x1850   :  { %v7837_v16 = vrot.slane %v7829_v62, %v14026_v17  ;;  %v7844_v5 = vrot.slane %v7830_v24, %v14026_v17  ;;  %v12843_v9 = vpack.c.bf16 %v8305_v41, %v8301_v26  ;;  %v8309_v62 = vld [vmem:[%s18911_s13 + $0x148] sm:$0xff] }
0x1851   :  { %v8313_v24 = vld [vmem:[%s18911_s13 + $0x168] sm:$0xff] }
0x1852   :  { %v7845_v12 = vcombine.low %v7837_v16, %v7844_v5  ;;  %v12847_v45 = vpack.c.bf16 %v8313_v24, %v8309_v62  ;;  %v8308_v16 = vld [vmem:[%s18911_s13 + $0x140] sm:$0xff]  ;;  %v8270_v24 = vld [vmem:[%s18911_s13 + $0x10] sm:$0xff] }
0x1853   :  { %v8312_v5 = vld [vmem:[%s18911_s13 + $0x160] sm:$0xff] }
0x1854   :  { %v7847_v28 = vadd.f32 %v7845_v12, %v7824_v38  ;;  %v12849_v57 = vpack.c.bf16 %v8312_v5, %v8308_v16  ;;  %v8317_v12 = vld [vmem:[%s18911_s13 + $0x188] sm:$0xff]  ;;  %v8279_v16 = vld [vmem:[%s18911_s13 + $0x58] sm:$0xff] }
0x1855   :  { %v8321_v38 = vld [vmem:[%s18911_s13 + $0x1a8] sm:$0xff]  ;;  %v8283_v5 = vld [vmem:[%s18911_s13 + $0x78] sm:$0xff] }
0x1856   :  { %v10882_v1 = vmul.f32 -1.442695, %v7847_v28  ;;  %v7855_v3 = vrot.slane %v7847_v28, 6  ;;  %v12851_v28 = vpack.c.bf16 %v8321_v38, %v8317_v12  ;;  %v12863_v38 = vpack.c.bf16 %v8283_v5, %v8279_v16  ;;  %v8541_v16 = vld [vmem:[%s18913_s15 + $0x40] sm:$0xff]  ;;  %v8542_v5 = vld [vmem:[%s18913_s15 + $0x48] sm:$0xff] }
0x1858   :  { %13474 = vpow2.f32 %v10882_v1  ;;  %v8316_v1 = vld [vmem:[%s18911_s13 + $0x180] sm:$0xff] }
0x1862   :  { %v13475_v53 = vpop.eup %13474 }
0x1863   :  { %v7851_v61 = vadd.f32 1.0, %v13475_v53  ;;  %v8320_v53 = vld [vmem:[%s18911_s13 + $0x1a0] sm:$0xff] }
0x1865   :  { %13476 = vrcp.f32 %v7851_v61  ;;  %v12853_v61 = vpack.c.bf16 %v8320_v53, %v8316_v1  ;;  %v8282_v1 = vld [vmem:[%s18911_s13 + $0x70] sm:$0xff]  ;;  %v8287_v53 = vld [vmem:[%s18911_s13 + $0x98] sm:$0xff] }
0x1866   :  { %13478 = vtanh.f32 %v7855_v3  ;;  %v8325_v3 = vld [vmem:[%s18911_s13 + $0x1c8] sm:$0xff] }
0x186f   :  { %v13477_v55 = vpop.eup %13476 }
0x1870   :  { %v7859_v15 = vrot.slane %v13477_v55, 2  ;;  %v13479_v58 = vpop.eup %13478  ;;  %v7865_v8 = vrot.slane %v13477_v55, 4 }
0x1871   :  { %v7862_v33 = vmul.f32 %v13479_v58, %v13477_v55  ;;  %v8329_v55 = vld [vmem:[%s18911_s13 + $0x1e8] sm:$0xff]  ;;  %v8328_v58 = vld [vmem:[%s18911_s13 + $0x1e0] sm:$0xff] }
0x1872   :  { %v7861_v4 = vmul.f32 %v7859_v15, %v17648_v35  ;;  %v12855_v15 = vpack.c.bf16 %v8329_v55, %v8325_v3 }
0x1874   :  { %v7863_v49 = vadd.f32 %v7862_v33, %v7861_v4  ;;  %v12857_v4 = vpack.c.bf16 %v8328_v58, %v8324_v0  ;;  %v13294_v33 = vld [vmem:[#allocation2 + $0x24] ss:$8 sps:$4 sm:$0xcc]   ;;  %v8290_v0 = vld [vmem:[%s18911_s13 + $0xb0] sm:$0xff]  ;;  %v8295_v58 = vld [vmem:[%s18911_s13 + $0xd8] sm:$0xff] }
0x1876   :  { %13480 = vtanh.f32 %v7863_v49  ;;  %v17702_v50 = vsel %vm7869_vm13, %v7863_v49, %v17648_v35  ;;  %v8285_v35 = vld [vmem:[%s18911_s13 + $0x88] sm:$0xff]  ;;  %v13295_v49 = vld [vmem:[#allocation2 + $0x34] ss:$8 sps:$4 sm:$0xcc]  }
0x1877   :  { %v12835_v20 = vpack.c.bf16 %v8289_v39, %v8285_v35 }
0x1880   :  { %v13481_v11 = vpop.eup %13480 }
0x1881   :  { %v7867_v10 = vmul.f32 %v13481_v11, %v7865_v8  ;;  %v13296_v8 = vld [vmem:[#allocation2] ss:$8 sps:$4 sm:$0x33]   ;;  %v13297_v11 = vld [vmem:[#allocation2 + $0x10] ss:$8 sps:$4 sm:$0x33]  }
0x1882   :  { %v8123_v46 = vrot.slane %v13296_v8, %v14026_v17  ;;  %v8130_v52 = vrot.slane %v13297_v11, %v14026_v17  ;;  %v8294_v8 = vld [vmem:[%s18911_s13 + $0xd0] sm:$0xff] }
0x1883   :  { %v7871_v32 = vsel %vm7869_vm13, %v7867_v10, %v17651_v23  ;;  %v7872_v51 = vsel %vm7869_vm13, %v7867_v10, 0.0  ;;  %v8288_v23 = vld [vmem:[%s18911_s13 + $0xa0] sm:$0xff]  ;;  %v8101_v10 = vrot.slane %v13294_v33, %v14026_v17  ;;  %v8298_v11 = vld [vmem:[%s18911_s13 + $0xf0] sm:$0xff] }
0x1884   :  { %7873 = vst.msk [vmem:[#allocation3 + $0xc] sm:$0x3] %vm579_vm3, %v7872_v51  ;;  %8004 = vmatmul.mubr.f32.vlgmr.msra.gmra.mrb[58].mxu0 %v7871_v32  ;;  %8075 = vmatmul.mubr.f32.vlgmr.msra.gmra.mrb[58].mxu1 %v7871_v32  ;;  %v12837_v14 = vpack.c.bf16 %v8288_v23, %v8284_v56  ;;  %v8108_v32 = vrot.slane %v13295_v49, %v14026_v17 }
0x1885   :  { %7874 = vst.msk [vmem:[#allocation3 + $0x2] sm:$0x3] %vm581_vm4, %v7872_v51  ;;  %8418 = vmatprep.mubr.f32.mxu1 %v18923_v7  ;;  %10980 = vmatprep.mubr.msk.f32.mxu0 %vm8186_vm14, %v8184_v63  ;;  %v8131_v31 = vcombine.low %v8123_v46, %v8130_v52  ;;  %v8311_v46 = vld [vmem:[%s18911_s13 + $0x158] sm:$0xff] }
0x1886   :  { %12830 = vmatpush1.bf16.msra.mxu1 %v12829_v25  ;;  %v8109_v47 = vcombine.high %v8101_v10, %v8108_v32  ;;  %v8303_v10 = vld [vmem:[%s18911_s13 + $0x118] sm:$0xff] }
0x1887   :  { %12832 = vmatprep.subr.bf16.mxu1 %v12831_v2  ;;  %v8307_v32 = vld [vmem:[%s18911_s13 + $0x138] sm:$0xff] }
0x1888   :  { %v8315_v52 = vld [vmem:[%s18911_s13 + $0x178] sm:$0xff] }
0x188a   :  { %12834 = vmatpush1.bf16.msra.mxu1 %v12833_v22  ;;  %v8133_v22 = vsel %vm63_vm1, %v8109_v47, %v8131_v31  ;;  %vm8178_vm1 = vcmp.gt.f32.partialorder %v8177_v29, 0.5  ;;  %v8310_v47 = vld [vmem:[%s18911_s13 + $0x150] sm:$0xff]  ;;  %v8323_v31 = vld [vmem:[%s18911_s13 + $0x1b8] sm:$0xff]  ;;  %v8534_v29 = vld [vmem:[%s18913_s15 + $0x8] sm:$0xff] }
0x188b   :  { %12836 = vmatprep.subr.bf16.mxu1 %v12835_v20 }
0x188e   :  { %12838 = vmatpush1.bf16.msra.mxu1 %v12837_v14 }
0x188f   :  { %12840 = vmatprep.subr.bf16.mxu1 %v12839_v34 }
0x1892   :  { %12842 = vmatpush1.bf16.msra.mxu1 %v12841_v42 }
0x1893   :  { %12844 = vmatprep.subr.bf16.mxu1 %v12843_v9  ;;  %v8275_v9 = vld [vmem:[%s18911_s13 + $0x38] sm:$0xff] }
0x1896   :  { %12846 = vmatpush1.bf16.msra.mxu1 %v12845_v60 }
0x1897   :  { %12848 = vmatprep.subr.bf16.mxu1 %v12847_v45  ;;  %v8274_v45 = vld [vmem:[%s18911_s13 + $0x30] sm:$0xff] }
0x1898   :  { %v12861_v12 = vpack.c.bf16 %v8274_v45, %v8270_v24  ;;  %v8540_v24 = vld [vmem:[%s18913_s15 + $0x38] sm:$0xff] }
0x189a   :  { %12850 = vmatpush1.bf16.msra.mxu1 %v12849_v57  ;;  %v8185_v57 = vld [vmem:[%s18910_s12 + $0x8] sm:$0xff] }
0x189b   :  { %12852 = vmatprep.subr.bf16.mxu1 %v12851_v28  ;;  %v8278_v28 = vld [vmem:[%s18911_s13 + $0x50] sm:$0xff] }
0x189c   :  { %v12865_v3 = vpack.c.bf16 %v8282_v1, %v8278_v28  ;;  %v8545_v1 = vld [vmem:[%s18913_s15 + $0x60] sm:$0xff] }
0x189e   :  { %12854 = vmatpush1.bf16.msra.mxu1 %v12853_v61  ;;  %v8291_v61 = vld [vmem:[%s18911_s13 + $0xb8] sm:$0xff] }
0x189f   :  { %12856 = vmatprep.subr.bf16.mxu1 %v12855_v15  ;;  %v12867_v55 = vpack.c.bf16 %v8291_v61, %v8287_v53  ;;  %v8286_v15 = vld [vmem:[%s18911_s13 + $0x90] sm:$0xff]  ;;  %v8546_v53 = vld [vmem:[%s18913_s15 + $0x68] sm:$0xff] }
0x18a0   :  { %v12869_v33 = vpack.c.bf16 %v8290_v0, %v8286_v15  ;;  %v17992_v61 = vpack.c.bf16 %v8546_v53, %v8545_v1  ;;  %v8700_v0 = vld [vmem:[%s18915_s17 + $0x18] sm:$0xff]  ;;  %v8763_v1 = vld [vmem:[%s18915_s17 + $0x210] sm:$0xff] }
0x18a1   :  { %v8771_v53 = vld [vmem:[%s18915_s17 + $0x250] sm:$0xff] }
0x18a2   :  { %12858 = vmatpush1.bf16.msra.mxu1 %v12857_v4  ;;  %v8299_v4 = vld [vmem:[%s18911_s13 + $0xf8] sm:$0xff] }
0x18a3   :  { %v12871_v49 = vpack.c.bf16 %v8299_v4, %v8295_v58  ;;  %v8708_v58 = vld [vmem:[%s18915_s17 + $0x58] sm:$0xff] }
0x18a4   :  { %v18014_v4 = vpack.c.bf16 %v8708_v58, %v8700_v0  ;;  %v18129_v0 = vpack.c.bf16 %v8771_v53, %v8763_v1  ;;  %v8735_v1 = vld [vmem:[%s18915_s17 + $0x130] sm:$0xff] }
0x18a5   :  { %v8743_v53 = vld [vmem:[%s18915_s17 + $0x170] sm:$0xff] }
0x1957   :  { %v8005_v51 = vpop.f32.mrb[58].mxu0  ;;  %v8076_v63 = vpop.f32.mrb[58].mxu1 }
0x1958   :  { %v8007_v43 = vpop.f32.mrb[59].mxu0  ;;  %v8078_v36 = vpop.f32.mrb[59].mxu1 }
0x1959   :  { %v8138_v59 = vcombine.low %v8005_v51, %v8007_v43  ;;  %v8139_v25 = vcombine.low %v8076_v63, %v8078_v36  ;;  %v12873_v51 = vpack.c.bf16 %v8298_v11, %v8294_v8  ;;  %v12875_v63 = vpack.c.bf16 %v8307_v32, %v8303_v10  ;;  %v8302_v43 = vld [vmem:[%s18911_s13 + $0x110] sm:$0xff] }
0x195a   :  { %v8306_v36 = vld [vmem:[%s18911_s13 + $0x130] sm:$0xff] }
0x195b   :  { %v8146_v6 = vrot.slane %v8138_v59, %v14026_v17  ;;  %v8153_v2 = vrot.slane %v8139_v25, %v14026_v17  ;;  %v12877_v59 = vpack.c.bf16 %v8306_v36, %v8302_v43  ;;  %v12879_v25 = vpack.c.bf16 %v8315_v52, %v8311_v46  ;;  %v8699_v32 = vld [vmem:[%s18915_s17 + $0x10] sm:$0xff] }
0x195d   :  { %v8154_v30 = vcombine.low %v8146_v6, %v8153_v2  ;;  %v8314_v6 = vld [vmem:[%s18911_s13 + $0x170] sm:$0xff]  ;;  %v8319_v2 = vld [vmem:[%s18911_s13 + $0x198] sm:$0xff] }
0x195f   :  { %v8156_v35 = vadd.f32 %v8154_v30, %v8133_v22  ;;  %v12881_v30 = vpack.c.bf16 %v8314_v6, %v8310_v47  ;;  %v12883_v22 = vpack.c.bf16 %v8323_v31, %v8319_v2  ;;  %v8715_v2 = vld [vmem:[%s18915_s17 + $0x90] sm:$0xff] }
0x1960   :  { %v8723_v31 = vld [vmem:[%s18915_s17 + $0xd0] sm:$0xff] }
0x1961   :  { %v10883_v39 = vmul.f32 -1.442695, %v8156_v35  ;;  %v8164_v23 = vrot.slane %v8156_v35, 6  ;;  %v8318_v35 = vld [vmem:[%s18911_s13 + $0x190] sm:$0xff] }
0x1963   :  { %13482 = vpow2.f32 %v10883_v39  ;;  %v8322_v39 = vld [vmem:[%s18911_s13 + $0x1b0] sm:$0xff] }
0x196d   :  { %v13483_v20 = vpop.eup %13482 }
0x196e   :  { %v8160_v56 = vadd.f32 1.0, %v13483_v20  ;;  %v8327_v20 = vld [vmem:[%s18911_s13 + $0x1d8] sm:$0xff] }
0x1970   :  { %13484 = vrcp.f32 %v8160_v56  ;;  %v8331_v56 = vld [vmem:[%s18911_s13 + $0x1f8] sm:$0xff] }
0x1971   :  { %13486 = vtanh.f32 %v8164_v23  ;;  %v12885_v23 = vpack.c.bf16 %v8322_v39, %v8318_v35 }
0x197a   :  { %v13485_v14 = vpop.eup %13484 }
0x197b   :  { %v8168_v44 = vrot.slane %v13485_v14, 2  ;;  %v13487_v37 = vpop.eup %13486  ;;  %v8174_v48 = vrot.slane %v13485_v14, 4 }
0x197c   :  { %v8171_v27 = vmul.f32 %v13487_v37, %v13485_v14  ;;  %v12887_v14 = vpack.c.bf16 %v8331_v56, %v8327_v20  ;;  %v8330_v37 = vld [vmem:[%s18911_s13 + $0x1f0] sm:$0xff]  ;;  %v8740_v20 = vld [vmem:[%s18915_s17 + $0x158] sm:$0xff] }
0x197d   :  { %v8170_v34 = vmul.f32 %v8168_v44, %v17702_v50  ;;  %v8271_v50 = vld [vmem:[%s18911_s13 + $0x18] sm:$0xff]  ;;  %v8326_v44 = vld [vmem:[%s18911_s13 + $0x1d0] sm:$0xff] }
0x197e   :  { %v12859_v62 = vpack.c.bf16 %v8275_v9, %v8271_v50  ;;  %v8536_v50 = vld [vmem:[%s18913_s15 + $0x18] sm:$0xff] }
0x197f   :  { %v8172_v17 = vadd.f32 %v8171_v27, %v8170_v34  ;;  %v12889_v34 = vpack.c.bf16 %v8330_v37, %v8326_v44  ;;  %v18921_v27 = vmov 0.0|0.0  }
0x1980   :  { %12891 = vmatprep.subr.bf16.mxu1 %v18921_v27 }
0x1981   :  { %13488 = vtanh.f32 %v8172_v17  ;;  %v8533_v17 = vld [vmem:[%s18913_s15] sm:$0xff] }
0x198b   :  { %v13489_v42 = vpop.eup %13488 }
0x198c   :  { %v8176_v26 = vmul.f32 %v13489_v42, %v8174_v48  ;;  %v17931_v42 = vpack.c.bf16 %v8534_v29, %v8533_v17  ;;  %v18074_v17 = vpack.c.bf16 %v8723_v31, %v8715_v2  ;;  %v8819_v2 = vld [vmem:[%s18915_s17 + $0x3d0] sm:$0xff] }
0x198e   :  { %v8179_v41 = vsel %vm8178_vm1, %v8176_v26, 0.0 }
0x198f   :  { %8180 = vst.msk [vmem:[#allocation3 + $0xe] sm:$0x3] %vm579_vm3, %v8179_v41  ;;  %vm13517_vm3 = vmmov 0  }
0x1990   :  { %8181 = vst.msk [vmem:[#allocation3] sm:$0x3] %vm581_vm4, %v8179_v41  ;;  %v8535_v41 = vld [vmem:[%s18913_s15 + $0x10] sm:$0xff] }
0x1991   :  { %v17942_v9 = vpack.c.bf16 %v8536_v50, %v8535_v41  ;;  %v8748_v41 = vld [vmem:[%s18915_s17 + $0x198] sm:$0xff] }
0x1992   :  { %v8756_v50 = vld [vmem:[%s18915_s17 + $0x1d8] sm:$0xff] }
0x1996   :  { %v8183_v54 = vld [vmem:[#allocation3 + $0x8] sm:$0xff] }
0x1997   :  { %v8182_v40 = vld [vmem:[#allocation3] sm:$0xff] }
0x1998   :  { %v12823_v60 = vpack.c.bf16 %v8183_v54, %v8182_v40  ;;  %v8537_v40 = vld [vmem:[%s18913_s15 + $0x20] sm:$0xff]  ;;  %v8538_v54 = vld [vmem:[%s18913_s15 + $0x28] sm:$0xff] }
0x199a   :  { %12824 = vmatprep.subr.bf16.mxu0 %v12823_v60 }
0x199b   :  { %12826 = vmatpush3.bf16.msra.mxu0 %v12823_v60  ;;  %v17952_v60 = vpack.c.bf16 %v8538_v54, %v8537_v40  ;;  %v18096_v54 = vpack.c.bf16 %v8756_v50, %v8748_v41  ;;  %v8727_v41 = vld [vmem:[%s18915_s17 + $0xf0] sm:$0xff] }
0x199c   :  { %12860 = vmatprep.subr.bf16.mxu0 %v12859_v62  ;;  %v8539_v62 = vld [vmem:[%s18913_s15 + $0x30] sm:$0xff] }
0x199d   :  { %v17962_v45 = vpack.c.bf16 %v8540_v24, %v8539_v62  ;;  %v8747_v62 = vld [vmem:[%s18915_s17 + $0x190] sm:$0xff] }
0x199e   :  { %10981 = vmatmul.mubr.msk.f32.vlgmr.msra.gmra.mrb[60].mxu0 %vm8186_vm14, %v8185_v57  ;;  %v17972_v57 = vpack.c.bf16 %v8542_v5, %v8541_v16  ;;  %v8755_v24 = vld [vmem:[%s18915_s17 + $0x1d0] sm:$0xff]  ;;  %v8764_v16 = vld [vmem:[%s18915_s17 + $0x218] sm:$0xff] }
0x199f   :  { %12862 = vmatpush1.bf16.msra.mxu0 %v12861_v12  ;;  %8495 = vmatprep.mubr.f32.mxu0 %v18923_v7  ;;  %v8543_v12 = vld [vmem:[%s18913_s15 + $0x50] sm:$0xff]  ;;  %v8772_v5 = vld [vmem:[%s18915_s17 + $0x258] sm:$0xff] }
0x19a0   :  { %12864 = vmatprep.subr.bf16.mxu0 %v12863_v38  ;;  %v8544_v38 = vld [vmem:[%s18913_s15 + $0x58] sm:$0xff] }
0x19a1   :  { %v17982_v28 = vpack.c.bf16 %v8544_v38, %v8543_v12  ;;  %v18111_v12 = vpack.c.bf16 %v8755_v24, %v8747_v62  ;;  %v18114_v38 = vpack.c.bf16 %v8772_v5, %v8764_v16  ;;  %v8736_v62 = vld [vmem:[%s18915_s17 + $0x138] sm:$0xff] }
0x19a2   :  { %v8744_v24 = vld [vmem:[%s18915_s17 + $0x178] sm:$0xff] }
0x19a3   :  { %12866 = vmatpush1.bf16.msra.mxu0 %v12865_v3  ;;  %v8547_v3 = vld [vmem:[%s18913_s15 + $0x70] sm:$0xff]  ;;  %v18228_v5 = vpack.c.bf16 %v8744_v24, %v8736_v62 }
0x19a4   :  { %12868 = vmatprep.subr.bf16.mxu0 %v12867_v55  ;;  %v8548_v55 = vld [vmem:[%s18913_s15 + $0x78] sm:$0xff]  ;;  %v8799_v62 = vld [vmem:[%s18915_s17 + $0x330] sm:$0xff]  ;;  %s13490_s15 = scalar_lea.vmem %s10836_s2, 256 }
0x19a5   :  { %v18003_v15 = vpack.c.bf16 %v8548_v55, %v8547_v3  ;;  %v8780_v3 = vld [vmem:[%s18915_s17 + $0x298] sm:$0xff]  ;;  %v8807_v24 = vld [vmem:[%s18915_s17 + $0x370] sm:$0xff]  ;;  %p13491_p0 = scmp.ne.s32.totalorder %s10836_s2, %s13490_s15  ;;  %p13496_p2 = scmp.lt.s32.totalorder %s13490_s15, %s13490_s15 }
0x19a6   :  { %v8788_v55 = vld [vmem:[%s18915_s17 + $0x2d8] sm:$0xff] }
0x19a7   :  { %12870 = vmatpush1.bf16.msra.mxu0 %v12869_v33  ;;  %v8332_v33 = vld [vmem:[%s18912_s14] sm:$0xf]  ;;  %v18132_v58 = vpack.c.bf16 %v8788_v55, %v8780_v3  ;;  %v8752_v3 = vld [vmem:[%s18915_s17 + $0x1b8] sm:$0xff]  ;;  %p13497_p3 = por %p13496_p2, %p13495_p1 }
0x19a8   :  { %12872 = vmatprep.subr.bf16.mxu0 %v12871_v49  ;;  %v8337_v49 = vrot.slane %v8332_v33, %v14011_v13  ;;  %v8341_v8 = vrot.slane %v8332_v33, %v14018_v19  ;;  %v8716_v13 = vld [vmem:[%s18915_s17 + $0x98] sm:$0xff] }
0x19a9   :  { %v8724_v19 = vld [vmem:[%s18915_s17 + $0xd8] sm:$0xff]  ;;  %p13498_p4 = pnand %p13497_p3, %p13491_p0 }
0x19aa   :  { %v18045_v6 = vpack.c.bf16 %v8724_v19, %v8716_v13  ;;  %v8812_v13 = vld [vmem:[%s18915_s17 + $0x398] sm:$0xff] }
0x19ab   :  { %12874 = vmatpush1.bf16.msra.mxu0 %v12873_v51  ;;  %v8707_v51 = vld [vmem:[%s18915_s17 + $0x50] sm:$0xff]  ;;  %v8820_v19 = vld [vmem:[%s18915_s17 + $0x3d8] sm:$0xff] }
0x19ac   :  { %12876 = vmatprep.subr.bf16.mxu0 %v12875_v63  ;;  %v8760_v55 = vld [vmem:[%s18915_s17 + $0x1f8] sm:$0xff] }
0x19af   :  { %12878 = vmatpush1.bf16.msra.mxu0 %v12877_v59  ;;  %v18040_v59 = vpack.c.bf16 %v8707_v51, %v8699_v32 }
0x19b0   :  { %12880 = vmatprep.subr.bf16.mxu0 %v12879_v25  ;;  %v18043_v25 = vrot.slane %v8332_v33, %v14016_v18  ;;  %v8732_v18 = vld [vmem:[%s18915_s17 + $0x118] sm:$0xff] }
0x19b1   :  { %v18077_v29 = vpack.c.bf16 %v8740_v20, %v8732_v18 }
0x19b3   :  { %12882 = vmatpush1.bf16.msra.mxu0 %v12881_v30 }
0x19b4   :  { %12884 = vmatprep.subr.bf16.mxu0 %v12883_v22  ;;  %v18054_v22 = vrot.slane %v8332_v33, %v14020_v21  ;;  %v8779_v33 = vld [vmem:[%s18915_s17 + $0x290] sm:$0xff] }
0x19b7   :  { %12886 = vmatpush1.bf16.msra.mxu0 %v12885_v23 }
0x19b8   :  { %12888 = vmatprep.subr.bf16.mxu0 %v12887_v14 }
0x19bb   :  { %12890 = vmatpush1.bf16.msra.mxu0 %v12889_v34 }
0x19bc   :  { %11018 = vmatprep.subr.mxu0 %v18923_v7 }
0x1a71   :  { %v10982_v48 = vpop.f32.mrb[60].mxu0 }
0x1a72   :  { %v8259_v26 = vpop.f32.mrb[61].mxu0 }
0x1a73   :  { %8419 = vmatmul.mubr.f32.vlgmr.msra.gmra.mrb[60].mxu1 %v8259_v26  ;;  %8496 = vmatmul.mubr.f32.vlgmr.msra.gmra.mrb[62].mxu0 %v8259_v26  ;;  %v8739_v26 = vld [vmem:[%s18915_s17 + $0x150] sm:$0xff] }
0x1a74   :  { %8424 = vmatprep.mubr.f32.mxu1 %v18923_v7  ;;  %8501 = vmatprep.mubr.f32.mxu0 %v18923_v7 }
0x1a75   :  { %12893 = vmatpush3.bf16.msra.mxu1 %v17931_v42 }
0x1a76   :  { %12894 = vmatprep.subr.bf16.mxu1 %v18921_v27 }
0x1a77   :  { %8425 = vmatmul.mubr.f32.gmra.mrb[62].mxu1 %v10982_v48  ;;  %8502 = vmatmul.mubr.f32.gmra.mrb[64].mxu0 %v10982_v48  ;;  %v8731_v48 = vld [vmem:[%s18915_s17 + $0x110] sm:$0xff] }
0x1a78   :  { %11015 = vmatprep.mubr.msk.f32.mxu1 %vm13517_vm3, %v18923_v7  ;;  %11020 = vmatprep.mubr.msk.f32.mxu0 %vm13517_vm3, %v18923_v7  ;;  %v18093_v40 = vpack.c.bf16 %v8739_v26, %v8731_v48  ;;  %v8719_v26 = vld [vmem:[%s18915_s17 + $0xb0] sm:$0xff] }
0x1a79   :  { %12896 = vmatpush3.bf16.msra.mxu1 %v17942_v9  ;;  %v18224_v16 = vpack.c.bf16 %v8727_v41, %v8719_v26 }
0x1a7a   :  { %12897 = vmatprep.subr.bf16.mxu1 %v18921_v27 }
0x1a7d   :  { %12899 = vmatpush3.bf16.msra.mxu1 %v17952_v60 }
0x1a7e   :  { %12900 = vmatprep.subr.bf16.mxu1 %v18921_v27 }
0x1a81   :  { %12902 = vmatpush3.bf16.msra.mxu1 %v17962_v45 }
0x1a82   :  { %12903 = vmatprep.subr.bf16.mxu1 %v18921_v27 }
0x1a85   :  { %12905 = vmatpush3.bf16.msra.mxu1 %v17972_v57 }
0x1a86   :  { %12906 = vmatprep.subr.bf16.mxu1 %v18921_v27 }
0x1a89   :  { %12908 = vmatpush3.bf16.msra.mxu1 %v17982_v28 }
0x1a8a   :  { %12909 = vmatprep.subr.bf16.mxu1 %v18921_v27 }
0x1a8d   :  { %12911 = vmatpush3.bf16.msra.mxu1 %v17992_v61 }
0x1a8e   :  { %12912 = vmatprep.subr.bf16.mxu1 %v18921_v27 }
0x1a91   :  { %12914 = vmatpush3.bf16.msra.mxu1 %v18003_v15 }
0x1a92   :  { %12948 = vmatprep.subr.bf16.mxu1 %v18014_v4 }
0x1b46   :  { %v8420_v11 = vpop.f32.mrb[60].mxu1  ;;  %v18024_v10 = vpop.f32.mrb[62].mxu0 }
0x1b47   :  { %v8421_v63 = vadd.f32 %v8420_v11, %v8337_v49  ;;  %v8422_v43 = vpop.f32.mrb[61].mxu1  ;;  %v18032_v36 = vpop.f32.mrb[63].mxu0  ;;  %v8804_v11 = vld [vmem:[%s18915_s17 + $0x358] sm:$0xff]  ;;  %v8498_v31 = vadd.f32 %v18024_v10, %v18043_v25  ;;  %v8703_v10 = vld [vmem:[%s18915_s17 + $0x30] sm:$0xff] }
0x1b48   :  { %v8423_v46 = vadd.f32 %v8422_v43, %v8341_v8  ;;  %v8803_v43 = vld [vmem:[%s18915_s17 + $0x350] sm:$0xff] }
0x1b49   :  { %vm8508_vm4 = vcmp.gt.f32.partialorder %v8421_v63, 0.0  ;;  %v8516_v52 = vmul.f32 0.1, %v8421_v63  ;;  %v8518_v20 = vmul.f32 0.1, %v8498_v31  ;;  %vm8510_vm0 = vcmp.gt.f32.partialorder %v8498_v31, 0.0 }
0x1b4a   :  { %vm8509_vm15 = vcmp.gt.f32.partialorder %v8423_v46, 0.0  ;;  %v8517_v47 = vmul.f32 0.1, %v8423_v46  ;;  %v8426_v35 = vpop.f32.mrb[62].mxu1  ;;  %v8503_v39 = vpop.f32.mrb[64].mxu0 }
0x1b4b   :  { %v8524_v30 = vsel %vm8508_vm4, %v8421_v63, %v8516_v52  ;;  %v18062_v56 = vadd.f32 %v8426_v35, %v8337_v49  ;;  %v18065_v23 = vadd.f32 %v8503_v39, %v18043_v25  ;;  %v8428_v14 = vpop.f32.mrb[63].mxu1  ;;  %v8505_v44 = vpop.f32.mrb[65].mxu0  ;;  %v8787_v49 = vld [vmem:[%s18915_s17 + $0x2d0] sm:$0xff]  ;;  %v18168_v52 = vpack.c.bf16 %v8820_v19, %v8812_v13  ;;  %v8712_v35 = vld [vmem:[%s18915_s17 + $0x78] sm:$0xff] }
0x1b4c   :  { %11016 = vmatmul.mubr.f32.vlgmr.msra.gmra.mrb[64].mxu1 %v8524_v30  ;;  %v8525_v21 = vsel %vm8509_vm15, %v8423_v46, %v8517_v47  ;;  %v18068_v37 = vadd.f32 %v8428_v14, %v8341_v8  ;;  %v18071_v34 = vadd.f32 %v8505_v44, %v18054_v22  ;;  %v8796_v8 = vld [vmem:[%s18915_s17 + $0x318] sm:$0xff]  ;;  %v18147_v32 = vpack.c.bf16 %v8787_v49, %v8779_v33  ;;  %v8795_v63 = vld [vmem:[%s18915_s17 + $0x310] sm:$0xff] }
0x1b4d   :  { %12950 = vmatpush1.bf16.msra.mxu1 %v18040_v59  ;;  %11019 = vmatpush3.xpose.msra.mxu0 %v8525_v21  ;;  %v18150_v51 = vpack.c.bf16 %v8804_v11, %v8796_v8  ;;  %v18165_v46 = vpack.c.bf16 %v8803_v43, %v8795_v63  ;;  %v8811_v47 = vld [vmem:[%s18915_s17 + $0x390] sm:$0xff]  ;;  %v8704_v30 = vld [vmem:[%s18915_s17 + $0x38] sm:$0xff]  ;;  %v18214_v50 = vsel %vm8510_vm0, %v8498_v31, %v8518_v20  ;;  %vm8512_vm5 = vcmp.gt.f32.partialorder %v18062_v56, 0.0 }
0x1b4e   :  { %12952 = vmatprep.subr.bf16.mxu1 %v18045_v6  ;;  %8960 = vmatprep.mubr.f32.mxu1 %v18923_v7  ;;  %v18185_v39 = vpack.c.bf16 %v8819_v2, %v8811_v47  ;;  %v18188_v18 = vpack.c.bf16 %v8712_v35, %v8704_v30  ;;  %v8711_v25 = vld [vmem:[%s18915_s17 + $0x70] sm:$0xff]  ;;  %v8720_v14 = vld [vmem:[%s18915_s17 + $0xb8] sm:$0xff]  ;;  %v18243_v33 = vpack.c.bf16 %v8743_v53, %v8735_v1  ;;  %vm8514_vm6 = vcmp.gt.f32.partialorder %v18065_v23, 0.0 }
0x1b4f   :  { %v8728_v44 = vld [vmem:[%s18915_s17 + $0xf8] sm:$0xff]  ;;  %v18203_v21 = vpack.c.bf16 %v8711_v25, %v8703_v10  ;;  %v18246_v49 = vpack.c.bf16 %v8760_v55, %v8752_v3  ;;  %v8751_v8 = vld [vmem:[%s18915_s17 + $0x1b0] sm:$0xff]  ;;  %v18315_v3 = vpack.c.bf16 %v8807_v24, %v8799_v62  ;;  %vm8515_vm7 = vcmp.gt.f32.partialorder %v18071_v34, 0.0 }
0x1b50   :  { %v18206_v48 = vpack.c.bf16 %v8728_v44, %v8720_v14  ;;  %v8759_v11 = vld [vmem:[%s18915_s17 + $0x1f0] sm:$0xff]  ;;  %v8768_v63 = vld [vmem:[%s18915_s17 + $0x238] sm:$0xff]  ;;  %vm8513_vm9 = vcmp.gt.f32.partialorder %v18068_v37, 0.0 }
0x1b51   :  { %12954 = vmatpush1.bf16.msra.mxu1 %v18074_v17  ;;  %v8776_v43 = vld [vmem:[%s18915_s17 + $0x278] sm:$0xff]  ;;  %v18261_v13 = vpack.c.bf16 %v8759_v11, %v8751_v8  ;;  %v8767_v47 = vld [vmem:[%s18915_s17 + $0x230] sm:$0xff] }
0x1b52   :  { %12956 = vmatprep.subr.bf16.mxu1 %v18077_v29  ;;  %v18264_v19 = vpack.c.bf16 %v8776_v43, %v8768_v63  ;;  %v8775_v2 = vld [vmem:[%s18915_s17 + $0x270] sm:$0xff]  ;;  %v8784_v31 = vld [vmem:[%s18915_s17 + $0x2b8] sm:$0xff]  ;;  %v8500_v43 = vadd.f32 %v18032_v36, %v18054_v22  ;;  %v8698_v36 = vld [vmem:[%s18915_s17 + $0x8] sm:$0xff] }
0x1b53   :  { %v8792_v30 = vld [vmem:[%s18915_s17 + $0x2f8] sm:$0xff]  ;;  %v18279_v35 = vpack.c.bf16 %v8775_v2, %v8767_v47  ;;  %v8783_v25 = vld [vmem:[%s18915_s17 + $0x2b0] sm:$0xff]  ;;  %v8706_v22 = vld [vmem:[%s18915_s17 + $0x48] sm:$0xff] }
0x1b54   :  { %v18282_v10 = vpack.c.bf16 %v8792_v30, %v8784_v31  ;;  %v8791_v20 = vld [vmem:[%s18915_s17 + $0x2f0] sm:$0xff]  ;;  %v8800_v14 = vld [vmem:[%s18915_s17 + $0x338] sm:$0xff]  ;;  %v8519_v47 = vmul.f32 0.1, %v8500_v43  ;;  %vm8511_vm2 = vcmp.gt.f32.partialorder %v8500_v43, 0.0  ;;  %v18347_v31 = vpack.c.bf16 %v8706_v22, %v8698_v36  ;;  %v8697_v30 = vld [vmem:[%s18915_s17] sm:$0xff] }
0x1b55   :  { %12958 = vmatpush1.bf16.msra.mxu1 %v18093_v40  ;;  %v8808_v44 = vld [vmem:[%s18915_s17 + $0x378] sm:$0xff]  ;;  %v18297_v26 = vpack.c.bf16 %v8791_v20, %v8783_v25  ;;  %v8815_v8 = vld [vmem:[%s18915_s17 + $0x3b0] sm:$0xff]  ;;  %v8705_v25 = vld [vmem:[%s18915_s17 + $0x40] sm:$0xff] }
0x1b56   :  { %12960 = vmatprep.subr.bf16.mxu1 %v18096_v54  ;;  %v18300_v41 = vpack.c.bf16 %v8808_v44, %v8800_v14  ;;  %v8816_v1 = vld [vmem:[%s18915_s17 + $0x3b8] sm:$0xff]  ;;  %v8823_v11 = vld [vmem:[%s18915_s17 + $0x3f0] sm:$0xff]  ;;  %v18337_v2 = vsel %vm8511_vm2, %v8500_v43, %v8519_v47  ;;  %12916 = vmatprep.subr.bf16.mxu0 %v18347_v31  ;;  %v18359_v20 = vld [vmem:[%s18914_s16] ss:$0 sm:$0xff]  ;;  %v18367_v24 = vpack.c.bf16 %v8705_v25, %v8697_v30 }
0x1b57   :  { %v8824_v53 = vld [vmem:[%s18915_s17 + $0x3f8] sm:$0xff]  ;;  %v18327_v63 = vpack.c.bf16 %v8823_v11, %v8815_v8  ;;  %v8714_v14 = vld [vmem:[%s18915_s17 + $0x88] sm:$0xff]  ;;  %v8713_v11 = vld [vmem:[%s18915_s17 + $0x80] sm:$0xff] }
0x1b58   :  { %v18318_v55 = vpack.c.bf16 %v8824_v53, %v8816_v1  ;;  %v8722_v44 = vld [vmem:[%s18915_s17 + $0xc8] sm:$0xff]  ;;  %v8721_v43 = vld [vmem:[%s18915_s17 + $0xc0] sm:$0xff] }
0x1b59   :  { %12962 = vmatpush1.bf16.msra.mxu1 %v18111_v12  ;;  %v18370_v8 = vpack.c.bf16 %v8722_v44, %v8714_v14  ;;  %v8730_v47 = vld [vmem:[%s18915_s17 + $0x108] sm:$0xff]  ;;  %v18385_v22 = vpack.c.bf16 %v8721_v43, %v8713_v11  ;;  %v8729_v25 = vld [vmem:[%s18915_s17 + $0x100] sm:$0xff] }
0x1b5a   :  { %12964 = vmatprep.subr.bf16.mxu1 %v18114_v38  ;;  %v8738_v36 = vld [vmem:[%s18915_s17 + $0x148] sm:$0xff]  ;;  %v8737_v14 = vld [vmem:[%s18915_s17 + $0x140] sm:$0xff] }
0x1b5b   :  { %18957 = vst [vmem:[#allocation7_spill] sm:$0xff] %v18385_v22  ;;  %v18389_v30 = vpack.c.bf16 %v8738_v36, %v8730_v47  ;;  %v8746_v44 = vld [vmem:[%s18915_s17 + $0x188] sm:$0xff]  ;;  %v8745_v11 = vld [vmem:[%s18915_s17 + $0x180] sm:$0xff] }
0x1b5c   :  { %v8753_v43 = vld [vmem:[%s18915_s17 + $0x1c0] sm:$0xff]  ;;  %v8762_v47 = vld [vmem:[%s18915_s17 + $0x208] sm:$0xff] }
0x1b5d   :  { %12966 = vmatpush1.bf16.msra.mxu1 %v18129_v0  ;;  %18958 = vst [vmem:[#allocation8_spill] sm:$0xff] %v18389_v30  ;;  %v8770_v36 = vld [vmem:[%s18915_s17 + $0x248] sm:$0xff] }
0x1b5e   :  { %12968 = vmatprep.subr.bf16.mxu1 %v18132_v58 }
0x1b61   :  { %12970 = vmatpush1.bf16.msra.mxu1 %v18147_v32 }
0x1b62   :  { %12972 = vmatprep.subr.bf16.mxu1 %v18150_v51 }
0x1b65   :  { %12974 = vmatpush1.bf16.msra.mxu1 %v18165_v46 }
0x1b66   :  { %12976 = vmatprep.subr.bf16.mxu1 %v18168_v52 }
0x1b69   :  { %12978 = vmatpush1.bf16.msra.mxu1 %v18185_v39 }
0x1b6a   :  { %13012 = vmatprep.subr.bf16.mxu1 %v18188_v18 }
0x1b6c   :  { %8961 = vmatmul.mubr.f32.vlgmr.msra.gmra.mrb[66].mxu1 %v18214_v50 }
0x1b6d   :  { %13014 = vmatpush1.bf16.msra.mxu1 %v18203_v21  ;;  %9102 = vmatprep.mubr.f32.mxu1 %v18923_v7 }
0x1b6e   :  { %13016 = vmatprep.subr.bf16.mxu1 %v18206_v48 }
0x1b71   :  { %13018 = vmatpush1.bf16.msra.mxu1 %v18224_v16 }
0x1b72   :  { %13020 = vmatprep.subr.bf16.mxu1 %v18228_v5 }
0x1b75   :  { %13022 = vmatpush1.bf16.msra.mxu1 %v18243_v33 }
0x1b76   :  { %13024 = vmatprep.subr.bf16.mxu1 %v18246_v49 }
0x1b79   :  { %13026 = vmatpush1.bf16.msra.mxu1 %v18261_v13 }
0x1b7a   :  { %13028 = vmatprep.subr.bf16.mxu1 %v18264_v19 }
0x1b7d   :  { %13030 = vmatpush1.bf16.msra.mxu1 %v18279_v35 }
0x1b7e   :  { %13032 = vmatprep.subr.bf16.mxu1 %v18282_v10 }
0x1b81   :  { %13034 = vmatpush1.bf16.msra.mxu1 %v18297_v26 }
0x1b82   :  { %13036 = vmatprep.subr.bf16.mxu1 %v18300_v41 }
0x1b85   :  { %13038 = vmatpush1.bf16.msra.mxu1 %v18315_v3 }
0x1b86   :  { %13040 = vmatprep.subr.bf16.mxu1 %v18318_v55 }
0x1b89   :  { %13042 = vmatpush1.bf16.msra.mxu1 %v18327_v63 }
0x1b8a   :  { %11053 = vmatprep.subr.mxu1 %v18923_v7 }
0x1b8c   :  { %9103 = vmatmul.mubr.f32.vlgmr.msra.gmra.mrb[68].mxu1 %v18214_v50 }
0x1b8d   :  { %11055 = vmatprep.mubr.msk.f32.mxu1 %vm13517_vm3, %v18923_v7 }
0x1b92   :  { %11054 = vmatpush3.xpose.msra.mxu1 %v18337_v2 }
0x1b93   :  { %13043 = vmatprep.subr.bf16.mxu1 %v18921_v27  ;;  %v8778_v27 = vld [vmem:[%s18915_s17 + $0x288] sm:$0xff] }
0x1c1f   :  { %v8621_v62 = vpop.f32.mrb[64].mxu1 }
0x1c20   :  { %v8622_v1 = vadd.f32 %v18359_v20, %v8621_v62  ;;  %v11017_v53 = vpop.f32.mrb[65].mxu1  ;;  %v8754_v62 = vld [vmem:[%s18915_s17 + $0x1c8] sm:$0xff] }
0x1c21   :  { %v18407_v53 = vpack.c.bf16 %v8754_v62, %v8746_v44  ;;  %v8761_v44 = vld [vmem:[%s18915_s17 + $0x200] sm:$0xff] }
0x1c22   :  { %11021 = vmatmul.mubr.f32.vlgmr.msra.gmra.mrb[66].mxu0 %v8622_v1  ;;  %v18404_v1 = vpack.c.bf16 %v8737_v14, %v8729_v25  ;;  %v18422_v25 = vpack.c.bf16 %v8753_v43, %v8745_v11  ;;  %v18425_v14 = vpack.c.bf16 %v8770_v36, %v8762_v47  ;;  %v8769_v62 = vld [vmem:[%s18915_s17 + $0x240] sm:$0xff]  ;;  %v8786_v11 = vld [vmem:[%s18915_s17 + $0x2c8] sm:$0xff] }
0x1c23   :  { %12918 = vmatpush1.bf16.msra.mxu0 %v18367_v24  ;;  %8889 = vmatprep.mubr.f32.mxu0 %v18923_v7  ;;  %18960 = vst [vmem:[#allocation10_spill] sm:$0xff] %v18407_v53  ;;  %v18440_v43 = vpack.c.bf16 %v8769_v62, %v8761_v44  ;;  %v18443_v47 = vpack.c.bf16 %v8786_v11, %v8778_v27  ;;  %v8777_v36 = vld [vmem:[%s18915_s17 + $0x280] sm:$0xff]  ;;  %v8802_v44 = vld [vmem:[%s18915_s17 + $0x348] sm:$0xff] }
0x1c24   :  { %12920 = vmatprep.subr.bf16.mxu0 %v18370_v8  ;;  %18959 = vst [vmem:[#allocation9_spill] sm:$0xff] %v18404_v1  ;;  %18961 = vst [vmem:[#allocation11_spill] sm:$0xff] %v18422_v25  ;;  %v8785_v7 = vld [vmem:[%s18915_s17 + $0x2c0] sm:$0xff] }
0x1c25   :  { %18962 = vst [vmem:[#allocation12_spill] sm:$0xff] %v18425_v14  ;;  %18963 = vst [vmem:[#allocation13_spill] sm:$0xff] %v18440_v43  ;;  %v18458_v27 = vpack.c.bf16 %v8785_v7, %v8777_v36  ;;  %v8793_v11 = vld [vmem:[%s18915_s17 + $0x300] sm:$0xff]  ;;  %v8818_v7 = vld [vmem:[%s18915_s17 + $0x3c8] sm:$0xff] }
0x1c26   :  { %18964 = vst [vmem:[#allocation14_spill] sm:$0xff] %v18443_v47 }
0x1c27   :  { %12922 = vmatpush1.bf16.msra.mxu0 %v18385_v22  ;;  %18965 = vst [vmem:[#allocation15_spill] sm:$0xff] %v18458_v27  ;;  %v8766_v22 = vld [vmem:[%s18915_s17 + $0x228] sm:$0xff] }
0x1c28   :  { %12924 = vmatprep.subr.bf16.mxu0 %v18389_v30  ;;  %v8741_v30 = vld [vmem:[%s18915_s17 + $0x160] sm:$0xff] }
0x1c2b   :  { %12926 = vmatpush1.bf16.msra.mxu0 %v18404_v1  ;;  %v8725_v1 = vld [vmem:[%s18915_s17 + $0xe0] sm:$0xff] }
0x1c2c   :  { %12928 = vmatprep.subr.bf16.mxu0 %v18407_v53  ;;  %v8794_v53 = vld [vmem:[%s18915_s17 + $0x308] sm:$0xff] }
0x1c2d   :  { %v18461_v62 = vpack.c.bf16 %v8802_v44, %v8794_v53  ;;  %v8809_v44 = vld [vmem:[%s18915_s17 + $0x380] sm:$0xff] }
0x1c2f   :  { %12930 = vmatpush1.bf16.msra.mxu0 %v18422_v25  ;;  %18966 = vst [vmem:[#allocation16_spill] sm:$0xff] %v18461_v62  ;;  %v8810_v25 = vld [vmem:[%s18915_s17 + $0x388] sm:$0xff] }
0x1c30   :  { %12932 = vmatprep.subr.bf16.mxu0 %v18425_v14  ;;  %v8801_v14 = vld [vmem:[%s18915_s17 + $0x340] sm:$0xff]  ;;  %v18479_v36 = vpack.c.bf16 %v8818_v7, %v8810_v25 }
0x1c31   :  { %v18476_v53 = vpack.c.bf16 %v8801_v14, %v8793_v11  ;;  %v8710_v14 = vld [vmem:[%s18915_s17 + $0x68] sm:$0xff]  ;;  %v8701_v7 = vld [vmem:[%s18915_s17 + $0x20] sm:$0xff] }
0x1c32   :  { %18968 = vst [vmem:[#allocation18_spill] sm:$0xff] %v18479_v36 }
0x1c33   :  { %12934 = vmatpush1.bf16.msra.mxu0 %v18440_v43  ;;  %18967 = vst [vmem:[#allocation17_spill] sm:$0xff] %v18476_v53  ;;  %v8702_v43 = vld [vmem:[%s18915_s17 + $0x28] sm:$0xff] }
0x1c34   :  { %12936 = vmatprep.subr.bf16.mxu0 %v18443_v47  ;;  %v8817_v47 = vld [vmem:[%s18915_s17 + $0x3c0] sm:$0xff]  ;;  %v18497_v11 = vpack.c.bf16 %v8710_v14, %v8702_v43 }
0x1c35   :  { %v18494_v25 = vpack.c.bf16 %v8817_v47, %v8809_v44  ;;  %v8726_v47 = vld [vmem:[%s18915_s17 + $0xe8] sm:$0xff] }
0x1c36   :  { %18970 = vst [vmem:[#allocation20_spill] sm:$0xff] %v18497_v11 }
0x1c37   :  { %12938 = vmatpush1.bf16.msra.mxu0 %v18458_v27  ;;  %18969 = vst [vmem:[#allocation19_spill] sm:$0xff] %v18494_v25  ;;  %v8718_v27 = vld [vmem:[%s18915_s17 + $0xa8] sm:$0xff] }
0x1c38   :  { %12940 = vmatprep.subr.bf16.mxu0 %v18461_v62  ;;  %v8709_v62 = vld [vmem:[%s18915_s17 + $0x60] sm:$0xff] }
0x1c39   :  { %v18514_v44 = vpack.c.bf16 %v8709_v62, %v8701_v7  ;;  %v8742_v62 = vld [vmem:[%s18915_s17 + $0x168] sm:$0xff]  ;;  %v18974_v7 = vmov 0.0  }
0x1c3b   :  { %12942 = vmatpush1.bf16.msra.mxu0 %v18476_v53  ;;  %18971 = vst [vmem:[#allocation21_spill] sm:$0xff] %v18514_v44  ;;  %v8717_v53 = vld [vmem:[%s18915_s17 + $0xa0] sm:$0xff] }
0x1c3c   :  { %12944 = vmatprep.subr.bf16.mxu0 %v18479_v36  ;;  %v18519_v36 = vpack.c.bf16 %v8726_v47, %v8718_v27  ;;  %v18535_v27 = vpack.c.bf16 %v8725_v1, %v8717_v53  ;;  %v8758_v1 = vld [vmem:[%s18915_s17 + $0x1e8] sm:$0xff] }
0x1c3e   :  { %18972 = vst [vmem:[#allocation22_spill] sm:$0xff] %v18519_v36  ;;  %18973 = vst [vmem:[#allocation23_spill] sm:$0xff] %v18535_v27 }
0x1c3f   :  { %12946 = vmatpush1.bf16.msra.mxu0 %v18494_v25  ;;  %v18512_v43 = vpop.f32.mrb[66].mxu1  ;;  %v8734_v25 = vld [vmem:[%s18915_s17 + $0x128] sm:$0xff] }
0x1c40   :  { %v18516_v14 = vpop.f32.mrb[67].mxu1  ;;  %12980 = vmatprep.subr.bf16.mxu0 %v18497_v11  ;;  %v18539_v47 = vpack.c.bf16 %v8742_v62, %v8734_v25  ;;  %v8733_v11 = vld [vmem:[%s18915_s17 + $0x120] sm:$0xff] }
0x1c41   :  { %v18554_v53 = vpack.c.bf16 %v8741_v30, %v8733_v11  ;;  %v8749_v62 = vld [vmem:[%s18915_s17 + $0x1a0] sm:$0xff]  ;;  %v8774_v30 = vld [vmem:[%s18915_s17 + $0x268] sm:$0xff] }
0x1c42   :  { %8890 = vmatmul.mubr.f32.vlgmr.msra.gmra.mrb[68].mxu0 %v18214_v50  ;;  %18975 = vst [vmem:[#allocation24_spill] sm:$0xff] %v18539_v47 }
0x1c43   :  { %12982 = vmatpush1.bf16.msra.mxu0 %v18514_v44  ;;  %9031 = vmatprep.mubr.f32.mxu0 %v18974_v7  ;;  %v8750_v44 = vld [vmem:[%s18915_s17 + $0x1a8] sm:$0xff]  ;;  %18976 = vst [vmem:[#allocation25_spill] sm:$0xff] %v18554_v53 }
0x1c44   :  { %12984 = vmatprep.subr.bf16.mxu0 %v18519_v36  ;;  %v18557_v25 = vpack.c.bf16 %v8758_v1, %v8750_v44  ;;  %v8757_v36 = vld [vmem:[%s18915_s17 + $0x1e0] sm:$0xff]  ;;  %v18575_v44 = vpack.c.bf16 %v8774_v30, %v8766_v22 }
0x1c45   :  { %v18572_v11 = vpack.c.bf16 %v8757_v36, %v8749_v62  ;;  %v8765_v1 = vld [vmem:[%s18915_s17 + $0x220] sm:$0xff]  ;;  %v8790_v36 = vld [vmem:[%s18915_s17 + $0x2e8] sm:$0xff] }
0x1c46   :  { %18977 = vst [vmem:[#allocation26_spill] sm:$0xff] %v18557_v25  ;;  %18979 = vst [vmem:[#allocation28_spill] sm:$0xff] %v18575_v44  ;;  %v8781_v30 = vld [vmem:[%s18915_s17 + $0x2a0] sm:$0xff] }
0x1c47   :  { %12986 = vmatpush1.bf16.msra.mxu0 %v18535_v27  ;;  %18978 = vst [vmem:[#allocation27_spill] sm:$0xff] %v18572_v11  ;;  %v8782_v27 = vld [vmem:[%s18915_s17 + $0x2a8] sm:$0xff] }
0x1c48   :  { %12988 = vmatprep.subr.bf16.mxu0 %v18539_v47  ;;  %v8773_v47 = vld [vmem:[%s18915_s17 + $0x260] sm:$0xff]  ;;  %v18593_v62 = vpack.c.bf16 %v8790_v36, %v8782_v27 }
0x1c49   :  { %v18590_v22 = vpack.c.bf16 %v8773_v47, %v8765_v1  ;;  %v8806_v47 = vld [vmem:[%s18915_s17 + $0x368] sm:$0xff]  ;;  %v8797_v36 = vld [vmem:[%s18915_s17 + $0x320] sm:$0xff] }
0x1c4a   :  { %18981 = vst [vmem:[#allocation30_spill] sm:$0xff] %v18593_v62 }
0x1c4b   :  { %12990 = vmatpush1.bf16.msra.mxu0 %v18554_v53  ;;  %18980 = vst [vmem:[#allocation29_spill] sm:$0xff] %v18590_v22  ;;  %v8798_v53 = vld [vmem:[%s18915_s17 + $0x328] sm:$0xff] }
0x1c4c   :  { %12992 = vmatprep.subr.bf16.mxu0 %v18557_v25  ;;  %v8789_v25 = vld [vmem:[%s18915_s17 + $0x2e0] sm:$0xff]  ;;  %v18611_v1 = vpack.c.bf16 %v8806_v47, %v8798_v53 }
0x1c4d   :  { %v18608_v27 = vpack.c.bf16 %v8789_v25, %v8781_v30  ;;  %v8822_v25 = vld [vmem:[%s18915_s17 + $0x3e8] sm:$0xff]  ;;  %v8813_v47 = vld [vmem:[%s18915_s17 + $0x3a0] sm:$0xff] }
0x1c4f   :  { %12994 = vmatpush1.bf16.msra.mxu0 %v18572_v11  ;;  %v8814_v11 = vld [vmem:[%s18915_s17 + $0x3a8] sm:$0xff] }
0x1c50   :  { %12996 = vmatprep.subr.bf16.mxu0 %v18575_v44  ;;  %v8805_v44 = vld [vmem:[%s18915_s17 + $0x360] sm:$0xff]  ;;  %v18629_v30 = vpack.c.bf16 %v8822_v25, %v8814_v11  ;;  %v18982_v11 = vmov 0.0|0.0  }
0x1c51   :  { %v18626_v53 = vpack.c.bf16 %v8805_v44, %v8797_v36 }
0x1c53   :  { %12998 = vmatpush1.bf16.msra.mxu0 %v18590_v22 }
0x1c54   :  { %13000 = vmatprep.subr.bf16.mxu0 %v18593_v62  ;;  %v8821_v62 = vld [vmem:[%s18915_s17 + $0x3e0] sm:$0xff] }
0x1c55   :  { %v18638_v22 = vpack.c.bf16 %v8821_v62, %v8813_v47 }
0x1c57   :  { %13002 = vmatpush1.bf16.msra.mxu0 %v18608_v27 }
0x1c58   :  { %13004 = vmatprep.subr.bf16.mxu0 %v18611_v1 }
0x1c5b   :  { %13006 = vmatpush1.bf16.msra.mxu0 %v18626_v53 }
0x1c5c   :  { %13008 = vmatprep.subr.bf16.mxu0 %v18629_v30 }
0x1c5f   :  { %13010 = vmatpush1.bf16.msra.mxu0 %v18638_v22  ;;  %v9104_v44 = vpop.f32.mrb[68].mxu1 }
0x1c60   :  { %v18642_v36 = vpop.f32.mrb[69].mxu1  ;;  %11056 = vmatmul.mubr.f32.vlgmr.msra.gmra.mrb[70].mxu1 %v9104_v44  ;;  %11023 = vmatprep.subr.mxu0 %v18974_v7 }
0x1c61   :  { %13045 = vmatpush3.bf16.msra.mxu1 %v17931_v42  ;;  %11095 = vmatprep.mubr.msk.f32.mxu1 %vm13517_vm3, %v18974_v7  ;;  %v8520_v42 = vmul.f32 0.1, %v18062_v56 }
0x1c62   :  { %9032 = vmatmul.mubr.f32.vlgmr.msra.gmra.mrb[70].mxu0 %v18214_v50  ;;  %13046 = vmatprep.subr.bf16.mxu1 %v18982_v11  ;;  %v18995_v50 = vld [vmem:[#allocation19_spill] sm:$0xff] }
0x1c63   :  { %11025 = vmatprep.mubr.msk.f32.mxu0 %vm13517_vm3, %v18974_v7 }
0x1c65   :  { %13048 = vmatpush3.bf16.msra.mxu1 %v17942_v9  ;;  %v8528_v9 = vsel %vm8512_vm5, %v18062_v56, %v8520_v42 }
0x1c66   :  { %13049 = vmatprep.subr.bf16.mxu1 %v18982_v11 }
0x1c68   :  { %11024 = vmatpush3.xpose.msra.mxu0 %v18337_v2 }
0x1c69   :  { %13051 = vmatpush3.bf16.msra.mxu1 %v17952_v60  ;;  %11028 = vmatprep.subr.mxu0 %v18974_v7  ;;  %v8522_v60 = vmul.f32 0.1, %v18065_v23 }
0x1c6a   :  { %13052 = vmatprep.subr.bf16.mxu1 %v18982_v11 }
0x1c6d   :  { %13054 = vmatpush3.bf16.msra.mxu1 %v17962_v45  ;;  %v18691_v45 = vsel %vm8514_vm6, %v18065_v23, %v8522_v60 }
0x1c6e   :  { %13055 = vmatprep.subr.bf16.mxu1 %v18982_v11 }
0x1c71   :  { %13057 = vmatpush3.bf16.msra.mxu1 %v17972_v57  ;;  %v8523_v57 = vmul.f32 0.1, %v18071_v34 }
0x1c72   :  { %13058 = vmatprep.subr.bf16.mxu1 %v18982_v11 }
0x1c75   :  { %13060 = vmatpush3.bf16.msra.mxu1 %v17982_v28  ;;  %v18717_v28 = vsel %vm8515_vm7, %v18071_v34, %v8523_v57 }
0x1c76   :  { %13061 = vmatprep.subr.bf16.mxu1 %v18982_v11 }
0x1c79   :  { %13063 = vmatpush3.bf16.msra.mxu1 %v17992_v61 }
0x1c7a   :  { %13064 = vmatprep.subr.bf16.mxu1 %v18982_v11 }
0x1c7d   :  { %13066 = vmatpush3.bf16.msra.mxu1 %v18003_v15 }
0x1c7e   :  { %13100 = vmatprep.subr.bf16.mxu1 %v18014_v4 }
0x1c80   :  { %11096 = vmatmul.mubr.f32.vlgmr.msra.gmra.mrb[72].mxu1 %v8528_v9 }
0x1c81   :  { %13102 = vmatpush1.bf16.msra.mxu1 %v18040_v59  ;;  %10105 = vmatprep.mubr.f32.mxu1 %v18974_v7 }
0x1c82   :  { %13104 = vmatprep.subr.bf16.mxu1 %v18045_v6 }
0x1c85   :  { %13106 = vmatpush1.bf16.msra.mxu1 %v18074_v17  ;;  %v8521_v17 = vmul.f32 0.1, %v18068_v37 }
0x1c86   :  { %13108 = vmatprep.subr.bf16.mxu1 %v18077_v29 }
0x1c87   :  { %v8529_v29 = vsel %vm8513_vm9, %v18068_v37, %v8521_v17  ;;  %v18984_v37 = vld [vmem:[#allocation8_spill] sm:$0xff] }
0x1c89   :  { %13110 = vmatpush1.bf16.msra.mxu1 %v18093_v40 }
0x1c8a   :  { %13112 = vmatprep.subr.bf16.mxu1 %v18096_v54 }
0x1c8d   :  { %13114 = vmatpush1.bf16.msra.mxu1 %v18111_v12 }
0x1c8e   :  { %13116 = vmatprep.subr.bf16.mxu1 %v18114_v38  ;;  %v18983_v38 = vld [vmem:[#allocation7_spill] sm:$0xff] }
0x1c91   :  { %13118 = vmatpush1.bf16.msra.mxu1 %v18129_v0  ;;  %v18985_v0 = vld [vmem:[#allocation9_spill] sm:$0xff] }
0x1c92   :  { %13120 = vmatprep.subr.bf16.mxu1 %v18132_v58  ;;  %v18986_v58 = vld [vmem:[#allocation10_spill] sm:$0xff] }
0x1c95   :  { %13122 = vmatpush1.bf16.msra.mxu1 %v18147_v32  ;;  %v18987_v32 = vld [vmem:[#allocation11_spill] sm:$0xff] }
0x1c96   :  { %13124 = vmatprep.subr.bf16.mxu1 %v18150_v51  ;;  %v18988_v51 = vld [vmem:[#allocation12_spill] sm:$0xff] }
0x1c99   :  { %13126 = vmatpush1.bf16.msra.mxu1 %v18165_v46  ;;  %v18989_v46 = vld [vmem:[#allocation13_spill] sm:$0xff] }
0x1c9a   :  { %13128 = vmatprep.subr.bf16.mxu1 %v18168_v52  ;;  %v18990_v52 = vld [vmem:[#allocation14_spill] sm:$0xff] }
0x1c9d   :  { %13130 = vmatpush1.bf16.msra.mxu1 %v18185_v39  ;;  %v18991_v39 = vld [vmem:[#allocation15_spill] sm:$0xff] }
0x1c9e   :  { %13164 = vmatprep.subr.bf16.mxu1 %v18188_v18  ;;  %v18992_v18 = vld [vmem:[#allocation16_spill] sm:$0xff] }
0x1ca0   :  { %10106 = vmatmul.mubr.f32.vlgmr.msra.gmra.mrb[74].mxu1 %v18691_v45 }
0x1ca1   :  { %13166 = vmatpush1.bf16.msra.mxu1 %v18203_v21  ;;  %10247 = vmatprep.mubr.f32.mxu1 %v18974_v7  ;;  %v18993_v21 = vld [vmem:[#allocation17_spill] sm:$0xff] }
0x1ca2   :  { %13168 = vmatprep.subr.bf16.mxu1 %v18206_v48  ;;  %v18994_v48 = vld [vmem:[#allocation18_spill] sm:$0xff] }
0x1ca5   :  { %13170 = vmatpush1.bf16.msra.mxu1 %v18224_v16 }
0x1ca6   :  { %13172 = vmatprep.subr.bf16.mxu1 %v18228_v5 }
0x1ca9   :  { %13174 = vmatpush1.bf16.msra.mxu1 %v18243_v33  ;;  %v18996_v33 = vld [vmem:[#allocation20_spill] sm:$0xff] }
0x1caa   :  { %13176 = vmatprep.subr.bf16.mxu1 %v18246_v49  ;;  %v18997_v49 = vld [vmem:[#allocation21_spill] sm:$0xff] }
0x1cad   :  { %13178 = vmatpush1.bf16.msra.mxu1 %v18261_v13  ;;  %v18998_v13 = vld [vmem:[#allocation22_spill] sm:$0xff] }
0x1cae   :  { %13180 = vmatprep.subr.bf16.mxu1 %v18264_v19  ;;  %v18999_v19 = vld [vmem:[#allocation23_spill] sm:$0xff] }
0x1cb1   :  { %13182 = vmatpush1.bf16.msra.mxu1 %v18279_v35  ;;  %v19000_v35 = vld [vmem:[#allocation24_spill] sm:$0xff] }
0x1cb2   :  { %13184 = vmatprep.subr.bf16.mxu1 %v18282_v10  ;;  %v19001_v10 = vld [vmem:[#allocation25_spill] sm:$0xff] }
0x1cb5   :  { %13186 = vmatpush1.bf16.msra.mxu1 %v18297_v26  ;;  %v19002_v26 = vld [vmem:[#allocation26_spill] sm:$0xff] }
0x1cb6   :  { %13188 = vmatprep.subr.bf16.mxu1 %v18300_v41  ;;  %v19003_v41 = vld [vmem:[#allocation27_spill] sm:$0xff] }
0x1cb9   :  { %13190 = vmatpush1.bf16.msra.mxu1 %v18315_v3  ;;  %v19004_v3 = vld [vmem:[#allocation28_spill] sm:$0xff] }
0x1cba   :  { %13192 = vmatprep.subr.bf16.mxu1 %v18318_v55  ;;  %v19005_v55 = vld [vmem:[#allocation29_spill] sm:$0xff] }
0x1cbd   :  { %13194 = vmatpush1.bf16.msra.mxu1 %v18327_v63  ;;  %v19006_v63 = vld [vmem:[#allocation30_spill] sm:$0xff] }
0x1cbe   :  { %11138 = vmatprep.subr.mxu1 %v18974_v7 }
0x1cc0   :  { %10248 = vmatmul.mubr.f32.vlgmr.msra.gmra.mrb[76].mxu1 %v18691_v45 }
0x1cc1   :  { %11140 = vmatprep.mubr.msk.f32.mxu1 %vm13517_vm3, %v18974_v7 }
0x1cc6   :  { %11139 = vmatpush3.xpose.msra.mxu1 %v18717_v28 }
0x1cf5   :  { %v8691_v61 = vpop.f32.mrb[66].mxu0 }
0x1cf6   :  { %8696 = vst.msk [vmem:[#allocation4] sm:$0xff] %vm8695_vm8, %v8691_v61  ;;  %v11022_v15 = vpop.f32.mrb[67].mxu0 }
0x1d15   :  { %v8891_v4 = vpop.f32.mrb[68].mxu0 }
0x1d16   :  { %v8893_v59 = vpop.f32.mrb[69].mxu0  ;;  %11026 = vmatmul.mubr.f32.vlgmr.msra.gmra.mrb[72].mxu0 %v8891_v4 }
0x1d17   :  { %11029 = vmatpush3.xpose.msra.mxu0 %v18337_v2  ;;  %11030 = vmatprep.mubr.msk.f32.mxu0 %vm13517_vm3, %v18974_v7 }
0x1d18   :  { %11033 = vmatprep.subr.mxu0 %v18974_v7 }
0x1d1a   :  { %11031 = vmatmul.mubr.f32.vlgmr.msra.gmra.mrb[74].mxu0 %v8893_v59 }
0x1d1b   :  { %11034 = vmatpush3.xpose.msra.mxu0 %v18337_v2  ;;  %11035 = vmatprep.mubr.msk.f32.mxu0 %vm13517_vm3, %v18974_v7 }
0x1d1c   :  { %11038 = vmatprep.subr.mxu0 %v18974_v7 }
0x1d1e   :  { %11036 = vmatmul.mubr.f32.vlgmr.msra.gmra.mrb[76].mxu0 %v18512_v43 }
0x1d1f   :  { %11039 = vmatpush3.xpose.msra.mxu0 %v18337_v2  ;;  %11040 = vmatprep.mubr.msk.f32.mxu0 %vm13517_vm3, %v18974_v7 }
0x1d20   :  { %11043 = vmatprep.subr.mxu0 %v18974_v7 }
0x1d22   :  { %11041 = vmatmul.mubr.f32.vlgmr.msra.gmra.mrb[78].mxu0 %v18516_v14 }
0x1d23   :  { %11044 = vmatpush3.xpose.msra.mxu0 %v18337_v2  ;;  %11045 = vmatprep.mubr.msk.f32.mxu0 %vm13517_vm3, %v18974_v7 }
0x1d24   :  { %11048 = vmatprep.subr.mxu0 %v18974_v7 }
0x1d33   :  { %v9606_v6 = vpop.f32.mrb[70].mxu1 }
0x1d34   :  { %10892 = vst.msk [vmem:[%s18917_s19 + $0x30] sm:$0xff] %vm8695_vm8, %v9606_v6  ;;  %v11057_v56 = vpop.f32.mrb[71].mxu1 }
0x1d35   :  { %v9033_v23 = vpop.f32.mrb[70].mxu0 }
0x1d36   :  { %v9035_v34 = vpop.f32.mrb[71].mxu0  ;;  %11046 = vmatmul.mubr.f32.vlgmr.msra.gmra.mrb[80].mxu0 %v9033_v23 }
0x1d37   :  { %11049 = vmatpush3.xpose.msra.mxu0 %v18337_v2  ;;  %11050 = vmatprep.mubr.msk.f32.mxu0 %vm13517_vm3, %v18974_v7 }
0x1d38   :  { %11058 = vmatprep.subr.mxu0 %v18974_v7 }
0x1d3a   :  { %11051 = vmatmul.mubr.f32.vlgmr.msra.gmra.mrb[82].mxu0 %v9035_v34 }
0x1d3b   :  { %11059 = vmatpush3.xpose.msra.mxu0 %v18337_v2  ;;  %11060 = vmatprep.mubr.msk.f32.mxu0 %vm13517_vm3, %v18974_v7 }
0x1d3c   :  { %11098 = vmatprep.subr.mxu0 %v18974_v7 }
0x1d3e   :  { %11061 = vmatmul.mubr.f32.vlgmr.msra.gmra.mrb[84].mxu0 %v18642_v36 }
0x1d3f   :  { %11099 = vmatpush3.xpose.msra.mxu0 %v8529_v29  ;;  %11100 = vmatprep.mubr.msk.f32.mxu0 %vm13517_vm3, %v18974_v7 }
0x1d40   :  { %13068 = vmatprep.subr.bf16.mxu0 %v18347_v31 }
0x1d53   :  { %v9766_v40 = vpop.f32.mrb[72].mxu1 }
0x1d54   :  { %v9767_v54 = vadd.f32 %v18359_v20, %v9766_v40  ;;  %v11097_v12 = vpop.f32.mrb[73].mxu1 }
0x1d56   :  { %11101 = vmatmul.mubr.f32.vlgmr.msra.gmra.mrb[86].mxu0 %v9767_v54 }
0x1d57   :  { %13070 = vmatpush1.bf16.msra.mxu0 %v18367_v24  ;;  %10034 = vmatprep.mubr.f32.mxu0 %v18974_v7 }
0x1d58   :  { %13072 = vmatprep.subr.bf16.mxu0 %v18370_v8 }
0x1d5b   :  { %13074 = vmatpush1.bf16.msra.mxu0 %v18983_v38 }
0x1d5c   :  { %13076 = vmatprep.subr.bf16.mxu0 %v18984_v37 }
0x1d5f   :  { %13078 = vmatpush1.bf16.msra.mxu0 %v18985_v0 }
0x1d60   :  { %13080 = vmatprep.subr.bf16.mxu0 %v18986_v58 }
0x1d63   :  { %13082 = vmatpush1.bf16.msra.mxu0 %v18987_v32 }
0x1d64   :  { %13084 = vmatprep.subr.bf16.mxu0 %v18988_v51 }
0x1d67   :  { %13086 = vmatpush1.bf16.msra.mxu0 %v18989_v46 }
0x1d68   :  { %13088 = vmatprep.subr.bf16.mxu0 %v18990_v52 }
0x1d6b   :  { %13090 = vmatpush1.bf16.msra.mxu0 %v18991_v39 }
0x1d6c   :  { %13092 = vmatprep.subr.bf16.mxu0 %v18992_v18 }
0x1d6f   :  { %13094 = vmatpush1.bf16.msra.mxu0 %v18993_v21 }
0x1d70   :  { %13096 = vmatprep.subr.bf16.mxu0 %v18994_v48 }
0x1d73   :  { %13098 = vmatpush1.bf16.msra.mxu0 %v18995_v50  ;;  %v10107_v16 = vpop.f32.mrb[74].mxu1 }
0x1d74   :  { %v18775_v5 = vpop.f32.mrb[75].mxu1  ;;  %13132 = vmatprep.subr.bf16.mxu0 %v18996_v33 }
0x1d76   :  { %10035 = vmatmul.mubr.f32.vlgmr.msra.gmra.mrb[88].mxu0 %v18691_v45 }
0x1d77   :  { %13134 = vmatpush1.bf16.msra.mxu0 %v18997_v49  ;;  %10176 = vmatprep.mubr.f32.mxu0 %v18974_v7 }
0x1d78   :  { %13136 = vmatprep.subr.bf16.mxu0 %v18998_v13 }
0x1d7b   :  { %13138 = vmatpush1.bf16.msra.mxu0 %v18999_v19 }
0x1d7c   :  { %13140 = vmatprep.subr.bf16.mxu0 %v19000_v35 }
0x1d7f   :  { %13142 = vmatpush1.bf16.msra.mxu0 %v19001_v10 }
0x1d80   :  { %13144 = vmatprep.subr.bf16.mxu0 %v19002_v26 }
0x1d83   :  { %13146 = vmatpush1.bf16.msra.mxu0 %v19003_v41 }
0x1d84   :  { %13148 = vmatprep.subr.bf16.mxu0 %v19004_v3 }
0x1d87   :  { %13150 = vmatpush1.bf16.msra.mxu0 %v19005_v55 }
0x1d88   :  { %13152 = vmatprep.subr.bf16.mxu0 %v19006_v63 }
0x1d8b   :  { %13154 = vmatpush1.bf16.msra.mxu0 %v18608_v27 }
0x1d8c   :  { %13156 = vmatprep.subr.bf16.mxu0 %v18611_v1 }
0x1d8f   :  { %13158 = vmatpush1.bf16.msra.mxu0 %v18626_v53 }
0x1d90   :  { %13160 = vmatprep.subr.bf16.mxu0 %v18629_v30 }
0x1d93   :  { %13162 = vmatpush1.bf16.msra.mxu0 %v18638_v22  ;;  %v10249_v2 = vpop.f32.mrb[76].mxu1 }
0x1d94   :  { %v10251_v31 = vpop.f32.mrb[77].mxu1  ;;  %11103 = vmatprep.subr.mxu0 %v18974_v7 }
0x1d95   :  { %11141 = vmatmul.mubr.f32.vlgmr.msra.gmra.mrb[78].mxu1 %v10251_v31 }
0x1d96   :  { %10177 = vmatmul.mubr.f32.vlgmr.msra.gmra.mrb[90].mxu0 %v18691_v45 }
0x1d97   :  { %11105 = vmatprep.mubr.msk.f32.mxu0 %vm13517_vm3, %v18974_v7 }
0x1d9c   :  { %11104 = vmatpush3.xpose.msra.mxu0 %v18717_v28 }
0x1d9d   :  { %11108 = vmatprep.subr.mxu0 %v18974_v7 }
0x1de9   :  { %v9175_v20 = vpop.f32.mrb[72].mxu0 }
0x1dea   :  { %9179 = vst.msk [vmem:[%s18917_s19] sm:$0xff] %vm8695_vm8, %v9175_v20  ;;  %v11027_v24 = vpop.f32.mrb[73].mxu0 }
0x1ded   :  { %v9246_v8 = vpop.f32.mrb[74].mxu0 }
0x1dee   :  { %10887 = vst.msk [vmem:[%s18917_s19 + $0x8] sm:$0xff] %vm8695_vm8, %v9246_v8  ;;  %v11032_v43 = vpop.f32.mrb[75].mxu0 }
0x1df1   :  { %v9318_v14 = vpop.f32.mrb[76].mxu0 }
0x1df2   :  { %10888 = vst.msk [vmem:[%s18917_s19 + $0x10] sm:$0xff] %vm8695_vm8, %v9318_v14  ;;  %v11037_v22 = vpop.f32.mrb[77].mxu0 }
0x1df5   :  { %v9390_v62 = vpop.f32.mrb[78].mxu0 }
0x1df6   :  { %10889 = vst.msk [vmem:[%s18917_s19 + $0x18] sm:$0xff] %vm8695_vm8, %v9390_v62  ;;  %v11042_v27 = vpop.f32.mrb[79].mxu0 }
0x1e09   :  { %v9462_v1 = vpop.f32.mrb[80].mxu0 }
0x1e0a   :  { %10890 = vst.msk [vmem:[%s18917_s19 + $0x20] sm:$0xff] %vm8695_vm8, %v9462_v1  ;;  %v11047_v25 = vpop.f32.mrb[81].mxu0 }
0x1e0d   :  { %v9534_v53 = vpop.f32.mrb[82].mxu0 }
0x1e0e   :  { %10891 = vst.msk [vmem:[%s18917_s19 + $0x28] sm:$0xff] %vm8695_vm8, %v9534_v53  ;;  %v11052_v30 = vpop.f32.mrb[83].mxu0 }
0x1e11   :  { %v9678_v47 = vpop.f32.mrb[84].mxu0 }
0x1e12   :  { %10893 = vst.msk [vmem:[%s18917_s19 + $0x38] sm:$0xff] %vm8695_vm8, %v9678_v47  ;;  %v11062_v44 = vpop.f32.mrb[85].mxu0 }
0x1e29   :  { %v9836_v36 = vpop.f32.mrb[86].mxu0 }
0x1e2a   :  { %9841 = vst.msk [vmem:[#allocation4 + $0x8] sm:$0xff] %vm8695_vm8, %v9836_v36  ;;  %v11102_v11 = vpop.f32.mrb[87].mxu0 }
0x1e49   :  { %v10036_v42 = vpop.f32.mrb[88].mxu0 }
0x1e4a   :  { %v10038_v9 = vpop.f32.mrb[89].mxu0  ;;  %11106 = vmatmul.mubr.f32.vlgmr.msra.gmra.mrb[92].mxu0 %v10036_v42 }
0x1e4b   :  { %11109 = vmatpush3.xpose.msra.mxu0 %v18717_v28  ;;  %11110 = vmatprep.mubr.msk.f32.mxu0 %vm13517_vm3, %v18974_v7 }
0x1e4c   :  { %11113 = vmatprep.subr.mxu0 %v18974_v7 }
0x1e4e   :  { %11111 = vmatmul.mubr.f32.vlgmr.msra.gmra.mrb[94].mxu0 %v10038_v9 }
0x1e4f   :  { %11114 = vmatpush3.xpose.msra.mxu0 %v18717_v28  ;;  %11115 = vmatprep.mubr.msk.f32.mxu0 %vm13517_vm3, %v18974_v7 }
0x1e50   :  { %11118 = vmatprep.subr.mxu0 %v18974_v7 }
0x1e52   :  { %11116 = vmatmul.mubr.f32.vlgmr.msra.gmra.mrb[96].mxu0 %v10107_v16 }
0x1e53   :  { %11119 = vmatpush3.xpose.msra.mxu0 %v18717_v28  ;;  %11120 = vmatprep.mubr.msk.f32.mxu0 %vm13517_vm3, %v18974_v7 }
0x1e54   :  { %11123 = vmatprep.subr.mxu0 %v18974_v7 }
0x1e56   :  { %11121 = vmatmul.mubr.f32.vlgmr.msra.gmra.mrb[98].mxu0 %v18775_v5 }
0x1e57   :  { %11124 = vmatpush3.xpose.msra.mxu0 %v18717_v28  ;;  %11125 = vmatprep.mubr.msk.f32.mxu0 %vm13517_vm3, %v18974_v7 }
0x1e58   :  { %11128 = vmatprep.subr.mxu0 %v18974_v7 }
0x1e68   :  { %v10824_v60 = vpop.f32.mrb[78].mxu1 }
0x1e69   :  { %v10178_v45 = vpop.f32.mrb[90].mxu0  ;;  %10901 = vst.msk [vmem:[%s18917_s19 + $0x78] sm:$0xff] %vm8695_vm8, %v10824_v60  ;;  %v11142_v57 = vpop.f32.mrb[79].mxu1 }
0x1e6a   :  { %v10180_v61 = vpop.f32.mrb[91].mxu0  ;;  %11126 = vmatmul.mubr.f32.vlgmr.msra.gmra.mrb[100].mxu0 %v10178_v45 }
0x1e6b   :  { %11129 = vmatpush3.xpose.msra.mxu0 %v18717_v28  ;;  %11130 = vmatprep.mubr.msk.f32.mxu0 %vm13517_vm3, %v18974_v7 }
0x1e6c   :  { %11133 = vmatprep.subr.mxu0 %v18974_v7 }
0x1e6e   :  { %11131 = vmatmul.mubr.f32.vlgmr.msra.gmra.mrb[102].mxu0 %v10180_v61 }
0x1e6f   :  { %11134 = vmatpush3.xpose.msra.mxu0 %v18717_v28  ;;  %11135 = vmatprep.mubr.msk.f32.mxu0 %vm13517_vm3, %v18974_v7 }
0x1e72   :  { %11136 = vmatmul.mubr.f32.vlgmr.msra.gmra.mrb[104].mxu0 %v10249_v2 }
0x1e73   :  { %13501 = shalt.err (!%p13498_p4)
}
0x1e74   :  { %s13502_s25 = scalar_lea.hbm %s18916_s18, 256 }
0x1e75   :  { %p13503_p5 = scmp.ne.s32.totalorder %s18916_s18, %s13502_s25  ;;  %p13506_p6 = scmp.lt.u32.totalorder %s13502_s25, %s18916_s18 }
0x1e77   :  { %p13508_p7 = pnand %p13506_p6, %p13503_p5 }
0x1e79   :  { %13511 = shalt.err (!%p13508_p7)
}
0x1e7a   :  { %s13519_s20 = smov 128   ;;  %s13520_s17 = smov 8  }
0x1e7b   :  { %10841 = dma.vmem_to_hbm [thread:$0]  %s10836_s2, 256, %s18916_s18, [#allocation5], %s13519_s20, %s13519_s20, %s13520_s17  }
0x1f1d   :  { %v10320_v7 = vpop.f32.mrb[92].mxu0 }
0x1f1e   :  { %10894 = vst.msk [vmem:[%s18917_s19 + $0x40] sm:$0xff] %vm8695_vm8, %v10320_v7  ;;  %v11107_v28 = vpop.f32.mrb[93].mxu0 }
0x1f21   :  { %v10392_v15 = vpop.f32.mrb[94].mxu0 }
0x1f22   :  { %10895 = vst.msk [vmem:[%s18917_s19 + $0x48] sm:$0xff] %vm8695_vm8, %v10392_v15  ;;  %v11112_v4 = vpop.f32.mrb[95].mxu0 }
0x1f25   :  { %v10464_v59 = vpop.f32.mrb[96].mxu0 }
0x1f26   :  { %10896 = vst.msk [vmem:[%s18917_s19 + $0x50] sm:$0xff] %vm8695_vm8, %v10464_v59  ;;  %v11117_v6 = vpop.f32.mrb[97].mxu0 }
0x1f29   :  { %v10536_v56 = vpop.f32.mrb[98].mxu0 }
0x1f2a   :  { %10897 = vst.msk [vmem:[%s18917_s19 + $0x58] sm:$0xff] %vm8695_vm8, %v10536_v56  ;;  %v11122_v23 = vpop.f32.mrb[99].mxu0 }
0x1f3d   :  { %v10608_v34 = vpop.f32.mrb[100].mxu0 }
0x1f3e   :  { %10898 = vst.msk [vmem:[%s18917_s19 + $0x60] sm:$0xff] %vm8695_vm8, %v10608_v34  ;;  %v11127_v17 = vpop.f32.mrb[101].mxu0 }
0x1f41   :  { %v10680_v29 = vpop.f32.mrb[102].mxu0 }
0x1f42   :  { %10899 = vst.msk [vmem:[%s18917_s19 + $0x68] sm:$0xff] %vm8695_vm8, %v10680_v29  ;;  %v11132_v40 = vpop.f32.mrb[103].mxu0 }
0x1f45   :  { %v10752_v54 = vpop.f32.mrb[104].mxu0 }
0x1f46   :  { %10900 = vst.msk [vmem:[%s18917_s19 + $0x70] sm:$0xff] %vm8695_vm8, %v10752_v54  ;;  %v11137_v12 = vpop.f32.mrb[105].mxu0 }
0x1f47   :  { %13512 = dma.done.wait [#allocation5], 256  }
0x1f48   :  { %13513 = vsyncadd [#allocation5], 4294967040 }
0x1f49   :  { %10849 = vsyncpa [#allocation5], 1 }

</bundles_post_ra>
